<compile_context>
chip_gen: v5e
topology: v5e:2x2
jax: 0.10.0
libtpu: 0.0.40
codegen_flags: <defaults>
</compile_context>

<pallas_src>
import functools

import jax
import jax.numpy as jnp
from jax import lax
from jax.experimental import pallas as pl
from jax.experimental.pallas import tpu as pltpu

EPS = 1e-5


# --------------------------------------------------------------------------- #
# Pallas kernels
# --------------------------------------------------------------------------- #
def _mm_bias_act_kernel(x_ref, w_ref, b_ref, o_ref, *, relu):
    y = jnp.dot(x_ref[...], w_ref[...], preferred_element_type=jnp.float32)
    y = y + b_ref[...]
    if relu:
        y = jnp.maximum(y, 0.0)
    o_ref[...] = y


def matmul_bias_act(x, w, b, relu=True, tm=64):
    """y = maybe_relu(x @ w + b), row-tiled grid (ragged tail handled by Pallas)."""
    M, K = x.shape
    _, N = w.shape
    tm = min(tm, M)
    grid = (pl.cdiv(M, tm),)
    return pl.pallas_call(
        functools.partial(_mm_bias_act_kernel, relu=relu),
        out_shape=jax.ShapeDtypeStruct((M, N), jnp.float32),
        grid=grid,
        in_specs=[
            pl.BlockSpec((tm, K), lambda i: (i, 0)),
            pl.BlockSpec((K, N), lambda i: (0, 0)),
            pl.BlockSpec((1, N), lambda i: (0, 0)),
        ],
        out_specs=pl.BlockSpec((tm, N), lambda i: (i, 0)),
        compiler_params=pltpu.CompilerParams(dimension_semantics=("parallel",)),
    )(x, w, b)


def _block_kernel(x_ref,
                  w1_ref, b1_ref, wd1_ref, bd1_ref, w3_ref, b3_ref,
                  w4_ref, b4_ref,
                  wt_ref, bt_ref,
                  w5_ref, b5_ref, wd2_ref, bd2_ref, w7_ref, b7_ref,
                  w8_ref, b8_ref,
                  wskip_ref,
                  o_ref,
                  pad1_ref, padt_ref, pad2_ref,
                  *, H, W):
    """Whole `Block` (IB1 -> Transit -> IB2 -> + 1x1 shortcut) for one image."""
    f32 = jnp.float32
    HW = H * W
    PAD = W + 1  # zero-padding rows on each side of the flattened spatial dim

    # Column-index masks for the horizontal (dj = +/-1) taps of the 3x3 convs.
    jcol = lax.broadcasted_iota(jnp.int32, (HW, 1), 0) % W
    m_l = (jcol > 0).astype(f32)          # valid when reading the left neighbor
    m_r = (jcol < (W - 1)).astype(f32)    # valid when reading the right neighbor

    def write_padded(t, pad_ref):
        pad_ref[...] = jnp.zeros(pad_ref.shape, f32)
        pad_ref[PAD:PAD + HW, :] = t

    def tap(pad_ref, di, dj):
        off = PAD + di * W + dj
        v = pad_ref[off:off + HW, :]
        if dj == -1:
            v = v * m_l
        elif dj == 1:
            v = v * m_r
        return v

    def dwconv_bn_relu(t, pad_ref, wd_ref, bd_ref):
        """Depthwise 3x3 (pad 1) with BN scale folded into wd; + shift, ReLU."""
        write_padded(t, pad_ref)
        acc = jnp.zeros(t.shape, f32)
        k = 0
        for di in (-1, 0, 1):
            for dj in (-1, 0, 1):
                acc = acc + tap(pad_ref, di, dj) * wd_ref[k:k + 1, :]
                k += 1
        return jnp.maximum(acc + bd_ref[...], 0.0)

    def conv3x3_bn_relu(t, pad_ref, wk_ref, bk_ref):
        """Dense 3x3 (pad 1): 9 shifted matmuls accumulated in f32; + shift, ReLU."""
        cout = wk_ref.shape[-1]
        write_padded(t, pad_ref)
        acc = jnp.zeros((HW, cout), f32)
        k = 0
        for di in (-1, 0, 1):
            for dj in (-1, 0, 1):
                acc = acc + jnp.dot(tap(pad_ref, di, dj), wk_ref[k],
                                    preferred_element_type=f32)
                k += 1
        return jnp.maximum(acc + bk_ref[...], 0.0)

    def mm(t, w_ref, b_ref, relu):
        y = jnp.dot(t, w_ref[...], preferred_element_type=f32) + b_ref[...]
        return jnp.maximum(y, 0.0) if relu else y

    xv = x_ref[...]                                   # (HW, Cin)

    # InvertedBottleneck 1
    t = mm(xv, w1_ref, b1_ref, True)
    t = dwconv_bn_relu(t, pad1_ref, wd1_ref, bd1_ref)
    t = mm(t, w3_ref, b3_ref, True)
    t = mm(t, w4_ref, b4_ref, False) + xv             # residual

    # Transit: 3x3 conv (pad 1) + BN + ReLU
    t = conv3x3_bn_relu(t, padt_ref, wt_ref, bt_ref)

    # InvertedBottleneck 2
    u = mm(t, w5_ref, b5_ref, True)
    u = dwconv_bn_relu(u, pad2_ref, wd2_ref, bd2_ref)
    u = mm(u, w7_ref, b7_ref, True)
    u = mm(u, w8_ref, b8_ref, False) + t              # residual

    # 1x1 shortcut on the block input
    o_ref[...] = u + jnp.dot(xv, wskip_ref[...], preferred_element_type=f32)


def fused_block(x2d, fp, N, H, W):
    """x2d: (N*H*W, Cin) -> (N*H*W, Cout); one fused Pallas call per Block."""
    HW = H * W
    assert HW % 8 == 0, "H*W must be a multiple of 8 (sublane tiling)"
    assert x2d.shape[0] == N * HW
    Cin = x2d.shape[1]
    Cout = fp["wskip"].shape[1]
    I1 = fp["w1"].shape[1]
    I2 = fp["w5"].shape[1]
    PAD = W + 1
    PR = HW + 2 * PAD

    weights = [fp["w1"], fp["b1"], fp["wd1"], fp["bd1"], fp["w3"], fp["b3"],
               fp["w4"], fp["b4"], fp["wt"], fp["bt"], fp["w5"], fp["b5"],
               fp["wd2"], fp["bd2"], fp["w7"], fp["b7"], fp["w8"], fp["b8"],
               fp["wskip"]]

    def whole(ndim):
        return lambda n: (0,) * ndim

    in_specs = [pl.BlockSpec((HW, Cin), lambda n: (n, 0))]
    in_specs += [pl.BlockSpec(w.shape, whole(w.ndim)) for w in weights]

    return pl.pallas_call(
        functools.partial(_block_kernel, H=H, W=W),
        out_shape=jax.ShapeDtypeStruct((N * HW, Cout), jnp.float32),
        grid=(N,),
        in_specs=in_specs,
        out_specs=pl.BlockSpec((HW, Cout), lambda n: (n, 0)),
        scratch_shapes=[
            pltpu.VMEM((PR, I1), jnp.float32),   # padded rows for IB1 depthwise
            pltpu.VMEM((PR, Cin), jnp.float32),  # padded rows for Transit 3x3
            pltpu.VMEM((PR, I2), jnp.float32),   # padded rows for IB2 depthwise
        ],
        compiler_params=pltpu.CompilerParams(dimension_semantics=("parallel",)),
    )(x2d, *weights)


def _heads_kernel(x_ref, w_ref, b_ref, o_ref, *, num_classes, inv_hw):
    # Global average pool over the spatial rows, then one fused head matmul.
    feat = jnp.sum(x_ref[...], axis=1) * inv_hw                      # (N, C)
    y = jnp.dot(feat, w_ref[...], preferred_element_type=jnp.float32)
    y = y + b_ref[...]
    col = lax.broadcasted_iota(jnp.int32, y.shape, 1)
    # first `num_classes` lanes = label head (already / ||W||), rest = ReLU closs.
    o_ref[...] = jnp.where(col < num_classes, y, jnp.maximum(y, 0.0))


def fused_heads(x3d, w_heads, b_heads, num_classes):
    """x3d: (N, H*W, C_last) -> (N, num_classes + feat_dim)."""
    N, HW, _ = x3d.shape
    NCF = w_heads.shape[1]
    vmem = pl.BlockSpec(memory_space=pltpu.MemorySpace.VMEM)
    return pl.pallas_call(
        functools.partial(_heads_kernel, num_classes=num_classes,
                          inv_hw=1.0 / float(HW)),
        out_shape=jax.ShapeDtypeStruct((N, NCF), jnp.float32),
        in_specs=[vmem, vmem, vmem],
        out_specs=vmem,
    )(x3d, w_heads, b_heads)


# --------------------------------------------------------------------------- #
# Parameter initialization (deterministic, synthetic; PyTorch-equivalent form)
# --------------------------------------------------------------------------- #
def _conv_w(key, shape):
    fan_in = 1
    for d in shape[:-1]:
        fan_in *= d
    return jax.random.normal(key, shape, jnp.float32) * (1.0 / jnp.sqrt(float(fan_in)))


def _bn_params(key, c):
    k1, k2, k3, k4 = jax.random.split(key, 4)
    gamma = 1.0 + 0.1 * jax.random.normal(k1, (c,), jnp.float32)
    beta = 0.1 * jax.random.normal(k2, (c,), jnp.float32)
    mean = 0.1 * jax.random.normal(k3, (c,), jnp.float32)
    var = 1.0 + 0.1 * jnp.abs(jax.random.normal(k4, (c,), jnp.float32))
    scale = gamma / jnp.sqrt(var + EPS)
    shift = beta - mean * scale
    return scale, shift


def _ib_params(key, in_c, inter_c):
    ks = jax.random.split(key, 8)
    p = {}
    p["w1"] = _conv_w(ks[0], (in_c, inter_c))            # 1x1
    p["s1"], p["b1"] = _bn_params(ks[1], inter_c)
    p["wd"] = _conv_w(ks[2], (3, 3, inter_c))            # depthwise 3x3
    p["sd"], p["bd"] = _bn_params(ks[3], inter_c)
    p["w3"] = _conv_w(ks[4], (inter_c, inter_c))         # 1x1
    p["s3"], p["b3"] = _bn_params(ks[5], inter_c)
    p["w4"] = _conv_w(ks[6], (inter_c, in_c))            # 1x1 (no relu) + BN
    p["s4"], p["b4"] = _bn_params(ks[7], in_c)
    return p


def _block_params(key, in_c, out_c):
    ks = jax.random.split(key, 5)
    p = {}
    p["ib1"] = _ib_params(ks[0], in_c, 4 * in_c)
    p["tw"] = _conv_w(ks[1], (3, 3, in_c, out_c))        # Transit 3x3, pad 1
    p["ts"], p["tb"] = _bn_params(ks[2], out_c)
    p["ib2"] = _ib_params(ks[3], out_c, 4 * out_c)
    p["wskip"] = _conv_w(ks[4], (in_c, out_c))           # shortcut 1x1
    return p


def init_params(key, num_feats, hidden_sizes, num_classes, feat_dim):
    hs = [num_feats] + list(hidden_sizes) + [num_classes]
    keys = jax.random.split(key, 16)
    p = {}
    p["stem_w"] = _conv_w(keys[0], (3, 3, num_feats, hs[1]))   # 3x3 stride 2, pad 0
    p["stem_s"], p["stem_b"] = _bn_params(keys[1], hs[1])
    blocks = []
    for idx in range(1, len(hs) - 2):
        blocks.append(_block_params(keys[2 + idx], hs[idx], hs[idx + 1]))
    p["blocks"] = blocks
    c_last = hs[-2]
    p["label_w"] = _conv_w(keys[10], (c_last, num_classes))    # (in, out)
    p["label_b"] = 0.1 * jax.random.normal(keys[11], (num_classes,), jnp.float32)
    p["closs_w"] = _conv_w(keys[12], (c_last, feat_dim))       # (in, out), no bias
    return p


# --------------------------------------------------------------------------- #
# Parameter preparation: fold BN scales / head norms into weights
# --------------------------------------------------------------------------- #
def _prepare_block(bp):
    ib1, ib2 = bp["ib1"], bp["ib2"]

    def f1(w, s):                       # 1x1 conv: (Cin, Cout) * scale over Cout
        return w * s[None, :]

    def fdw(w, s):                      # depthwise: (3,3,C) -> (9, C) * scale
        return w.reshape(9, -1) * s[None, :]

    fp = {}
    fp["w1"] = f1(ib1["w1"], ib1["s1"]); fp["b1"] = ib1["b1"].reshape(1, -1)
    fp["wd1"] = fdw(ib1["wd"], ib1["sd"]); fp["bd1"] = ib1["bd"].reshape(1, -1)
    fp["w3"] = f1(ib1["w3"], ib1["s3"]); fp["b3"] = ib1["b3"].reshape(1, -1)
    fp["w4"] = f1(ib1["w4"], ib1["s4"]); fp["b4"] = ib1["b4"].reshape(1, -1)

    cin, cout = bp["wskip"].shape
    fp["wt"] = bp["tw"].reshape(9, cin, cout) * bp["ts"][None, None, :]
    fp["bt"] = bp["tb"].reshape(1, -1)

    fp["w5"] = f1(ib2["w1"], ib2["s1"]); fp["b5"] = ib2["b1"].reshape(1, -1)
    fp["wd2"] = fdw(ib2["wd"], ib2["sd"]); fp["bd2"] = ib2["bd"].reshape(1, -1)
    fp["w7"] = f1(ib2["w3"], ib2["s3"]); fp["b7"] = ib2["b3"].reshape(1, -1)
    fp["w8"] = f1(ib2["w4"], ib2["s4"]); fp["b8"] = ib2["b4"].reshape(1, -1)
    fp["wskip"] = bp["wskip"]
    return fp


def prepare_params(p):
    fp = {}
    c1 = p["stem_w"].shape[-1]
    fp["stem_w"] = p["stem_w"].reshape(-1, c1) * p["stem_s"][None, :]
    fp["stem_b"] = p["stem_b"].reshape(1, -1)
    fp["blocks"] = [_prepare_block(bp) for bp in p["blocks"]]

    wl, bl, wc = p["label_w"], p["label_b"], p["closs_w"]
    inv_norm = 1.0 / jnp.sqrt(jnp.sum(wl * wl, axis=0))        # torch.norm(W, dim=1)
    fp["w_heads"] = jnp.concatenate([wl * inv_norm[None, :], wc], axis=1)
    fp["b_heads"] = jnp.concatenate(
        [(bl * inv_norm).reshape(1, -1),
         jnp.zeros((1, wc.shape[1]), jnp.float32)], axis=1)
    return fp


# --------------------------------------------------------------------------- #
# Forward pass
# --------------------------------------------------------------------------- #
def _stem_patches(x_nhwc, k=3, stride=2):
    # TODO(synk): stride-2 patch gather stays in XLA (3-channel, KB-scale input);
    # all other convs are computed fully inside the Pallas kernels.
    N, H, W, C = x_nhwc.shape
    Ho = (H - k) // stride + 1
    Wo = (W - k) // stride + 1
    cols = []
    for di in range(k):
        for dj in range(k):
            cols.append(x_nhwc[:, di:di + stride * Ho:stride,
                               dj:dj + stride * Wo:stride, :])
    patches = jnp.concatenate(cols, axis=-1)                   # (N, Ho, Wo, 9*C)
    return patches.reshape(N * Ho * Wo, k * k * C), Ho, Wo


def network_forward(x_nchw, fp, *, num_classes):
    x = jnp.transpose(x_nchw, (0, 2, 3, 1)).astype(jnp.float32)   # NCHW -> NHWC
    N = x.shape[0]

    patches, H, W = _stem_patches(x)                              # stride-2 stem
    h = matmul_bias_act(patches, fp["stem_w"], fp["stem_b"], relu=True)

    for bfp in fp["blocks"]:
        h = fused_block(h, bfp, N, H, W)                          # (N*H*W, Cout)

    c_last = h.shape[1]
    y = fused_heads(h.reshape(N, H * W, c_last),
                    fp["w_heads"], fp["b_heads"], num_classes)    # (N, nc+fd)
    label = y[:, :num_classes]
    closs = y[:, num_classes:]
    return closs, label


# --------------------------------------------------------------------------- #
# Plain-JAX reference (eval semantics) for a numerical cross-check
# --------------------------------------------------------------------------- #
def _ref_bn(x, s, b):
    return x * s + b


def _ref_conv1x1(x, w):
    return jnp.einsum('nhwc,cd->nhwd', x, w)


def _ref_dw3x3(x, w):
    N, H, W, C = x.shape
    xp = jnp.pad(x, ((0, 0), (1, 1), (1, 1), (0, 0)))
    acc = jnp.zeros_like(x)
    for a in range(3):
        for b in range(3):
            acc = acc + xp[:, a:a + H, b:b + W, :] * w[a, b]
    return acc


def _ref_conv3x3(x, w, stride, pad):
    if pad:
        x = jnp.pad(x, ((0, 0), (pad, pad), (pad, pad), (0, 0)))
    Hp, Wp = x.shape[1], x.shape[2]
    Ho = (Hp - 3) // stride + 1
    Wo = (Wp - 3) // stride + 1
    acc = 0
    for a in range(3):
        for b in range(3):
            acc = acc + jnp.einsum(
                'nhwc,cd->nhwd',
                x[:, a:a + stride * Ho:stride, b:b + stride * Wo:stride, :],
                w[a, b])
    return acc


def _ref_ib(x, p):
    t = jax.nn.relu(_ref_bn(_ref_conv1x1(x, p["w1"]), p["s1"], p["b1"]))
    t = jax.nn.relu(_ref_bn(_ref_dw3x3(t, p["wd"]), p["sd"], p["bd"]))
    t = jax.nn.relu(_ref_bn(_ref_conv1x1(t, p["w3"]), p["s3"], p["b3"]))
    t = _ref_bn(_ref_conv1x1(t, p["w4"]), p["s4"], p["b4"])
    return t + x


def _ref_block(x, p):
    t = _ref_ib(x, p["ib1"])
    t = jax.nn.relu(_ref_bn(_ref_conv3x3(t, p["tw"], 1, 1), p["ts"], p["tb"]))
    t = _ref_ib(t, p["ib2"])
    return t + _ref_conv1x1(x, p["wskip"])


def _ref_network(x_nchw, p):
    x = jnp.transpose(x_nchw, (0, 2, 3, 1)).astype(jnp.float32)
    x = jax.nn.relu(_ref_bn(_ref_conv3x3(x, p["stem_w"], 2, 0),
                            p["stem_s"], p["stem_b"]))
    for bp in p["blocks"]:
        x = _ref_block(x, bp)
    feat = jnp.mean(x, axis=(1, 2))
    wl, bl = p["label_w"], p["label_b"]
    label = (feat @ wl + bl) / jnp.sqrt(jnp.sum(wl * wl, axis=0))
    closs = jax.nn.relu(feat @ p["closs_w"])
    return closs, label


# --------------------------------------------------------------------------- #
if __name__ == "__main__":
    key = jax.random.PRNGKey(0)
    kx, kp = jax.random.split(key)

    # Small shapes consistent with the module structure (4 hidden sizes -> 3 Blocks).
    num_feats = 3
    hidden_sizes = [8, 16, 24, 32]
    num_classes = 16
    feat_dim = 16

    x = jax.random.normal(kx, (2, num_feats, 17, 17), jnp.float32)  # NCHW like PyTorch
    raw_params = init_params(kp, num_feats, hidden_sizes, num_classes, feat_dim)
    fused_params = prepare_params(raw_params)

    fwd = jax.jit(functools.partial(network_forward, num_classes=num_classes))
    closs, label = fwd(x, fused_params)
    jax.block_until_ready((closs, label))

    assert closs.shape == (2, feat_dim)
    assert label.shape == (2, num_classes)
    assert bool(jnp.all(jnp.isfinite(closs))) and bool(jnp.all(jnp.isfinite(label)))

    # Numerical cross-check against a plain-JAX reference (eval semantics).
    ref_closs, ref_label = _ref_network(x, raw_params)
    assert bool(jnp.allclose(closs, ref_closs, rtol=2e-3, atol=2e-3)), "closs mismatch"
    assert bool(jnp.allclose(label, ref_label, rtol=2e-3, atol=2e-3)), "label mismatch"

    print("KERNEL_OK")
</pallas_src>

<mosaic_0001>
module attributes {stable_mosaic.version = 11 : i64} {
  func.func @_mm_bias_act_kernel(%arg0: i32, %arg1: memref<64x27xf32, #tpu.memory_space<vmem>>, %arg2: memref<27x8xf32, #tpu.memory_space<vmem>>, %arg3: memref<1x8xf32, #tpu.memory_space<vmem>>, %arg4: memref<64x8xf32, #tpu.memory_space<vmem>>) attributes {dimension_semantics = [#tpu.dimension_semantics<parallel>], iteration_bounds = array<i64: 2>, scalar_prefetch = 0 : i64, scratch_operands = 0 : i64, tpu.core_type = #tpu.core_type<tc>, window_params = [{transform_indices = @transform_0, window_bounds = array<i64: 64, 27>}, {pipeline_mode = #tpu.pipeline_mode<synchronous>, transform_indices = @transform_1, window_bounds = array<i64: 27, 8>}, {pipeline_mode = #tpu.pipeline_mode<synchronous>, transform_indices = @transform_2, window_bounds = array<i64: 1, 8>}, {transform_indices = @transform_3, window_bounds = array<i64: 64, 8>}]} {
    %c0 = arith.constant 0 : index
    %c0_0 = arith.constant 0 : index
    %0 = vector.load %arg1[%c0, %c0_0] : memref<64x27xf32, #tpu.memory_space<vmem>>, vector<64x27xf32>
    %c0_1 = arith.constant 0 : index
    %c0_2 = arith.constant 0 : index
    %1 = vector.load %arg2[%c0_1, %c0_2] : memref<27x8xf32, #tpu.memory_space<vmem>>, vector<27x8xf32>
    %cst = arith.constant dense<0.000000e+00> : vector<64x8xf32>
    %2 = tpu.matmul %0, %1, %cst {dimension_numbers = #tpu.dot_dimension_numbers<[1], [0], [0], [1], [0, 0, 1, 1], [], []>} : vector<64x27xf32>, vector<27x8xf32>, vector<64x8xf32> -> vector<64x8xf32>
    %c0_3 = arith.constant 0 : index
    %c0_4 = arith.constant 0 : index
    %3 = vector.load %arg3[%c0_3, %c0_4] : memref<1x8xf32, #tpu.memory_space<vmem>>, vector<1x8xf32>
    %4 = vector.broadcast %3 : vector<1x8xf32> to vector<64x8xf32>
    %5 = arith.addf %2, %4 : vector<64x8xf32>
    %cst_5 = arith.constant 0.000000e+00 : f32
    %6 = vector.broadcast %cst_5 : f32 to vector<64x8xf32>
    %7 = arith.maximumf %5, %6 : vector<64x8xf32>
    %c0_6 = arith.constant 0 : index
    %c0_7 = arith.constant 0 : index
    %8 = vector.load %arg4[%c0_6, %c0_7] : memref<64x8xf32, #tpu.memory_space<vmem>>, vector<64x8xf32>
    tpu.vector_store %arg4[%c0_6, %c0_7], %7 {strides = array<i32>} : memref<64x8xf32, #tpu.memory_space<vmem>>, vector<64x8xf32>,
    return
  }
  func.func @transform_0(%arg0: i32) -> (i32, i32) {
    %c0_i32 = arith.constant 0 : i32
    %c0_i32_0 = arith.constant 0 : i32
    return %arg0, %c0_i32 : i32, i32
  }
  func.func @transform_1(%arg0: i32) -> (i32, i32) {
    %c0_i32 = arith.constant 0 : i32
    %c0_i32_0 = arith.constant 0 : i32
    %c0_i32_1 = arith.constant 0 : i32
    return %c0_i32, %c0_i32_0 : i32, i32
  }
  func.func @transform_2(%arg0: i32) -> (i32, i32) {
    %c0_i32 = arith.constant 0 : i32
    %c0_i32_0 = arith.constant 0 : i32
    %c0_i32_1 = arith.constant 0 : i32
    return %c0_i32, %c0_i32_0 : i32, i32
  }
  func.func @transform_3(%arg0: i32) -> (i32, i32) {
    %c0_i32 = arith.constant 0 : i32
    %c0_i32_0 = arith.constant 0 : i32
    return %arg0, %c0_i32 : i32, i32
  }
}

module attributes {stable_mosaic.version = 11 : i64} {
  func.func @_block_kernel(%arg0: i32, %arg1: memref<64x8xf32, #tpu.memory_space<vmem>>, %arg2: memref<8x32xf32, #tpu.memory_space<vmem>>, %arg3: memref<1x32xf32, #tpu.memory_space<vmem>>, %arg4: memref<9x32xf32, #tpu.memory_space<vmem>>, %arg5: memref<1x32xf32, #tpu.memory_space<vmem>>, %arg6: memref<32x32xf32, #tpu.memory_space<vmem>>, %arg7: memref<1x32xf32, #tpu.memory_space<vmem>>, %arg8: memref<32x8xf32, #tpu.memory_space<vmem>>, %arg9: memref<1x8xf32, #tpu.memory_space<vmem>>, %arg10: memref<9x8x16xf32, #tpu.memory_space<vmem>>, %arg11: memref<1x16xf32, #tpu.memory_space<vmem>>, %arg12: memref<16x64xf32, #tpu.memory_space<vmem>>, %arg13: memref<1x64xf32, #tpu.memory_space<vmem>>, %arg14: memref<9x64xf32, #tpu.memory_space<vmem>>, %arg15: memref<1x64xf32, #tpu.memory_space<vmem>>, %arg16: memref<64x64xf32, #tpu.memory_space<vmem>>, %arg17: memref<1x64xf32, #tpu.memory_space<vmem>>, %arg18: memref<64x16xf32, #tpu.memory_space<vmem>>, %arg19: memref<1x16xf32, #tpu.memory_space<vmem>>, %arg20: memref<8x16xf32, #tpu.memory_space<vmem>>, %arg21: memref<64x16xf32, #tpu.memory_space<vmem>>, %arg22: memref<82x32xf32, #tpu.memory_space<vmem>>, %arg23: memref<82x8xf32, #tpu.memory_space<vmem>>, %arg24: memref<82x64xf32, #tpu.memory_space<vmem>>) attributes {dimension_semantics = [#tpu.dimension_semantics<parallel>], iteration_bounds = array<i64: 2>, scalar_prefetch = 0 : i64, scratch_operands = 3 : i64, tpu.core_type = #tpu.core_type<tc>, window_params = [{transform_indices = @transform_0, window_bounds = array<i64: 64, 8>}, {pipeline_mode = #tpu.pipeline_mode<synchronous>, transform_indices = @transform_1, window_bounds = array<i64: 8, 32>}, {pipeline_mode = #tpu.pipeline_mode<synchronous>, transform_indices = @transform_2, window_bounds = array<i64: 1, 32>}, {pipeline_mode = #tpu.pipeline_mode<synchronous>, transform_indices = @transform_3, window_bounds = array<i64: 9, 32>}, {pipeline_mode = #tpu.pipeline_mode<synchronous>, transform_indices = @transform_4, window_bounds = array<i64: 1, 32>}, {pipeline_mode = #tpu.pipeline_mode<synchronous>, transform_indices = @transform_5, window_bounds = array<i64: 32, 32>}, {pipeline_mode = #tpu.pipeline_mode<synchronous>, transform_indices = @transform_6, window_bounds = array<i64: 1, 32>}, {pipeline_mode = #tpu.pipeline_mode<synchronous>, transform_indices = @transform_7, window_bounds = array<i64: 32, 8>}, {pipeline_mode = #tpu.pipeline_mode<synchronous>, transform_indices = @transform_8, window_bounds = array<i64: 1, 8>}, {pipeline_mode = #tpu.pipeline_mode<synchronous>, transform_indices = @transform_9, window_bounds = array<i64: 9, 8, 16>}, {pipeline_mode = #tpu.pipeline_mode<synchronous>, transform_indices = @transform_10, window_bounds = array<i64: 1, 16>}, {pipeline_mode = #tpu.pipeline_mode<synchronous>, transform_indices = @transform_11, window_bounds = array<i64: 16, 64>}, {pipeline_mode = #tpu.pipeline_mode<synchronous>, transform_indices = @transform_12, window_bounds = array<i64: 1, 64>}, {pipeline_mode = #tpu.pipeline_mode<synchronous>, transform_indices = @transform_13, window_bounds = array<i64: 9, 64>}, {pipeline_mode = #tpu.pipeline_mode<synchronous>, transform_indices = @transform_14, window_bounds = array<i64: 1, 64>}, {pipeline_mode = #tpu.pipeline_mode<synchronous>, transform_indices = @transform_15, window_bounds = array<i64: 64, 64>}, {pipeline_mode = #tpu.pipeline_mode<synchronous>, transform_indices = @transform_16, window_bounds = array<i64: 1, 64>}, {pipeline_mode = #tpu.pipeline_mode<synchronous>, transform_indices = @transform_17, window_bounds = array<i64: 64, 16>}, {pipeline_mode = #tpu.pipeline_mode<synchronous>, transform_indices = @transform_18, window_bounds = array<i64: 1, 16>}, {pipeline_mode = #tpu.pipeline_mode<synchronous>, transform_indices = @transform_19, window_bounds = array<i64: 8, 16>}, {transform_indices = @transform_20, window_bounds = array<i64: 64, 16>}]} {
    %0 = tpu.iota {dimensions = array<i32: 0>} : vector<64x1xi32>
    %c8_i32 = arith.constant 8 : i32
    %c0_i32 = arith.constant 0 : i32
    %1 = arith.cmpi eq, %c8_i32, %c0_i32 : i32
    %c1_i32 = arith.constant 1 : i32
    %2 = arith.select %1, %c1_i32, %c8_i32 : i32
    %3 = vector.broadcast %2 : i32 to vector<64x1xi32>
    %4 = arith.remsi %0, %3 : vector<64x1xi32>
    %c0_i32_0 = arith.constant 0 : i32
    %5 = vector.broadcast %c0_i32_0 : i32 to vector<64x1xi32>
    %6 = arith.cmpi ne, %4, %5 : vector<64x1xi32>
    %c0_i32_1 = arith.constant 0 : i32
    %7 = vector.broadcast %c0_i32_1 : i32 to vector<64x1xi32>
    %8 = arith.cmpi slt, %4, %7 : vector<64x1xi32>
    %c0_i32_2 = arith.constant 0 : i32
    %9 = arith.cmpi slt, %2, %c0_i32_2 : i32
    %10 = vector.broadcast %9 : i1 to vector<64x1xi1>
    %11 = vector.broadcast %10 : vector<64x1xi1> to vector<64x1xi1>
    %12 = arith.xori %8, %11 : vector<64x1xi1>
    %13 = arith.andi %12, %6 : vector<64x1xi1>
    %14 = vector.broadcast %2 : i32 to vector<64x1xi32>
    %15 = arith.addi %4, %14 : vector<64x1xi32>
    %16 = arith.select %13, %15, %4 : vector<64x1xi1>, vector<64x1xi32>
    %c0_i32_3 = arith.constant 0 : i32
    %17 = vector.broadcast %c0_i32_3 : i32 to vector<64x1xi32>
    %18 = arith.cmpi sgt, %16, %17 : vector<64x1xi32>
    %19 = arith.extui %18 : vector<64x1xi1> to vector<64x1xi32>
    %20 = arith.sitofp %19 : vector<64x1xi32> to vector<64x1xf32>
    %c7_i32 = arith.constant 7 : i32
    %21 = vector.broadcast %c7_i32 : i32 to vector<64x1xi32>
    %22 = arith.cmpi slt, %16, %21 : vector<64x1xi32>
    %23 = arith.extui %22 : vector<64x1xi1> to vector<64x1xi32>
    %24 = arith.sitofp %23 : vector<64x1xi32> to vector<64x1xf32>
    %c0 = arith.constant 0 : index
    %c0_4 = arith.constant 0 : index
    %25 = vector.load %arg1[%c0, %c0_4] : memref<64x8xf32, #tpu.memory_space<vmem>>, vector<64x8xf32>
    %c0_5 = arith.constant 0 : index
    %c0_6 = arith.constant 0 : index
    %26 = vector.load %arg2[%c0_5, %c0_6] : memref<8x32xf32, #tpu.memory_space<vmem>>, vector<8x32xf32>
    %cst = arith.constant dense<0.000000e+00> : vector<64x32xf32>
    %27 = tpu.matmul %25, %26, %cst {dimension_numbers = #tpu.dot_dimension_numbers<[1], [0], [0], [1], [0, 0, 1, 1], [], []>} : vector<64x8xf32>, vector<8x32xf32>, vector<64x32xf32> -> vector<64x32xf32>
    %c0_7 = arith.constant 0 : index
    %c0_8 = arith.constant 0 : index
    %28 = vector.load %arg3[%c0_7, %c0_8] : memref<1x32xf32, #tpu.memory_space<vmem>>, vector<1x32xf32>
    %29 = vector.broadcast %28 : vector<1x32xf32> to vector<64x32xf32>
    %30 = arith.addf %27, %29 : vector<64x32xf32>
    %cst_9 = arith.constant 0.000000e+00 : f32
    %31 = vector.broadcast %cst_9 : f32 to vector<64x32xf32>
    %32 = arith.maximumf %30, %31 : vector<64x32xf32>
    %cst_10 = arith.constant 0.000000e+00 : f32
    %33 = vector.broadcast %cst_10 : f32 to vector<82x32xf32>
    %c0_11 = arith.constant 0 : index
    %c0_12 = arith.constant 0 : index
    %34 = vector.load %arg22[%c0_11, %c0_12] : memref<82x32xf32, #tpu.memory_space<vmem>>, vector<82x32xf32>
    tpu.vector_store %arg22[%c0_11, %c0_12], %33 {strides = array<i32>} : memref<82x32xf32, #tpu.memory_space<vmem>>, vector<82x32xf32>,
    %c9 = arith.constant 9 : index
    %c0_13 = arith.constant 0 : index
    %35 = vector.load %arg22[%c9, %c0_13] : memref<82x32xf32, #tpu.memory_space<vmem>>, vector<64x32xf32>
    tpu.vector_store %arg22[%c9, %c0_13], %32 {strides = array<i32>} : memref<82x32xf32, #tpu.memory_space<vmem>>, vector<64x32xf32>,
    %cst_14 = arith.constant 0.000000e+00 : f32
    %36 = vector.broadcast %cst_14 : f32 to vector<64x32xf32>
    %c0_15 = arith.constant 0 : index
    %c0_16 = arith.constant 0 : index
    %37 = vector.load %arg22[%c0_15, %c0_16] : memref<82x32xf32, #tpu.memory_space<vmem>>, vector<64x32xf32>
    %38 = vector.broadcast %20 : vector<64x1xf32> to vector<64x32xf32>
    %39 = arith.mulf %37, %38 : vector<64x32xf32>
    %c0_17 = arith.constant 0 : index
    %c0_18 = arith.constant 0 : index
    %40 = vector.load %arg4[%c0_17, %c0_18] : memref<9x32xf32, #tpu.memory_space<vmem>>, vector<1x32xf32>
    %41 = vector.broadcast %40 : vector<1x32xf32> to vector<64x32xf32>
    %42 = arith.mulf %39, %41 : vector<64x32xf32>
    %43 = arith.addf %36, %42 : vector<64x32xf32>
    %c1 = arith.constant 1 : index
    %c0_19 = arith.constant 0 : index
    %44 = vector.load %arg22[%c1, %c0_19] : memref<82x32xf32, #tpu.memory_space<vmem>>, vector<64x32xf32>
    %c1_20 = arith.constant 1 : index
    %c0_21 = arith.constant 0 : index
    %45 = vector.load %arg4[%c1_20, %c0_21] : memref<9x32xf32, #tpu.memory_space<vmem>>, vector<1x32xf32>
    %46 = vector.broadcast %45 : vector<1x32xf32> to vector<64x32xf32>
    %47 = arith.mulf %44, %46 : vector<64x32xf32>
    %48 = arith.addf %43, %47 : vector<64x32xf32>
    %c2 = arith.constant 2 : index
    %c0_22 = arith.constant 0 : index
    %49 = vector.load %arg22[%c2, %c0_22] : memref<82x32xf32, #tpu.memory_space<vmem>>, vector<64x32xf32>
    %50 = vector.broadcast %24 : vector<64x1xf32> to vector<64x32xf32>
    %51 = arith.mulf %49, %50 : vector<64x32xf32>
    %c2_23 = arith.constant 2 : index
    %c0_24 = arith.constant 0 : index
    %52 = vector.load %arg4[%c2_23, %c0_24] : memref<9x32xf32, #tpu.memory_space<vmem>>, vector<1x32xf32>
    %53 = vector.broadcast %52 : vector<1x32xf32> to vector<64x32xf32>
    %54 = arith.mulf %51, %53 : vector<64x32xf32>
    %55 = arith.addf %48, %54 : vector<64x32xf32>
    %c8 = arith.constant 8 : index
    %c0_25 = arith.constant 0 : index
    %56 = vector.load %arg22[%c8, %c0_25] : memref<82x32xf32, #tpu.memory_space<vmem>>, vector<64x32xf32>
    %57 = vector.broadcast %20 : vector<64x1xf32> to vector<64x32xf32>
    %58 = arith.mulf %56, %57 : vector<64x32xf32>
    %c3 = arith.constant 3 : index
    %c0_26 = arith.constant 0 : index
    %59 = vector.load %arg4[%c3, %c0_26] : memref<9x32xf32, #tpu.memory_space<vmem>>, vector<1x32xf32>
    %60 = vector.broadcast %59 : vector<1x32xf32> to vector<64x32xf32>
    %61 = arith.mulf %58, %60 : vector<64x32xf32>
    %62 = arith.addf %55, %61 : vector<64x32xf32>
    %c9_27 = arith.constant 9 : index
    %c0_28 = arith.constant 0 : index
    %63 = vector.load %arg22[%c9_27, %c0_28] : memref<82x32xf32, #tpu.memory_space<vmem>>, vector<64x32xf32>
    %c4 = arith.constant 4 : index
    %c0_29 = arith.constant 0 : index
    %64 = vector.load %arg4[%c4, %c0_29] : memref<9x32xf32, #tpu.memory_space<vmem>>, vector<1x32xf32>
    %65 = vector.broadcast %64 : vector<1x32xf32> to vector<64x32xf32>
    %66 = arith.mulf %63, %65 : vector<64x32xf32>
    %67 = arith.addf %62, %66 : vector<64x32xf32>
    %c10 = arith.constant 10 : index
    %c0_30 = arith.constant 0 : index
    %68 = vector.load %arg22[%c10, %c0_30] : memref<82x32xf32, #tpu.memory_space<vmem>>, vector<64x32xf32>
    %69 = vector.broadcast %24 : vector<64x1xf32> to vector<64x32xf32>
    %70 = arith.mulf %68, %69 : vector<64x32xf32>
    %c5 = arith.constant 5 : index
    %c0_31 = arith.constant 0 : index
    %71 = vector.load %arg4[%c5, %c0_31] : memref<9x32xf32, #tpu.memory_space<vmem>>, vector<1x32xf32>
    %72 = vector.broadcast %71 : vector<1x32xf32> to vector<64x32xf32>
    %73 = arith.mulf %70, %72 : vector<64x32xf32>
    %74 = arith.addf %67, %73 : vector<64x32xf32>
    %c16 = arith.constant 16 : index
    %c0_32 = arith.constant 0 : index
    %75 = vector.load %arg22[%c16, %c0_32] : memref<82x32xf32, #tpu.memory_space<vmem>>, vector<64x32xf32>
    %76 = vector.broadcast %20 : vector<64x1xf32> to vector<64x32xf32>
    %77 = arith.mulf %75, %76 : vector<64x32xf32>
    %c6 = arith.constant 6 : index
    %c0_33 = arith.constant 0 : index
    %78 = vector.load %arg4[%c6, %c0_33] : memref<9x32xf32, #tpu.memory_space<vmem>>, vector<1x32xf32>
    %79 = vector.broadcast %78 : vector<1x32xf32> to vector<64x32xf32>
    %80 = arith.mulf %77, %79 : vector<64x32xf32>
    %81 = arith.addf %74, %80 : vector<64x32xf32>
    %c17 = arith.constant 17 : index
    %c0_34 = arith.constant 0 : index
    %82 = vector.load %arg22[%c17, %c0_34] : memref<82x32xf32, #tpu.memory_space<vmem>>, vector<64x32xf32>
    %c7 = arith.constant 7 : index
    %c0_35 = arith.constant 0 : index
    %83 = vector.load %arg4[%c7, %c0_35] : memref<9x32xf32, #tpu.memory_space<vmem>>, vector<1x32xf32>
    %84 = vector.broadcast %83 : vector<1x32xf32> to vector<64x32xf32>
    %85 = arith.mulf %82, %84 : vector<64x32xf32>
    %86 = arith.addf %81, %85 : vector<64x32xf32>
    %c18 = arith.constant 18 : index
    %c0_36 = arith.constant 0 : index
    %87 = vector.load %arg22[%c18, %c0_36] : memref<82x32xf32, #tpu.memory_space<vmem>>, vector<64x32xf32>
    %88 = vector.broadcast %24 : vector<64x1xf32> to vector<64x32xf32>
    %89 = arith.mulf %87, %88 : vector<64x32xf32>
    %c8_37 = arith.constant 8 : index
    %c0_38 = arith.constant 0 : index
    %90 = vector.load %arg4[%c8_37, %c0_38] : memref<9x32xf32, #tpu.memory_space<vmem>>, vector<1x32xf32>
    %91 = vector.broadcast %90 : vector<1x32xf32> to vector<64x32xf32>
    %92 = arith.mulf %89, %91 : vector<64x32xf32>
    %93 = arith.addf %86, %92 : vector<64x32xf32>
    %c0_39 = arith.constant 0 : index
    %c0_40 = arith.constant 0 : index
    %94 = vector.load %arg5[%c0_39, %c0_40] : memref<1x32xf32, #tpu.memory_space<vmem>>, vector<1x32xf32>
    %95 = vector.broadcast %94 : vector<1x32xf32> to vector<64x32xf32>
    %96 = arith.addf %93, %95 : vector<64x32xf32>
    %cst_41 = arith.constant 0.000000e+00 : f32
    %97 = vector.broadcast %cst_41 : f32 to vector<64x32xf32>
    %98 = arith.maximumf %96, %97 : vector<64x32xf32>
    %c0_42 = arith.constant 0 : index
    %c0_43 = arith.constant 0 : index
    %99 = vector.load %arg6[%c0_42, %c0_43] : memref<32x32xf32, #tpu.memory_space<vmem>>, vector<32x32xf32>
    %cst_44 = arith.constant dense<0.000000e+00> : vector<64x32xf32>
    %100 = tpu.matmul %98, %99, %cst_44 {dimension_numbers = #tpu.dot_dimension_numbers<[1], [0], [0], [1], [0, 0, 1, 1], [], []>} : vector<64x32xf32>, vector<32x32xf32>, vector<64x32xf32> -> vector<64x32xf32>
    %c0_45 = arith.constant 0 : index
    %c0_46 = arith.constant 0 : index
    %101 = vector.load %arg7[%c0_45, %c0_46] : memref<1x32xf32, #tpu.memory_space<vmem>>, vector<1x32xf32>
    %102 = vector.broadcast %101 : vector<1x32xf32> to vector<64x32xf32>
    %103 = arith.addf %100, %102 : vector<64x32xf32>
    %cst_47 = arith.constant 0.000000e+00 : f32
    %104 = vector.broadcast %cst_47 : f32 to vector<64x32xf32>
    %105 = arith.maximumf %103, %104 : vector<64x32xf32>
    %c0_48 = arith.constant 0 : index
    %c0_49 = arith.constant 0 : index
    %106 = vector.load %arg8[%c0_48, %c0_49] : memref<32x8xf32, #tpu.memory_space<vmem>>, vector<32x8xf32>
    %cst_50 = arith.constant dense<0.000000e+00> : vector<64x8xf32>
    %107 = tpu.matmul %105, %106, %cst_50 {dimension_numbers = #tpu.dot_dimension_numbers<[1], [0], [0], [1], [0, 0, 1, 1], [], []>} : vector<64x32xf32>, vector<32x8xf32>, vector<64x8xf32> -> vector<64x8xf32>
    %c0_51 = arith.constant 0 : index
    %c0_52 = arith.constant 0 : index
    %108 = vector.load %arg9[%c0_51, %c0_52] : memref<1x8xf32, #tpu.memory_space<vmem>>, vector<1x8xf32>
    %109 = vector.broadcast %108 : vector<1x8xf32> to vector<64x8xf32>
    %110 = arith.addf %107, %109 : vector<64x8xf32>
    %111 = arith.addf %110, %25 : vector<64x8xf32>
    %cst_53 = arith.constant 0.000000e+00 : f32
    %112 = vector.broadcast %cst_53 : f32 to vector<82x8xf32>
    %c0_54 = arith.constant 0 : index
    %c0_55 = arith.constant 0 : index
    %113 = vector.load %arg23[%c0_54, %c0_55] : memref<82x8xf32, #tpu.memory_space<vmem>>, vector<82x8xf32>
    tpu.vector_store %arg23[%c0_54, %c0_55], %112 {strides = array<i32>} : memref<82x8xf32, #tpu.memory_space<vmem>>, vector<82x8xf32>,
    %c9_56 = arith.constant 9 : index
    %c0_57 = arith.constant 0 : index
    %114 = vector.load %arg23[%c9_56, %c0_57] : memref<82x8xf32, #tpu.memory_space<vmem>>, vector<64x8xf32>
    tpu.vector_store %arg23[%c9_56, %c0_57], %111 {strides = array<i32>} : memref<82x8xf32, #tpu.memory_space<vmem>>, vector<64x8xf32>,
    %cst_58 = arith.constant 0.000000e+00 : f32
    %115 = vector.broadcast %cst_58 : f32 to vector<64x16xf32>
    %c0_59 = arith.constant 0 : index
    %c0_60 = arith.constant 0 : index
    %116 = vector.load %arg23[%c0_59, %c0_60] : memref<82x8xf32, #tpu.memory_space<vmem>>, vector<64x8xf32>
    %117 = vector.broadcast %20 : vector<64x1xf32> to vector<64x8xf32>
    %118 = arith.mulf %116, %117 : vector<64x8xf32>
    %c0_61 = arith.constant 0 : index
    %c0_62 = arith.constant 0 : index
    %c0_63 = arith.constant 0 : index
    %119 = vector.load %arg10[%c0_61, %c0_62, %c0_63] : memref<9x8x16xf32, #tpu.memory_space<vmem>>, vector<1x8x16xf32>
    %120 = vector.shape_cast %119 : vector<1x8x16xf32> to vector<8x16xf32>
    %cst_64 = arith.constant dense<0.000000e+00> : vector<64x16xf32>
    %121 = tpu.matmul %118, %120, %cst_64 {dimension_numbers = #tpu.dot_dimension_numbers<[1], [0], [0], [1], [0, 0, 1, 1], [], []>} : vector<64x8xf32>, vector<8x16xf32>, vector<64x16xf32> -> vector<64x16xf32>
    %122 = arith.addf %115, %121 : vector<64x16xf32>
    %c1_65 = arith.constant 1 : index
    %c0_66 = arith.constant 0 : index
    %123 = vector.load %arg23[%c1_65, %c0_66] : memref<82x8xf32, #tpu.memory_space<vmem>>, vector<64x8xf32>
    %c1_67 = arith.constant 1 : index
    %c0_68 = arith.constant 0 : index
    %c0_69 = arith.constant 0 : index
    %124 = vector.load %arg10[%c1_67, %c0_68, %c0_69] : memref<9x8x16xf32, #tpu.memory_space<vmem>>, vector<1x8x16xf32>
    %125 = vector.shape_cast %124 : vector<1x8x16xf32> to vector<8x16xf32>
    %cst_70 = arith.constant dense<0.000000e+00> : vector<64x16xf32>
    %126 = tpu.matmul %123, %125, %cst_70 {dimension_numbers = #tpu.dot_dimension_numbers<[1], [0], [0], [1], [0, 0, 1, 1], [], []>} : vector<64x8xf32>, vector<8x16xf32>, vector<64x16xf32> -> vector<64x16xf32>
    %127 = arith.addf %122, %126 : vector<64x16xf32>
    %c2_71 = arith.constant 2 : index
    %c0_72 = arith.constant 0 : index
    %128 = vector.load %arg23[%c2_71, %c0_72] : memref<82x8xf32, #tpu.memory_space<vmem>>, vector<64x8xf32>
    %129 = vector.broadcast %24 : vector<64x1xf32> to vector<64x8xf32>
    %130 = arith.mulf %128, %129 : vector<64x8xf32>
    %c2_73 = arith.constant 2 : index
    %c0_74 = arith.constant 0 : index
    %c0_75 = arith.constant 0 : index
    %131 = vector.load %arg10[%c2_73, %c0_74, %c0_75] : memref<9x8x16xf32, #tpu.memory_space<vmem>>, vector<1x8x16xf32>
    %132 = vector.shape_cast %131 : vector<1x8x16xf32> to vector<8x16xf32>
    %cst_76 = arith.constant dense<0.000000e+00> : vector<64x16xf32>
    %133 = tpu.matmul %130, %132, %cst_76 {dimension_numbers = #tpu.dot_dimension_numbers<[1], [0], [0], [1], [0, 0, 1, 1], [], []>} : vector<64x8xf32>, vector<8x16xf32>, vector<64x16xf32> -> vector<64x16xf32>
    %134 = arith.addf %127, %133 : vector<64x16xf32>
    %c8_77 = arith.constant 8 : index
    %c0_78 = arith.constant 0 : index
    %135 = vector.load %arg23[%c8_77, %c0_78] : memref<82x8xf32, #tpu.memory_space<vmem>>, vector<64x8xf32>
    %136 = vector.broadcast %20 : vector<64x1xf32> to vector<64x8xf32>
    %137 = arith.mulf %135, %136 : vector<64x8xf32>
    %c3_79 = arith.constant 3 : index
    %c0_80 = arith.constant 0 : index
    %c0_81 = arith.constant 0 : index
    %138 = vector.load %arg10[%c3_79, %c0_80, %c0_81] : memref<9x8x16xf32, #tpu.memory_space<vmem>>, vector<1x8x16xf32>
    %139 = vector.shape_cast %138 : vector<1x8x16xf32> to vector<8x16xf32>
    %cst_82 = arith.constant dense<0.000000e+00> : vector<64x16xf32>
    %140 = tpu.matmul %137, %139, %cst_82 {dimension_numbers = #tpu.dot_dimension_numbers<[1], [0], [0], [1], [0, 0, 1, 1], [], []>} : vector<64x8xf32>, vector<8x16xf32>, vector<64x16xf32> -> vector<64x16xf32>
    %141 = arith.addf %134, %140 : vector<64x16xf32>
    %c9_83 = arith.constant 9 : index
    %c0_84 = arith.constant 0 : index
    %142 = vector.load %arg23[%c9_83, %c0_84] : memref<82x8xf32, #tpu.memory_space<vmem>>, vector<64x8xf32>
    %c4_85 = arith.constant 4 : index
    %c0_86 = arith.constant 0 : index
    %c0_87 = arith.constant 0 : index
    %143 = vector.load %arg10[%c4_85, %c0_86, %c0_87] : memref<9x8x16xf32, #tpu.memory_space<vmem>>, vector<1x8x16xf32>
    %144 = vector.shape_cast %143 : vector<1x8x16xf32> to vector<8x16xf32>
    %cst_88 = arith.constant dense<0.000000e+00> : vector<64x16xf32>
    %145 = tpu.matmul %142, %144, %cst_88 {dimension_numbers = #tpu.dot_dimension_numbers<[1], [0], [0], [1], [0, 0, 1, 1], [], []>} : vector<64x8xf32>, vector<8x16xf32>, vector<64x16xf32> -> vector<64x16xf32>
    %146 = arith.addf %141, %145 : vector<64x16xf32>
    %c10_89 = arith.constant 10 : index
    %c0_90 = arith.constant 0 : index
    %147 = vector.load %arg23[%c10_89, %c0_90] : memref<82x8xf32, #tpu.memory_space<vmem>>, vector<64x8xf32>
    %148 = vector.broadcast %24 : vector<64x1xf32> to vector<64x8xf32>
    %149 = arith.mulf %147, %148 : vector<64x8xf32>
    %c5_91 = arith.constant 5 : index
    %c0_92 = arith.constant 0 : index
    %c0_93 = arith.constant 0 : index
    %150 = vector.load %arg10[%c5_91, %c0_92, %c0_93] : memref<9x8x16xf32, #tpu.memory_space<vmem>>, vector<1x8x16xf32>
    %151 = vector.shape_cast %150 : vector<1x8x16xf32> to vector<8x16xf32>
    %cst_94 = arith.constant dense<0.000000e+00> : vector<64x16xf32>
    %152 = tpu.matmul %149, %151, %cst_94 {dimension_numbers = #tpu.dot_dimension_numbers<[1], [0], [0], [1], [0, 0, 1, 1], [], []>} : vector<64x8xf32>, vector<8x16xf32>, vector<64x16xf32> -> vector<64x16xf32>
    %153 = arith.addf %146, %152 : vector<64x16xf32>
    %c16_95 = arith.constant 16 : index
    %c0_96 = arith.constant 0 : index
    %154 = vector.load %arg23[%c16_95, %c0_96] : memref<82x8xf32, #tpu.memory_space<vmem>>, vector<64x8xf32>
    %155 = vector.broadcast %20 : vector<64x1xf32> to vector<64x8xf32>
    %156 = arith.mulf %154, %155 : vector<64x8xf32>
    %c6_97 = arith.constant 6 : index
    %c0_98 = arith.constant 0 : index
    %c0_99 = arith.constant 0 : index
    %157 = vector.load %arg10[%c6_97, %c0_98, %c0_99] : memref<9x8x16xf32, #tpu.memory_space<vmem>>, vector<1x8x16xf32>
    %158 = vector.shape_cast %157 : vector<1x8x16xf32> to vector<8x16xf32>
    %cst_100 = arith.constant dense<0.000000e+00> : vector<64x16xf32>
    %159 = tpu.matmul %156, %158, %cst_100 {dimension_numbers = #tpu.dot_dimension_numbers<[1], [0], [0], [1], [0, 0, 1, 1], [], []>} : vector<64x8xf32>, vector<8x16xf32>, vector<64x16xf32> -> vector<64x16xf32>
    %160 = arith.addf %153, %159 : vector<64x16xf32>
    %c17_101 = arith.constant 17 : index
    %c0_102 = arith.constant 0 : index
    %161 = vector.load %arg23[%c17_101, %c0_102] : memref<82x8xf32, #tpu.memory_space<vmem>>, vector<64x8xf32>
    %c7_103 = arith.constant 7 : index
    %c0_104 = arith.constant 0 : index
    %c0_105 = arith.constant 0 : index
    %162 = vector.load %arg10[%c7_103, %c0_104, %c0_105] : memref<9x8x16xf32, #tpu.memory_space<vmem>>, vector<1x8x16xf32>
    %163 = vector.shape_cast %162 : vector<1x8x16xf32> to vector<8x16xf32>
    %cst_106 = arith.constant dense<0.000000e+00> : vector<64x16xf32>
    %164 = tpu.matmul %161, %163, %cst_106 {dimension_numbers = #tpu.dot_dimension_numbers<[1], [0], [0], [1], [0, 0, 1, 1], [], []>} : vector<64x8xf32>, vector<8x16xf32>, vector<64x16xf32> -> vector<64x16xf32>
    %165 = arith.addf %160, %164 : vector<64x16xf32>
    %c18_107 = arith.constant 18 : index
    %c0_108 = arith.constant 0 : index
    %166 = vector.load %arg23[%c18_107, %c0_108] : memref<82x8xf32, #tpu.memory_space<vmem>>, vector<64x8xf32>
    %167 = vector.broadcast %24 : vector<64x1xf32> to vector<64x8xf32>
    %168 = arith.mulf %166, %167 : vector<64x8xf32>
    %c8_109 = arith.constant 8 : index
    %c0_110 = arith.constant 0 : index
    %c0_111 = arith.constant 0 : index
    %169 = vector.load %arg10[%c8_109, %c0_110, %c0_111] : memref<9x8x16xf32, #tpu.memory_space<vmem>>, vector<1x8x16xf32>
    %170 = vector.shape_cast %169 : vector<1x8x16xf32> to vector<8x16xf32>
    %cst_112 = arith.constant dense<0.000000e+00> : vector<64x16xf32>
    %171 = tpu.matmul %168, %170, %cst_112 {dimension_numbers = #tpu.dot_dimension_numbers<[1], [0], [0], [1], [0, 0, 1, 1], [], []>} : vector<64x8xf32>, vector<8x16xf32>, vector<64x16xf32> -> vector<64x16xf32>
    %172 = arith.addf %165, %171 : vector<64x16xf32>
    %c0_113 = arith.constant 0 : index
    %c0_114 = arith.constant 0 : index
    %173 = vector.load %arg11[%c0_113, %c0_114] : memref<1x16xf32, #tpu.memory_space<vmem>>, vector<1x16xf32>
    %174 = vector.broadcast %173 : vector<1x16xf32> to vector<64x16xf32>
    %175 = arith.addf %172, %174 : vector<64x16xf32>
    %cst_115 = arith.constant 0.000000e+00 : f32
    %176 = vector.broadcast %cst_115 : f32 to vector<64x16xf32>
    %177 = arith.maximumf %175, %176 : vector<64x16xf32>
    %c0_116 = arith.constant 0 : index
    %c0_117 = arith.constant 0 : index
    %178 = vector.load %arg12[%c0_116, %c0_117] : memref<16x64xf32, #tpu.memory_space<vmem>>, vector<16x64xf32>
    %cst_118 = arith.constant dense<0.000000e+00> : vector<64x64xf32>
    %179 = tpu.matmul %177, %178, %cst_118 {dimension_numbers = #tpu.dot_dimension_numbers<[1], [0], [0], [1], [0, 0, 1, 1], [], []>} : vector<64x16xf32>, vector<16x64xf32>, vector<64x64xf32> -> vector<64x64xf32>
    %c0_119 = arith.constant 0 : index
    %c0_120 = arith.constant 0 : index
    %180 = vector.load %arg13[%c0_119, %c0_120] : memref<1x64xf32, #tpu.memory_space<vmem>>, vector<1x64xf32>
    %181 = vector.broadcast %180 : vector<1x64xf32> to vector<64x64xf32>
    %182 = arith.addf %179, %181 : vector<64x64xf32>
    %cst_121 = arith.constant 0.000000e+00 : f32
    %183 = vector.broadcast %cst_121 : f32 to vector<64x64xf32>
    %184 = arith.maximumf %182, %183 : vector<64x64xf32>
    %cst_122 = arith.constant 0.000000e+00 : f32
    %185 = vector.broadcast %cst_122 : f32 to vector<82x64xf32>
    %c0_123 = arith.constant 0 : index
    %c0_124 = arith.constant 0 : index
    %186 = vector.load %arg24[%c0_123, %c0_124] : memref<82x64xf32, #tpu.memory_space<vmem>>, vector<82x64xf32>
    tpu.vector_store %arg24[%c0_123, %c0_124], %185 {strides = array<i32>} : memref<82x64xf32, #tpu.memory_space<vmem>>, vector<82x64xf32>,
    %c9_125 = arith.constant 9 : index
    %c0_126 = arith.constant 0 : index
    %187 = vector.load %arg24[%c9_125, %c0_126] : memref<82x64xf32, #tpu.memory_space<vmem>>, vector<64x64xf32>
    tpu.vector_store %arg24[%c9_125, %c0_126], %184 {strides = array<i32>} : memref<82x64xf32, #tpu.memory_space<vmem>>, vector<64x64xf32>,
    %cst_127 = arith.constant 0.000000e+00 : f32
    %188 = vector.broadcast %cst_127 : f32 to vector<64x64xf32>
    %c0_128 = arith.constant 0 : index
    %c0_129 = arith.constant 0 : index
    %189 = vector.load %arg24[%c0_128, %c0_129] : memref<82x64xf32, #tpu.memory_space<vmem>>, vector<64x64xf32>
    %190 = vector.broadcast %20 : vector<64x1xf32> to vector<64x64xf32>
    %191 = arith.mulf %189, %190 : vector<64x64xf32>
    %c0_130 = arith.constant 0 : index
    %c0_131 = arith.constant 0 : index
    %192 = vector.load %arg14[%c0_130, %c0_131] : memref<9x64xf32, #tpu.memory_space<vmem>>, vector<1x64xf32>
    %193 = vector.broadcast %192 : vector<1x64xf32> to vector<64x64xf32>
    %194 = arith.mulf %191, %193 : vector<64x64xf32>
    %195 = arith.addf %188, %194 : vector<64x64xf32>
    %c1_132 = arith.constant 1 : index
    %c0_133 = arith.constant 0 : index
    %196 = vector.load %arg24[%c1_132, %c0_133] : memref<82x64xf32, #tpu.memory_space<vmem>>, vector<64x64xf32>
    %c1_134 = arith.constant 1 : index
    %c0_135 = arith.constant 0 : index
    %197 = vector.load %arg14[%c1_134, %c0_135] : memref<9x64xf32, #tpu.memory_space<vmem>>, vector<1x64xf32>
    %198 = vector.broadcast %197 : vector<1x64xf32> to vector<64x64xf32>
    %199 = arith.mulf %196, %198 : vector<64x64xf32>
    %200 = arith.addf %195, %199 : vector<64x64xf32>
    %c2_136 = arith.constant 2 : index
    %c0_137 = arith.constant 0 : index
    %201 = vector.load %arg24[%c2_136, %c0_137] : memref<82x64xf32, #tpu.memory_space<vmem>>, vector<64x64xf32>
    %202 = vector.broadcast %24 : vector<64x1xf32> to vector<64x64xf32>
    %203 = arith.mulf %201, %202 : vector<64x64xf32>
    %c2_138 = arith.constant 2 : index
    %c0_139 = arith.constant 0 : index
    %204 = vector.load %arg14[%c2_138, %c0_139] : memref<9x64xf32, #tpu.memory_space<vmem>>, vector<1x64xf32>
    %205 = vector.broadcast %204 : vector<1x64xf32> to vector<64x64xf32>
    %206 = arith.mulf %203, %205 : vector<64x64xf32>
    %207 = arith.addf %200, %206 : vector<64x64xf32>
    %c8_140 = arith.constant 8 : index
    %c0_141 = arith.constant 0 : index
    %208 = vector.load %arg24[%c8_140, %c0_141] : memref<82x64xf32, #tpu.memory_space<vmem>>, vector<64x64xf32>
    %209 = vector.broadcast %20 : vector<64x1xf32> to vector<64x64xf32>
    %210 = arith.mulf %208, %209 : vector<64x64xf32>
    %c3_142 = arith.constant 3 : index
    %c0_143 = arith.constant 0 : index
    %211 = vector.load %arg14[%c3_142, %c0_143] : memref<9x64xf32, #tpu.memory_space<vmem>>, vector<1x64xf32>
    %212 = vector.broadcast %211 : vector<1x64xf32> to vector<64x64xf32>
    %213 = arith.mulf %210, %212 : vector<64x64xf32>
    %214 = arith.addf %207, %213 : vector<64x64xf32>
    %c9_144 = arith.constant 9 : index
    %c0_145 = arith.constant 0 : index
    %215 = vector.load %arg24[%c9_144, %c0_145] : memref<82x64xf32, #tpu.memory_space<vmem>>, vector<64x64xf32>
    %c4_146 = arith.constant 4 : index
    %c0_147 = arith.constant 0 : index
    %216 = vector.load %arg14[%c4_146, %c0_147] : memref<9x64xf32, #tpu.memory_space<vmem>>, vector<1x64xf32>
    %217 = vector.broadcast %216 : vector<1x64xf32> to vector<64x64xf32>
    %218 = arith.mulf %215, %217 : vector<64x64xf32>
    %219 = arith.addf %214, %218 : vector<64x64xf32>
    %c10_148 = arith.constant 10 : index
    %c0_149 = arith.constant 0 : index
    %220 = vector.load %arg24[%c10_148, %c0_149] : memref<82x64xf32, #tpu.memory_space<vmem>>, vector<64x64xf32>
    %221 = vector.broadcast %24 : vector<64x1xf32> to vector<64x64xf32>
    %222 = arith.mulf %220, %221 : vector<64x64xf32>
    %c5_150 = arith.constant 5 : index
    %c0_151 = arith.constant 0 : index
    %223 = vector.load %arg14[%c5_150, %c0_151] : memref<9x64xf32, #tpu.memory_space<vmem>>, vector<1x64xf32>
    %224 = vector.broadcast %223 : vector<1x64xf32> to vector<64x64xf32>
    %225 = arith.mulf %222, %224 : vector<64x64xf32>
    %226 = arith.addf %219, %225 : vector<64x64xf32>
    %c16_152 = arith.constant 16 : index
    %c0_153 = arith.constant 0 : index
    %227 = vector.load %arg24[%c16_152, %c0_153] : memref<82x64xf32, #tpu.memory_space<vmem>>, vector<64x64xf32>
    %228 = vector.broadcast %20 : vector<64x1xf32> to vector<64x64xf32>
    %229 = arith.mulf %227, %228 : vector<64x64xf32>
    %c6_154 = arith.constant 6 : index
    %c0_155 = arith.constant 0 : index
    %230 = vector.load %arg14[%c6_154, %c0_155] : memref<9x64xf32, #tpu.memory_space<vmem>>, vector<1x64xf32>
    %231 = vector.broadcast %230 : vector<1x64xf32> to vector<64x64xf32>
    %232 = arith.mulf %229, %231 : vector<64x64xf32>
    %233 = arith.addf %226, %232 : vector<64x64xf32>
    %c17_156 = arith.constant 17 : index
    %c0_157 = arith.constant 0 : index
    %234 = vector.load %arg24[%c17_156, %c0_157] : memref<82x64xf32, #tpu.memory_space<vmem>>, vector<64x64xf32>
    %c7_158 = arith.constant 7 : index
    %c0_159 = arith.constant 0 : index
    %235 = vector.load %arg14[%c7_158, %c0_159] : memref<9x64xf32, #tpu.memory_space<vmem>>, vector<1x64xf32>
    %236 = vector.broadcast %235 : vector<1x64xf32> to vector<64x64xf32>
    %237 = arith.mulf %234, %236 : vector<64x64xf32>
    %238 = arith.addf %233, %237 : vector<64x64xf32>
    %c18_160 = arith.constant 18 : index
    %c0_161 = arith.constant 0 : index
    %239 = vector.load %arg24[%c18_160, %c0_161] : memref<82x64xf32, #tpu.memory_space<vmem>>, vector<64x64xf32>
    %240 = vector.broadcast %24 : vector<64x1xf32> to vector<64x64xf32>
    %241 = arith.mulf %239, %240 : vector<64x64xf32>
    %c8_162 = arith.constant 8 : index
    %c0_163 = arith.constant 0 : index
    %242 = vector.load %arg14[%c8_162, %c0_163] : memref<9x64xf32, #tpu.memory_space<vmem>>, vector<1x64xf32>
    %243 = vector.broadcast %242 : vector<1x64xf32> to vector<64x64xf32>
    %244 = arith.mulf %241, %243 : vector<64x64xf32>
    %245 = arith.addf %238, %244 : vector<64x64xf32>
    %c0_164 = arith.constant 0 : index
    %c0_165 = arith.constant 0 : index
    %246 = vector.load %arg15[%c0_164, %c0_165] : memref<1x64xf32, #tpu.memory_space<vmem>>, vector<1x64xf32>
    %247 = vector.broadcast %246 : vector<1x64xf32> to vector<64x64xf32>
    %248 = arith.addf %245, %247 : vector<64x64xf32>
    %cst_166 = arith.constant 0.000000e+00 : f32
    %249 = vector.broadcast %cst_166 : f32 to vector<64x64xf32>
    %250 = arith.maximumf %248, %249 : vector<64x64xf32>
    %c0_167 = arith.constant 0 : index
    %c0_168 = arith.constant 0 : index
    %251 = vector.load %arg16[%c0_167, %c0_168] : memref<64x64xf32, #tpu.memory_space<vmem>>, vector<64x64xf32>
    %cst_169 = arith.constant dense<0.000000e+00> : vector<64x64xf32>
    %252 = tpu.matmul %250, %251, %cst_169 {dimension_numbers = #tpu.dot_dimension_numbers<[1], [0], [0], [1], [0, 0, 1, 1], [], []>} : vector<64x64xf32>, vector<64x64xf32>, vector<64x64xf32> -> vector<64x64xf32>
    %c0_170 = arith.constant 0 : index
    %c0_171 = arith.constant 0 : index
    %253 = vector.load %arg17[%c0_170, %c0_171] : memref<1x64xf32, #tpu.memory_space<vmem>>, vector<1x64xf32>
    %254 = vector.broadcast %253 : vector<1x64xf32> to vector<64x64xf32>
    %255 = arith.addf %252, %254 : vector<64x64xf32>
    %cst_172 = arith.constant 0.000000e+00 : f32
    %256 = vector.broadcast %cst_172 : f32 to vector<64x64xf32>
    %257 = arith.maximumf %255, %256 : vector<64x64xf32>
    %c0_173 = arith.constant 0 : index
    %c0_174 = arith.constant 0 : index
    %258 = vector.load %arg18[%c0_173, %c0_174] : memref<64x16xf32, #tpu.memory_space<vmem>>, vector<64x16xf32>
    %cst_175 = arith.constant dense<0.000000e+00> : vector<64x16xf32>
    %259 = tpu.matmul %257, %258, %cst_175 {dimension_numbers = #tpu.dot_dimension_numbers<[1], [0], [0], [1], [0, 0, 1, 1], [], []>} : vector<64x64xf32>, vector<64x16xf32>, vector<64x16xf32> -> vector<64x16xf32>
    %c0_176 = arith.constant 0 : index
    %c0_177 = arith.constant 0 : index
    %260 = vector.load %arg19[%c0_176, %c0_177] : memref<1x16xf32, #tpu.memory_space<vmem>>, vector<1x16xf32>
    %261 = vector.broadcast %260 : vector<1x16xf32> to vector<64x16xf32>
    %262 = arith.addf %259, %261 : vector<64x16xf32>
    %263 = arith.addf %262, %177 : vector<64x16xf32>
    %c0_178 = arith.constant 0 : index
    %c0_179 = arith.constant 0 : index
    %264 = vector.load %arg20[%c0_178, %c0_179] : memref<8x16xf32, #tpu.memory_space<vmem>>, vector<8x16xf32>
    %cst_180 = arith.constant dense<0.000000e+00> : vector<64x16xf32>
    %265 = tpu.matmul %25, %264, %cst_180 {dimension_numbers = #tpu.dot_dimension_numbers<[1], [0], [0], [1], [0, 0, 1, 1], [], []>} : vector<64x8xf32>, vector<8x16xf32>, vector<64x16xf32> -> vector<64x16xf32>
    %266 = arith.addf %263, %265 : vector<64x16xf32>
    %c0_181 = arith.constant 0 : index
    %c0_182 = arith.constant 0 : index
    %267 = vector.load %arg21[%c0_181, %c0_182] : memref<64x16xf32, #tpu.memory_space<vmem>>, vector<64x16xf32>
    tpu.vector_store %arg21[%c0_181, %c0_182], %266 {strides = array<i32>} : memref<64x16xf32, #tpu.memory_space<vmem>>, vector<64x16xf32>,
    return
  }
  func.func @transform_0(%arg0: i32) -> (i32, i32) {
    %c0_i32 = arith.constant 0 : i32
    %c0_i32_0 = arith.constant 0 : i32
    return %arg0, %c0_i32 : i32, i32
  }
  func.func @transform_1(%arg0: i32) -> (i32, i32) {
    %c0_i32 = arith.constant 0 : i32
    %c0_i32_0 = arith.constant 0 : i32
    %c0_i32_1 = arith.constant 0 : i32
    return %c0_i32, %c0_i32_0 : i32, i32
  }
  func.func @transform_2(%arg0: i32) -> (i32, i32) {
    %c0_i32 = arith.constant 0 : i32
    %c0_i32_0 = arith.constant 0 : i32
    %c0_i32_1 = arith.constant 0 : i32
    return %c0_i32, %c0_i32_0 : i32, i32
  }
  func.func @transform_3(%arg0: i32) -> (i32, i32) {
    %c0_i32 = arith.constant 0 : i32
    %c0_i32_0 = arith.constant 0 : i32
    %c0_i32_1 = arith.constant 0 : i32
    return %c0_i32, %c0_i32_0 : i32, i32
  }
  func.func @transform_4(%arg0: i32) -> (i32, i32) {
    %c0_i32 = arith.constant 0 : i32
    %c0_i32_0 = arith.constant 0 : i32
    %c0_i32_1 = arith.constant 0 : i32
    return %c0_i32, %c0_i32_0 : i32, i32
  }
  func.func @transform_5(%arg0: i32) -> (i32, i32) {
    %c0_i32 = arith.constant 0 : i32
    %c0_i32_0 = arith.constant 0 : i32
    %c0_i32_1 = arith.constant 0 : i32
    return %c0_i32, %c0_i32_0 : i32, i32
  }
  func.func @transform_6(%arg0: i32) -> (i32, i32) {
    %c0_i32 = arith.constant 0 : i32
    %c0_i32_0 = arith.constant 0 : i32
    %c0_i32_1 = arith.constant 0 : i32
    return %c0_i32, %c0_i32_0 : i32, i32
  }
  func.func @transform_7(%arg0: i32) -> (i32, i32) {
    %c0_i32 = arith.constant 0 : i32
    %c0_i32_0 = arith.constant 0 : i32
    %c0_i32_1 = arith.constant 0 : i32
    return %c0_i32, %c0_i32_0 : i32, i32
  }
  func.func @transform_8(%arg0: i32) -> (i32, i32) {
    %c0_i32 = arith.constant 0 : i32
    %c0_i32_0 = arith.constant 0 : i32
    %c0_i32_1 = arith.constant 0 : i32
    return %c0_i32, %c0_i32_0 : i32, i32
  }
  func.func @transform_9(%arg0: i32) -> (i32, i32, i32) {
    %c0_i32 = arith.constant 0 : i32
    %c0_i32_0 = arith.constant 0 : i32
    %c0_i32_1 = arith.constant 0 : i32
    %c0_i32_2 = arith.constant 0 : i32
    return %c0_i32, %c0_i32_0, %c0_i32_1 : i32, i32, i32
  }
  func.func @transform_10(%arg0: i32) -> (i32, i32) {
    %c0_i32 = arith.constant 0 : i32
    %c0_i32_0 = arith.constant 0 : i32
    %c0_i32_1 = arith.constant 0 : i32
    return %c0_i32, %c0_i32_0 : i32, i32
  }
  func.func @transform_11(%arg0: i32) -> (i32, i32) {
    %c0_i32 = arith.constant 0 : i32
    %c0_i32_0 = arith.constant 0 : i32
    %c0_i32_1 = arith.constant 0 : i32
    return %c0_i32, %c0_i32_0 : i32, i32
  }
  func.func @transform_12(%arg0: i32) -> (i32, i32) {
    %c0_i32 = arith.constant 0 : i32
    %c0_i32_0 = arith.constant 0 : i32
    %c0_i32_1 = arith.constant 0 : i32
    return %c0_i32, %c0_i32_0 : i32, i32
  }
  func.func @transform_13(%arg0: i32) -> (i32, i32) {
    %c0_i32 = arith.constant 0 : i32
    %c0_i32_0 = arith.constant 0 : i32
    %c0_i32_1 = arith.constant 0 : i32
    return %c0_i32, %c0_i32_0 : i32, i32
  }
  func.func @transform_14(%arg0: i32) -> (i32, i32) {
    %c0_i32 = arith.constant 0 : i32
    %c0_i32_0 = arith.constant 0 : i32
    %c0_i32_1 = arith.constant 0 : i32
    return %c0_i32, %c0_i32_0 : i32, i32
  }
  func.func @transform_15(%arg0: i32) -> (i32, i32) {
    %c0_i32 = arith.constant 0 : i32
    %c0_i32_0 = arith.constant 0 : i32
    %c0_i32_1 = arith.constant 0 : i32
    return %c0_i32, %c0_i32_0 : i32, i32
  }
  func.func @transform_16(%arg0: i32) -> (i32, i32) {
    %c0_i32 = arith.constant 0 : i32
    %c0_i32_0 = arith.constant 0 : i32
    %c0_i32_1 = arith.constant 0 : i32
    return %c0_i32, %c0_i32_0 : i32, i32
  }
  func.func @transform_17(%arg0: i32) -> (i32, i32) {
    %c0_i32 = arith.constant 0 : i32
    %c0_i32_0 = arith.constant 0 : i32
    %c0_i32_1 = arith.constant 0 : i32
    return %c0_i32, %c0_i32_0 : i32, i32
  }
  func.func @transform_18(%arg0: i32) -> (i32, i32) {
    %c0_i32 = arith.constant 0 : i32
    %c0_i32_0 = arith.constant 0 : i32
    %c0_i32_1 = arith.constant 0 : i32
    return %c0_i32, %c0_i32_0 : i32, i32
  }
  func.func @transform_19(%arg0: i32) -> (i32, i32) {
    %c0_i32 = arith.constant 0 : i32
    %c0_i32_0 = arith.constant 0 : i32
    %c0_i32_1 = arith.constant 0 : i32
    return %c0_i32, %c0_i32_0 : i32, i32
  }
  func.func @transform_20(%arg0: i32) -> (i32, i32) {
    %c0_i32 = arith.constant 0 : i32
    %c0_i32_0 = arith.constant 0 : i32
    return %arg0, %c0_i32 : i32, i32
  }
}

module attributes {stable_mosaic.version = 11 : i64} {
  func.func @_block_kernel(%arg0: i32, %arg1: memref<64x16xf32, #tpu.memory_space<vmem>>, %arg2: memref<16x64xf32, #tpu.memory_space<vmem>>, %arg3: memref<1x64xf32, #tpu.memory_space<vmem>>, %arg4: memref<9x64xf32, #tpu.memory_space<vmem>>, %arg5: memref<1x64xf32, #tpu.memory_space<vmem>>, %arg6: memref<64x64xf32, #tpu.memory_space<vmem>>, %arg7: memref<1x64xf32, #tpu.memory_space<vmem>>, %arg8: memref<64x16xf32, #tpu.memory_space<vmem>>, %arg9: memref<1x16xf32, #tpu.memory_space<vmem>>, %arg10: memref<9x16x24xf32, #tpu.memory_space<vmem>>, %arg11: memref<1x24xf32, #tpu.memory_space<vmem>>, %arg12: memref<24x96xf32, #tpu.memory_space<vmem>>, %arg13: memref<1x96xf32, #tpu.memory_space<vmem>>, %arg14: memref<9x96xf32, #tpu.memory_space<vmem>>, %arg15: memref<1x96xf32, #tpu.memory_space<vmem>>, %arg16: memref<96x96xf32, #tpu.memory_space<vmem>>, %arg17: memref<1x96xf32, #tpu.memory_space<vmem>>, %arg18: memref<96x24xf32, #tpu.memory_space<vmem>>, %arg19: memref<1x24xf32, #tpu.memory_space<vmem>>, %arg20: memref<16x24xf32, #tpu.memory_space<vmem>>, %arg21: memref<64x24xf32, #tpu.memory_space<vmem>>, %arg22: memref<82x64xf32, #tpu.memory_space<vmem>>, %arg23: memref<82x16xf32, #tpu.memory_space<vmem>>, %arg24: memref<82x96xf32, #tpu.memory_space<vmem>>) attributes {dimension_semantics = [#tpu.dimension_semantics<parallel>], iteration_bounds = array<i64: 2>, scalar_prefetch = 0 : i64, scratch_operands = 3 : i64, tpu.core_type = #tpu.core_type<tc>, window_params = [{transform_indices = @transform_0, window_bounds = array<i64: 64, 16>}, {pipeline_mode = #tpu.pipeline_mode<synchronous>, transform_indices = @transform_1, window_bounds = array<i64: 16, 64>}, {pipeline_mode = #tpu.pipeline_mode<synchronous>, transform_indices = @transform_2, window_bounds = array<i64: 1, 64>}, {pipeline_mode = #tpu.pipeline_mode<synchronous>, transform_indices = @transform_3, window_bounds = array<i64: 9, 64>}, {pipeline_mode = #tpu.pipeline_mode<synchronous>, transform_indices = @transform_4, window_bounds = array<i64: 1, 64>}, {pipeline_mode = #tpu.pipeline_mode<synchronous>, transform_indices = @transform_5, window_bounds = array<i64: 64, 64>}, {pipeline_mode = #tpu.pipeline_mode<synchronous>, transform_indices = @transform_6, window_bounds = array<i64: 1, 64>}, {pipeline_mode = #tpu.pipeline_mode<synchronous>, transform_indices = @transform_7, window_bounds = array<i64: 64, 16>}, {pipeline_mode = #tpu.pipeline_mode<synchronous>, transform_indices = @transform_8, window_bounds = array<i64: 1, 16>}, {pipeline_mode = #tpu.pipeline_mode<synchronous>, transform_indices = @transform_9, window_bounds = array<i64: 9, 16, 24>}, {pipeline_mode = #tpu.pipeline_mode<synchronous>, transform_indices = @transform_10, window_bounds = array<i64: 1, 24>}, {pipeline_mode = #tpu.pipeline_mode<synchronous>, transform_indices = @transform_11, window_bounds = array<i64: 24, 96>}, {pipeline_mode = #tpu.pipeline_mode<synchronous>, transform_indices = @transform_12, window_bounds = array<i64: 1, 96>}, {pipeline_mode = #tpu.pipeline_mode<synchronous>, transform_indices = @transform_13, window_bounds = array<i64: 9, 96>}, {pipeline_mode = #tpu.pipeline_mode<synchronous>, transform_indices = @transform_14, window_bounds = array<i64: 1, 96>}, {pipeline_mode = #tpu.pipeline_mode<synchronous>, transform_indices = @transform_15, window_bounds = array<i64: 96, 96>}, {pipeline_mode = #tpu.pipeline_mode<synchronous>, transform_indices = @transform_16, window_bounds = array<i64: 1, 96>}, {pipeline_mode = #tpu.pipeline_mode<synchronous>, transform_indices = @transform_17, window_bounds = array<i64: 96, 24>}, {pipeline_mode = #tpu.pipeline_mode<synchronous>, transform_indices = @transform_18, window_bounds = array<i64: 1, 24>}, {pipeline_mode = #tpu.pipeline_mode<synchronous>, transform_indices = @transform_19, window_bounds = array<i64: 16, 24>}, {transform_indices = @transform_20, window_bounds = array<i64: 64, 24>}]} {
    %0 = tpu.iota {dimensions = array<i32: 0>} : vector<64x1xi32>
    %c8_i32 = arith.constant 8 : i32
    %c0_i32 = arith.constant 0 : i32
    %1 = arith.cmpi eq, %c8_i32, %c0_i32 : i32
    %c1_i32 = arith.constant 1 : i32
    %2 = arith.select %1, %c1_i32, %c8_i32 : i32
    %3 = vector.broadcast %2 : i32 to vector<64x1xi32>
    %4 = arith.remsi %0, %3 : vector<64x1xi32>
    %c0_i32_0 = arith.constant 0 : i32
    %5 = vector.broadcast %c0_i32_0 : i32 to vector<64x1xi32>
    %6 = arith.cmpi ne, %4, %5 : vector<64x1xi32>
    %c0_i32_1 = arith.constant 0 : i32
    %7 = vector.broadcast %c0_i32_1 : i32 to vector<64x1xi32>
    %8 = arith.cmpi slt, %4, %7 : vector<64x1xi32>
    %c0_i32_2 = arith.constant 0 : i32
    %9 = arith.cmpi slt, %2, %c0_i32_2 : i32
    %10 = vector.broadcast %9 : i1 to vector<64x1xi1>
    %11 = vector.broadcast %10 : vector<64x1xi1> to vector<64x1xi1>
    %12 = arith.xori %8, %11 : vector<64x1xi1>
    %13 = arith.andi %12, %6 : vector<64x1xi1>
    %14 = vector.broadcast %2 : i32 to vector<64x1xi32>
    %15 = arith.addi %4, %14 : vector<64x1xi32>
    %16 = arith.select %13, %15, %4 : vector<64x1xi1>, vector<64x1xi32>
    %c0_i32_3 = arith.constant 0 : i32
    %17 = vector.broadcast %c0_i32_3 : i32 to vector<64x1xi32>
    %18 = arith.cmpi sgt, %16, %17 : vector<64x1xi32>
    %19 = arith.extui %18 : vector<64x1xi1> to vector<64x1xi32>
    %20 = arith.sitofp %19 : vector<64x1xi32> to vector<64x1xf32>
    %c7_i32 = arith.constant 7 : i32
    %21 = vector.broadcast %c7_i32 : i32 to vector<64x1xi32>
    %22 = arith.cmpi slt, %16, %21 : vector<64x1xi32>
    %23 = arith.extui %22 : vector<64x1xi1> to vector<64x1xi32>
    %24 = arith.sitofp %23 : vector<64x1xi32> to vector<64x1xf32>
    %c0 = arith.constant 0 : index
    %c0_4 = arith.constant 0 : index
    %25 = vector.load %arg1[%c0, %c0_4] : memref<64x16xf32, #tpu.memory_space<vmem>>, vector<64x16xf32>
    %c0_5 = arith.constant 0 : index
    %c0_6 = arith.constant 0 : index
    %26 = vector.load %arg2[%c0_5, %c0_6] : memref<16x64xf32, #tpu.memory_space<vmem>>, vector<16x64xf32>
    %cst = arith.constant dense<0.000000e+00> : vector<64x64xf32>
    %27 = tpu.matmul %25, %26, %cst {dimension_numbers = #tpu.dot_dimension_numbers<[1], [0], [0], [1], [0, 0, 1, 1], [], []>} : vector<64x16xf32>, vector<16x64xf32>, vector<64x64xf32> -> vector<64x64xf32>
    %c0_7 = arith.constant 0 : index
    %c0_8 = arith.constant 0 : index
    %28 = vector.load %arg3[%c0_7, %c0_8] : memref<1x64xf32, #tpu.memory_space<vmem>>, vector<1x64xf32>
    %29 = vector.broadcast %28 : vector<1x64xf32> to vector<64x64xf32>
    %30 = arith.addf %27, %29 : vector<64x64xf32>
    %cst_9 = arith.constant 0.000000e+00 : f32
    %31 = vector.broadcast %cst_9 : f32 to vector<64x64xf32>
    %32 = arith.maximumf %30, %31 : vector<64x64xf32>
    %cst_10 = arith.constant 0.000000e+00 : f32
    %33 = vector.broadcast %cst_10 : f32 to vector<82x64xf32>
    %c0_11 = arith.constant 0 : index
    %c0_12 = arith.constant 0 : index
    %34 = vector.load %arg22[%c0_11, %c0_12] : memref<82x64xf32, #tpu.memory_space<vmem>>, vector<82x64xf32>
    tpu.vector_store %arg22[%c0_11, %c0_12], %33 {strides = array<i32>} : memref<82x64xf32, #tpu.memory_space<vmem>>, vector<82x64xf32>,
    %c9 = arith.constant 9 : index
    %c0_13 = arith.constant 0 : index
    %35 = vector.load %arg22[%c9, %c0_13] : memref<82x64xf32, #tpu.memory_space<vmem>>, vector<64x64xf32>
    tpu.vector_store %arg22[%c9, %c0_13], %32 {strides = array<i32>} : memref<82x64xf32, #tpu.memory_space<vmem>>, vector<64x64xf32>,
    %cst_14 = arith.constant 0.000000e+00 : f32
    %36 = vector.broadcast %cst_14 : f32 to vector<64x64xf32>
    %c0_15 = arith.constant 0 : index
    %c0_16 = arith.constant 0 : index
    %37 = vector.load %arg22[%c0_15, %c0_16] : memref<82x64xf32, #tpu.memory_space<vmem>>, vector<64x64xf32>
    %38 = vector.broadcast %20 : vector<64x1xf32> to vector<64x64xf32>
    %39 = arith.mulf %37, %38 : vector<64x64xf32>
    %c0_17 = arith.constant 0 : index
    %c0_18 = arith.constant 0 : index
    %40 = vector.load %arg4[%c0_17, %c0_18] : memref<9x64xf32, #tpu.memory_space<vmem>>, vector<1x64xf32>
    %41 = vector.broadcast %40 : vector<1x64xf32> to vector<64x64xf32>
    %42 = arith.mulf %39, %41 : vector<64x64xf32>
    %43 = arith.addf %36, %42 : vector<64x64xf32>
    %c1 = arith.constant 1 : index
    %c0_19 = arith.constant 0 : index
    %44 = vector.load %arg22[%c1, %c0_19] : memref<82x64xf32, #tpu.memory_space<vmem>>, vector<64x64xf32>
    %c1_20 = arith.constant 1 : index
    %c0_21 = arith.constant 0 : index
    %45 = vector.load %arg4[%c1_20, %c0_21] : memref<9x64xf32, #tpu.memory_space<vmem>>, vector<1x64xf32>
    %46 = vector.broadcast %45 : vector<1x64xf32> to vector<64x64xf32>
    %47 = arith.mulf %44, %46 : vector<64x64xf32>
    %48 = arith.addf %43, %47 : vector<64x64xf32>
    %c2 = arith.constant 2 : index
    %c0_22 = arith.constant 0 : index
    %49 = vector.load %arg22[%c2, %c0_22] : memref<82x64xf32, #tpu.memory_space<vmem>>, vector<64x64xf32>
    %50 = vector.broadcast %24 : vector<64x1xf32> to vector<64x64xf32>
    %51 = arith.mulf %49, %50 : vector<64x64xf32>
    %c2_23 = arith.constant 2 : index
    %c0_24 = arith.constant 0 : index
    %52 = vector.load %arg4[%c2_23, %c0_24] : memref<9x64xf32, #tpu.memory_space<vmem>>, vector<1x64xf32>
    %53 = vector.broadcast %52 : vector<1x64xf32> to vector<64x64xf32>
    %54 = arith.mulf %51, %53 : vector<64x64xf32>
    %55 = arith.addf %48, %54 : vector<64x64xf32>
    %c8 = arith.constant 8 : index
    %c0_25 = arith.constant 0 : index
    %56 = vector.load %arg22[%c8, %c0_25] : memref<82x64xf32, #tpu.memory_space<vmem>>, vector<64x64xf32>
    %57 = vector.broadcast %20 : vector<64x1xf32> to vector<64x64xf32>
    %58 = arith.mulf %56, %57 : vector<64x64xf32>
    %c3 = arith.constant 3 : index
    %c0_26 = arith.constant 0 : index
    %59 = vector.load %arg4[%c3, %c0_26] : memref<9x64xf32, #tpu.memory_space<vmem>>, vector<1x64xf32>
    %60 = vector.broadcast %59 : vector<1x64xf32> to vector<64x64xf32>
    %61 = arith.mulf %58, %60 : vector<64x64xf32>
    %62 = arith.addf %55, %61 : vector<64x64xf32>
    %c9_27 = arith.constant 9 : index
    %c0_28 = arith.constant 0 : index
    %63 = vector.load %arg22[%c9_27, %c0_28] : memref<82x64xf32, #tpu.memory_space<vmem>>, vector<64x64xf32>
    %c4 = arith.constant 4 : index
    %c0_29 = arith.constant 0 : index
    %64 = vector.load %arg4[%c4, %c0_29] : memref<9x64xf32, #tpu.memory_space<vmem>>, vector<1x64xf32>
    %65 = vector.broadcast %64 : vector<1x64xf32> to vector<64x64xf32>
    %66 = arith.mulf %63, %65 : vector<64x64xf32>
    %67 = arith.addf %62, %66 : vector<64x64xf32>
    %c10 = arith.constant 10 : index
    %c0_30 = arith.constant 0 : index
    %68 = vector.load %arg22[%c10, %c0_30] : memref<82x64xf32, #tpu.memory_space<vmem>>, vector<64x64xf32>
    %69 = vector.broadcast %24 : vector<64x1xf32> to vector<64x64xf32>
    %70 = arith.mulf %68, %69 : vector<64x64xf32>
    %c5 = arith.constant 5 : index
    %c0_31 = arith.constant 0 : index
    %71 = vector.load %arg4[%c5, %c0_31] : memref<9x64xf32, #tpu.memory_space<vmem>>, vector<1x64xf32>
    %72 = vector.broadcast %71 : vector<1x64xf32> to vector<64x64xf32>
    %73 = arith.mulf %70, %72 : vector<64x64xf32>
    %74 = arith.addf %67, %73 : vector<64x64xf32>
    %c16 = arith.constant 16 : index
    %c0_32 = arith.constant 0 : index
    %75 = vector.load %arg22[%c16, %c0_32] : memref<82x64xf32, #tpu.memory_space<vmem>>, vector<64x64xf32>
    %76 = vector.broadcast %20 : vector<64x1xf32> to vector<64x64xf32>
    %77 = arith.mulf %75, %76 : vector<64x64xf32>
    %c6 = arith.constant 6 : index
    %c0_33 = arith.constant 0 : index
    %78 = vector.load %arg4[%c6, %c0_33] : memref<9x64xf32, #tpu.memory_space<vmem>>, vector<1x64xf32>
    %79 = vector.broadcast %78 : vector<1x64xf32> to vector<64x64xf32>
    %80 = arith.mulf %77, %79 : vector<64x64xf32>
    %81 = arith.addf %74, %80 : vector<64x64xf32>
    %c17 = arith.constant 17 : index
    %c0_34 = arith.constant 0 : index
    %82 = vector.load %arg22[%c17, %c0_34] : memref<82x64xf32, #tpu.memory_space<vmem>>, vector<64x64xf32>
    %c7 = arith.constant 7 : index
    %c0_35 = arith.constant 0 : index
    %83 = vector.load %arg4[%c7, %c0_35] : memref<9x64xf32, #tpu.memory_space<vmem>>, vector<1x64xf32>
    %84 = vector.broadcast %83 : vector<1x64xf32> to vector<64x64xf32>
    %85 = arith.mulf %82, %84 : vector<64x64xf32>
    %86 = arith.addf %81, %85 : vector<64x64xf32>
    %c18 = arith.constant 18 : index
    %c0_36 = arith.constant 0 : index
    %87 = vector.load %arg22[%c18, %c0_36] : memref<82x64xf32, #tpu.memory_space<vmem>>, vector<64x64xf32>
    %88 = vector.broadcast %24 : vector<64x1xf32> to vector<64x64xf32>
    %89 = arith.mulf %87, %88 : vector<64x64xf32>
    %c8_37 = arith.constant 8 : index
    %c0_38 = arith.constant 0 : index
    %90 = vector.load %arg4[%c8_37, %c0_38] : memref<9x64xf32, #tpu.memory_space<vmem>>, vector<1x64xf32>
    %91 = vector.broadcast %90 : vector<1x64xf32> to vector<64x64xf32>
    %92 = arith.mulf %89, %91 : vector<64x64xf32>
    %93 = arith.addf %86, %92 : vector<64x64xf32>
    %c0_39 = arith.constant 0 : index
    %c0_40 = arith.constant 0 : index
    %94 = vector.load %arg5[%c0_39, %c0_40] : memref<1x64xf32, #tpu.memory_space<vmem>>, vector<1x64xf32>
    %95 = vector.broadcast %94 : vector<1x64xf32> to vector<64x64xf32>
    %96 = arith.addf %93, %95 : vector<64x64xf32>
    %cst_41 = arith.constant 0.000000e+00 : f32
    %97 = vector.broadcast %cst_41 : f32 to vector<64x64xf32>
    %98 = arith.maximumf %96, %97 : vector<64x64xf32>
    %c0_42 = arith.constant 0 : index
    %c0_43 = arith.constant 0 : index
    %99 = vector.load %arg6[%c0_42, %c0_43] : memref<64x64xf32, #tpu.memory_space<vmem>>, vector<64x64xf32>
    %cst_44 = arith.constant dense<0.000000e+00> : vector<64x64xf32>
    %100 = tpu.matmul %98, %99, %cst_44 {dimension_numbers = #tpu.dot_dimension_numbers<[1], [0], [0], [1], [0, 0, 1, 1], [], []>} : vector<64x64xf32>, vector<64x64xf32>, vector<64x64xf32> -> vector<64x64xf32>
    %c0_45 = arith.constant 0 : index
    %c0_46 = arith.constant 0 : index
    %101 = vector.load %arg7[%c0_45, %c0_46] : memref<1x64xf32, #tpu.memory_space<vmem>>, vector<1x64xf32>
    %102 = vector.broadcast %101 : vector<1x64xf32> to vector<64x64xf32>
    %103 = arith.addf %100, %102 : vector<64x64xf32>
    %cst_47 = arith.constant 0.000000e+00 : f32
    %104 = vector.broadcast %cst_47 : f32 to vector<64x64xf32>
    %105 = arith.maximumf %103, %104 : vector<64x64xf32>
    %c0_48 = arith.constant 0 : index
    %c0_49 = arith.constant 0 : index
    %106 = vector.load %arg8[%c0_48, %c0_49] : memref<64x16xf32, #tpu.memory_space<vmem>>, vector<64x16xf32>
    %cst_50 = arith.constant dense<0.000000e+00> : vector<64x16xf32>
    %107 = tpu.matmul %105, %106, %cst_50 {dimension_numbers = #tpu.dot_dimension_numbers<[1], [0], [0], [1], [0, 0, 1, 1], [], []>} : vector<64x64xf32>, vector<64x16xf32>, vector<64x16xf32> -> vector<64x16xf32>
    %c0_51 = arith.constant 0 : index
    %c0_52 = arith.constant 0 : index
    %108 = vector.load %arg9[%c0_51, %c0_52] : memref<1x16xf32, #tpu.memory_space<vmem>>, vector<1x16xf32>
    %109 = vector.broadcast %108 : vector<1x16xf32> to vector<64x16xf32>
    %110 = arith.addf %107, %109 : vector<64x16xf32>
    %111 = arith.addf %110, %25 : vector<64x16xf32>
    %cst_53 = arith.constant 0.000000e+00 : f32
    %112 = vector.broadcast %cst_53 : f32 to vector<82x16xf32>
    %c0_54 = arith.constant 0 : index
    %c0_55 = arith.constant 0 : index
    %113 = vector.load %arg23[%c0_54, %c0_55] : memref<82x16xf32, #tpu.memory_space<vmem>>, vector<82x16xf32>
    tpu.vector_store %arg23[%c0_54, %c0_55], %112 {strides = array<i32>} : memref<82x16xf32, #tpu.memory_space<vmem>>, vector<82x16xf32>,
    %c9_56 = arith.constant 9 : index
    %c0_57 = arith.constant 0 : index
    %114 = vector.load %arg23[%c9_56, %c0_57] : memref<82x16xf32, #tpu.memory_space<vmem>>, vector<64x16xf32>
    tpu.vector_store %arg23[%c9_56, %c0_57], %111 {strides = array<i32>} : memref<82x16xf32, #tpu.memory_space<vmem>>, vector<64x16xf32>,
    %cst_58 = arith.constant 0.000000e+00 : f32
    %115 = vector.broadcast %cst_58 : f32 to vector<64x24xf32>
    %c0_59 = arith.constant 0 : index
    %c0_60 = arith.constant 0 : index
    %116 = vector.load %arg23[%c0_59, %c0_60] : memref<82x16xf32, #tpu.memory_space<vmem>>, vector<64x16xf32>
    %117 = vector.broadcast %20 : vector<64x1xf32> to vector<64x16xf32>
    %118 = arith.mulf %116, %117 : vector<64x16xf32>
    %c0_61 = arith.constant 0 : index
    %c0_62 = arith.constant 0 : index
    %c0_63 = arith.constant 0 : index
    %119 = vector.load %arg10[%c0_61, %c0_62, %c0_63] : memref<9x16x24xf32, #tpu.memory_space<vmem>>, vector<1x16x24xf32>
    %120 = vector.shape_cast %119 : vector<1x16x24xf32> to vector<16x24xf32>
    %cst_64 = arith.constant dense<0.000000e+00> : vector<64x24xf32>
    %121 = tpu.matmul %118, %120, %cst_64 {dimension_numbers = #tpu.dot_dimension_numbers<[1], [0], [0], [1], [0, 0, 1, 1], [], []>} : vector<64x16xf32>, vector<16x24xf32>, vector<64x24xf32> -> vector<64x24xf32>
    %122 = arith.addf %115, %121 : vector<64x24xf32>
    %c1_65 = arith.constant 1 : index
    %c0_66 = arith.constant 0 : index
    %123 = vector.load %arg23[%c1_65, %c0_66] : memref<82x16xf32, #tpu.memory_space<vmem>>, vector<64x16xf32>
    %c1_67 = arith.constant 1 : index
    %c0_68 = arith.constant 0 : index
    %c0_69 = arith.constant 0 : index
    %124 = vector.load %arg10[%c1_67, %c0_68, %c0_69] : memref<9x16x24xf32, #tpu.memory_space<vmem>>, vector<1x16x24xf32>
    %125 = vector.shape_cast %124 : vector<1x16x24xf32> to vector<16x24xf32>
    %cst_70 = arith.constant dense<0.000000e+00> : vector<64x24xf32>
    %126 = tpu.matmul %123, %125, %cst_70 {dimension_numbers = #tpu.dot_dimension_numbers<[1], [0], [0], [1], [0, 0, 1, 1], [], []>} : vector<64x16xf32>, vector<16x24xf32>, vector<64x24xf32> -> vector<64x24xf32>
    %127 = arith.addf %122, %126 : vector<64x24xf32>
    %c2_71 = arith.constant 2 : index
    %c0_72 = arith.constant 0 : index
    %128 = vector.load %arg23[%c2_71, %c0_72] : memref<82x16xf32, #tpu.memory_space<vmem>>, vector<64x16xf32>
    %129 = vector.broadcast %24 : vector<64x1xf32> to vector<64x16xf32>
    %130 = arith.mulf %128, %129 : vector<64x16xf32>
    %c2_73 = arith.constant 2 : index
    %c0_74 = arith.constant 0 : index
    %c0_75 = arith.constant 0 : index
    %131 = vector.load %arg10[%c2_73, %c0_74, %c0_75] : memref<9x16x24xf32, #tpu.memory_space<vmem>>, vector<1x16x24xf32>
    %132 = vector.shape_cast %131 : vector<1x16x24xf32> to vector<16x24xf32>
    %cst_76 = arith.constant dense<0.000000e+00> : vector<64x24xf32>
    %133 = tpu.matmul %130, %132, %cst_76 {dimension_numbers = #tpu.dot_dimension_numbers<[1], [0], [0], [1], [0, 0, 1, 1], [], []>} : vector<64x16xf32>, vector<16x24xf32>, vector<64x24xf32> -> vector<64x24xf32>
    %134 = arith.addf %127, %133 : vector<64x24xf32>
    %c8_77 = arith.constant 8 : index
    %c0_78 = arith.constant 0 : index
    %135 = vector.load %arg23[%c8_77, %c0_78] : memref<82x16xf32, #tpu.memory_space<vmem>>, vector<64x16xf32>
    %136 = vector.broadcast %20 : vector<64x1xf32> to vector<64x16xf32>
    %137 = arith.mulf %135, %136 : vector<64x16xf32>
    %c3_79 = arith.constant 3 : index
    %c0_80 = arith.constant 0 : index
    %c0_81 = arith.constant 0 : index
    %138 = vector.load %arg10[%c3_79, %c0_80, %c0_81] : memref<9x16x24xf32, #tpu.memory_space<vmem>>, vector<1x16x24xf32>
    %139 = vector.shape_cast %138 : vector<1x16x24xf32> to vector<16x24xf32>
    %cst_82 = arith.constant dense<0.000000e+00> : vector<64x24xf32>
    %140 = tpu.matmul %137, %139, %cst_82 {dimension_numbers = #tpu.dot_dimension_numbers<[1], [0], [0], [1], [0, 0, 1, 1], [], []>} : vector<64x16xf32>, vector<16x24xf32>, vector<64x24xf32> -> vector<64x24xf32>
    %141 = arith.addf %134, %140 : vector<64x24xf32>
    %c9_83 = arith.constant 9 : index
    %c0_84 = arith.constant 0 : index
    %142 = vector.load %arg23[%c9_83, %c0_84] : memref<82x16xf32, #tpu.memory_space<vmem>>, vector<64x16xf32>
    %c4_85 = arith.constant 4 : index
    %c0_86 = arith.constant 0 : index
    %c0_87 = arith.constant 0 : index
    %143 = vector.load %arg10[%c4_85, %c0_86, %c0_87] : memref<9x16x24xf32, #tpu.memory_space<vmem>>, vector<1x16x24xf32>
    %144 = vector.shape_cast %143 : vector<1x16x24xf32> to vector<16x24xf32>
    %cst_88 = arith.constant dense<0.000000e+00> : vector<64x24xf32>
    %145 = tpu.matmul %142, %144, %cst_88 {dimension_numbers = #tpu.dot_dimension_numbers<[1], [0], [0], [1], [0, 0, 1, 1], [], []>} : vector<64x16xf32>, vector<16x24xf32>, vector<64x24xf32> -> vector<64x24xf32>
    %146 = arith.addf %141, %145 : vector<64x24xf32>
    %c10_89 = arith.constant 10 : index
    %c0_90 = arith.constant 0 : index
    %147 = vector.load %arg23[%c10_89, %c0_90] : memref<82x16xf32, #tpu.memory_space<vmem>>, vector<64x16xf32>
    %148 = vector.broadcast %24 : vector<64x1xf32> to vector<64x16xf32>
    %149 = arith.mulf %147, %148 : vector<64x16xf32>
    %c5_91 = arith.constant 5 : index
    %c0_92 = arith.constant 0 : index
    %c0_93 = arith.constant 0 : index
    %150 = vector.load %arg10[%c5_91, %c0_92, %c0_93] : memref<9x16x24xf32, #tpu.memory_space<vmem>>, vector<1x16x24xf32>
    %151 = vector.shape_cast %150 : vector<1x16x24xf32> to vector<16x24xf32>
    %cst_94 = arith.constant dense<0.000000e+00> : vector<64x24xf32>
    %152 = tpu.matmul %149, %151, %cst_94 {dimension_numbers = #tpu.dot_dimension_numbers<[1], [0], [0], [1], [0, 0, 1, 1], [], []>} : vector<64x16xf32>, vector<16x24xf32>, vector<64x24xf32> -> vector<64x24xf32>
    %153 = arith.addf %146, %152 : vector<64x24xf32>
    %c16_95 = arith.constant 16 : index
    %c0_96 = arith.constant 0 : index
    %154 = vector.load %arg23[%c16_95, %c0_96] : memref<82x16xf32, #tpu.memory_space<vmem>>, vector<64x16xf32>
    %155 = vector.broadcast %20 : vector<64x1xf32> to vector<64x16xf32>
    %156 = arith.mulf %154, %155 : vector<64x16xf32>
    %c6_97 = arith.constant 6 : index
    %c0_98 = arith.constant 0 : index
    %c0_99 = arith.constant 0 : index
    %157 = vector.load %arg10[%c6_97, %c0_98, %c0_99] : memref<9x16x24xf32, #tpu.memory_space<vmem>>, vector<1x16x24xf32>
    %158 = vector.shape_cast %157 : vector<1x16x24xf32> to vector<16x24xf32>
    %cst_100 = arith.constant dense<0.000000e+00> : vector<64x24xf32>
    %159 = tpu.matmul %156, %158, %cst_100 {dimension_numbers = #tpu.dot_dimension_numbers<[1], [0], [0], [1], [0, 0, 1, 1], [], []>} : vector<64x16xf32>, vector<16x24xf32>, vector<64x24xf32> -> vector<64x24xf32>
    %160 = arith.addf %153, %159 : vector<64x24xf32>
    %c17_101 = arith.constant 17 : index
    %c0_102 = arith.constant 0 : index
    %161 = vector.load %arg23[%c17_101, %c0_102] : memref<82x16xf32, #tpu.memory_space<vmem>>, vector<64x16xf32>
    %c7_103 = arith.constant 7 : index
    %c0_104 = arith.constant 0 : index
    %c0_105 = arith.constant 0 : index
    %162 = vector.load %arg10[%c7_103, %c0_104, %c0_105] : memref<9x16x24xf32, #tpu.memory_space<vmem>>, vector<1x16x24xf32>
    %163 = vector.shape_cast %162 : vector<1x16x24xf32> to vector<16x24xf32>
    %cst_106 = arith.constant dense<0.000000e+00> : vector<64x24xf32>
    %164 = tpu.matmul %161, %163, %cst_106 {dimension_numbers = #tpu.dot_dimension_numbers<[1], [0], [0], [1], [0, 0, 1, 1], [], []>} : vector<64x16xf32>, vector<16x24xf32>, vector<64x24xf32> -> vector<64x24xf32>
    %165 = arith.addf %160, %164 : vector<64x24xf32>
    %c18_107 = arith.constant 18 : index
    %c0_108 = arith.constant 0 : index
    %166 = vector.load %arg23[%c18_107, %c0_108] : memref<82x16xf32, #tpu.memory_space<vmem>>, vector<64x16xf32>
    %167 = vector.broadcast %24 : vector<64x1xf32> to vector<64x16xf32>
    %168 = arith.mulf %166, %167 : vector<64x16xf32>
    %c8_109 = arith.constant 8 : index
    %c0_110 = arith.constant 0 : index
    %c0_111 = arith.constant 0 : index
    %169 = vector.load %arg10[%c8_109, %c0_110, %c0_111] : memref<9x16x24xf32, #tpu.memory_space<vmem>>, vector<1x16x24xf32>
    %170 = vector.shape_cast %169 : vector<1x16x24xf32> to vector<16x24xf32>
    %cst_112 = arith.constant dense<0.000000e+00> : vector<64x24xf32>
    %171 = tpu.matmul %168, %170, %cst_112 {dimension_numbers = #tpu.dot_dimension_numbers<[1], [0], [0], [1], [0, 0, 1, 1], [], []>} : vector<64x16xf32>, vector<16x24xf32>, vector<64x24xf32> -> vector<64x24xf32>
    %172 = arith.addf %165, %171 : vector<64x24xf32>
    %c0_113 = arith.constant 0 : index
    %c0_114 = arith.constant 0 : index
    %173 = vector.load %arg11[%c0_113, %c0_114] : memref<1x24xf32, #tpu.memory_space<vmem>>, vector<1x24xf32>
    %174 = vector.broadcast %173 : vector<1x24xf32> to vector<64x24xf32>
    %175 = arith.addf %172, %174 : vector<64x24xf32>
    %cst_115 = arith.constant 0.000000e+00 : f32
    %176 = vector.broadcast %cst_115 : f32 to vector<64x24xf32>
    %177 = arith.maximumf %175, %176 : vector<64x24xf32>
    %c0_116 = arith.constant 0 : index
    %c0_117 = arith.constant 0 : index
    %178 = vector.load %arg12[%c0_116, %c0_117] : memref<24x96xf32, #tpu.memory_space<vmem>>, vector<24x96xf32>
    %cst_118 = arith.constant dense<0.000000e+00> : vector<64x96xf32>
    %179 = tpu.matmul %177, %178, %cst_118 {dimension_numbers = #tpu.dot_dimension_numbers<[1], [0], [0], [1], [0, 0, 1, 1], [], []>} : vector<64x24xf32>, vector<24x96xf32>, vector<64x96xf32> -> vector<64x96xf32>
    %c0_119 = arith.constant 0 : index
    %c0_120 = arith.constant 0 : index
    %180 = vector.load %arg13[%c0_119, %c0_120] : memref<1x96xf32, #tpu.memory_space<vmem>>, vector<1x96xf32>
    %181 = vector.broadcast %180 : vector<1x96xf32> to vector<64x96xf32>
    %182 = arith.addf %179, %181 : vector<64x96xf32>
    %cst_121 = arith.constant 0.000000e+00 : f32
    %183 = vector.broadcast %cst_121 : f32 to vector<64x96xf32>
    %184 = arith.maximumf %182, %183 : vector<64x96xf32>
    %cst_122 = arith.constant 0.000000e+00 : f32
    %185 = vector.broadcast %cst_122 : f32 to vector<82x96xf32>
    %c0_123 = arith.constant 0 : index
    %c0_124 = arith.constant 0 : index
    %186 = vector.load %arg24[%c0_123, %c0_124] : memref<82x96xf32, #tpu.memory_space<vmem>>, vector<82x96xf32>
    tpu.vector_store %arg24[%c0_123, %c0_124], %185 {strides = array<i32>} : memref<82x96xf32, #tpu.memory_space<vmem>>, vector<82x96xf32>,
    %c9_125 = arith.constant 9 : index
    %c0_126 = arith.constant 0 : index
    %187 = vector.load %arg24[%c9_125, %c0_126] : memref<82x96xf32, #tpu.memory_space<vmem>>, vector<64x96xf32>
    tpu.vector_store %arg24[%c9_125, %c0_126], %184 {strides = array<i32>} : memref<82x96xf32, #tpu.memory_space<vmem>>, vector<64x96xf32>,
    %cst_127 = arith.constant 0.000000e+00 : f32
    %188 = vector.broadcast %cst_127 : f32 to vector<64x96xf32>
    %c0_128 = arith.constant 0 : index
    %c0_129 = arith.constant 0 : index
    %189 = vector.load %arg24[%c0_128, %c0_129] : memref<82x96xf32, #tpu.memory_space<vmem>>, vector<64x96xf32>
    %190 = vector.broadcast %20 : vector<64x1xf32> to vector<64x96xf32>
    %191 = arith.mulf %189, %190 : vector<64x96xf32>
    %c0_130 = arith.constant 0 : index
    %c0_131 = arith.constant 0 : index
    %192 = vector.load %arg14[%c0_130, %c0_131] : memref<9x96xf32, #tpu.memory_space<vmem>>, vector<1x96xf32>
    %193 = vector.broadcast %192 : vector<1x96xf32> to vector<64x96xf32>
    %194 = arith.mulf %191, %193 : vector<64x96xf32>
    %195 = arith.addf %188, %194 : vector<64x96xf32>
    %c1_132 = arith.constant 1 : index
    %c0_133 = arith.constant 0 : index
    %196 = vector.load %arg24[%c1_132, %c0_133] : memref<82x96xf32, #tpu.memory_space<vmem>>, vector<64x96xf32>
    %c1_134 = arith.constant 1 : index
    %c0_135 = arith.constant 0 : index
    %197 = vector.load %arg14[%c1_134, %c0_135] : memref<9x96xf32, #tpu.memory_space<vmem>>, vector<1x96xf32>
    %198 = vector.broadcast %197 : vector<1x96xf32> to vector<64x96xf32>
    %199 = arith.mulf %196, %198 : vector<64x96xf32>
    %200 = arith.addf %195, %199 : vector<64x96xf32>
    %c2_136 = arith.constant 2 : index
    %c0_137 = arith.constant 0 : index
    %201 = vector.load %arg24[%c2_136, %c0_137] : memref<82x96xf32, #tpu.memory_space<vmem>>, vector<64x96xf32>
    %202 = vector.broadcast %24 : vector<64x1xf32> to vector<64x96xf32>
    %203 = arith.mulf %201, %202 : vector<64x96xf32>
    %c2_138 = arith.constant 2 : index
    %c0_139 = arith.constant 0 : index
    %204 = vector.load %arg14[%c2_138, %c0_139] : memref<9x96xf32, #tpu.memory_space<vmem>>, vector<1x96xf32>
    %205 = vector.broadcast %204 : vector<1x96xf32> to vector<64x96xf32>
    %206 = arith.mulf %203, %205 : vector<64x96xf32>
    %207 = arith.addf %200, %206 : vector<64x96xf32>
    %c8_140 = arith.constant 8 : index
    %c0_141 = arith.constant 0 : index
    %208 = vector.load %arg24[%c8_140, %c0_141] : memref<82x96xf32, #tpu.memory_space<vmem>>, vector<64x96xf32>
    %209 = vector.broadcast %20 : vector<64x1xf32> to vector<64x96xf32>
    %210 = arith.mulf %208, %209 : vector<64x96xf32>
    %c3_142 = arith.constant 3 : index
    %c0_143 = arith.constant 0 : index
    %211 = vector.load %arg14[%c3_142, %c0_143] : memref<9x96xf32, #tpu.memory_space<vmem>>, vector<1x96xf32>
    %212 = vector.broadcast %211 : vector<1x96xf32> to vector<64x96xf32>
    %213 = arith.mulf %210, %212 : vector<64x96xf32>
    %214 = arith.addf %207, %213 : vector<64x96xf32>
    %c9_144 = arith.constant 9 : index
    %c0_145 = arith.constant 0 : index
    %215 = vector.load %arg24[%c9_144, %c0_145] : memref<82x96xf32, #tpu.memory_space<vmem>>, vector<64x96xf32>
    %c4_146 = arith.constant 4 : index
    %c0_147 = arith.constant 0 : index
    %216 = vector.load %arg14[%c4_146, %c0_147] : memref<9x96xf32, #tpu.memory_space<vmem>>, vector<1x96xf32>
    %217 = vector.broadcast %216 : vector<1x96xf32> to vector<64x96xf32>
    %218 = arith.mulf %215, %217 : vector<64x96xf32>
    %219 = arith.addf %214, %218 : vector<64x96xf32>
    %c10_148 = arith.constant 10 : index
    %c0_149 = arith.constant 0 : index
    %220 = vector.load %arg24[%c10_148, %c0_149] : memref<82x96xf32, #tpu.memory_space<vmem>>, vector<64x96xf32>
    %221 = vector.broadcast %24 : vector<64x1xf32> to vector<64x96xf32>
    %222 = arith.mulf %220, %221 : vector<64x96xf32>
    %c5_150 = arith.constant 5 : index
    %c0_151 = arith.constant 0 : index
    %223 = vector.load %arg14[%c5_150, %c0_151] : memref<9x96xf32, #tpu.memory_space<vmem>>, vector<1x96xf32>
    %224 = vector.broadcast %223 : vector<1x96xf32> to vector<64x96xf32>
    %225 = arith.mulf %222, %224 : vector<64x96xf32>
    %226 = arith.addf %219, %225 : vector<64x96xf32>
    %c16_152 = arith.constant 16 : index
    %c0_153 = arith.constant 0 : index
    %227 = vector.load %arg24[%c16_152, %c0_153] : memref<82x96xf32, #tpu.memory_space<vmem>>, vector<64x96xf32>
    %228 = vector.broadcast %20 : vector<64x1xf32> to vector<64x96xf32>
    %229 = arith.mulf %227, %228 : vector<64x96xf32>
    %c6_154 = arith.constant 6 : index
    %c0_155 = arith.constant 0 : index
    %230 = vector.load %arg14[%c6_154, %c0_155] : memref<9x96xf32, #tpu.memory_space<vmem>>, vector<1x96xf32>
    %231 = vector.broadcast %230 : vector<1x96xf32> to vector<64x96xf32>
    %232 = arith.mulf %229, %231 : vector<64x96xf32>
    %233 = arith.addf %226, %232 : vector<64x96xf32>
    %c17_156 = arith.constant 17 : index
    %c0_157 = arith.constant 0 : index
    %234 = vector.load %arg24[%c17_156, %c0_157] : memref<82x96xf32, #tpu.memory_space<vmem>>, vector<64x96xf32>
    %c7_158 = arith.constant 7 : index
    %c0_159 = arith.constant 0 : index
    %235 = vector.load %arg14[%c7_158, %c0_159] : memref<9x96xf32, #tpu.memory_space<vmem>>, vector<1x96xf32>
    %236 = vector.broadcast %235 : vector<1x96xf32> to vector<64x96xf32>
    %237 = arith.mulf %234, %236 : vector<64x96xf32>
    %238 = arith.addf %233, %237 : vector<64x96xf32>
    %c18_160 = arith.constant 18 : index
    %c0_161 = arith.constant 0 : index
    %239 = vector.load %arg24[%c18_160, %c0_161] : memref<82x96xf32, #tpu.memory_space<vmem>>, vector<64x96xf32>
    %240 = vector.broadcast %24 : vector<64x1xf32> to vector<64x96xf32>
    %241 = arith.mulf %239, %240 : vector<64x96xf32>
    %c8_162 = arith.constant 8 : index
    %c0_163 = arith.constant 0 : index
    %242 = vector.load %arg14[%c8_162, %c0_163] : memref<9x96xf32, #tpu.memory_space<vmem>>, vector<1x96xf32>
    %243 = vector.broadcast %242 : vector<1x96xf32> to vector<64x96xf32>
    %244 = arith.mulf %241, %243 : vector<64x96xf32>
    %245 = arith.addf %238, %244 : vector<64x96xf32>
    %c0_164 = arith.constant 0 : index
    %c0_165 = arith.constant 0 : index
    %246 = vector.load %arg15[%c0_164, %c0_165] : memref<1x96xf32, #tpu.memory_space<vmem>>, vector<1x96xf32>
    %247 = vector.broadcast %246 : vector<1x96xf32> to vector<64x96xf32>
    %248 = arith.addf %245, %247 : vector<64x96xf32>
    %cst_166 = arith.constant 0.000000e+00 : f32
    %249 = vector.broadcast %cst_166 : f32 to vector<64x96xf32>
    %250 = arith.maximumf %248, %249 : vector<64x96xf32>
    %c0_167 = arith.constant 0 : index
    %c0_168 = arith.constant 0 : index
    %251 = vector.load %arg16[%c0_167, %c0_168] : memref<96x96xf32, #tpu.memory_space<vmem>>, vector<96x96xf32>
    %cst_169 = arith.constant dense<0.000000e+00> : vector<64x96xf32>
    %252 = tpu.matmul %250, %251, %cst_169 {dimension_numbers = #tpu.dot_dimension_numbers<[1], [0], [0], [1], [0, 0, 1, 1], [], []>} : vector<64x96xf32>, vector<96x96xf32>, vector<64x96xf32> -> vector<64x96xf32>
    %c0_170 = arith.constant 0 : index
    %c0_171 = arith.constant 0 : index
    %253 = vector.load %arg17[%c0_170, %c0_171] : memref<1x96xf32, #tpu.memory_space<vmem>>, vector<1x96xf32>
    %254 = vector.broadcast %253 : vector<1x96xf32> to vector<64x96xf32>
    %255 = arith.addf %252, %254 : vector<64x96xf32>
    %cst_172 = arith.constant 0.000000e+00 : f32
    %256 = vector.broadcast %cst_172 : f32 to vector<64x96xf32>
    %257 = arith.maximumf %255, %256 : vector<64x96xf32>
    %c0_173 = arith.constant 0 : index
    %c0_174 = arith.constant 0 : index
    %258 = vector.load %arg18[%c0_173, %c0_174] : memref<96x24xf32, #tpu.memory_space<vmem>>, vector<96x24xf32>
    %cst_175 = arith.constant dense<0.000000e+00> : vector<64x24xf32>
    %259 = tpu.matmul %257, %258, %cst_175 {dimension_numbers = #tpu.dot_dimension_numbers<[1], [0], [0], [1], [0, 0, 1, 1], [], []>} : vector<64x96xf32>, vector<96x24xf32>, vector<64x24xf32> -> vector<64x24xf32>
    %c0_176 = arith.constant 0 : index
    %c0_177 = arith.constant 0 : index
    %260 = vector.load %arg19[%c0_176, %c0_177] : memref<1x24xf32, #tpu.memory_space<vmem>>, vector<1x24xf32>
    %261 = vector.broadcast %260 : vector<1x24xf32> to vector<64x24xf32>
    %262 = arith.addf %259, %261 : vector<64x24xf32>
    %263 = arith.addf %262, %177 : vector<64x24xf32>
    %c0_178 = arith.constant 0 : index
    %c0_179 = arith.constant 0 : index
    %264 = vector.load %arg20[%c0_178, %c0_179] : memref<16x24xf32, #tpu.memory_space<vmem>>, vector<16x24xf32>
    %cst_180 = arith.constant dense<0.000000e+00> : vector<64x24xf32>
    %265 = tpu.matmul %25, %264, %cst_180 {dimension_numbers = #tpu.dot_dimension_numbers<[1], [0], [0], [1], [0, 0, 1, 1], [], []>} : vector<64x16xf32>, vector<16x24xf32>, vector<64x24xf32> -> vector<64x24xf32>
    %266 = arith.addf %263, %265 : vector<64x24xf32>
    %c0_181 = arith.constant 0 : index
    %c0_182 = arith.constant 0 : index
    %267 = vector.load %arg21[%c0_181, %c0_182] : memref<64x24xf32, #tpu.memory_space<vmem>>, vector<64x24xf32>
    tpu.vector_store %arg21[%c0_181, %c0_182], %266 {strides = array<i32>} : memref<64x24xf32, #tpu.memory_space<vmem>>, vector<64x24xf32>,
    return
  }
  func.func @transform_0(%arg0: i32) -> (i32, i32) {
    %c0_i32 = arith.constant 0 : i32
    %c0_i32_0 = arith.constant 0 : i32
    return %arg0, %c0_i32 : i32, i32
  }
  func.func @transform_1(%arg0: i32) -> (i32, i32) {
    %c0_i32 = arith.constant 0 : i32
    %c0_i32_0 = arith.constant 0 : i32
    %c0_i32_1 = arith.constant 0 : i32
    return %c0_i32, %c0_i32_0 : i32, i32
  }
  func.func @transform_2(%arg0: i32) -> (i32, i32) {
    %c0_i32 = arith.constant 0 : i32
    %c0_i32_0 = arith.constant 0 : i32
    %c0_i32_1 = arith.constant 0 : i32
    return %c0_i32, %c0_i32_0 : i32, i32
  }
  func.func @transform_3(%arg0: i32) -> (i32, i32) {
    %c0_i32 = arith.constant 0 : i32
    %c0_i32_0 = arith.constant 0 : i32
    %c0_i32_1 = arith.constant 0 : i32
    return %c0_i32, %c0_i32_0 : i32, i32
  }
  func.func @transform_4(%arg0: i32) -> (i32, i32) {
    %c0_i32 = arith.constant 0 : i32
    %c0_i32_0 = arith.constant 0 : i32
    %c0_i32_1 = arith.constant 0 : i32
    return %c0_i32, %c0_i32_0 : i32, i32
  }
  func.func @transform_5(%arg0: i32) -> (i32, i32) {
    %c0_i32 = arith.constant 0 : i32
    %c0_i32_0 = arith.constant 0 : i32
    %c0_i32_1 = arith.constant 0 : i32
    return %c0_i32, %c0_i32_0 : i32, i32
  }
  func.func @transform_6(%arg0: i32) -> (i32, i32) {
    %c0_i32 = arith.constant 0 : i32
    %c0_i32_0 = arith.constant 0 : i32
    %c0_i32_1 = arith.constant 0 : i32
    return %c0_i32, %c0_i32_0 : i32, i32
  }
  func.func @transform_7(%arg0: i32) -> (i32, i32) {
    %c0_i32 = arith.constant 0 : i32
    %c0_i32_0 = arith.constant 0 : i32
    %c0_i32_1 = arith.constant 0 : i32
    return %c0_i32, %c0_i32_0 : i32, i32
  }
  func.func @transform_8(%arg0: i32) -> (i32, i32) {
    %c0_i32 = arith.constant 0 : i32
    %c0_i32_0 = arith.constant 0 : i32
    %c0_i32_1 = arith.constant 0 : i32
    return %c0_i32, %c0_i32_0 : i32, i32
  }
  func.func @transform_9(%arg0: i32) -> (i32, i32, i32) {
    %c0_i32 = arith.constant 0 : i32
    %c0_i32_0 = arith.constant 0 : i32
    %c0_i32_1 = arith.constant 0 : i32
    %c0_i32_2 = arith.constant 0 : i32
    return %c0_i32, %c0_i32_0, %c0_i32_1 : i32, i32, i32
  }
  func.func @transform_10(%arg0: i32) -> (i32, i32) {
    %c0_i32 = arith.constant 0 : i32
    %c0_i32_0 = arith.constant 0 : i32
    %c0_i32_1 = arith.constant 0 : i32
    return %c0_i32, %c0_i32_0 : i32, i32
  }
  func.func @transform_11(%arg0: i32) -> (i32, i32) {
    %c0_i32 = arith.constant 0 : i32
    %c0_i32_0 = arith.constant 0 : i32
    %c0_i32_1 = arith.constant 0 : i32
    return %c0_i32, %c0_i32_0 : i32, i32
  }
  func.func @transform_12(%arg0: i32) -> (i32, i32) {
    %c0_i32 = arith.constant 0 : i32
    %c0_i32_0 = arith.constant 0 : i32
    %c0_i32_1 = arith.constant 0 : i32
    return %c0_i32, %c0_i32_0 : i32, i32
  }
  func.func @transform_13(%arg0: i32) -> (i32, i32) {
    %c0_i32 = arith.constant 0 : i32
    %c0_i32_0 = arith.constant 0 : i32
    %c0_i32_1 = arith.constant 0 : i32
    return %c0_i32, %c0_i32_0 : i32, i32
  }
  func.func @transform_14(%arg0: i32) -> (i32, i32) {
    %c0_i32 = arith.constant 0 : i32
    %c0_i32_0 = arith.constant 0 : i32
    %c0_i32_1 = arith.constant 0 : i32
    return %c0_i32, %c0_i32_0 : i32, i32
  }
  func.func @transform_15(%arg0: i32) -> (i32, i32) {
    %c0_i32 = arith.constant 0 : i32
    %c0_i32_0 = arith.constant 0 : i32
    %c0_i32_1 = arith.constant 0 : i32
    return %c0_i32, %c0_i32_0 : i32, i32
  }
  func.func @transform_16(%arg0: i32) -> (i32, i32) {
    %c0_i32 = arith.constant 0 : i32
    %c0_i32_0 = arith.constant 0 : i32
    %c0_i32_1 = arith.constant 0 : i32
    return %c0_i32, %c0_i32_0 : i32, i32
  }
  func.func @transform_17(%arg0: i32) -> (i32, i32) {
    %c0_i32 = arith.constant 0 : i32
    %c0_i32_0 = arith.constant 0 : i32
    %c0_i32_1 = arith.constant 0 : i32
    return %c0_i32, %c0_i32_0 : i32, i32
  }
  func.func @transform_18(%arg0: i32) -> (i32, i32) {
    %c0_i32 = arith.constant 0 : i32
    %c0_i32_0 = arith.constant 0 : i32
    %c0_i32_1 = arith.constant 0 : i32
    return %c0_i32, %c0_i32_0 : i32, i32
  }
  func.func @transform_19(%arg0: i32) -> (i32, i32) {
    %c0_i32 = arith.constant 0 : i32
    %c0_i32_0 = arith.constant 0 : i32
    %c0_i32_1 = arith.constant 0 : i32
    return %c0_i32, %c0_i32_0 : i32, i32
  }
  func.func @transform_20(%arg0: i32) -> (i32, i32) {
    %c0_i32 = arith.constant 0 : i32
    %c0_i32_0 = arith.constant 0 : i32
    return %arg0, %c0_i32 : i32, i32
  }
}

module attributes {stable_mosaic.version = 11 : i64} {
  func.func @_block_kernel(%arg0: i32, %arg1: memref<64x24xf32, #tpu.memory_space<vmem>>, %arg2: memref<24x96xf32, #tpu.memory_space<vmem>>, %arg3: memref<1x96xf32, #tpu.memory_space<vmem>>, %arg4: memref<9x96xf32, #tpu.memory_space<vmem>>, %arg5: memref<1x96xf32, #tpu.memory_space<vmem>>, %arg6: memref<96x96xf32, #tpu.memory_space<vmem>>, %arg7: memref<1x96xf32, #tpu.memory_space<vmem>>, %arg8: memref<96x24xf32, #tpu.memory_space<vmem>>, %arg9: memref<1x24xf32, #tpu.memory_space<vmem>>, %arg10: memref<9x24x32xf32, #tpu.memory_space<vmem>>, %arg11: memref<1x32xf32, #tpu.memory_space<vmem>>, %arg12: memref<32x128xf32, #tpu.memory_space<vmem>>, %arg13: memref<1x128xf32, #tpu.memory_space<vmem>>, %arg14: memref<9x128xf32, #tpu.memory_space<vmem>>, %arg15: memref<1x128xf32, #tpu.memory_space<vmem>>, %arg16: memref<128x128xf32, #tpu.memory_space<vmem>>, %arg17: memref<1x128xf32, #tpu.memory_space<vmem>>, %arg18: memref<128x32xf32, #tpu.memory_space<vmem>>, %arg19: memref<1x32xf32, #tpu.memory_space<vmem>>, %arg20: memref<24x32xf32, #tpu.memory_space<vmem>>, %arg21: memref<64x32xf32, #tpu.memory_space<vmem>>, %arg22: memref<82x96xf32, #tpu.memory_space<vmem>>, %arg23: memref<82x24xf32, #tpu.memory_space<vmem>>, %arg24: memref<82x128xf32, #tpu.memory_space<vmem>>) attributes {dimension_semantics = [#tpu.dimension_semantics<parallel>], iteration_bounds = array<i64: 2>, scalar_prefetch = 0 : i64, scratch_operands = 3 : i64, tpu.core_type = #tpu.core_type<tc>, window_params = [{transform_indices = @transform_0, window_bounds = array<i64: 64, 24>}, {pipeline_mode = #tpu.pipeline_mode<synchronous>, transform_indices = @transform_1, window_bounds = array<i64: 24, 96>}, {pipeline_mode = #tpu.pipeline_mode<synchronous>, transform_indices = @transform_2, window_bounds = array<i64: 1, 96>}, {pipeline_mode = #tpu.pipeline_mode<synchronous>, transform_indices = @transform_3, window_bounds = array<i64: 9, 96>}, {pipeline_mode = #tpu.pipeline_mode<synchronous>, transform_indices = @transform_4, window_bounds = array<i64: 1, 96>}, {pipeline_mode = #tpu.pipeline_mode<synchronous>, transform_indices = @transform_5, window_bounds = array<i64: 96, 96>}, {pipeline_mode = #tpu.pipeline_mode<synchronous>, transform_indices = @transform_6, window_bounds = array<i64: 1, 96>}, {pipeline_mode = #tpu.pipeline_mode<synchronous>, transform_indices = @transform_7, window_bounds = array<i64: 96, 24>}, {pipeline_mode = #tpu.pipeline_mode<synchronous>, transform_indices = @transform_8, window_bounds = array<i64: 1, 24>}, {pipeline_mode = #tpu.pipeline_mode<synchronous>, transform_indices = @transform_9, window_bounds = array<i64: 9, 24, 32>}, {pipeline_mode = #tpu.pipeline_mode<synchronous>, transform_indices = @transform_10, window_bounds = array<i64: 1, 32>}, {pipeline_mode = #tpu.pipeline_mode<synchronous>, transform_indices = @transform_11, window_bounds = array<i64: 32, 128>}, {pipeline_mode = #tpu.pipeline_mode<synchronous>, transform_indices = @transform_12, window_bounds = array<i64: 1, 128>}, {pipeline_mode = #tpu.pipeline_mode<synchronous>, transform_indices = @transform_13, window_bounds = array<i64: 9, 128>}, {pipeline_mode = #tpu.pipeline_mode<synchronous>, transform_indices = @transform_14, window_bounds = array<i64: 1, 128>}, {pipeline_mode = #tpu.pipeline_mode<synchronous>, transform_indices = @transform_15, window_bounds = array<i64: 128, 128>}, {pipeline_mode = #tpu.pipeline_mode<synchronous>, transform_indices = @transform_16, window_bounds = array<i64: 1, 128>}, {pipeline_mode = #tpu.pipeline_mode<synchronous>, transform_indices = @transform_17, window_bounds = array<i64: 128, 32>}, {pipeline_mode = #tpu.pipeline_mode<synchronous>, transform_indices = @transform_18, window_bounds = array<i64: 1, 32>}, {pipeline_mode = #tpu.pipeline_mode<synchronous>, transform_indices = @transform_19, window_bounds = array<i64: 24, 32>}, {transform_indices = @transform_20, window_bounds = array<i64: 64, 32>}]} {
    %0 = tpu.iota {dimensions = array<i32: 0>} : vector<64x1xi32>
    %c8_i32 = arith.constant 8 : i32
    %c0_i32 = arith.constant 0 : i32
    %1 = arith.cmpi eq, %c8_i32, %c0_i32 : i32
    %c1_i32 = arith.constant 1 : i32
    %2 = arith.select %1, %c1_i32, %c8_i32 : i32
    %3 = vector.broadcast %2 : i32 to vector<64x1xi32>
    %4 = arith.remsi %0, %3 : vector<64x1xi32>
    %c0_i32_0 = arith.constant 0 : i32
    %5 = vector.broadcast %c0_i32_0 : i32 to vector<64x1xi32>
    %6 = arith.cmpi ne, %4, %5 : vector<64x1xi32>
    %c0_i32_1 = arith.constant 0 : i32
    %7 = vector.broadcast %c0_i32_1 : i32 to vector<64x1xi32>
    %8 = arith.cmpi slt, %4, %7 : vector<64x1xi32>
    %c0_i32_2 = arith.constant 0 : i32
    %9 = arith.cmpi slt, %2, %c0_i32_2 : i32
    %10 = vector.broadcast %9 : i1 to vector<64x1xi1>
    %11 = vector.broadcast %10 : vector<64x1xi1> to vector<64x1xi1>
    %12 = arith.xori %8, %11 : vector<64x1xi1>
    %13 = arith.andi %12, %6 : vector<64x1xi1>
    %14 = vector.broadcast %2 : i32 to vector<64x1xi32>
    %15 = arith.addi %4, %14 : vector<64x1xi32>
    %16 = arith.select %13, %15, %4 : vector<64x1xi1>, vector<64x1xi32>
    %c0_i32_3 = arith.constant 0 : i32
    %17 = vector.broadcast %c0_i32_3 : i32 to vector<64x1xi32>
    %18 = arith.cmpi sgt, %16, %17 : vector<64x1xi32>
    %19 = arith.extui %18 : vector<64x1xi1> to vector<64x1xi32>
    %20 = arith.sitofp %19 : vector<64x1xi32> to vector<64x1xf32>
    %c7_i32 = arith.constant 7 : i32
    %21 = vector.broadcast %c7_i32 : i32 to vector<64x1xi32>
    %22 = arith.cmpi slt, %16, %21 : vector<64x1xi32>
    %23 = arith.extui %22 : vector<64x1xi1> to vector<64x1xi32>
    %24 = arith.sitofp %23 : vector<64x1xi32> to vector<64x1xf32>
    %c0 = arith.constant 0 : index
    %c0_4 = arith.constant 0 : index
    %25 = vector.load %arg1[%c0, %c0_4] : memref<64x24xf32, #tpu.memory_space<vmem>>, vector<64x24xf32>
    %c0_5 = arith.constant 0 : index
    %c0_6 = arith.constant 0 : index
    %26 = vector.load %arg2[%c0_5, %c0_6] : memref<24x96xf32, #tpu.memory_space<vmem>>, vector<24x96xf32>
    %cst = arith.constant dense<0.000000e+00> : vector<64x96xf32>
    %27 = tpu.matmul %25, %26, %cst {dimension_numbers = #tpu.dot_dimension_numbers<[1], [0], [0], [1], [0, 0, 1, 1], [], []>} : vector<64x24xf32>, vector<24x96xf32>, vector<64x96xf32> -> vector<64x96xf32>
    %c0_7 = arith.constant 0 : index
    %c0_8 = arith.constant 0 : index
    %28 = vector.load %arg3[%c0_7, %c0_8] : memref<1x96xf32, #tpu.memory_space<vmem>>, vector<1x96xf32>
    %29 = vector.broadcast %28 : vector<1x96xf32> to vector<64x96xf32>
    %30 = arith.addf %27, %29 : vector<64x96xf32>
    %cst_9 = arith.constant 0.000000e+00 : f32
    %31 = vector.broadcast %cst_9 : f32 to vector<64x96xf32>
    %32 = arith.maximumf %30, %31 : vector<64x96xf32>
    %cst_10 = arith.constant 0.000000e+00 : f32
    %33 = vector.broadcast %cst_10 : f32 to vector<82x96xf32>
    %c0_11 = arith.constant 0 : index
    %c0_12 = arith.constant 0 : index
    %34 = vector.load %arg22[%c0_11, %c0_12] : memref<82x96xf32, #tpu.memory_space<vmem>>, vector<82x96xf32>
    tpu.vector_store %arg22[%c0_11, %c0_12], %33 {strides = array<i32>} : memref<82x96xf32, #tpu.memory_space<vmem>>, vector<82x96xf32>,
    %c9 = arith.constant 9 : index
    %c0_13 = arith.constant 0 : index
    %35 = vector.load %arg22[%c9, %c0_13] : memref<82x96xf32, #tpu.memory_space<vmem>>, vector<64x96xf32>
    tpu.vector_store %arg22[%c9, %c0_13], %32 {strides = array<i32>} : memref<82x96xf32, #tpu.memory_space<vmem>>, vector<64x96xf32>,
    %cst_14 = arith.constant 0.000000e+00 : f32
    %36 = vector.broadcast %cst_14 : f32 to vector<64x96xf32>
    %c0_15 = arith.constant 0 : index
    %c0_16 = arith.constant 0 : index
    %37 = vector.load %arg22[%c0_15, %c0_16] : memref<82x96xf32, #tpu.memory_space<vmem>>, vector<64x96xf32>
    %38 = vector.broadcast %20 : vector<64x1xf32> to vector<64x96xf32>
    %39 = arith.mulf %37, %38 : vector<64x96xf32>
    %c0_17 = arith.constant 0 : index
    %c0_18 = arith.constant 0 : index
    %40 = vector.load %arg4[%c0_17, %c0_18] : memref<9x96xf32, #tpu.memory_space<vmem>>, vector<1x96xf32>
    %41 = vector.broadcast %40 : vector<1x96xf32> to vector<64x96xf32>
    %42 = arith.mulf %39, %41 : vector<64x96xf32>
    %43 = arith.addf %36, %42 : vector<64x96xf32>
    %c1 = arith.constant 1 : index
    %c0_19 = arith.constant 0 : index
    %44 = vector.load %arg22[%c1, %c0_19] : memref<82x96xf32, #tpu.memory_space<vmem>>, vector<64x96xf32>
    %c1_20 = arith.constant 1 : index
    %c0_21 = arith.constant 0 : index
    %45 = vector.load %arg4[%c1_20, %c0_21] : memref<9x96xf32, #tpu.memory_space<vmem>>, vector<1x96xf32>
    %46 = vector.broadcast %45 : vector<1x96xf32> to vector<64x96xf32>
    %47 = arith.mulf %44, %46 : vector<64x96xf32>
    %48 = arith.addf %43, %47 : vector<64x96xf32>
    %c2 = arith.constant 2 : index
    %c0_22 = arith.constant 0 : index
    %49 = vector.load %arg22[%c2, %c0_22] : memref<82x96xf32, #tpu.memory_space<vmem>>, vector<64x96xf32>
    %50 = vector.broadcast %24 : vector<64x1xf32> to vector<64x96xf32>
    %51 = arith.mulf %49, %50 : vector<64x96xf32>
    %c2_23 = arith.constant 2 : index
    %c0_24 = arith.constant 0 : index
    %52 = vector.load %arg4[%c2_23, %c0_24] : memref<9x96xf32, #tpu.memory_space<vmem>>, vector<1x96xf32>
    %53 = vector.broadcast %52 : vector<1x96xf32> to vector<64x96xf32>
    %54 = arith.mulf %51, %53 : vector<64x96xf32>
    %55 = arith.addf %48, %54 : vector<64x96xf32>
    %c8 = arith.constant 8 : index
    %c0_25 = arith.constant 0 : index
    %56 = vector.load %arg22[%c8, %c0_25] : memref<82x96xf32, #tpu.memory_space<vmem>>, vector<64x96xf32>
    %57 = vector.broadcast %20 : vector<64x1xf32> to vector<64x96xf32>
    %58 = arith.mulf %56, %57 : vector<64x96xf32>
    %c3 = arith.constant 3 : index
    %c0_26 = arith.constant 0 : index
    %59 = vector.load %arg4[%c3, %c0_26] : memref<9x96xf32, #tpu.memory_space<vmem>>, vector<1x96xf32>
    %60 = vector.broadcast %59 : vector<1x96xf32> to vector<64x96xf32>
    %61 = arith.mulf %58, %60 : vector<64x96xf32>
    %62 = arith.addf %55, %61 : vector<64x96xf32>
    %c9_27 = arith.constant 9 : index
    %c0_28 = arith.constant 0 : index
    %63 = vector.load %arg22[%c9_27, %c0_28] : memref<82x96xf32, #tpu.memory_space<vmem>>, vector<64x96xf32>
    %c4 = arith.constant 4 : index
    %c0_29 = arith.constant 0 : index
    %64 = vector.load %arg4[%c4, %c0_29] : memref<9x96xf32, #tpu.memory_space<vmem>>, vector<1x96xf32>
    %65 = vector.broadcast %64 : vector<1x96xf32> to vector<64x96xf32>
    %66 = arith.mulf %63, %65 : vector<64x96xf32>
    %67 = arith.addf %62, %66 : vector<64x96xf32>
    %c10 = arith.constant 10 : index
    %c0_30 = arith.constant 0 : index
    %68 = vector.load %arg22[%c10, %c0_30] : memref<82x96xf32, #tpu.memory_space<vmem>>, vector<64x96xf32>
    %69 = vector.broadcast %24 : vector<64x1xf32> to vector<64x96xf32>
    %70 = arith.mulf %68, %69 : vector<64x96xf32>
    %c5 = arith.constant 5 : index
    %c0_31 = arith.constant 0 : index
    %71 = vector.load %arg4[%c5, %c0_31] : memref<9x96xf32, #tpu.memory_space<vmem>>, vector<1x96xf32>
    %72 = vector.broadcast %71 : vector<1x96xf32> to vector<64x96xf32>
    %73 = arith.mulf %70, %72 : vector<64x96xf32>
    %74 = arith.addf %67, %73 : vector<64x96xf32>
    %c16 = arith.constant 16 : index
    %c0_32 = arith.constant 0 : index
    %75 = vector.load %arg22[%c16, %c0_32] : memref<82x96xf32, #tpu.memory_space<vmem>>, vector<64x96xf32>
    %76 = vector.broadcast %20 : vector<64x1xf32> to vector<64x96xf32>
    %77 = arith.mulf %75, %76 : vector<64x96xf32>
    %c6 = arith.constant 6 : index
    %c0_33 = arith.constant 0 : index
    %78 = vector.load %arg4[%c6, %c0_33] : memref<9x96xf32, #tpu.memory_space<vmem>>, vector<1x96xf32>
    %79 = vector.broadcast %78 : vector<1x96xf32> to vector<64x96xf32>
    %80 = arith.mulf %77, %79 : vector<64x96xf32>
    %81 = arith.addf %74, %80 : vector<64x96xf32>
    %c17 = arith.constant 17 : index
    %c0_34 = arith.constant 0 : index
    %82 = vector.load %arg22[%c17, %c0_34] : memref<82x96xf32, #tpu.memory_space<vmem>>, vector<64x96xf32>
    %c7 = arith.constant 7 : index
    %c0_35 = arith.constant 0 : index
    %83 = vector.load %arg4[%c7, %c0_35] : memref<9x96xf32, #tpu.memory_space<vmem>>, vector<1x96xf32>
    %84 = vector.broadcast %83 : vector<1x96xf32> to vector<64x96xf32>
    %85 = arith.mulf %82, %84 : vector<64x96xf32>
    %86 = arith.addf %81, %85 : vector<64x96xf32>
    %c18 = arith.constant 18 : index
    %c0_36 = arith.constant 0 : index
    %87 = vector.load %arg22[%c18, %c0_36] : memref<82x96xf32, #tpu.memory_space<vmem>>, vector<64x96xf32>
    %88 = vector.broadcast %24 : vector<64x1xf32> to vector<64x96xf32>
    %89 = arith.mulf %87, %88 : vector<64x96xf32>
    %c8_37 = arith.constant 8 : index
    %c0_38 = arith.constant 0 : index
    %90 = vector.load %arg4[%c8_37, %c0_38] : memref<9x96xf32, #tpu.memory_space<vmem>>, vector<1x96xf32>
    %91 = vector.broadcast %90 : vector<1x96xf32> to vector<64x96xf32>
    %92 = arith.mulf %89, %91 : vector<64x96xf32>
    %93 = arith.addf %86, %92 : vector<64x96xf32>
    %c0_39 = arith.constant 0 : index
    %c0_40 = arith.constant 0 : index
    %94 = vector.load %arg5[%c0_39, %c0_40] : memref<1x96xf32, #tpu.memory_space<vmem>>, vector<1x96xf32>
    %95 = vector.broadcast %94 : vector<1x96xf32> to vector<64x96xf32>
    %96 = arith.addf %93, %95 : vector<64x96xf32>
    %cst_41 = arith.constant 0.000000e+00 : f32
    %97 = vector.broadcast %cst_41 : f32 to vector<64x96xf32>
    %98 = arith.maximumf %96, %97 : vector<64x96xf32>
    %c0_42 = arith.constant 0 : index
    %c0_43 = arith.constant 0 : index
    %99 = vector.load %arg6[%c0_42, %c0_43] : memref<96x96xf32, #tpu.memory_space<vmem>>, vector<96x96xf32>
    %cst_44 = arith.constant dense<0.000000e+00> : vector<64x96xf32>
    %100 = tpu.matmul %98, %99, %cst_44 {dimension_numbers = #tpu.dot_dimension_numbers<[1], [0], [0], [1], [0, 0, 1, 1], [], []>} : vector<64x96xf32>, vector<96x96xf32>, vector<64x96xf32> -> vector<64x96xf32>
    %c0_45 = arith.constant 0 : index
    %c0_46 = arith.constant 0 : index
    %101 = vector.load %arg7[%c0_45, %c0_46] : memref<1x96xf32, #tpu.memory_space<vmem>>, vector<1x96xf32>
    %102 = vector.broadcast %101 : vector<1x96xf32> to vector<64x96xf32>
    %103 = arith.addf %100, %102 : vector<64x96xf32>
    %cst_47 = arith.constant 0.000000e+00 : f32
    %104 = vector.broadcast %cst_47 : f32 to vector<64x96xf32>
    %105 = arith.maximumf %103, %104 : vector<64x96xf32>
    %c0_48 = arith.constant 0 : index
    %c0_49 = arith.constant 0 : index
    %106 = vector.load %arg8[%c0_48, %c0_49] : memref<96x24xf32, #tpu.memory_space<vmem>>, vector<96x24xf32>
    %cst_50 = arith.constant dense<0.000000e+00> : vector<64x24xf32>
    %107 = tpu.matmul %105, %106, %cst_50 {dimension_numbers = #tpu.dot_dimension_numbers<[1], [0], [0], [1], [0, 0, 1, 1], [], []>} : vector<64x96xf32>, vector<96x24xf32>, vector<64x24xf32> -> vector<64x24xf32>
    %c0_51 = arith.constant 0 : index
    %c0_52 = arith.constant 0 : index
    %108 = vector.load %arg9[%c0_51, %c0_52] : memref<1x24xf32, #tpu.memory_space<vmem>>, vector<1x24xf32>
    %109 = vector.broadcast %108 : vector<1x24xf32> to vector<64x24xf32>
    %110 = arith.addf %107, %109 : vector<64x24xf32>
    %111 = arith.addf %110, %25 : vector<64x24xf32>
    %cst_53 = arith.constant 0.000000e+00 : f32
    %112 = vector.broadcast %cst_53 : f32 to vector<82x24xf32>
    %c0_54 = arith.constant 0 : index
    %c0_55 = arith.constant 0 : index
    %113 = vector.load %arg23[%c0_54, %c0_55] : memref<82x24xf32, #tpu.memory_space<vmem>>, vector<82x24xf32>
    tpu.vector_store %arg23[%c0_54, %c0_55], %112 {strides = array<i32>} : memref<82x24xf32, #tpu.memory_space<vmem>>, vector<82x24xf32>,
    %c9_56 = arith.constant 9 : index
    %c0_57 = arith.constant 0 : index
    %114 = vector.load %arg23[%c9_56, %c0_57] : memref<82x24xf32, #tpu.memory_space<vmem>>, vector<64x24xf32>
    tpu.vector_store %arg23[%c9_56, %c0_57], %111 {strides = array<i32>} : memref<82x24xf32, #tpu.memory_space<vmem>>, vector<64x24xf32>,
    %cst_58 = arith.constant 0.000000e+00 : f32
    %115 = vector.broadcast %cst_58 : f32 to vector<64x32xf32>
    %c0_59 = arith.constant 0 : index
    %c0_60 = arith.constant 0 : index
    %116 = vector.load %arg23[%c0_59, %c0_60] : memref<82x24xf32, #tpu.memory_space<vmem>>, vector<64x24xf32>
    %117 = vector.broadcast %20 : vector<64x1xf32> to vector<64x24xf32>
    %118 = arith.mulf %116, %117 : vector<64x24xf32>
    %c0_61 = arith.constant 0 : index
    %c0_62 = arith.constant 0 : index
    %c0_63 = arith.constant 0 : index
    %119 = vector.load %arg10[%c0_61, %c0_62, %c0_63] : memref<9x24x32xf32, #tpu.memory_space<vmem>>, vector<1x24x32xf32>
    %120 = vector.shape_cast %119 : vector<1x24x32xf32> to vector<24x32xf32>
    %cst_64 = arith.constant dense<0.000000e+00> : vector<64x32xf32>
    %121 = tpu.matmul %118, %120, %cst_64 {dimension_numbers = #tpu.dot_dimension_numbers<[1], [0], [0], [1], [0, 0, 1, 1], [], []>} : vector<64x24xf32>, vector<24x32xf32>, vector<64x32xf32> -> vector<64x32xf32>
    %122 = arith.addf %115, %121 : vector<64x32xf32>
    %c1_65 = arith.constant 1 : index
    %c0_66 = arith.constant 0 : index
    %123 = vector.load %arg23[%c1_65, %c0_66] : memref<82x24xf32, #tpu.memory_space<vmem>>, vector<64x24xf32>
    %c1_67 = arith.constant 1 : index
    %c0_68 = arith.constant 0 : index
    %c0_69 = arith.constant 0 : index
    %124 = vector.load %arg10[%c1_67, %c0_68, %c0_69] : memref<9x24x32xf32, #tpu.memory_space<vmem>>, vector<1x24x32xf32>
    %125 = vector.shape_cast %124 : vector<1x24x32xf32> to vector<24x32xf32>
    %cst_70 = arith.constant dense<0.000000e+00> : vector<64x32xf32>
    %126 = tpu.matmul %123, %125, %cst_70 {dimension_numbers = #tpu.dot_dimension_numbers<[1], [0], [0], [1], [0, 0, 1, 1], [], []>} : vector<64x24xf32>, vector<24x32xf32>, vector<64x32xf32> -> vector<64x32xf32>
    %127 = arith.addf %122, %126 : vector<64x32xf32>
    %c2_71 = arith.constant 2 : index
    %c0_72 = arith.constant 0 : index
    %128 = vector.load %arg23[%c2_71, %c0_72] : memref<82x24xf32, #tpu.memory_space<vmem>>, vector<64x24xf32>
    %129 = vector.broadcast %24 : vector<64x1xf32> to vector<64x24xf32>
    %130 = arith.mulf %128, %129 : vector<64x24xf32>
    %c2_73 = arith.constant 2 : index
    %c0_74 = arith.constant 0 : index
    %c0_75 = arith.constant 0 : index
    %131 = vector.load %arg10[%c2_73, %c0_74, %c0_75] : memref<9x24x32xf32, #tpu.memory_space<vmem>>, vector<1x24x32xf32>
    %132 = vector.shape_cast %131 : vector<1x24x32xf32> to vector<24x32xf32>
    %cst_76 = arith.constant dense<0.000000e+00> : vector<64x32xf32>
    %133 = tpu.matmul %130, %132, %cst_76 {dimension_numbers = #tpu.dot_dimension_numbers<[1], [0], [0], [1], [0, 0, 1, 1], [], []>} : vector<64x24xf32>, vector<24x32xf32>, vector<64x32xf32> -> vector<64x32xf32>
    %134 = arith.addf %127, %133 : vector<64x32xf32>
    %c8_77 = arith.constant 8 : index
    %c0_78 = arith.constant 0 : index
    %135 = vector.load %arg23[%c8_77, %c0_78] : memref<82x24xf32, #tpu.memory_space<vmem>>, vector<64x24xf32>
    %136 = vector.broadcast %20 : vector<64x1xf32> to vector<64x24xf32>
    %137 = arith.mulf %135, %136 : vector<64x24xf32>
    %c3_79 = arith.constant 3 : index
    %c0_80 = arith.constant 0 : index
    %c0_81 = arith.constant 0 : index
    %138 = vector.load %arg10[%c3_79, %c0_80, %c0_81] : memref<9x24x32xf32, #tpu.memory_space<vmem>>, vector<1x24x32xf32>
    %139 = vector.shape_cast %138 : vector<1x24x32xf32> to vector<24x32xf32>
    %cst_82 = arith.constant dense<0.000000e+00> : vector<64x32xf32>
    %140 = tpu.matmul %137, %139, %cst_82 {dimension_numbers = #tpu.dot_dimension_numbers<[1], [0], [0], [1], [0, 0, 1, 1], [], []>} : vector<64x24xf32>, vector<24x32xf32>, vector<64x32xf32> -> vector<64x32xf32>
    %141 = arith.addf %134, %140 : vector<64x32xf32>
    %c9_83 = arith.constant 9 : index
    %c0_84 = arith.constant 0 : index
    %142 = vector.load %arg23[%c9_83, %c0_84] : memref<82x24xf32, #tpu.memory_space<vmem>>, vector<64x24xf32>
    %c4_85 = arith.constant 4 : index
    %c0_86 = arith.constant 0 : index
    %c0_87 = arith.constant 0 : index
    %143 = vector.load %arg10[%c4_85, %c0_86, %c0_87] : memref<9x24x32xf32, #tpu.memory_space<vmem>>, vector<1x24x32xf32>
    %144 = vector.shape_cast %143 : vector<1x24x32xf32> to vector<24x32xf32>
    %cst_88 = arith.constant dense<0.000000e+00> : vector<64x32xf32>
    %145 = tpu.matmul %142, %144, %cst_88 {dimension_numbers = #tpu.dot_dimension_numbers<[1], [0], [0], [1], [0, 0, 1, 1], [], []>} : vector<64x24xf32>, vector<24x32xf32>, vector<64x32xf32> -> vector<64x32xf32>
    %146 = arith.addf %141, %145 : vector<64x32xf32>
    %c10_89 = arith.constant 10 : index
    %c0_90 = arith.constant 0 : index
    %147 = vector.load %arg23[%c10_89, %c0_90] : memref<82x24xf32, #tpu.memory_space<vmem>>, vector<64x24xf32>
    %148 = vector.broadcast %24 : vector<64x1xf32> to vector<64x24xf32>
    %149 = arith.mulf %147, %148 : vector<64x24xf32>
    %c5_91 = arith.constant 5 : index
    %c0_92 = arith.constant 0 : index
    %c0_93 = arith.constant 0 : index
    %150 = vector.load %arg10[%c5_91, %c0_92, %c0_93] : memref<9x24x32xf32, #tpu.memory_space<vmem>>, vector<1x24x32xf32>
    %151 = vector.shape_cast %150 : vector<1x24x32xf32> to vector<24x32xf32>
    %cst_94 = arith.constant dense<0.000000e+00> : vector<64x32xf32>
    %152 = tpu.matmul %149, %151, %cst_94 {dimension_numbers = #tpu.dot_dimension_numbers<[1], [0], [0], [1], [0, 0, 1, 1], [], []>} : vector<64x24xf32>, vector<24x32xf32>, vector<64x32xf32> -> vector<64x32xf32>
    %153 = arith.addf %146, %152 : vector<64x32xf32>
    %c16_95 = arith.constant 16 : index
    %c0_96 = arith.constant 0 : index
    %154 = vector.load %arg23[%c16_95, %c0_96] : memref<82x24xf32, #tpu.memory_space<vmem>>, vector<64x24xf32>
    %155 = vector.broadcast %20 : vector<64x1xf32> to vector<64x24xf32>
    %156 = arith.mulf %154, %155 : vector<64x24xf32>
    %c6_97 = arith.constant 6 : index
    %c0_98 = arith.constant 0 : index
    %c0_99 = arith.constant 0 : index
    %157 = vector.load %arg10[%c6_97, %c0_98, %c0_99] : memref<9x24x32xf32, #tpu.memory_space<vmem>>, vector<1x24x32xf32>
    %158 = vector.shape_cast %157 : vector<1x24x32xf32> to vector<24x32xf32>
    %cst_100 = arith.constant dense<0.000000e+00> : vector<64x32xf32>
    %159 = tpu.matmul %156, %158, %cst_100 {dimension_numbers = #tpu.dot_dimension_numbers<[1], [0], [0], [1], [0, 0, 1, 1], [], []>} : vector<64x24xf32>, vector<24x32xf32>, vector<64x32xf32> -> vector<64x32xf32>
    %160 = arith.addf %153, %159 : vector<64x32xf32>
    %c17_101 = arith.constant 17 : index
    %c0_102 = arith.constant 0 : index
    %161 = vector.load %arg23[%c17_101, %c0_102] : memref<82x24xf32, #tpu.memory_space<vmem>>, vector<64x24xf32>
    %c7_103 = arith.constant 7 : index
    %c0_104 = arith.constant 0 : index
    %c0_105 = arith.constant 0 : index
    %162 = vector.load %arg10[%c7_103, %c0_104, %c0_105] : memref<9x24x32xf32, #tpu.memory_space<vmem>>, vector<1x24x32xf32>
    %163 = vector.shape_cast %162 : vector<1x24x32xf32> to vector<24x32xf32>
    %cst_106 = arith.constant dense<0.000000e+00> : vector<64x32xf32>
    %164 = tpu.matmul %161, %163, %cst_106 {dimension_numbers = #tpu.dot_dimension_numbers<[1], [0], [0], [1], [0, 0, 1, 1], [], []>} : vector<64x24xf32>, vector<24x32xf32>, vector<64x32xf32> -> vector<64x32xf32>
    %165 = arith.addf %160, %164 : vector<64x32xf32>
    %c18_107 = arith.constant 18 : index
    %c0_108 = arith.constant 0 : index
    %166 = vector.load %arg23[%c18_107, %c0_108] : memref<82x24xf32, #tpu.memory_space<vmem>>, vector<64x24xf32>
    %167 = vector.broadcast %24 : vector<64x1xf32> to vector<64x24xf32>
    %168 = arith.mulf %166, %167 : vector<64x24xf32>
    %c8_109 = arith.constant 8 : index
    %c0_110 = arith.constant 0 : index
    %c0_111 = arith.constant 0 : index
    %169 = vector.load %arg10[%c8_109, %c0_110, %c0_111] : memref<9x24x32xf32, #tpu.memory_space<vmem>>, vector<1x24x32xf32>
    %170 = vector.shape_cast %169 : vector<1x24x32xf32> to vector<24x32xf32>
    %cst_112 = arith.constant dense<0.000000e+00> : vector<64x32xf32>
    %171 = tpu.matmul %168, %170, %cst_112 {dimension_numbers = #tpu.dot_dimension_numbers<[1], [0], [0], [1], [0, 0, 1, 1], [], []>} : vector<64x24xf32>, vector<24x32xf32>, vector<64x32xf32> -> vector<64x32xf32>
    %172 = arith.addf %165, %171 : vector<64x32xf32>
    %c0_113 = arith.constant 0 : index
    %c0_114 = arith.constant 0 : index
    %173 = vector.load %arg11[%c0_113, %c0_114] : memref<1x32xf32, #tpu.memory_space<vmem>>, vector<1x32xf32>
    %174 = vector.broadcast %173 : vector<1x32xf32> to vector<64x32xf32>
    %175 = arith.addf %172, %174 : vector<64x32xf32>
    %cst_115 = arith.constant 0.000000e+00 : f32
    %176 = vector.broadcast %cst_115 : f32 to vector<64x32xf32>
    %177 = arith.maximumf %175, %176 : vector<64x32xf32>
    %c0_116 = arith.constant 0 : index
    %c0_117 = arith.constant 0 : index
    %178 = vector.load %arg12[%c0_116, %c0_117] : memref<32x128xf32, #tpu.memory_space<vmem>>, vector<32x128xf32>
    %cst_118 = arith.constant dense<0.000000e+00> : vector<64x128xf32>
    %179 = tpu.matmul %177, %178, %cst_118 {dimension_numbers = #tpu.dot_dimension_numbers<[1], [0], [0], [1], [0, 0, 1, 1], [], []>} : vector<64x32xf32>, vector<32x128xf32>, vector<64x128xf32> -> vector<64x128xf32>
    %c0_119 = arith.constant 0 : index
    %c0_120 = arith.constant 0 : index
    %180 = vector.load %arg13[%c0_119, %c0_120] : memref<1x128xf32, #tpu.memory_space<vmem>>, vector<1x128xf32>
    %181 = vector.broadcast %180 : vector<1x128xf32> to vector<64x128xf32>
    %182 = arith.addf %179, %181 : vector<64x128xf32>
    %cst_121 = arith.constant 0.000000e+00 : f32
    %183 = vector.broadcast %cst_121 : f32 to vector<64x128xf32>
    %184 = arith.maximumf %182, %183 : vector<64x128xf32>
    %cst_122 = arith.constant 0.000000e+00 : f32
    %185 = vector.broadcast %cst_122 : f32 to vector<82x128xf32>
    %c0_123 = arith.constant 0 : index
    %c0_124 = arith.constant 0 : index
    %186 = vector.load %arg24[%c0_123, %c0_124] : memref<82x128xf32, #tpu.memory_space<vmem>>, vector<82x128xf32>
    tpu.vector_store %arg24[%c0_123, %c0_124], %185 {strides = array<i32>} : memref<82x128xf32, #tpu.memory_space<vmem>>, vector<82x128xf32>,
    %c9_125 = arith.constant 9 : index
    %c0_126 = arith.constant 0 : index
    %187 = vector.load %arg24[%c9_125, %c0_126] : memref<82x128xf32, #tpu.memory_space<vmem>>, vector<64x128xf32>
    tpu.vector_store %arg24[%c9_125, %c0_126], %184 {strides = array<i32>} : memref<82x128xf32, #tpu.memory_space<vmem>>, vector<64x128xf32>,
    %cst_127 = arith.constant 0.000000e+00 : f32
    %188 = vector.broadcast %cst_127 : f32 to vector<64x128xf32>
    %c0_128 = arith.constant 0 : index
    %c0_129 = arith.constant 0 : index
    %189 = vector.load %arg24[%c0_128, %c0_129] : memref<82x128xf32, #tpu.memory_space<vmem>>, vector<64x128xf32>
    %190 = vector.broadcast %20 : vector<64x1xf32> to vector<64x128xf32>
    %191 = arith.mulf %189, %190 : vector<64x128xf32>
    %c0_130 = arith.constant 0 : index
    %c0_131 = arith.constant 0 : index
    %192 = vector.load %arg14[%c0_130, %c0_131] : memref<9x128xf32, #tpu.memory_space<vmem>>, vector<1x128xf32>
    %193 = vector.broadcast %192 : vector<1x128xf32> to vector<64x128xf32>
    %194 = arith.mulf %191, %193 : vector<64x128xf32>
    %195 = arith.addf %188, %194 : vector<64x128xf32>
    %c1_132 = arith.constant 1 : index
    %c0_133 = arith.constant 0 : index
    %196 = vector.load %arg24[%c1_132, %c0_133] : memref<82x128xf32, #tpu.memory_space<vmem>>, vector<64x128xf32>
    %c1_134 = arith.constant 1 : index
    %c0_135 = arith.constant 0 : index
    %197 = vector.load %arg14[%c1_134, %c0_135] : memref<9x128xf32, #tpu.memory_space<vmem>>, vector<1x128xf32>
    %198 = vector.broadcast %197 : vector<1x128xf32> to vector<64x128xf32>
    %199 = arith.mulf %196, %198 : vector<64x128xf32>
    %200 = arith.addf %195, %199 : vector<64x128xf32>
    %c2_136 = arith.constant 2 : index
    %c0_137 = arith.constant 0 : index
    %201 = vector.load %arg24[%c2_136, %c0_137] : memref<82x128xf32, #tpu.memory_space<vmem>>, vector<64x128xf32>
    %202 = vector.broadcast %24 : vector<64x1xf32> to vector<64x128xf32>
    %203 = arith.mulf %201, %202 : vector<64x128xf32>
    %c2_138 = arith.constant 2 : index
    %c0_139 = arith.constant 0 : index
    %204 = vector.load %arg14[%c2_138, %c0_139] : memref<9x128xf32, #tpu.memory_space<vmem>>, vector<1x128xf32>
    %205 = vector.broadcast %204 : vector<1x128xf32> to vector<64x128xf32>
    %206 = arith.mulf %203, %205 : vector<64x128xf32>
    %207 = arith.addf %200, %206 : vector<64x128xf32>
    %c8_140 = arith.constant 8 : index
    %c0_141 = arith.constant 0 : index
    %208 = vector.load %arg24[%c8_140, %c0_141] : memref<82x128xf32, #tpu.memory_space<vmem>>, vector<64x128xf32>
    %209 = vector.broadcast %20 : vector<64x1xf32> to vector<64x128xf32>
    %210 = arith.mulf %208, %209 : vector<64x128xf32>
    %c3_142 = arith.constant 3 : index
    %c0_143 = arith.constant 0 : index
    %211 = vector.load %arg14[%c3_142, %c0_143] : memref<9x128xf32, #tpu.memory_space<vmem>>, vector<1x128xf32>
    %212 = vector.broadcast %211 : vector<1x128xf32> to vector<64x128xf32>
    %213 = arith.mulf %210, %212 : vector<64x128xf32>
    %214 = arith.addf %207, %213 : vector<64x128xf32>
    %c9_144 = arith.constant 9 : index
    %c0_145 = arith.constant 0 : index
    %215 = vector.load %arg24[%c9_144, %c0_145] : memref<82x128xf32, #tpu.memory_space<vmem>>, vector<64x128xf32>
    %c4_146 = arith.constant 4 : index
    %c0_147 = arith.constant 0 : index
    %216 = vector.load %arg14[%c4_146, %c0_147] : memref<9x128xf32, #tpu.memory_space<vmem>>, vector<1x128xf32>
    %217 = vector.broadcast %216 : vector<1x128xf32> to vector<64x128xf32>
    %218 = arith.mulf %215, %217 : vector<64x128xf32>
    %219 = arith.addf %214, %218 : vector<64x128xf32>
    %c10_148 = arith.constant 10 : index
    %c0_149 = arith.constant 0 : index
    %220 = vector.load %arg24[%c10_148, %c0_149] : memref<82x128xf32, #tpu.memory_space<vmem>>, vector<64x128xf32>
    %221 = vector.broadcast %24 : vector<64x1xf32> to vector<64x128xf32>
    %222 = arith.mulf %220, %221 : vector<64x128xf32>
    %c5_150 = arith.constant 5 : index
    %c0_151 = arith.constant 0 : index
    %223 = vector.load %arg14[%c5_150, %c0_151] : memref<9x128xf32, #tpu.memory_space<vmem>>, vector<1x128xf32>
    %224 = vector.broadcast %223 : vector<1x128xf32> to vector<64x128xf32>
    %225 = arith.mulf %222, %224 : vector<64x128xf32>
    %226 = arith.addf %219, %225 : vector<64x128xf32>
    %c16_152 = arith.constant 16 : index
    %c0_153 = arith.constant 0 : index
    %227 = vector.load %arg24[%c16_152, %c0_153] : memref<82x128xf32, #tpu.memory_space<vmem>>, vector<64x128xf32>
    %228 = vector.broadcast %20 : vector<64x1xf32> to vector<64x128xf32>
    %229 = arith.mulf %227, %228 : vector<64x128xf32>
    %c6_154 = arith.constant 6 : index
    %c0_155 = arith.constant 0 : index
    %230 = vector.load %arg14[%c6_154, %c0_155] : memref<9x128xf32, #tpu.memory_space<vmem>>, vector<1x128xf32>
    %231 = vector.broadcast %230 : vector<1x128xf32> to vector<64x128xf32>
    %232 = arith.mulf %229, %231 : vector<64x128xf32>
    %233 = arith.addf %226, %232 : vector<64x128xf32>
    %c17_156 = arith.constant 17 : index
    %c0_157 = arith.constant 0 : index
    %234 = vector.load %arg24[%c17_156, %c0_157] : memref<82x128xf32, #tpu.memory_space<vmem>>, vector<64x128xf32>
    %c7_158 = arith.constant 7 : index
    %c0_159 = arith.constant 0 : index
    %235 = vector.load %arg14[%c7_158, %c0_159] : memref<9x128xf32, #tpu.memory_space<vmem>>, vector<1x128xf32>
    %236 = vector.broadcast %235 : vector<1x128xf32> to vector<64x128xf32>
    %237 = arith.mulf %234, %236 : vector<64x128xf32>
    %238 = arith.addf %233, %237 : vector<64x128xf32>
    %c18_160 = arith.constant 18 : index
    %c0_161 = arith.constant 0 : index
    %239 = vector.load %arg24[%c18_160, %c0_161] : memref<82x128xf32, #tpu.memory_space<vmem>>, vector<64x128xf32>
    %240 = vector.broadcast %24 : vector<64x1xf32> to vector<64x128xf32>
    %241 = arith.mulf %239, %240 : vector<64x128xf32>
    %c8_162 = arith.constant 8 : index
    %c0_163 = arith.constant 0 : index
    %242 = vector.load %arg14[%c8_162, %c0_163] : memref<9x128xf32, #tpu.memory_space<vmem>>, vector<1x128xf32>
    %243 = vector.broadcast %242 : vector<1x128xf32> to vector<64x128xf32>
    %244 = arith.mulf %241, %243 : vector<64x128xf32>
    %245 = arith.addf %238, %244 : vector<64x128xf32>
    %c0_164 = arith.constant 0 : index
    %c0_165 = arith.constant 0 : index
    %246 = vector.load %arg15[%c0_164, %c0_165] : memref<1x128xf32, #tpu.memory_space<vmem>>, vector<1x128xf32>
    %247 = vector.broadcast %246 : vector<1x128xf32> to vector<64x128xf32>
    %248 = arith.addf %245, %247 : vector<64x128xf32>
    %cst_166 = arith.constant 0.000000e+00 : f32
    %249 = vector.broadcast %cst_166 : f32 to vector<64x128xf32>
    %250 = arith.maximumf %248, %249 : vector<64x128xf32>
    %c0_167 = arith.constant 0 : index
    %c0_168 = arith.constant 0 : index
    %251 = vector.load %arg16[%c0_167, %c0_168] : memref<128x128xf32, #tpu.memory_space<vmem>>, vector<128x128xf32>
    %cst_169 = arith.constant dense<0.000000e+00> : vector<64x128xf32>
    %252 = tpu.matmul %250, %251, %cst_169 {dimension_numbers = #tpu.dot_dimension_numbers<[1], [0], [0], [1], [0, 0, 1, 1], [], []>} : vector<64x128xf32>, vector<128x128xf32>, vector<64x128xf32> -> vector<64x128xf32>
    %c0_170 = arith.constant 0 : index
    %c0_171 = arith.constant 0 : index
    %253 = vector.load %arg17[%c0_170, %c0_171] : memref<1x128xf32, #tpu.memory_space<vmem>>, vector<1x128xf32>
    %254 = vector.broadcast %253 : vector<1x128xf32> to vector<64x128xf32>
    %255 = arith.addf %252, %254 : vector<64x128xf32>
    %cst_172 = arith.constant 0.000000e+00 : f32
    %256 = vector.broadcast %cst_172 : f32 to vector<64x128xf32>
    %257 = arith.maximumf %255, %256 : vector<64x128xf32>
    %c0_173 = arith.constant 0 : index
    %c0_174 = arith.constant 0 : index
    %258 = vector.load %arg18[%c0_173, %c0_174] : memref<128x32xf32, #tpu.memory_space<vmem>>, vector<128x32xf32>
    %cst_175 = arith.constant dense<0.000000e+00> : vector<64x32xf32>
    %259 = tpu.matmul %257, %258, %cst_175 {dimension_numbers = #tpu.dot_dimension_numbers<[1], [0], [0], [1], [0, 0, 1, 1], [], []>} : vector<64x128xf32>, vector<128x32xf32>, vector<64x32xf32> -> vector<64x32xf32>
    %c0_176 = arith.constant 0 : index
    %c0_177 = arith.constant 0 : index
    %260 = vector.load %arg19[%c0_176, %c0_177] : memref<1x32xf32, #tpu.memory_space<vmem>>, vector<1x32xf32>
    %261 = vector.broadcast %260 : vector<1x32xf32> to vector<64x32xf32>
    %262 = arith.addf %259, %261 : vector<64x32xf32>
    %263 = arith.addf %262, %177 : vector<64x32xf32>
    %c0_178 = arith.constant 0 : index
    %c0_179 = arith.constant 0 : index
    %264 = vector.load %arg20[%c0_178, %c0_179] : memref<24x32xf32, #tpu.memory_space<vmem>>, vector<24x32xf32>
    %cst_180 = arith.constant dense<0.000000e+00> : vector<64x32xf32>
    %265 = tpu.matmul %25, %264, %cst_180 {dimension_numbers = #tpu.dot_dimension_numbers<[1], [0], [0], [1], [0, 0, 1, 1], [], []>} : vector<64x24xf32>, vector<24x32xf32>, vector<64x32xf32> -> vector<64x32xf32>
    %266 = arith.addf %263, %265 : vector<64x32xf32>
    %c0_181 = arith.constant 0 : index
    %c0_182 = arith.constant 0 : index
    %267 = vector.load %arg21[%c0_181, %c0_182] : memref<64x32xf32, #tpu.memory_space<vmem>>, vector<64x32xf32>
    tpu.vector_store %arg21[%c0_181, %c0_182], %266 {strides = array<i32>} : memref<64x32xf32, #tpu.memory_space<vmem>>, vector<64x32xf32>,
    return
  }
  func.func @transform_0(%arg0: i32) -> (i32, i32) {
    %c0_i32 = arith.constant 0 : i32
    %c0_i32_0 = arith.constant 0 : i32
    return %arg0, %c0_i32 : i32, i32
  }
  func.func @transform_1(%arg0: i32) -> (i32, i32) {
    %c0_i32 = arith.constant 0 : i32
    %c0_i32_0 = arith.constant 0 : i32
    %c0_i32_1 = arith.constant 0 : i32
    return %c0_i32, %c0_i32_0 : i32, i32
  }
  func.func @transform_2(%arg0: i32) -> (i32, i32) {
    %c0_i32 = arith.constant 0 : i32
    %c0_i32_0 = arith.constant 0 : i32
    %c0_i32_1 = arith.constant 0 : i32
    return %c0_i32, %c0_i32_0 : i32, i32
  }
  func.func @transform_3(%arg0: i32) -> (i32, i32) {
    %c0_i32 = arith.constant 0 : i32
    %c0_i32_0 = arith.constant 0 : i32
    %c0_i32_1 = arith.constant 0 : i32
    return %c0_i32, %c0_i32_0 : i32, i32
  }
  func.func @transform_4(%arg0: i32) -> (i32, i32) {
    %c0_i32 = arith.constant 0 : i32
    %c0_i32_0 = arith.constant 0 : i32
    %c0_i32_1 = arith.constant 0 : i32
    return %c0_i32, %c0_i32_0 : i32, i32
  }
  func.func @transform_5(%arg0: i32) -> (i32, i32) {
    %c0_i32 = arith.constant 0 : i32
    %c0_i32_0 = arith.constant 0 : i32
    %c0_i32_1 = arith.constant 0 : i32
    return %c0_i32, %c0_i32_0 : i32, i32
  }
  func.func @transform_6(%arg0: i32) -> (i32, i32) {
    %c0_i32 = arith.constant 0 : i32
    %c0_i32_0 = arith.constant 0 : i32
    %c0_i32_1 = arith.constant 0 : i32
    return %c0_i32, %c0_i32_0 : i32, i32
  }
  func.func @transform_7(%arg0: i32) -> (i32, i32) {
    %c0_i32 = arith.constant 0 : i32
    %c0_i32_0 = arith.constant 0 : i32
    %c0_i32_1 = arith.constant 0 : i32
    return %c0_i32, %c0_i32_0 : i32, i32
  }
  func.func @transform_8(%arg0: i32) -> (i32, i32) {
    %c0_i32 = arith.constant 0 : i32
    %c0_i32_0 = arith.constant 0 : i32
    %c0_i32_1 = arith.constant 0 : i32
    return %c0_i32, %c0_i32_0 : i32, i32
  }
  func.func @transform_9(%arg0: i32) -> (i32, i32, i32) {
    %c0_i32 = arith.constant 0 : i32
    %c0_i32_0 = arith.constant 0 : i32
    %c0_i32_1 = arith.constant 0 : i32
    %c0_i32_2 = arith.constant 0 : i32
    return %c0_i32, %c0_i32_0, %c0_i32_1 : i32, i32, i32
  }
  func.func @transform_10(%arg0: i32) -> (i32, i32) {
    %c0_i32 = arith.constant 0 : i32
    %c0_i32_0 = arith.constant 0 : i32
    %c0_i32_1 = arith.constant 0 : i32
    return %c0_i32, %c0_i32_0 : i32, i32
  }
  func.func @transform_11(%arg0: i32) -> (i32, i32) {
    %c0_i32 = arith.constant 0 : i32
    %c0_i32_0 = arith.constant 0 : i32
    %c0_i32_1 = arith.constant 0 : i32
    return %c0_i32, %c0_i32_0 : i32, i32
  }
  func.func @transform_12(%arg0: i32) -> (i32, i32) {
    %c0_i32 = arith.constant 0 : i32
    %c0_i32_0 = arith.constant 0 : i32
    %c0_i32_1 = arith.constant 0 : i32
    return %c0_i32, %c0_i32_0 : i32, i32
  }
  func.func @transform_13(%arg0: i32) -> (i32, i32) {
    %c0_i32 = arith.constant 0 : i32
    %c0_i32_0 = arith.constant 0 : i32
    %c0_i32_1 = arith.constant 0 : i32
    return %c0_i32, %c0_i32_0 : i32, i32
  }
  func.func @transform_14(%arg0: i32) -> (i32, i32) {
    %c0_i32 = arith.constant 0 : i32
    %c0_i32_0 = arith.constant 0 : i32
    %c0_i32_1 = arith.constant 0 : i32
    return %c0_i32, %c0_i32_0 : i32, i32
  }
  func.func @transform_15(%arg0: i32) -> (i32, i32) {
    %c0_i32 = arith.constant 0 : i32
    %c0_i32_0 = arith.constant 0 : i32
    %c0_i32_1 = arith.constant 0 : i32
    return %c0_i32, %c0_i32_0 : i32, i32
  }
  func.func @transform_16(%arg0: i32) -> (i32, i32) {
    %c0_i32 = arith.constant 0 : i32
    %c0_i32_0 = arith.constant 0 : i32
    %c0_i32_1 = arith.constant 0 : i32
    return %c0_i32, %c0_i32_0 : i32, i32
  }
  func.func @transform_17(%arg0: i32) -> (i32, i32) {
    %c0_i32 = arith.constant 0 : i32
    %c0_i32_0 = arith.constant 0 : i32
    %c0_i32_1 = arith.constant 0 : i32
    return %c0_i32, %c0_i32_0 : i32, i32
  }
  func.func @transform_18(%arg0: i32) -> (i32, i32) {
    %c0_i32 = arith.constant 0 : i32
    %c0_i32_0 = arith.constant 0 : i32
    %c0_i32_1 = arith.constant 0 : i32
    return %c0_i32, %c0_i32_0 : i32, i32
  }
  func.func @transform_19(%arg0: i32) -> (i32, i32) {
    %c0_i32 = arith.constant 0 : i32
    %c0_i32_0 = arith.constant 0 : i32
    %c0_i32_1 = arith.constant 0 : i32
    return %c0_i32, %c0_i32_0 : i32, i32
  }
  func.func @transform_20(%arg0: i32) -> (i32, i32) {
    %c0_i32 = arith.constant 0 : i32
    %c0_i32_0 = arith.constant 0 : i32
    return %arg0, %c0_i32 : i32, i32
  }
}

module attributes {stable_mosaic.version = 11 : i64} {
  func.func @_heads_kernel(%arg0: memref<2x64x32xf32, #tpu.memory_space<vmem>>, %arg1: memref<32x32xf32, #tpu.memory_space<vmem>>, %arg2: memref<1x32xf32, #tpu.memory_space<vmem>>, %arg3: memref<2x32xf32, #tpu.memory_space<vmem>>) attributes {dimension_semantics = [], scalar_prefetch = 0 : i64, scratch_operands = 0 : i64, tpu.core_type = #tpu.core_type<tc>} {
    %c0 = arith.constant 0 : index
    %c0_0 = arith.constant 0 : index
    %c0_1 = arith.constant 0 : index
    %0 = vector.load %arg0[%c0, %c0_0, %c0_1] : memref<2x64x32xf32, #tpu.memory_space<vmem>>, vector<2x64x32xf32>
    %cst = arith.constant dense<0.000000e+00> : vector<2x32xf32>
    %1 = vector.multi_reduction <add>, %0, %cst [1] : vector<2x64x32xf32> to vector<2x32xf32>
    %cst_2 = arith.constant 1.562500e-02 : f32
    %2 = vector.broadcast %cst_2 : f32 to vector<2x32xf32>
    %3 = arith.mulf %1, %2 : vector<2x32xf32>
    %c0_3 = arith.constant 0 : index
    %c0_4 = arith.constant 0 : index
    %4 = vector.load %arg1[%c0_3, %c0_4] : memref<32x32xf32, #tpu.memory_space<vmem>>, vector<32x32xf32>
    %cst_5 = arith.constant dense<0.000000e+00> : vector<2x32xf32>
    %5 = tpu.matmul %3, %4, %cst_5 {dimension_numbers = #tpu.dot_dimension_numbers<[1], [0], [0], [1], [0, 0, 1, 1], [], []>} : vector<2x32xf32>, vector<32x32xf32>, vector<2x32xf32> -> vector<2x32xf32>
    %c0_6 = arith.constant 0 : index
    %c0_7 = arith.constant 0 : index
    %6 = vector.load %arg2[%c0_6, %c0_7] : memref<1x32xf32, #tpu.memory_space<vmem>>, vector<1x32xf32>
    %7 = vector.broadcast %6 : vector<1x32xf32> to vector<2x32xf32>
    %8 = arith.addf %5, %7 : vector<2x32xf32>
    %9 = tpu.iota {dimensions = array<i32: 1>} : vector<2x32xi32>
    %c16_i32 = arith.constant 16 : i32
    %10 = vector.broadcast %c16_i32 : i32 to vector<2x32xi32>
    %11 = arith.cmpi slt, %9, %10 : vector<2x32xi32>
    %cst_8 = arith.constant 0.000000e+00 : f32
    %12 = vector.broadcast %cst_8 : f32 to vector<2x32xf32>
    %13 = arith.maximumf %8, %12 : vector<2x32xf32>
    %14 = arith.select %11, %8, %13 : vector<2x32xi1>, vector<2x32xf32>
    %c0_9 = arith.constant 0 : index
    %c0_10 = arith.constant 0 : index
    %15 = vector.load %arg3[%c0_9, %c0_10] : memref<2x32xf32, #tpu.memory_space<vmem>>, vector<2x32xf32>
    tpu.vector_store %arg3[%c0_9, %c0_10], %14 {strides = array<i32>} : memref<2x32xf32, #tpu.memory_space<vmem>>, vector<2x32xf32>,
    return
  }
}

</mosaic_0001>

<bundles_post_ra>
// kernel: network_forward.5
= control target key start
LH: loop header
LB: loop body
LE: loop exit
PB: predicated region body
PF: predicated region fallthrough
CT: control target
= control target key end

     0   :  { %s402_s12 = smov 0   ;;  %s457_s0 = inlined_call_operand.vmem [shape: f32[128,27], index: 0, kind: input, shape index: {}]   ;;  %s458_s1 = inlined_call_operand.vmem [shape: f32[27,8], index: 1, kind: input, shape index: {}]   ;;  %s459_s2 = inlined_call_operand.vmem [shape: f32[1,8], index: 2, kind: input, shape index: {}]   ;;  %s460_s3 = inlined_call_operand.vmem [shape: f32[128,8], index: 3, kind: output, shape index: {}]  }
   0x1 LB: > { %s333_s13 = sadd.s32 4294967295, %s380_s12   ;;  %p337_p0 = scmp.ge.s32.totalorder %s380_s12, 1  ;;  %s380_s12 = sphi %s402_s12, %s13_s12  }
   0x2   : > { %p138_p1 = scmp.lt.s32.totalorder %s380_s12, 3 }
   0x4   : > { %p139_p2 = pnand %p337_p0, %p138_p1 }
   0x5   : > { %s338_s18 = sshll.u32 (!%p139_p2), %s333_s13, 3 }
   0x6   : > { %142 = sbr.rel (%p139_p2) target bundleno = 165 (0xa5), region = 32  ;;  %p163_p3 = scmp.lt.s32.totalorder (!%p139_p2), %s338_s18, 15 }
   0xb   : > { %v185_v0 = vld [vmem:[%s458_s1 + $0x18] sm:$0x7]  ;;  %vm215_vm0 = vcmask 1042432   ;;  %v184_v1 = vld [vmem:[%s458_s1 + $0x10] sm:$0xff]  ;;  %v183_v2 = vld [vmem:[%s458_s1 + $0x8] sm:$0xff]  ;;  %s462_s18 = smov (!%p163_p3, %s338_s18), 15 }
   0xc   : > { %354 = vmatpush.msk.msra.mxu2 %vm215_vm0, %v185_v0  ;;  %355 = vmatpush.msk.msra.mxu3 %vm215_vm0, %v185_v0  ;;  %v182_v3 = vld [vmem:[%s458_s1] sm:$0xff]  ;;  %s339_s23 = sshll.u32 %s462_s18, 3  ;;  %vm190_vm1 = vcmask 220160   ;;  %vm268_vm2 = vcmask 64512  }
   0xd   : > { %342 = vmatpush.msk.msra.mxu0 %vm215_vm0, %v185_v0  ;;  %353 = vmatpush.msk.msra.mxu1 %vm215_vm0, %v185_v0  ;;  %s166_s26 = scalar_lea.vmem %s457_s0, %s339_s23  ;;  %v373_v12 = vld [vmem:[%s459_s2] ss:$0 sm:$0xff]  ;;  %s172_s4 = scalar_lea.vmem %s460_s3, %s339_s23 }
   0xe   : > { %357 = vmatpush.msra.mxu2 %v184_v1  ;;  %358 = vmatpush.msra.mxu3 %v184_v1  ;;  %v178_v4 = vld [vmem:[%s166_s26 + $0x20] sm:$0xff]  ;;  %v180_v5 = vld [vmem:[%s166_s26 + $0x30] sm:$0xff]  ;;  %v179_v8 = vld [vmem:[%s166_s26 + $0x28] sm:$0xff] }
   0xf   : > { %232 = vmatpush.msra.mxu0 %v184_v1  ;;  %356 = vmatpush.msra.mxu1 %v184_v1  ;;  %v174_v6 = vld [vmem:[%s166_s26] sm:$0xff]  ;;  %v176_v7 = vld [vmem:[%s166_s26 + $0x10] sm:$0xff]  ;;  %v181_v9 = vld [vmem:[%s166_s26 + $0x38] sm:$0xff] }
  0x10   : > { %360 = vmatpush.msra.mxu2 %v183_v2  ;;  %361 = vmatpush.msra.mxu3 %v183_v2  ;;  %v175_v10 = vld [vmem:[%s166_s26 + $0x8] sm:$0xff]  ;;  %v177_v11 = vld [vmem:[%s166_s26 + $0x18] sm:$0xff] }
  0x11   : > { %233 = vmatpush.msra.mxu0 %v183_v2  ;;  %359 = vmatpush.msra.mxu1 %v183_v2 }
  0x12   : > { %363 = vmatpush.msra.mxu2 %v182_v3  ;;  %364 = vmatpush.msra.mxu3 %v182_v3 }
  0x13   : > { %347 = vmatmul.msk.f32.vlgmr.msra.gmra.mxu2 %vm190_vm1, %v178_v4  ;;  %349 = vmatmul.msk.f32.vlgmr.msra.gmra.mxu3 %vm190_vm1, %v180_v5 }
  0x14   : > { %234 = vmatpush.msra.mxu0 %v182_v3  ;;  %362 = vmatpush.msra.mxu1 %v182_v3 }
  0x15   : > { %343 = vmatmul.msk.f32.vlgmr.msra.gmra.mxu0 %vm190_vm1, %v174_v6  ;;  %345 = vmatmul.msk.f32.vlgmr.msra.gmra.mxu1 %vm190_vm1, %v176_v7 }
  0x1b   : > { %348 = vmatmul.msk.f32.gmra.mxu2 %vm190_vm1, %v179_v8  ;;  %350 = vmatmul.msk.f32.gmra.mxu3 %vm190_vm1, %v181_v9 }
  0x1d   : > { %344 = vmatmul.msk.f32.gmra.mxu0 %vm190_vm1, %v175_v10  ;;  %346 = vmatmul.msk.f32.gmra.mxu1 %vm190_vm1, %v177_v11 }
  0x92   : > { %v236_v13 = vpop.f32.mrf.mxu0  ;;  %v242_v14 = vpop.f32.mrf.mxu1 }
  0x93   : > { %v237_v15 = vadd.f32 %v373_v12, %v236_v13  ;;  %v243_v16 = vadd.f32 %v373_v12, %v242_v14 }
  0x95   : > { %v260_v17 = vmax.f32 %v237_v15, 0.0  ;;  %v262_v18 = vmax.f32 %v243_v16, 0.0 }
  0x96   : > { %v248_v19 = vpop.f32.mrf.mxu2  ;;  %v254_v20 = vpop.f32.mrf.mxu3 }
  0x97   : > { %269 = vst.msk [vmem:[%s172_s4] sm:$0xff] %vm268_vm2, %v260_v17  ;;  %v249_v21 = vadd.f32 %v373_v12, %v248_v19  ;;  %v255_v22 = vadd.f32 %v373_v12, %v254_v20 }
  0x98   : > { %271 = vst.msk [vmem:[%s172_s4 + $0x10] sm:$0xff] %vm268_vm2, %v262_v18 }
  0x99   : > { %v264_v23 = vmax.f32 %v249_v21, 0.0  ;;  %v266_v24 = vmax.f32 %v255_v22, 0.0 }
  0x9a   : > { %v239_v25 = vpop.f32.mrf.mxu0  ;;  %v245_v26 = vpop.f32.mrf.mxu1 }
  0x9b   : > { %273 = vst.msk [vmem:[%s172_s4 + $0x20] sm:$0xff] %vm268_vm2, %v264_v23  ;;  %v240_v27 = vadd.f32 %v373_v12, %v239_v25  ;;  %v246_v28 = vadd.f32 %v373_v12, %v245_v26 }
  0x9c   : > { %275 = vst.msk [vmem:[%s172_s4 + $0x30] sm:$0xff] %vm268_vm2, %v266_v24 }
  0x9d   : > { %v261_v29 = vmax.f32 %v240_v27, 0.0  ;;  %v263_v30 = vmax.f32 %v246_v28, 0.0 }
  0x9e   : > { %v251_v31 = vpop.f32.mrf.mxu2  ;;  %v257_v32 = vpop.f32.mrf.mxu3 }
  0x9f   : > { %270 = vst.msk [vmem:[%s172_s4 + $0x8] sm:$0xff] %vm268_vm2, %v261_v29  ;;  %v252_v33 = vadd.f32 %v373_v12, %v251_v31  ;;  %v258_v34 = vadd.f32 %v373_v12, %v257_v32 }
  0xa0   : > { %272 = vst.msk [vmem:[%s172_s4 + $0x18] sm:$0xff] %vm268_vm2, %v263_v30 }
  0xa1   : > { %v265_v35 = vmax.f32 %v252_v33, 0.0  ;;  %v267_v36 = vmax.f32 %v258_v34, 0.0 }
  0xa3   : > { %274 = vst.msk [vmem:[%s172_s4 + $0x28] sm:$0xff] %vm268_vm2, %v265_v35 }
  0xa4   : > { %276 = vst.msk [vmem:[%s172_s4 + $0x38] sm:$0xff] %vm268_vm2, %v267_v36 }
  0xa5 PF: > { %s13_s12 = sadd.s32 1, %s380_s12  }
  0xa6   : > { %p10_p4 = scmp.ge.s32.totalorder %s13_s12, 4  }
  0xa8   :  { %12 = sbr.rel (!%p10_p4) target bundleno = 1 (0x1), region = 62 }

// kernel: network_forward.9
= control target key start
LH: loop header
LB: loop body
LE: loop exit
PB: predicated region body
PF: predicated region fallthrough
CT: control target
= control target key end

     0   :  { %vm30_vm0 = vcmask 261120   ;;  %vm85_vm1 = vcmask 1041409   ;;  %vm114_vm3 = vcmask 254976   ;;  %s225_s1 = inlined_call_operand.vmem [shape: f32[32,32], index: 1, kind: input, shape index: {}]   ;;  %s226_s0 = inlined_call_operand.vmem [shape: f32[2,64,32], index: 0, kind: input, shape index: {}]   ;;  %s227_s2 = inlined_call_operand.vmem [shape: f32[1,32], index: 2, kind: input, shape index: {}]   ;;  %s228_s3 = inlined_call_operand.vmem [shape: f32[2,32], index: 3, kind: output, shape index: {}]  }
   0x1   :  { %v78_v0 = vld [vmem:[%s225_s1 + $0x18] sm:$0xff]  ;;  %v77_v1 = vld [vmem:[%s225_s1 + $0x10] sm:$0xff]  ;;  %v14_v2 = vld [vmem:[%s226_s0] sm:$0xff] }
   0x2   :  { %101 = vmatpush.msra.mxu0 %v78_v0  ;;  %v15_v3 = vld [vmem:[%s226_s0 + $0x8] sm:$0xff]  ;;  %v16_v5 = vld [vmem:[%s226_s0 + $0x10] sm:$0xff]  ;;  %v17_v6 = vld [vmem:[%s226_s0 + $0x18] sm:$0xff]  ;;  %v31_v7 = vsel %vm30_vm0, %v14_v2, 0.0 }
   0x3   :  { %v76_v4 = vld [vmem:[%s225_s1 + $0x8] sm:$0xff]  ;;  %v32_v8 = vsel %vm30_vm0, %v15_v3, 0.0  ;;  %v75_v9 = vld [vmem:[%s225_s1] sm:$0xff]  ;;  %v34_v12 = vsel %vm30_vm0, %v16_v5, 0.0  ;;  %v24_v15 = vld [vmem:[%s226_s0 + $0x50] sm:$0xff]  ;;  %v36_v16 = vsel %vm30_vm0, %v17_v6, 0.0 }
   0x4   :  { %102 = vmatpush.msra.mxu0 %v77_v1  ;;  %v18_v10 = vld [vmem:[%s226_s0 + $0x20] sm:$0xff]  ;;  %v33_v11 = vadd.f32 %v32_v8, %v31_v7  ;;  %v23_v14 = vld [vmem:[%s226_s0 + $0x48] sm:$0xff]  ;;  %v25_v18 = vld [vmem:[%s226_s0 + $0x58] sm:$0xff]  ;;  %v55_v22 = vsel %vm30_vm0, %v24_v15, 0.0  ;;  %v109_v1 = vlaneseq }
   0x5   :  { %v22_v13 = vld [vmem:[%s226_s0 + $0x40] sm:$0xff]  ;;  %v19_v17 = vld [vmem:[%s226_s0 + $0x28] sm:$0xff]  ;;  %v53_v21 = vsel %vm30_vm0, %v23_v14, 0.0  ;;  %v38_v24 = vsel %vm30_vm0, %v18_v10, 0.0  ;;  %v20_v26 = vld [vmem:[%s226_s0 + $0x30] sm:$0xff]  ;;  %v57_v28 = vsel %vm30_vm0, %v25_v18, 0.0 }
   0x6   :  { %103 = vmatpush.msra.mxu0 %v76_v4  ;;  %v35_v19 = vadd.f32 %v34_v12, %v33_v11  ;;  %v52_v20 = vsel %vm30_vm0, %v22_v13, 0.0  ;;  %v26_v23 = vld [vmem:[%s226_s0 + $0x60] sm:$0xff]  ;;  %v27_v29 = vld [vmem:[%s226_s0 + $0x68] sm:$0xff]  ;;  %v40_v30 = vsel %vm30_vm0, %v19_v17, 0.0  ;;  %v21_v32 = vld [vmem:[%s226_s0 + $0x38] sm:$0xff]  ;;  %v42_v36 = vsel %vm30_vm0, %v20_v26, 0.0 }
   0x7   :  { %v54_v25 = vadd.f32 %v53_v21, %v52_v20  ;;  %v59_v34 = vsel %vm30_vm0, %v26_v23, 0.0  ;;  %v28_v35 = vld [vmem:[%s226_s0 + $0x70] sm:$0xff]  ;;  %v61_v39 = vsel %vm30_vm0, %v27_v29, 0.0  ;;  %v29_v40 = vld [vmem:[%s226_s0 + $0x78] sm:$0xff]  ;;  %v44_v41 = vsel %vm30_vm0, %v21_v32, 0.0 }
   0x8   :  { %104 = vmatpush.msra.mxu0 %v75_v9  ;;  %v37_v27 = vadd.f32 %v36_v16, %v35_v19  ;;  %v63_v44 = vsel %vm30_vm0, %v28_v35, 0.0  ;;  %v65_v47 = vsel %vm30_vm0, %v29_v40, 0.0  ;;  %v121_v2 = vld [vmem:[%s227_s2] ss:$0 sm:$0xff]  ;;  %v110_v3 = vand.u32 127, %v109_v1 }
   0x9   :  { %v56_v31 = vadd.f32 %v55_v22, %v54_v25 }
   0xa   :  { %v39_v33 = vadd.f32 %v38_v24, %v37_v27  ;;  %vm111_vm2 = vcmp.lt.s32.totalorder %v110_v3, 16 }
   0xb   :  { %v58_v37 = vadd.f32 %v57_v28, %v56_v31 }
   0xc   :  { %v41_v38 = vadd.f32 %v40_v30, %v39_v33 }
   0xd   :  { %v60_v42 = vadd.f32 %v59_v34, %v58_v37 }
   0xe   :  { %v43_v43 = vadd.f32 %v42_v36, %v41_v38 }
   0xf   :  { %v62_v45 = vadd.f32 %v61_v39, %v60_v42 }
  0x10   :  { %v45_v46 = vadd.f32 %v44_v41, %v43_v43 }
  0x11   :  { %v64_v48 = vadd.f32 %v63_v44, %v62_v45 }
  0x12   :  { %v46_v49 = vrot.slane %v45_v46, 4 }
  0x13   :  { %v66_v50 = vadd.f32 %v65_v47, %v64_v48 }
  0x14   :  { %v47_v51 = vadd.f32 %v46_v49, %v45_v46 }
  0x15   :  { %v67_v52 = vrot.slane %v66_v50, 4 }
  0x16   :  { %v48_v53 = vrot.slane %v47_v51, 2 }
  0x17   :  { %v68_v54 = vadd.f32 %v67_v52, %v66_v50 }
  0x18   :  { %v49_v55 = vadd.f32 %v48_v53, %v47_v51 }
  0x19   :  { %v69_v56 = vrot.slane %v68_v54, 2 }
  0x1a   :  { %v50_v57 = vrot.slane %v49_v55, 1 }
  0x1b   :  { %v70_v58 = vadd.f32 %v69_v56, %v68_v54 }
  0x1c   :  { %v51_v59 = vadd.f32 %v50_v57, %v49_v55 }
  0x1d   :  { %v71_v60 = vrot.slane %v70_v58, 1 }
  0x1e   :  { %v73_v62 = vmul.f32 0.015625, %v51_v59 }
  0x1f   :  { %v72_v61 = vadd.f32 %v71_v60, %v70_v58 }
  0x21   :  { %v74_v63 = vmul.f32 0.015625, %v72_v61 }
  0x23   :  { %v86_v0 = vsel %vm85_vm1, %v74_v63, %v73_v62 }
  0x24   :  { %120 = vmatmul.msk.f32.vlgmr.msra.gmra.mxu0 %vm30_vm0, %v86_v0 }
  0xa1   :  { %v106_v4 = vpop.f32.mrf.mxu0 }
  0xa2   :  { %v107_v5 = vadd.f32 %v121_v2, %v106_v4 }
  0xa4   :  { %v112_v6 = vmax.f32 %v107_v5, 0.0 }
  0xa6   :  { %v113_v7 = vsel %vm111_vm2, %v107_v5, %v112_v6 }
  0xa7   :  { %115 = vst.msk [vmem:[%s228_s3] sm:$0x3] %vm114_vm3, %v113_v7 }

// kernel: network_forward.6
= control target key start
LH: loop header
LB: loop body
LE: loop exit
PB: predicated region body
PF: predicated region fallthrough
CT: control target
= control target key end

     0   :  { %s4294_s0 = inlined_call_operand.vmem [shape: f32[128,8], index: 0, kind: input, shape index: {}]   ;;  %s4295_s1 = inlined_call_operand.vmem [shape: f32[8,32], index: 1, kind: input, shape index: {}]   ;;  %s4296_s2 = inlined_call_operand.vmem [shape: f32[1,32], index: 2, kind: input, shape index: {}]   ;;  %s4297_s3 = inlined_call_operand.vmem [shape: f32[9,32], index: 3, kind: input, shape index: {}]   ;;  %s4298_s4 = inlined_call_operand.vmem [shape: f32[1,32], index: 4, kind: input, shape index: {}]   ;;  %s4299_s5 = inlined_call_operand.vmem [shape: f32[32,32], index: 5, kind: input, shape index: {}]   ;;  %s4300_s6 = inlined_call_operand.vmem [shape: f32[1,32], index: 6, kind: input, shape index: {}]   ;;  %s4301_s7 = inlined_call_operand.vmem [shape: f32[32,8], index: 7, kind: input, shape index: {}]   ;;  %s4302_s8 = inlined_call_operand.vmem [shape: f32[1,8], index: 8, kind: input, shape index: {}]   ;;  %s4303_s9 = inlined_call_operand.vmem [shape: f32[9,8,16], index: 9, kind: input, shape index: {}]   ;;  %s4304_s10 = inlined_call_operand.vmem [shape: f32[1,16], index: 10, kind: input, shape index: {}]   ;;  %s4305_s11 = inlined_call_operand.vmem [shape: f32[16,64], index: 11, kind: input, shape index: {}]   ;;  %s4306_s12 = inlined_call_operand.vmem [shape: f32[1,64], index: 12, kind: input, shape index: {}]   ;;  %s4307_s13 = inlined_call_operand.vmem [shape: f32[9,64], index: 13, kind: input, shape index: {}]   ;;  %s4308_s14 = inlined_call_operand.vmem [shape: f32[1,64], index: 14, kind: input, shape index: {}]   ;;  %s4309_s15 = inlined_call_operand.vmem [shape: f32[64,64], index: 15, kind: input, shape index: {}]   ;;  %s4310_s16 = inlined_call_operand.vmem [shape: f32[1,64], index: 16, kind: input, shape index: {}]   ;;  %s4311_s17 = inlined_call_operand.vmem [shape: f32[64,16], index: 17, kind: input, shape index: {}]   ;;  %s4312_s18 = inlined_call_operand.vmem [shape: f32[1,16], index: 18, kind: input, shape index: {}]   ;;  %s4313_s19 = inlined_call_operand.vmem [shape: f32[8,16], index: 19, kind: input, shape index: {}]   ;;  %s4314_s20 = inlined_call_operand.vmem [shape: f32[128,16], index: 20, kind: output, shape index: {}]  }
   0x1   :  { %4336 = sst [smem:[#allocation14_spill]] %s4294_s0 }
   0x2   :  { %4337 = sst [smem:[#allocation15_spill]] %s4295_s1  ;;  %s3100_s1 = smov 0  }
   0x3   :  { %4338 = sst [smem:[#allocation16_spill]] %s4296_s2 }
   0x4   :  { %4339 = sst [smem:[#allocation17_spill]] %s4297_s3 }
   0x5   :  { %4340 = sst [smem:[#allocation18_spill]] %s4298_s4 }
   0x6 LB: > { %s2779_s22 = sadd.s32 4294967295, %s2992_s1   ;;  %p2783_p0 = scmp.ge.s32.totalorder %s2992_s1, 1  ;;  %s2992_s1 = sphi %s3100_s1, %s30_s1  }
   0x7   : > { %p563_p1 = scmp.lt.s32.totalorder %s2992_s1, 3 }
   0x9   : > { %p564_p2 = pnand %p2783_p0, %p563_p1 }
   0xb   : > { %567 = sbr.rel (%p564_p2) target bundleno = 1214 (0x4be), region = 100 }
  0x10   : > { %s4341_s2 = sld [smem:[#allocation15_spill]]  ;;  %s2784_s25 = sshll.u32 %s2779_s22, 3  ;;  %vm799_vm0 = vcmask 64512   ;;  %v4316_v5 = vmov 0.0   ;;  %vm873_vm1 = vcmask 261120   ;;  %v633_v10 = vlaneseq  ;;  %v1157_v14 = vld [vmem:[%s4299_s5 + $0x18] sm:$0xff] }
  0x11   : > { %p622_p3 = scmp.lt.s32.totalorder %s2784_s25, 15  ;;  %s4342_s28 = sld [smem:[#allocation14_spill]]  ;;  %1316 = vst.msk [vmem:[#allocation3] sm:$0xff] %vm799_vm0, %v4316_v5  ;;  %1198 = vmatpush.msra.mxu1 %v1157_v14  ;;  %v1156_v18 = vld [vmem:[%s4299_s5 + $0x10] sm:$0xff]  ;;  %v1155_v22 = vld [vmem:[%s4299_s5 + $0x8] sm:$0xff]  ;;  %v1154_v24 = vld [vmem:[%s4299_s5] sm:$0xff] }
  0x12   : > { %1317 = vst.msk [vmem:[#allocation3 + $0x8] sm:$0xff] %vm799_vm0, %v4316_v5  ;;  %v3201_v11 = vshrl.u32 %v633_v10, 7  ;;  %s4343_s0 = sld [smem:[#allocation16_spill]]  ;;  %vm884_vm14 = vcmask 254976  }
  0x13   : > { %s4382_s25 = smov (!%p622_p3, %s2784_s25), 15  ;;  %1318 = vst.msk [vmem:[#allocation3 + $0x10] sm:$0xff] %vm799_vm0, %v4316_v5  ;;  %1199 = vmatpush.msra.mxu1 %v1156_v18  ;;  %s4352_s29 = sld [smem:[#allocation18_spill]] }
  0x14   : > { %s2785_s3 = sshll.u32 %s4382_s25, 3  ;;  %1319 = vst.msk [vmem:[#allocation3 + $0x18] sm:$0xff] %vm799_vm0, %v4316_v5  ;;  %v646_v12 = vand.u32 7, %v3201_v11  ;;  %v635_v16 = vadd.s32 8, %v3201_v11  ;;  %v636_v31 = vadd.s32 16, %v3201_v11  ;;  %v637_v47 = vadd.s32 24, %v3201_v11 }
  0x15   : > { %1320 = vst.msk [vmem:[#allocation3 + $0x20] sm:$0xff] %vm799_vm0, %v4316_v5  ;;  %1200 = vmatpush.msra.mxu1 %v1155_v22  ;;  %v638_v63 = vadd.s32 32, %v3201_v11  ;;  %s4259_s27 = scalar_lea.vmem %s4314_s20, %s2785_s3 }
  0x16   : > { %v794_v0 = vld [vmem:[%s4341_s2] sm:$0xff]  ;;  %1321 = vst.msk [vmem:[#allocation3 + $0x28] sm:$0xff] %vm799_vm0, %v4316_v5  ;;  %vm738_vm2 = vcmp.gt.s32.totalorder %v646_v12, 0  ;;  %v653_v23 = vand.u32 7, %v635_v16  ;;  %vm762_vm3 = vcmp.lt.s32.totalorder %v646_v12, 7  ;;  %v660_v40 = vand.u32 7, %v636_v31 }
  0x17   : > { %839 = vmatpush.msra.mxu0 %v794_v0  ;;  %s3119_s4 = scalar_lea.vmem %s4342_s28, %s2785_s3  ;;  %1322 = vst.msk [vmem:[#allocation3 + $0x30] sm:$0xff] %vm799_vm0, %v4316_v5  ;;  %v3218_v19 = vsel %vm738_vm2, 1.0, %v4316_v5  ;;  %1201 = vmatpush.msra.mxu1 %v1154_v24  ;;  %v3243_v34 = vsel %vm762_vm3, 1.0, %v4316_v5  ;;  %v667_v56 = vand.u32 7, %v637_v47 }
  0x18   : > { %v3122_v1 = vld [vmem:[%s3119_s4] sm:$0xff]  ;;  %v3127_v2 = vld [vmem:[%s3119_s4 + $0x8] sm:$0xff]  ;;  %v3132_v3 = vld [vmem:[%s3119_s4 + $0x10] sm:$0xff]  ;;  %1323 = vst.msk [vmem:[#allocation3 + $0x38] sm:$0xff] %vm799_vm0, %v4316_v5  ;;  %vm739_vm4 = vcmp.gt.s32.totalorder %v653_v23, 0  ;;  %vm763_vm5 = vcmp.lt.s32.totalorder %v653_v23, 7 }
  0x19   : > { %2804 = vmatmul.msk.f32.vlgmr.msra.gmra.mxu0 %vm799_vm0, %v3122_v1  ;;  %v3137_v4 = vld [vmem:[%s3119_s4 + $0x18] sm:$0xff]  ;;  %v3150_v6 = vld [vmem:[%s3119_s4 + $0x20] sm:$0xff]  ;;  %1324 = vst.msk [vmem:[#allocation3 + $0x40] sm:$0xff] %vm799_vm0, %v4316_v5  ;;  %v3167_v7 = vld [vmem:[%s3119_s4 + $0x28] sm:$0xff]  ;;  %v3251_v37 = vsel %vm739_vm4, 1.0, %v4316_v5  ;;  %vm740_vm6 = vcmp.gt.s32.totalorder %v660_v40, 0 }
  0x1a   : > { %1325 = vst.msk [vmem:[#allocation3 + $0x48] sm:$0xff] %vm799_vm0, %v4316_v5  ;;  %v3172_v8 = vld [vmem:[%s3119_s4 + $0x30] sm:$0xff]  ;;  %v3177_v9 = vld [vmem:[%s3119_s4 + $0x38] sm:$0xff]  ;;  %v3207_v13 = vld [vmem:[%s4343_s0] ss:$0 sm:$0xff]  ;;  %s4344_s0 = sld [smem:[#allocation17_spill]] }
  0x1b   : > { %875 = vst.msk [vmem:[#allocation2 + $0x8] sm:$0xff] %vm873_vm1, %v4316_v5  ;;  %v3266_v51 = vsel %vm763_vm5, 1.0, %v4316_v5  ;;  %v3276_v58 = vsel %vm740_vm6, 1.0, %v4316_v5  ;;  %vm3285_vm7 = vcmp.lt.s32.totalorder %v660_v40, 7  ;;  %vm3301_vm8 = vcmp.gt.s32.totalorder %v667_v56, 0 }
  0x1c   : > { %876 = vst.msk [vmem:[#allocation2 + $0x10] sm:$0xff] %vm873_vm1, %v4316_v5  ;;  %vm765_vm9 = vcmp.lt.s32.totalorder %v667_v56, 7  ;;  %v3311_v31 = vsel %vm3285_vm7, 1.0, %v4316_v5  ;;  %vm2140_vm5 = vcmask 130048   ;;  %vm2214_vm6 = vcmask 523264  }
  0x1d   : > { %874 = vst.msk [vmem:[#allocation2] sm:$0xff] %vm873_vm1, %v4316_v5  ;;  %v3335_v47 = vsel %vm765_vm9, 1.0, %v4316_v5  ;;  %vm2225_vm7 = vcmask 517120  }
  0x1e   : > { %877 = vst.msk [vmem:[#allocation2 + $0x18] sm:$0xff] %vm873_vm1, %v4316_v5 }
  0x1f   : > { %878 = vst.msk [vmem:[#allocation2 + $0x20] sm:$0xff] %vm873_vm1, %v4316_v5 }
  0x20   : > { %879 = vst.msk [vmem:[#allocation2 + $0x28] sm:$0xff] %vm873_vm1, %v4316_v5  ;;  %v3231_v26 = vld [vmem:[%s4344_s0] ss:$0 sm:$0xff]  ;;  %v3236_v27 = vld [vmem:[%s4344_s0 + $0x1] ss:$0 sm:$0xff] }
  0x21   : > { %2805 = vmatmul.msk.f32.gmra.mxu0 %vm799_vm0, %v3127_v2  ;;  %880 = vst.msk [vmem:[#allocation2 + $0x30] sm:$0xff] %vm873_vm1, %v4316_v5  ;;  %v3248_v36 = vld [vmem:[%s4344_s0 + $0x2] ss:$0 sm:$0xff]  ;;  %v3259_v44 = vld [vmem:[%s4344_s0 + $0x3] ss:$0 sm:$0xff] }
  0x22   : > { %881 = vst.msk [vmem:[#allocation2 + $0x38] sm:$0xff] %vm873_vm1, %v4316_v5  ;;  %v3272_v54 = vld [vmem:[%s4344_s0 + $0x4] ss:$0 sm:$0xff]  ;;  %v3281_v62 = vld [vmem:[%s4344_s0 + $0x5] ss:$0 sm:$0xff] }
  0x23   : > { %882 = vst.msk [vmem:[#allocation2 + $0x40] sm:$0xff] %vm873_vm1, %v4316_v5  ;;  %v3298_v18 = vld [vmem:[%s4344_s0 + $0x6] ss:$0 sm:$0xff] }
  0x24   : > { %883 = vst.msk [vmem:[#allocation2 + $0x48] sm:$0xff] %vm873_vm1, %v4316_v5  ;;  %v894_v20 = vld [vmem:[#allocation2] sm:$0xff] }
  0x25   : > { %v902_v25 = vmul.f32 %v3218_v19, %v894_v20  ;;  %v928_v28 = vld [vmem:[#allocation2 + $0x1] sm:$0xff]  ;;  %4349 = vst [vmem:[#allocation5_spill] sm:$0xff] %v3335_v47 }
  0x26   : > { %v938_v33 = vmul.f32 %v3236_v27, %v928_v28  ;;  %885 = vst.msk [vmem:[#allocation2 + $0x50] sm:$0x3] %vm884_vm14, %v4316_v5 }
  0x27   : > { %v912_v32 = vmul.f32 %v3231_v26, %v902_v25 }
  0x29   : > { %2806 = vmatmul.msk.f32.gmra.mxu0 %vm799_vm0, %v3132_v3  ;;  %v946_v41 = vadd.f32 %v938_v33, %v912_v32  ;;  %v3316_v33 = vld [vmem:[%s4344_s0 + $0x7] ss:$0 sm:$0xff] }
  0x31   : > { %2807 = vmatmul.msk.f32.gmra.mxu0 %vm799_vm0, %v3137_v4 }
  0x39   : > { %2808 = vmatmul.msk.f32.gmra.mxu0 %vm799_vm0, %v3150_v6 }
  0x41   : > { %2809 = vmatmul.msk.f32.gmra.mxu0 %vm799_vm0, %v3167_v7 }
  0x49   : > { %2810 = vmatmul.msk.f32.gmra.mxu0 %vm799_vm0, %v3172_v8 }
  0x51   : > { %2811 = vmatmul.msk.f32.gmra.mxu0 %vm799_vm0, %v3177_v9 }
  0x96   : > { %v841_v15 = vpop.f32.mrf.mxu0 }
  0x97   : > { %v842_v17 = vadd.f32 %v3207_v13, %v841_v15 }
  0x99   : > { %v865_v21 = vmax.f32 %v842_v17, 0.0 }
  0x9b   : > { %886 = vst.msk [vmem:[#allocation2 + $0x9] sm:$0xff] %vm873_vm1, %v865_v21 }
  0x9e   : > { %v844_v29 = vpop.f32.mrf.mxu0 }
  0x9f   : > { %v845_v30 = vadd.f32 %v3207_v13, %v844_v29  ;;  %v674_v29 = vand.u32 7, %v638_v63 }
  0xa1   : > { %v866_v35 = vmax.f32 %v845_v30, 0.0  ;;  %vm3338_vm10 = vcmp.gt.s32.totalorder %v674_v29, 0  ;;  %vm3366_vm11 = vcmp.lt.s32.totalorder %v674_v29, 7  ;;  %v3379_v29 = vadd.s32 48, %v3201_v11 }
  0xa2   : > { %v895_v38 = vld [vmem:[#allocation2 + $0x8] sm:$0xff] }
  0xa3   : > { %v954_v39 = vld [vmem:[#allocation2 + $0x2] sm:$0xff]  ;;  %887 = vst.msk [vmem:[#allocation2 + $0x11] sm:$0xff] %vm873_vm1, %v866_v35  ;;  %v989_v43 = vmul.f32 %v3218_v19, %v895_v38  ;;  %v903_v45 = vmul.f32 %v3251_v37, %v895_v38 }
  0xa4   : > { %v962_v42 = vmul.f32 %v3243_v34, %v954_v39  ;;  %v929_v52 = vld [vmem:[#allocation2 + $0x9] sm:$0xff] }
  0xa5   : > { %v999_v53 = vmul.f32 %v3259_v44, %v989_v43  ;;  %v913_v57 = vmul.f32 %v3231_v26, %v903_v45  ;;  %v939_v10 = vmul.f32 %v3236_v27, %v929_v52  ;;  %v1018_v15 = vmul.f32 %v3272_v54, %v929_v52  ;;  %v3327_v45 = vld [vmem:[%s4344_s0 + $0x8] ss:$0 sm:$0xff] }
  0xa6   : > { %v972_v46 = vmul.f32 %v3248_v36, %v962_v42  ;;  %v847_v48 = vpop.f32.mrf.mxu0 }
  0xa7   : > { %v848_v49 = vadd.f32 %v3207_v13, %v847_v48  ;;  %v947_v22 = vadd.f32 %v939_v10, %v913_v57 }
  0xa8   : > { %v980_v50 = vadd.f32 %v972_v46, %v946_v41  ;;  %v3321_v41 = vadd.s32 40, %v3201_v11  ;;  %v3332_v46 = vsel %vm3301_vm8, 1.0, %v4316_v5 }
  0xa9   : > { %v867_v55 = vmax.f32 %v848_v49, 0.0 }
  0xaa   : > { %v896_v59 = vld [vmem:[#allocation2 + $0x10] sm:$0xff]  ;;  %v1007_v61 = vadd.f32 %v999_v53, %v980_v50  ;;  %v681_v10 = vand.u32 7, %v3321_v41 }
  0xab   : > { %v955_v60 = vld [vmem:[#allocation2 + $0xa] sm:$0xff]  ;;  %888 = vst.msk [vmem:[#allocation2 + $0x19] sm:$0xff] %vm873_vm1, %v867_v55  ;;  %v990_v14 = vmul.f32 %v3251_v37, %v896_v59  ;;  %v1062_v17 = vmul.f32 %v3218_v19, %v896_v59  ;;  %v904_v20 = vmul.f32 %v3276_v58, %v896_v59 }
  0xac   : > { %v963_v12 = vmul.f32 %v3266_v51, %v955_v60  ;;  %v1035_v16 = vmul.f32 %v3243_v34, %v955_v60  ;;  %v1026_v25 = vadd.f32 %v1018_v15, %v1007_v61  ;;  %v930_v32 = vld [vmem:[#allocation2 + $0x11] sm:$0xff]  ;;  %vm3374_vm12 = vcmp.gt.s32.totalorder %v681_v10, 0 }
  0xad   : > { %v1072_v39 = vmul.f32 %v3298_v18, %v1062_v17  ;;  %v1000_v40 = vmul.f32 %v3259_v44, %v990_v14  ;;  %v914_v43 = vmul.f32 %v3231_v26, %v904_v20  ;;  %v940_v48 = vmul.f32 %v3236_v27, %v930_v32  ;;  %v3356_v17 = vld [vmem:[%s4352_s29] ss:$0 sm:$0xff] }
  0xae   : > { %v973_v23 = vmul.f32 %v3248_v36, %v963_v12  ;;  %v850_v24 = vpop.f32.mrf.mxu0  ;;  %v1045_v28 = vmul.f32 %v3281_v62, %v1035_v16  ;;  %v1091_v59 = vmul.f32 %v3316_v33, %v930_v32  ;;  %v1019_v61 = vmul.f32 %v3272_v54, %v930_v32 }
  0xaf   : > { %v851_v30 = vadd.f32 %v3207_v13, %v850_v24  ;;  %v948_v12 = vadd.f32 %v940_v48, %v914_v43  ;;  %v3363_v24 = vsel %vm3338_vm10, 1.0, %v4316_v5  ;;  %v3403_v32 = vsel %vm3374_vm12, 1.0, %v4316_v5 }
  0xb0   : > { %v981_v35 = vadd.f32 %v973_v23, %v947_v22  ;;  %v1053_v38 = vadd.f32 %v1045_v28, %v1026_v25  ;;  %4353 = vst [vmem:[#allocation6_spill] sm:$0xff] %v3363_v24  ;;  %vm3408_vm13 = vcmp.lt.s32.totalorder %v681_v10, 7 }
  0xb1   : > { %v868_v42 = vmax.f32 %v851_v30, 0.0  ;;  %4359 = vst [vmem:[#allocation8_spill] sm:$0xff] %v3403_v32 }
  0xb2   : > { %v956_v49 = vld [vmem:[#allocation2 + $0x12] sm:$0xff]  ;;  %v1080_v50 = vadd.f32 %v1072_v39, %v1053_v38  ;;  %v1008_v53 = vadd.f32 %v1000_v40, %v981_v35 }
  0xb3   : > { %v897_v52 = vld [vmem:[#allocation2 + $0x18] sm:$0xff]  ;;  %889 = vst.msk [vmem:[#allocation2 + $0x21] sm:$0xff] %vm873_vm1, %v868_v42  ;;  %v964_v56 = vmul.f32 %v3311_v31, %v956_v49  ;;  %v1036_v57 = vmul.f32 %v3266_v51, %v956_v49  ;;  %v1108_v60 = vmul.f32 %v3243_v34, %v956_v49 }
  0xb4   : > { %v905_v63 = vmul.f32 %v3332_v46, %v897_v52  ;;  %v991_v0 = vmul.f32 %v3276_v58, %v897_v52  ;;  %v1099_v15 = vadd.f32 %v1091_v59, %v1080_v50  ;;  %v1027_v21 = vadd.f32 %v1019_v61, %v1008_v53  ;;  %v931_v30 = vld [vmem:[#allocation2 + $0x19] sm:$0xff] }
  0xb5   : > { %v974_v14 = vmul.f32 %v3248_v36, %v964_v56  ;;  %v1118_v16 = vmul.f32 %v3327_v45, %v1108_v60  ;;  %v1046_v22 = vmul.f32 %v3281_v62, %v1036_v57  ;;  %v1063_v23 = vmul.f32 %v3251_v37, %v897_v52 }
  0xb6   : > { %v853_v20 = vpop.f32.mrf.mxu0  ;;  %v915_v38 = vmul.f32 %v3231_v26, %v905_v63  ;;  %v1001_v41 = vmul.f32 %v3259_v44, %v991_v0  ;;  %v941_v49 = vmul.f32 %v3236_v27, %v931_v30  ;;  %v1092_v53 = vmul.f32 %v3316_v33, %v931_v30 }
  0xb7   : > { %v854_v25 = vadd.f32 %v3207_v13, %v853_v20  ;;  %v1126_v28 = vadd.f32 %v1118_v16, %v1099_v15  ;;  %v982_v35 = vadd.f32 %v974_v14, %v948_v12  ;;  %v1054_v39 = vadd.f32 %v1046_v22, %v1027_v21 }
  0xb8   : > { %v1073_v40 = vmul.f32 %v3298_v18, %v1063_v23  ;;  %v949_v63 = vadd.f32 %v941_v49, %v915_v38  ;;  %v1020_v0 = vmul.f32 %v3272_v54, %v931_v30  ;;  %v3391_v12 = vsel %vm3366_vm11, 1.0, %v4316_v5 }
  0xb9   : > { %v869_v42 = vmax.f32 %v854_v25, 0.0  ;;  %v1138_v43 = vadd.f32 %v3356_v17, %v1126_v28  ;;  %v1009_v56 = vadd.f32 %v1001_v41, %v982_v35  ;;  %4358 = vst [vmem:[#allocation7_spill] sm:$0xff] %v3391_v12 }
  0xba   : > { %v957_v50 = vld [vmem:[#allocation2 + $0x1a] sm:$0xff]  ;;  %v1081_v52 = vadd.f32 %v1073_v40, %v1054_v39  ;;  %v688_v40 = vand.u32 7, %v3379_v29 }
  0xbb   : > { %v898_v55 = vld [vmem:[#allocation2 + $0x20] sm:$0xff]  ;;  %890 = vst.msk [vmem:[#allocation2 + $0x29] sm:$0xff] %vm873_vm1, %v869_v42  ;;  %v1146_v57 = vmax.f32 %v1138_v43, 0.0  ;;  %v965_v59 = vmul.f32 %v3335_v47, %v957_v50  ;;  %v1037_v60 = vmul.f32 %v3311_v31, %v957_v50  ;;  %v1109_v61 = vmul.f32 %v3266_v51, %v957_v50 }
  0xbc   : > { %v992_v14 = vmul.f32 %v3332_v46, %v898_v55  ;;  %v1100_v16 = vadd.f32 %v1092_v53, %v1081_v52  ;;  %v906_v21 = vmul.f32 %v3363_v24, %v898_v55  ;;  %v932_v23 = vld [vmem:[#allocation2 + $0x21] sm:$0xff]  ;;  %v1028_v25 = vadd.f32 %v1020_v0, %v1009_v56 }
  0xbd   : > { %2812 = vmatmul.msk.f32.vlgmr.msra.gmra.mxu1 %vm873_vm1, %v1146_v57  ;;  %v975_v15 = vmul.f32 %v3248_v36, %v965_v59  ;;  %v1119_v20 = vmul.f32 %v3327_v45, %v1109_v61  ;;  %v1047_v28 = vmul.f32 %v3281_v62, %v1037_v60  ;;  %v1064_v30 = vmul.f32 %v3276_v58, %v898_v55 }
  0xbe   : > { %v856_v22 = vpop.f32.mrf.mxu0  ;;  %v1002_v49 = vmul.f32 %v3259_v44, %v992_v14  ;;  %v916_v52 = vmul.f32 %v3231_v26, %v906_v21  ;;  %v942_v53 = vmul.f32 %v3236_v27, %v932_v23  ;;  %v1093_v29 = vmul.f32 %v3316_v33, %v932_v23 }
  0xbf   : > { %v857_v35 = vadd.f32 %v3207_v13, %v856_v22  ;;  %v1127_v38 = vadd.f32 %v1119_v20, %v1100_v16  ;;  %v983_v39 = vadd.f32 %v975_v15, %v949_v63  ;;  %v1055_v41 = vadd.f32 %v1047_v28, %v1028_v25 }
  0xc0   : > { %v1074_v42 = vmul.f32 %v3298_v18, %v1064_v30  ;;  %v1021_v0 = vmul.f32 %v3272_v54, %v932_v23  ;;  %v3425_v16 = vadd.s32 56, %v3201_v11  ;;  %v950_v20 = vadd.f32 %v942_v53, %v916_v52 }
  0xc1   : > { %v870_v50 = vmax.f32 %v857_v35, 0.0  ;;  %v1139_v48 = vadd.f32 %v3356_v17, %v1127_v38  ;;  %v1010_v59 = vadd.f32 %v1002_v49, %v983_v39  ;;  %vm744_vm15 = vcmp.gt.s32.totalorder %v688_v40, 0 }
  0xc2   : > { %v958_v55 = vld [vmem:[#allocation2 + $0x22] sm:$0xff]  ;;  %v1082_v56 = vadd.f32 %v1074_v42, %v1055_v41  ;;  %v3437_v39 = vsel %vm3408_vm13, 1.0, %v4316_v5  ;;  %vm3454_vm2 = vcmp.lt.s32.totalorder %v688_v40, 7 }
  0xc3   : > { %v899_v57 = vld [vmem:[#allocation2 + $0x28] sm:$0xff]  ;;  %891 = vst.msk [vmem:[#allocation2 + $0x31] sm:$0xff] %vm873_vm1, %v870_v50  ;;  %v1147_v10 = vmax.f32 %v1139_v48, 0.0  ;;  %v966_v60 = vmul.f32 %v3391_v12, %v958_v55  ;;  %v1038_v61 = vmul.f32 %v3335_v47, %v958_v55  ;;  %v1110_v63 = vmul.f32 %v3311_v31, %v958_v55 }
  0xc4   : > { %v907_v14 = vmul.f32 %v3403_v32, %v899_v57  ;;  %v993_v15 = vmul.f32 %v3363_v24, %v899_v57  ;;  %v1101_v22 = vadd.f32 %v1093_v29, %v1082_v56  ;;  %v1029_v30 = vadd.f32 %v1021_v0, %v1010_v59  ;;  %4362 = vst [vmem:[#allocation9_spill] sm:$0xff] %v3437_v39  ;;  %v933_v41 = vld [vmem:[#allocation2 + $0x29] sm:$0xff] }
  0xc5   : > { %2813 = vmatmul.msk.f32.gmra.mxu1 %vm873_vm1, %v1147_v10  ;;  %v976_v21 = vmul.f32 %v3248_v36, %v966_v60  ;;  %v1120_v25 = vmul.f32 %v3327_v45, %v1110_v63  ;;  %v1048_v23 = vmul.f32 %v3281_v62, %v1038_v61  ;;  %v1065_v35 = vmul.f32 %v3332_v46, %v899_v57 }
  0xc6   : > { %v859_v28 = vpop.f32.mrf.mxu0  ;;  %v917_v49 = vmul.f32 %v3231_v26, %v907_v14  ;;  %v1003_v52 = vmul.f32 %v3259_v44, %v993_v15  ;;  %v3444_v56 = vsel %vm744_vm15, 1.0, %v4316_v5  ;;  %v695_v29 = vand.u32 7, %v3425_v16 }
  0xc7   : > { %v860_v11 = vadd.f32 %v3207_v13, %v859_v28  ;;  %v1128_v38 = vadd.f32 %v1120_v25, %v1101_v22  ;;  %v984_v42 = vadd.f32 %v976_v21, %v950_v20  ;;  %v1056_v50 = vadd.f32 %v1048_v23, %v1029_v30  ;;  %4363 = vst [vmem:[#allocation10_spill] sm:$0xff] %v3444_v56 }
  0xc8   : > { %v1075_v48 = vmul.f32 %v3298_v18, %v1065_v35  ;;  %v943_v43 = vmul.f32 %v3236_v27, %v933_v41  ;;  %v1094_v10 = vmul.f32 %v3316_v33, %v933_v41  ;;  %v1022_v16 = vmul.f32 %v3272_v54, %v933_v41 }
  0xc9   : > { %v871_v53 = vmax.f32 %v860_v11, 0.0  ;;  %v1140_v55 = vadd.f32 %v3356_v17, %v1128_v38  ;;  %v1011_v61 = vadd.f32 %v1003_v52, %v984_v42  ;;  %vm745_vm3 = vcmp.gt.s32.totalorder %v695_v29, 0 }
  0xca   : > { %v959_v57 = vld [vmem:[#allocation2 + $0x2a] sm:$0xff]  ;;  %v1083_v59 = vadd.f32 %v1075_v48, %v1056_v50  ;;  %v951_v20 = vadd.f32 %v943_v43, %v917_v49  ;;  %v3469_v48 = vsel %vm3454_vm2, 1.0, %v4316_v5  ;;  %vm3485_vm4 = vcmp.lt.s32.totalorder %v695_v29, 7 }
  0xcb   : > { %v900_v60 = vld [vmem:[#allocation2 + $0x30] sm:$0xff]  ;;  %892 = vst.msk [vmem:[#allocation2 + $0x39] sm:$0xff] %vm873_vm1, %v871_v53  ;;  %v1148_v63 = vmax.f32 %v1140_v55, 0.0  ;;  %v967_v0 = vmul.f32 %v3437_v39, %v959_v57  ;;  %v1039_v14 = vmul.f32 %v3391_v12, %v959_v57  ;;  %v1111_v15 = vmul.f32 %v3335_v47, %v959_v57 }
  0xcc   : > { %v994_v22 = vmul.f32 %v3403_v32, %v900_v60  ;;  %v1102_v28 = vadd.f32 %v1094_v10, %v1083_v59  ;;  %v908_v23 = vmul.f32 %v3444_v56, %v900_v60  ;;  %v1030_v11 = vadd.f32 %v1022_v16, %v1011_v61  ;;  %v934_v49 = vld [vmem:[#allocation2 + $0x31] sm:$0xff]  ;;  %4366 = vst [vmem:[#allocation11_spill] sm:$0xff] %v3469_v48 }
  0xcd   : > { %2814 = vmatmul.msk.f32.gmra.mxu1 %vm873_vm1, %v1148_v63  ;;  %v977_v25 = vmul.f32 %v3248_v36, %v967_v0  ;;  %v1121_v30 = vmul.f32 %v3327_v45, %v1111_v15  ;;  %v1049_v38 = vmul.f32 %v3281_v62, %v1039_v14  ;;  %v1066_v40 = vmul.f32 %v3363_v24, %v900_v60 }
  0xce   : > { %v862_v35 = vpop.f32.mrf.mxu0  ;;  %v1004_v55 = vmul.f32 %v3259_v44, %v994_v22  ;;  %v918_v59 = vmul.f32 %v3231_v26, %v908_v23  ;;  %v944_v10 = vmul.f32 %v3236_v27, %v934_v49  ;;  %v1095_v63 = vmul.f32 %v3316_v33, %v934_v49 }
  0xcf   : > { %v863_v41 = vadd.f32 %v3207_v13, %v862_v35  ;;  %v1129_v42 = vadd.f32 %v1121_v30, %v1102_v28  ;;  %v985_v50 = vadd.f32 %v977_v25, %v951_v20  ;;  %v1057_v52 = vadd.f32 %v1049_v38, %v1030_v11 }
  0xd0   : > { %v1076_v53 = vmul.f32 %v3298_v18, %v1066_v40  ;;  %v3476_v13 = vsel %vm745_vm3, 1.0, %v4316_v5  ;;  %v1023_v22 = vmul.f32 %v3272_v54, %v934_v49  ;;  %v952_v23 = vadd.f32 %v944_v10, %v918_v59  ;;  %v1238_v40 = vld [vmem:[%s4301_s7 + $0x18] sm:$0xff] }
  0xd1   : > { %v872_v43 = vmax.f32 %v863_v41, 0.0  ;;  %v1141_v57 = vadd.f32 %v3356_v17, %v1129_v42  ;;  %4367 = vst [vmem:[#allocation12_spill] sm:$0xff] %v3476_v13  ;;  %v1012_v14 = vadd.f32 %v1004_v55, %v985_v50  ;;  %1279 = vmatpush.msra.mxu2 %v1238_v40  ;;  %v3503_v55 = vsel %vm3485_vm4, 1.0, %v4316_v5 }
  0xd2   : > { %v960_v60 = vld [vmem:[#allocation2 + $0x32] sm:$0xff]  ;;  %v1084_v61 = vadd.f32 %v1076_v53, %v1057_v52  ;;  %4370 = vst [vmem:[#allocation13_spill] sm:$0xff] %v3503_v55 }
  0xd3   : > { %v901_v0 = vld [vmem:[#allocation2 + $0x38] sm:$0xff]  ;;  %893 = vst.msk [vmem:[#allocation2 + $0x41] sm:$0xff] %vm873_vm1, %v872_v43  ;;  %v1149_v15 = vmax.f32 %v1141_v57, 0.0  ;;  %v968_v20 = vmul.f32 %v3469_v48, %v960_v60  ;;  %v1040_v16 = vmul.f32 %v3437_v39, %v960_v60  ;;  %v1112_v21 = vmul.f32 %v3391_v12, %v960_v60 }
  0xd4   : > { %v909_v28 = vmul.f32 %v3476_v13, %v901_v0  ;;  %v995_v30 = vmul.f32 %v3444_v56, %v901_v0  ;;  %v1103_v11 = vadd.f32 %v1095_v63, %v1084_v61  ;;  %v1031_v29 = vadd.f32 %v1023_v22, %v1012_v14  ;;  %v935_v50 = vld [vmem:[#allocation2 + $0x39] sm:$0xff] }
  0xd5   : > { %2815 = vmatmul.msk.f32.gmra.mxu1 %vm873_vm1, %v1149_v15  ;;  %v978_v35 = vmul.f32 %v3248_v36, %v968_v20  ;;  %v1122_v38 = vmul.f32 %v3327_v45, %v1112_v21  ;;  %v1050_v41 = vmul.f32 %v3281_v62, %v1040_v16  ;;  %v1067_v42 = vmul.f32 %v3403_v32, %v901_v0 }
  0xd6   : > { %v1005_v53 = vmul.f32 %v3259_v44, %v995_v30  ;;  %v919_v43 = vmul.f32 %v3231_v26, %v909_v28  ;;  %v945_v61 = vmul.f32 %v3236_v27, %v935_v50  ;;  %v1024_v0 = vmul.f32 %v3272_v54, %v935_v50 }
  0xd7   : > { %v1130_v49 = vadd.f32 %v1122_v38, %v1103_v11  ;;  %v986_v52 = vadd.f32 %v978_v35, %v952_v23  ;;  %v1058_v57 = vadd.f32 %v1050_v41, %v1031_v29  ;;  %v1077_v59 = vmul.f32 %v3298_v18, %v1067_v42 }
  0xd8   : > { %v1096_v15 = vmul.f32 %v3316_v33, %v935_v50  ;;  %v953_v28 = vadd.f32 %v945_v61, %v919_v43 }
  0xd9   : > { %v1142_v10 = vadd.f32 %v3356_v17, %v1130_v49  ;;  %v1013_v60 = vadd.f32 %v1005_v53, %v986_v52  ;;  %v1085_v14 = vadd.f32 %v1077_v59, %v1058_v57  ;;  %v1107_v57 = vld [vmem:[#allocation2 + $0x4a] sm:$0xff] }
  0xda   : > { %v961_v63 = vld [vmem:[#allocation2 + $0x3a] sm:$0xff]  ;;  %v1034_v25 = vld [vmem:[#allocation2 + $0x42] sm:$0xff] }
  0xdb   : > { %v988_v20 = vld [vmem:[#allocation2 + $0x40] sm:$0xff]  ;;  %v1150_v16 = vmax.f32 %v1142_v10, 0.0  ;;  %v969_v21 = vmul.f32 %v3503_v55, %v961_v63  ;;  %v1041_v26 = vmul.f32 %v3469_v48, %v961_v63  ;;  %v1113_v22 = vmul.f32 %v3437_v39, %v961_v63  ;;  %v1061_v42 = vld [vmem:[#allocation2 + $0x48] sm:$0xff] }
  0xdc   : > { %v1104_v30 = vadd.f32 %v1096_v15, %v1085_v14  ;;  %v996_v23 = vmul.f32 %v3476_v13, %v988_v20  ;;  %v1032_v11 = vadd.f32 %v1024_v0, %v1013_v60  ;;  %v1015_v40 = vld [vmem:[#allocation2 + $0x41] sm:$0xff]  ;;  %v1042_v29 = vmul.f32 %v3503_v55, %v1034_v25  ;;  %v1088_v14 = vld [vmem:[#allocation2 + $0x49] sm:$0xff] }
  0xdd   : > { %2816 = vmatmul.msk.f32.gmra.mxu1 %vm873_vm1, %v1150_v16  ;;  %v979_v27 = vmul.f32 %v3248_v36, %v969_v21  ;;  %v1123_v35 = vmul.f32 %v3327_v45, %v1113_v22  ;;  %v1051_v38 = vmul.f32 %v3281_v62, %v1041_v26  ;;  %v1068_v41 = vmul.f32 %v3444_v56, %v988_v20 }
  0xde   : > { %v1006_v53 = vmul.f32 %v3259_v44, %v996_v23  ;;  %v1114_v36 = vmul.f32 %v3469_v48, %v1034_v25  ;;  %v1025_v10 = vmul.f32 %v3272_v54, %v1015_v40  ;;  %v1069_v61 = vmul.f32 %v3476_v13, %v1061_v42 }
  0xdf   : > { %v1131_v49 = vadd.f32 %v1123_v35, %v1104_v30  ;;  %v1059_v50 = vadd.f32 %v1051_v38, %v1032_v11  ;;  %v987_v52 = vadd.f32 %v979_v27, %v953_v28  ;;  %v1078_v43 = vmul.f32 %v3298_v18, %v1068_v41 }
  0xe0   : > { %v1097_v0 = vmul.f32 %v3316_v33, %v1015_v40  ;;  %v1052_v44 = vmul.f32 %v3281_v62, %v1042_v29  ;;  %v1115_v16 = vmul.f32 %v3503_v55, %v1107_v57  ;;  %v1124_v26 = vmul.f32 %v3327_v45, %v1114_v36 }
  0xe1   : > { %v1143_v59 = vadd.f32 %v3356_v17, %v1131_v49  ;;  %v1014_v60 = vadd.f32 %v1006_v53, %v987_v52  ;;  %v1086_v63 = vadd.f32 %v1078_v43, %v1059_v50  ;;  %v1079_v54 = vmul.f32 %v3298_v18, %v1069_v61  ;;  %v1237_v18 = vld [vmem:[%s4301_s7 + $0x10] sm:$0xff] }
  0xe2   : > { %v1098_v25 = vmul.f32 %v3316_v33, %v1088_v14  ;;  %v1125_v23 = vmul.f32 %v3327_v45, %v1115_v16  ;;  %v1236_v33 = vld [vmem:[%s4301_s7 + $0x8] sm:$0xff]  ;;  %1280 = vmatpush.msra.mxu2 %v1237_v18  ;;  %v1235_v45 = vld [vmem:[%s4301_s7] sm:$0xff] }
  0xe3   : > { %v1151_v15 = vmax.f32 %v1143_v59, 0.0  ;;  %v1033_v20 = vadd.f32 %v1025_v10, %v1014_v60  ;;  %v1105_v21 = vadd.f32 %v1097_v0, %v1086_v63 }
  0xe4   : > { %1281 = vmatpush.msra.mxu2 %v1236_v33 }
  0xe5   : > { %2817 = vmatmul.msk.f32.gmra.mxu1 %vm873_vm1, %v1151_v15  ;;  %v1060_v22 = vadd.f32 %v1052_v44, %v1033_v20  ;;  %v1132_v28 = vadd.f32 %v1124_v26, %v1105_v21 }
  0xe6   : > { %1282 = vmatpush.msra.mxu2 %v1235_v45 }
  0xe7   : > { %v1087_v30 = vadd.f32 %v1079_v54, %v1060_v22  ;;  %v1144_v27 = vadd.f32 %v3356_v17, %v1132_v28  ;;  %v2828_v54 = vld [vmem:[%s4303_s9 + $0x8] sm:$0xff]  ;;  %v2845_v28 = vld [vmem:[%s4303_s9 + $0x10] sm:$0xff] }
  0xe8   : > { %1402 = vmatpush.msra.mxu3 %v2828_v54 }
  0xe9   : > { %v1106_v35 = vadd.f32 %v1098_v25, %v1087_v30  ;;  %v1152_v62 = vmax.f32 %v1144_v27, 0.0  ;;  %v1353_v25 = vld [vmem:[#allocation3 + $0x1] sm:$0xff] }
  0xea   : > { %v1352_v30 = vld [vmem:[%s4303_s9] sm:$0xff]  ;;  %2829 = vmatmul.msk.f32.vlgmr.msra.gmra.mxu3 %vm799_vm0, %v1353_v25 }
  0xeb   : > { %v1133_v11 = vadd.f32 %v1125_v23, %v1106_v35  ;;  %v1336_v23 = vld [vmem:[#allocation3] sm:$0xff]  ;;  %1467 = vmatpush.msrb.mxu0 %v1352_v30  ;;  %1550 = vmatpush.msrb.mxu3 %v2845_v28  ;;  %v2863_v35 = vld [vmem:[%s4303_s9 + $0x20] sm:$0xff] }
  0xec   : > { %v1344_v27 = vmul.f32 %v3218_v19, %v1336_v23  ;;  %1724 = vmatpush.msrb.mxu2 %v2863_v35 }
  0xed   : > { %2818 = vmatmul.msk.f32.gmra.mxu1 %vm873_vm1, %v1152_v62  ;;  %v1145_v38 = vadd.f32 %v3356_v17, %v1133_v11  ;;  %v2962_v17 = vld [vmem:[%s4300_s6] ss:$0 sm:$0xff]  ;;  %v2854_v62 = vld [vmem:[%s4303_s9 + $0x18] sm:$0xff] }
  0xee   : > { %2837 = vmatmul.msk.f32.vlgmr.msrb.gmra.mxu0 %vm799_vm0, %v1344_v27  ;;  %1641 = vmatpush.msrb.mxu1 %v2854_v62  ;;  %v3580_v11 = vld [vmem:[%s4302_s8] ss:$0 sm:$0xff] }
  0xef   : > { %v1153_v40 = vmax.f32 %v1145_v38, 0.0 }
  0xf5   : > { %2819 = vmatmul.msk.f32.gmra.mxu1 %vm873_vm1, %v1153_v40 }
 0x13a   : > { %v1203_v29 = vpop.f32.mrf.mxu1 }
 0x13b   : > { %v1204_v41 = vadd.f32 %v2962_v17, %v1203_v29 }
 0x13d   : > { %v1227_v42 = vmax.f32 %v1204_v41, 0.0 }
 0x13f   : > { %2820 = vmatmul.msk.f32.vlgmr.msra.gmra.mxu2 %vm873_vm1, %v1227_v42 }
 0x142   : > { %v1206_v49 = vpop.f32.mrf.mxu1 }
 0x143   : > { %v1207_v50 = vadd.f32 %v2962_v17, %v1206_v49 }
 0x145   : > { %v1228_v52 = vmax.f32 %v1207_v50, 0.0 }
 0x147   : > { %2821 = vmatmul.msk.f32.gmra.mxu2 %vm873_vm1, %v1228_v52 }
 0x14a   : > { %v1209_v53 = vpop.f32.mrf.mxu1 }
 0x14b   : > { %v1210_v43 = vadd.f32 %v2962_v17, %v1209_v53 }
 0x14d   : > { %v1229_v36 = vmax.f32 %v1210_v43, 0.0 }
 0x14f   : > { %2822 = vmatmul.msk.f32.gmra.mxu2 %vm873_vm1, %v1229_v36 }
 0x152   : > { %v1212_v57 = vpop.f32.mrf.mxu1 }
 0x153   : > { %v1213_v59 = vadd.f32 %v2962_v17, %v1212_v57 }
 0x155   : > { %v1230_v10 = vmax.f32 %v1213_v59, 0.0 }
 0x157   : > { %2823 = vmatmul.msk.f32.gmra.mxu2 %vm873_vm1, %v1230_v10 }
 0x15a   : > { %v1215_v60 = vpop.f32.mrf.mxu1 }
 0x15b   : > { %v1216_v61 = vadd.f32 %v2962_v17, %v1215_v60 }
 0x15d   : > { %v1231_v63 = vmax.f32 %v1216_v61, 0.0 }
 0x15f   : > { %2824 = vmatmul.msk.f32.gmra.mxu2 %vm873_vm1, %v1231_v63 }
 0x162   : > { %v1218_v0 = vpop.f32.mrf.mxu1 }
 0x163   : > { %v1219_v14 = vadd.f32 %v2962_v17, %v1218_v0 }
 0x165   : > { %v1232_v15 = vmax.f32 %v1219_v14, 0.0 }
 0x167   : > { %2825 = vmatmul.msk.f32.gmra.mxu2 %vm873_vm1, %v1232_v15 }
 0x16a   : > { %v1221_v20 = vpop.f32.mrf.mxu1 }
 0x16b   : > { %v1222_v44 = vadd.f32 %v2962_v17, %v1221_v20 }
 0x16d   : > { %v1233_v16 = vmax.f32 %v1222_v44, 0.0 }
 0x16f   : > { %2826 = vmatmul.msk.f32.gmra.mxu2 %vm873_vm1, %v1233_v16 }
 0x172   : > { %v1224_v21 = vpop.f32.mrf.mxu1 }
 0x173   : > { %v1225_v26 = vadd.f32 %v2962_v17, %v1224_v21  ;;  %v2872_v21 = vld [vmem:[%s4303_s9 + $0x28] sm:$0xff] }
 0x174   : > { %1815 = vmatpush.msra.mxu0 %v2872_v21 }
 0x175   : > { %v1234_v22 = vmax.f32 %v1225_v26, 0.0  ;;  %v2899_v26 = vld [vmem:[%s4303_s9 + $0x40] sm:$0xff] }
 0x176   : > { %2080 = vmatpush.msra.mxu2 %v2899_v26 }
 0x177   : > { %2827 = vmatmul.msk.f32.gmra.mxu2 %vm873_vm1, %v1234_v22  ;;  %vm1326_vm1 = vcmask 58368  }
 0x178   : > { %1327 = vst.msk [vmem:[#allocation3 + $0x50] sm:$0x3] %vm1326_vm1, %v4316_v5 }
 0x1c2   : > { %v1284_v38 = vpop.f32.mrf.mxu2 }
 0x1c3   : > { %v1285_v40 = vadd.f32 %v3580_v11, %v1284_v38 }
 0x1c5   : > { %v1308_v18 = vadd.f32 %v1285_v40, %v3122_v1 }
 0x1c7   : > { %1328 = vst.msk [vmem:[#allocation3 + $0x9] sm:$0xff] %vm799_vm0, %v1308_v18 }
 0x1ca   : > { %v1287_v33 = vpop.f32.mrf.mxu2 }
 0x1cb   : > { %v1288_v45 = vadd.f32 %v3580_v11, %v1287_v33 }
 0x1cd   : > { %v1309_v17 = vadd.f32 %v1288_v45, %v3127_v2 }
 0x1ce   : > { %v1354_v29 = vld [vmem:[#allocation3 + $0x9] sm:$0xff] }
 0x1cf   : > { %v1337_v41 = vld [vmem:[#allocation3 + $0x8] sm:$0xff]  ;;  %1329 = vst.msk [vmem:[#allocation3 + $0x11] sm:$0xff] %vm799_vm0, %v1309_v17  ;;  %2830 = vmatmul.msk.f32.gmra.mxu3 %vm799_vm0, %v1354_v29  ;;  %2864 = vmatmul.msk.f32.vlgmr.msrb.gmra.mxu2 %vm799_vm0, %v1354_v29 }
 0x1d0   : > { %v1345_v42 = vmul.f32 %v3251_v37, %v1337_v41  ;;  %v1592_v49 = vmul.f32 %v3218_v19, %v1337_v41 }
 0x1d2   : > { %2838 = vmatmul.msk.f32.gmra.mxu0 %vm799_vm0, %v1345_v42  ;;  %2855 = vmatmul.msk.f32.vlgmr.msrb.gmra.mxu1 %vm799_vm0, %v1592_v49  ;;  %v1290_v1 = vpop.f32.mrf.mxu2 }
 0x1d3   : > { %v1291_v50 = vadd.f32 %v3580_v11, %v1290_v1 }
 0x1d5   : > { %v1310_v2 = vadd.f32 %v1291_v50, %v3132_v3 }
 0x1d6   : > { %v3596_v52 = vld [vmem:[#allocation3 + $0x11] sm:$0xff] }
 0x1d7   : > { %v3598_v53 = vld [vmem:[#allocation3 + $0x10] sm:$0xff]  ;;  %1330 = vst.msk [vmem:[#allocation3 + $0x19] sm:$0xff] %vm799_vm0, %v1310_v2  ;;  %2831 = vmatmul.msk.f32.gmra.mxu3 %vm799_vm0, %v3596_v52  ;;  %2865 = vmatmul.msk.f32.gmra.mxu2 %vm799_vm0, %v3596_v52 }
 0x1d8   : > { %v1346_v43 = vmul.f32 %v3276_v58, %v3598_v53  ;;  %v1593_v36 = vmul.f32 %v3251_v37, %v3598_v53  ;;  %v1758_v1 = vld [vmem:[#allocation3 + $0xa] sm:$0xff] }
 0x1da   : > { %2839 = vmatmul.msk.f32.gmra.mxu0 %vm799_vm0, %v1346_v43  ;;  %2856 = vmatmul.msk.f32.gmra.mxu1 %vm799_vm0, %v1593_v36  ;;  %v1293_v3 = vpop.f32.mrf.mxu2 }
 0x1db   : > { %v1294_v57 = vadd.f32 %v3580_v11, %v1293_v3  ;;  %v1766_v3 = vmul.f32 %v3243_v34, %v1758_v1 }
 0x1dd   : > { %v1311_v59 = vadd.f32 %v1294_v57, %v3137_v4 }
 0x1de   : > { %v3613_v10 = vld [vmem:[#allocation3 + $0x19] sm:$0xff] }
 0x1df   : > { %v3615_v60 = vld [vmem:[#allocation3 + $0x18] sm:$0xff]  ;;  %1331 = vst.msk [vmem:[#allocation3 + $0x21] sm:$0xff] %vm799_vm0, %v1311_v59  ;;  %2832 = vmatmul.msk.f32.gmra.mxu3 %vm799_vm0, %v3613_v10  ;;  %2866 = vmatmul.msk.f32.gmra.mxu2 %vm799_vm0, %v3613_v10  ;;  %v1502_v59 = vmul.f32 %v3266_v51, %v1758_v1  ;;  %v2030_v1 = vld [vmem:[#allocation3 + $0x4a] sm:$0xff] }
 0x1e0   : > { %v1347_v61 = vmul.f32 %v3332_v46, %v3615_v60  ;;  %v1594_v63 = vmul.f32 %v3276_v58, %v3615_v60  ;;  %v2023_v57 = vld [vmem:[#allocation3 + $0x12] sm:$0xff] }
 0x1e2   : > { %2840 = vmatmul.msk.f32.gmra.mxu0 %vm799_vm0, %v1347_v61  ;;  %2857 = vmatmul.msk.f32.gmra.mxu1 %vm799_vm0, %v1594_v63  ;;  %v1296_v4 = vpop.f32.mrf.mxu2  ;;  %v2031_v61 = vmul.f32 %v3243_v34, %v2023_v57  ;;  %v1767_v63 = vmul.f32 %v3266_v51, %v2023_v57 }
 0x1e3   : > { %v1297_v0 = vadd.f32 %v3580_v11, %v1296_v4 }
 0x1e5   : > { %v1312_v14 = vadd.f32 %v1297_v0, %v3150_v6  ;;  %v2881_v6 = vld [vmem:[%s4303_s9 + $0x30] sm:$0xff]  ;;  %v1503_v0 = vmul.f32 %v3311_v31, %v2023_v57 }
 0x1e6   : > { %v3630_v15 = vld [vmem:[#allocation3 + $0x21] sm:$0xff]  ;;  %1906 = vmatpush.msra.mxu3 %v2881_v6 }
 0x1e7   : > { %v3632_v20 = vld [vmem:[#allocation3 + $0x20] sm:$0xff]  ;;  %1332 = vst.msk [vmem:[#allocation3 + $0x29] sm:$0xff] %vm799_vm0, %v1312_v14  ;;  %2833 = vmatmul.msk.f32.gmra.mxu3 %vm799_vm0, %v3630_v15  ;;  %2867 = vmatmul.msk.f32.gmra.mxu2 %vm799_vm0, %v3630_v15 }
 0x1e8   : > { %v1348_v44 = vmul.f32 %v3363_v24, %v3632_v20  ;;  %v1595_v16 = vmul.f32 %v3332_v46, %v3632_v20  ;;  %v2024_v4 = vld [vmem:[#allocation3 + $0x1a] sm:$0xff] }
 0x1e9   : > { %v2032_v14 = vmul.f32 %v3266_v51, %v2024_v4  ;;  %v1504_v6 = vmul.f32 %v3335_v47, %v2024_v4 }
 0x1ea   : > { %2841 = vmatmul.msk.f32.gmra.mxu0 %vm799_vm0, %v1348_v44  ;;  %2858 = vmatmul.msk.f32.gmra.mxu1 %vm799_vm0, %v1595_v16  ;;  %v1299_v22 = vpop.f32.mrf.mxu2  ;;  %v1768_v44 = vmul.f32 %v3311_v31, %v2024_v4 }
 0x1eb   : > { %v1300_v54 = vadd.f32 %v3580_v11, %v1299_v22 }
 0x1ed   : > { %v1313_v25 = vadd.f32 %v1300_v54, %v3167_v7  ;;  %v2890_v7 = vld [vmem:[%s4303_s9 + $0x38] sm:$0xff] }
 0x1ee   : > { %v3656_v28 = vld [vmem:[#allocation3 + $0x29] sm:$0xff]  ;;  %1989 = vmatpush.msra.mxu1 %v2890_v7 }
 0x1ef   : > { %v3658_v30 = vld [vmem:[#allocation3 + $0x28] sm:$0xff]  ;;  %1333 = vst.msk [vmem:[#allocation3 + $0x31] sm:$0xff] %vm799_vm0, %v1313_v25  ;;  %2834 = vmatmul.msk.f32.gmra.mxu3 %vm799_vm0, %v3656_v28  ;;  %2868 = vmatmul.msk.f32.gmra.mxu2 %vm799_vm0, %v3656_v28 }
 0x1f0   : > { %v1349_v23 = vmul.f32 %v3403_v32, %v3658_v30  ;;  %v1596_v27 = vmul.f32 %v3363_v24, %v3658_v30  ;;  %v2025_v16 = vld [vmem:[#allocation3 + $0x22] sm:$0xff] }
 0x1f1   : > { %v1769_v21 = vmul.f32 %v3335_v47, %v2025_v16  ;;  %v1505_v22 = vmul.f32 %v3391_v12, %v2025_v16 }
 0x1f2   : > { %2842 = vmatmul.msk.f32.gmra.mxu0 %vm799_vm0, %v1349_v23  ;;  %2859 = vmatmul.msk.f32.gmra.mxu1 %vm799_vm0, %v1596_v27  ;;  %v1302_v35 = vpop.f32.mrf.mxu2 }
 0x1f3   : > { %v1303_v62 = vadd.f32 %v3580_v11, %v1302_v35 }
 0x1f5   : > { %v1314_v38 = vadd.f32 %v1303_v62, %v3172_v8 }
 0x1f6   : > { %v3676_v40 = vld [vmem:[#allocation3 + $0x31] sm:$0xff] }
 0x1f7   : > { %v3678_v18 = vld [vmem:[#allocation3 + $0x30] sm:$0xff]  ;;  %1334 = vst.msk [vmem:[#allocation3 + $0x39] sm:$0xff] %vm799_vm0, %v1314_v38  ;;  %2835 = vmatmul.msk.f32.gmra.mxu3 %vm799_vm0, %v3676_v40  ;;  %2869 = vmatmul.msk.f32.gmra.mxu2 %vm799_vm0, %v3676_v40 }
 0x1f8   : > { %v1350_v33 = vmul.f32 %v3444_v56, %v3678_v18  ;;  %v1597_v45 = vmul.f32 %v3403_v32, %v3678_v18  ;;  %v2026_v26 = vld [vmem:[#allocation3 + $0x2a] sm:$0xff] }
 0x1f9   : > { %v1770_v54 = vmul.f32 %v3391_v12, %v2026_v26  ;;  %v1506_v23 = vmul.f32 %v3437_v39, %v2026_v26 }
 0x1fa   : > { %2843 = vmatmul.msk.f32.gmra.mxu0 %vm799_vm0, %v1350_v33  ;;  %2860 = vmatmul.msk.f32.gmra.mxu1 %vm799_vm0, %v1597_v45  ;;  %v1305_v8 = vpop.f32.mrf.mxu2 }
 0x1fb   : > { %v1306_v17 = vadd.f32 %v3580_v11, %v1305_v8  ;;  %v1857_v8 = vmul.f32 %v3218_v19, %v3598_v53  ;;  %v1860_v53 = vmul.f32 %v3332_v46, %v3658_v30  ;;  %v1469_v30 = vpop.f32.mrf.mxu0 }
 0x1fd   : > { %v1315_v29 = vadd.f32 %v1306_v17, %v3177_v9  ;;  %v1493_v9 = vld [vmem:[#allocation3 + $0x2] sm:$0xff]  ;;  %v3780_v17 = vpop.f32.mrf.mxu3 }
 0x1fe   : > { %v3693_v41 = vld [vmem:[#allocation3 + $0x39] sm:$0xff]  ;;  %v1501_v50 = vmul.f32 %v3243_v34, %v1493_v9  ;;  %v1861_v9 = vmul.f32 %v3363_v24, %v3678_v18 }
 0x1ff   : > { %v3695_v42 = vld [vmem:[#allocation3 + $0x38] sm:$0xff]  ;;  %1335 = vst.msk [vmem:[#allocation3 + $0x41] sm:$0xff] %vm799_vm0, %v1315_v29  ;;  %2836 = vmatmul.msk.f32.gmra.mxu3 %vm799_vm0, %v3693_v41  ;;  %2870 = vmatmul.msk.f32.gmra.mxu2 %vm799_vm0, %v3693_v41  ;;  %v1858_v29 = vmul.f32 %v3251_v37, %v3615_v60 }
 0x200   : > { %v1351_v49 = vmul.f32 %v3476_v13, %v3695_v42  ;;  %v1598_v11 = vmul.f32 %v3444_v56, %v3695_v42  ;;  %v2027_v25 = vld [vmem:[#allocation3 + $0x32] sm:$0xff] }
 0x201   : > { %v1771_v27 = vmul.f32 %v3437_v39, %v2027_v25  ;;  %v1507_v35 = vmul.f32 %v3469_v48, %v2027_v25 }
 0x202   : > { %2844 = vmatmul.msk.f32.gmra.mxu0 %vm799_vm0, %v1351_v49  ;;  %2861 = vmatmul.msk.f32.gmra.mxu1 %vm799_vm0, %v1598_v11  ;;  %v1859_v49 = vmul.f32 %v3276_v58, %v3632_v20  ;;  %v2038_v20 = vmul.f32 %v3503_v55, %v2030_v1 }
 0x206   : > { %v3709_v2 = vld [vmem:[#allocation3 + $0x41] sm:$0xff] }
 0x207   : > { %v3711_v43 = vld [vmem:[#allocation3 + $0x40] sm:$0xff]  ;;  %2846 = vmatmul.msk.f32.vlgmr.msrb.gmra.mxu3 %vm799_vm0, %v1501_v50  ;;  %2871 = vmatmul.msk.f32.gmra.mxu2 %vm799_vm0, %v3709_v2  ;;  %v1947_v50 = vld [vmem:[#allocation3 + $0x49] sm:$0xff] }
 0x208   : > { %v1599_v36 = vmul.f32 %v3476_v13, %v3711_v43  ;;  %v2028_v7 = vld [vmem:[#allocation3 + $0x3a] sm:$0xff]  ;;  %v2029_v38 = vld [vmem:[#allocation3 + $0x42] sm:$0xff] }
 0x209   : > { %v1772_v62 = vmul.f32 %v3469_v48, %v2028_v7  ;;  %v1508_v33 = vmul.f32 %v3503_v55, %v2028_v7  ;;  %v1773_v45 = vmul.f32 %v3503_v55, %v2029_v38 }
 0x20a   : > { %2862 = vmatmul.msk.f32.gmra.mxu1 %vm799_vm0, %v1599_v36  ;;  %2873 = vmatmul.msk.f32.vlgmr.msra.gmra.mxu0 %vm799_vm0, %v1766_v3  ;;  %v1862_v36 = vmul.f32 %v3403_v32, %v3695_v42 }
 0x20f   : > { %2847 = vmatmul.msk.f32.gmra.mxu3 %vm799_vm0, %v1502_v59  ;;  %2900 = vmatmul.msk.f32.vlgmr.msra.gmra.mxu2 %vm799_vm0, %v2031_v61  ;;  %v1863_v61 = vmul.f32 %v3444_v56, %v3711_v43 }
 0x212   : > { %2874 = vmatmul.msk.f32.gmra.mxu0 %vm799_vm0, %v1767_v63  ;;  %2891 = vmatmul.msk.f32.vlgmr.msra.gmra.mxu1 %vm799_vm0, %v3596_v52  ;;  %v2033_v52 = vmul.f32 %v3311_v31, %v2025_v16  ;;  %v2135_v63 = vld [vmem:[%s4305_s11 + $0x8] sm:$0xff] }
 0x213   : > { %2179 = vmatpush.msrb.mxu0 %v2135_v63 }
 0x217   : > { %2848 = vmatmul.msk.f32.gmra.mxu3 %vm799_vm0, %v1503_v0  ;;  %2901 = vmatmul.msk.f32.gmra.mxu2 %vm799_vm0, %v2032_v14  ;;  %v1856_v14 = vld [vmem:[#allocation3 + $0x48] sm:$0xff] }
 0x21a   : > { %2875 = vmatmul.msk.f32.gmra.mxu0 %vm799_vm0, %v1768_v44  ;;  %2892 = vmatmul.msk.f32.gmra.mxu1 %vm799_vm0, %v3613_v10  ;;  %v2034_v10 = vmul.f32 %v3335_v47, %v2026_v26  ;;  %v1864_v44 = vmul.f32 %v3476_v13, %v1856_v14 }
 0x21f   : > { %2849 = vmatmul.msk.f32.gmra.mxu3 %vm799_vm0, %v1504_v6  ;;  %2902 = vmatmul.msk.f32.gmra.mxu2 %vm799_vm0, %v2033_v52 }
 0x222   : > { %2876 = vmatmul.msk.f32.gmra.mxu0 %vm799_vm0, %v1769_v21  ;;  %2893 = vmatmul.msk.f32.gmra.mxu1 %vm799_vm0, %v3630_v15  ;;  %v2035_v15 = vmul.f32 %v3391_v12, %v2027_v25 }
 0x227   : > { %2850 = vmatmul.msk.f32.gmra.mxu3 %vm799_vm0, %v1505_v22  ;;  %2903 = vmatmul.msk.f32.gmra.mxu2 %vm799_vm0, %v2034_v10 }
 0x22a   : > { %2877 = vmatmul.msk.f32.gmra.mxu0 %vm799_vm0, %v1770_v54  ;;  %2894 = vmatmul.msk.f32.gmra.mxu1 %vm799_vm0, %v3656_v28  ;;  %v2036_v28 = vmul.f32 %v3437_v39, %v2028_v7 }
 0x22f   : > { %2851 = vmatmul.msk.f32.gmra.mxu3 %vm799_vm0, %v1506_v23  ;;  %2904 = vmatmul.msk.f32.gmra.mxu2 %vm799_vm0, %v2035_v15  ;;  %v2134_v23 = vld [vmem:[%s4305_s11] sm:$0xff] }
 0x230   : > { %2180 = vmatpush.msrb.mxu0 %v2134_v23 }
 0x232   : > { %2878 = vmatmul.msk.f32.gmra.mxu0 %vm799_vm0, %v1771_v27  ;;  %2895 = vmatmul.msk.f32.gmra.mxu1 %vm799_vm0, %v3676_v40  ;;  %v2037_v40 = vmul.f32 %v3469_v48, %v2029_v38 }
 0x237   : > { %2852 = vmatmul.msk.f32.gmra.mxu3 %vm799_vm0, %v1507_v35  ;;  %2905 = vmatmul.msk.f32.gmra.mxu2 %vm799_vm0, %v2036_v28 }
 0x23a   : > { %2879 = vmatmul.msk.f32.gmra.mxu0 %vm799_vm0, %v1772_v62  ;;  %2896 = vmatmul.msk.f32.gmra.mxu1 %vm799_vm0, %v3693_v41 }
 0x23f   : > { %2853 = vmatmul.msk.f32.gmra.mxu3 %vm799_vm0, %v1508_v33  ;;  %2906 = vmatmul.msk.f32.gmra.mxu2 %vm799_vm0, %v2037_v40 }
 0x242   : > { %2880 = vmatmul.msk.f32.gmra.mxu0 %vm799_vm0, %v1773_v45  ;;  %2897 = vmatmul.msk.f32.gmra.mxu1 %vm799_vm0, %v3709_v2 }
 0x247   : > { %2882 = vmatmul.msk.f32.vlgmr.msra.gmra.mxu3 %vm799_vm0, %v1857_v8  ;;  %2907 = vmatmul.msk.f32.gmra.mxu2 %vm799_vm0, %v2038_v20 }
 0x24a   : > { %2898 = vmatmul.msk.f32.gmra.mxu1 %vm799_vm0, %v1947_v50  ;;  %v1470_v50 = vadd.f32 %v1469_v30, %v3780_v17 }
 0x24f   : > { %2883 = vmatmul.msk.f32.gmra.mxu3 %vm799_vm0, %v1858_v29  ;;  %v1643_v3 = vpop.f32.mrf.mxu1  ;;  %v1472_v59 = vpop.f32.mrf.mxu0 }
 0x252   : > { %v3785_v41 = vpop.f32.mrf.mxu3  ;;  %v1726_v18 = vpop.f32.mrf.mxu2 }
 0x253   : > { %v1473_v23 = vadd.f32 %v1472_v59, %v3785_v41 }
 0x257   : > { %2884 = vmatmul.msk.f32.gmra.mxu3 %vm799_vm0, %v1859_v49  ;;  %v1646_v4 = vpop.f32.mrf.mxu1  ;;  %v1475_v16 = vpop.f32.mrf.mxu0 }
 0x25a   : > { %v3790_v11 = vpop.f32.mrf.mxu3  ;;  %v1729_v0 = vpop.f32.mrf.mxu2 }
 0x25b   : > { %v1476_v24 = vadd.f32 %v1475_v16, %v3790_v11 }
 0x25f   : > { %2885 = vmatmul.msk.f32.gmra.mxu3 %vm799_vm0, %v1860_v53  ;;  %v1649_v6 = vpop.f32.mrf.mxu1  ;;  %v1478_v21 = vpop.f32.mrf.mxu0 }
 0x262   : > { %v3796_v60 = vpop.f32.mrf.mxu3  ;;  %v1732_v43 = vpop.f32.mrf.mxu2 }
 0x267   : > { %2886 = vmatmul.msk.f32.gmra.mxu3 %vm799_vm0, %v1861_v9  ;;  %v1652_v22 = vpop.f32.mrf.mxu1  ;;  %v3825_v54 = vpop.f32.mrf.mxu0 }
 0x26a   : > { %v3804_v2 = vpop.f32.mrf.mxu3  ;;  %v3823_v10 = vpop.f32.mrf.mxu2 }
 0x26f   : > { %2887 = vmatmul.msk.f32.gmra.mxu3 %vm799_vm0, %v1862_v36  ;;  %v3830_v15 = vpop.f32.mrf.mxu1  ;;  %v3834_v35 = vpop.f32.mrf.mxu0 }
 0x272   : > { %v3809_v57 = vpop.f32.mrf.mxu3  ;;  %v3832_v27 = vpop.f32.mrf.mxu2 }
 0x277   : > { %2888 = vmatmul.msk.f32.gmra.mxu3 %vm799_vm0, %v1863_v61  ;;  %v3836_v28 = vpop.f32.mrf.mxu1  ;;  %v3840_v33 = vpop.f32.mrf.mxu0 }
 0x27a   : > { %v3817_v42 = vpop.f32.mrf.mxu3  ;;  %v3838_v62 = vpop.f32.mrf.mxu2 }
 0x27f   : > { %2889 = vmatmul.msk.f32.gmra.mxu3 %vm799_vm0, %v1864_v44  ;;  %v3842_v40 = vpop.f32.mrf.mxu1  ;;  %v3846_v29 = vpop.f32.mrf.mxu0 }
 0x282   : > { %v3821_v52 = vpop.f32.mrf.mxu3  ;;  %v3844_v8 = vpop.f32.mrf.mxu2 }
 0x287   : > { %v3850_v53 = vpop.f32.mrf.mxu1  ;;  %v1817_v1 = vpop.f32.mrf.mxu0 }
 0x28a   : > { %v1552_v26 = vpop.f32.mrf.mxu3  ;;  %v3852_v9 = vpop.f32.mrf.mxu2 }
 0x28b   : > { %v1576_v36 = vadd.f32 %v1552_v26, %v1470_v50 }
 0x28d   : > { %v1667_v14 = vadd.f32 %v1643_v3, %v1576_v36  ;;  %v3864_v3 = vld [vmem:[%s4304_s10] ss:$0 sm:$0xff] }
 0x28f   : > { %v1991_v61 = vpop.f32.mrf.mxu1  ;;  %v1820_v5 = vpop.f32.mrf.mxu0  ;;  %v1750_v13 = vadd.f32 %v1726_v18, %v1667_v14 }
 0x291   : > { %v1841_v39 = vadd.f32 %v1817_v1, %v1750_v13 }
 0x292   : > { %v1555_v25 = vpop.f32.mrf.mxu3  ;;  %v2082_v63 = vpop.f32.mrf.mxu2 }
 0x293   : > { %v1577_v55 = vadd.f32 %v1555_v25, %v1473_v23 }
 0x295   : > { %v1668_v56 = vadd.f32 %v1646_v4, %v1577_v55 }
 0x297   : > { %v1994_v48 = vpop.f32.mrf.mxu1  ;;  %v1751_v26 = vadd.f32 %v1729_v0, %v1668_v56  ;;  %v1823_v41 = vpop.f32.mrf.mxu0 }
 0x299   : > { %v1842_v13 = vadd.f32 %v1820_v5, %v1751_v26 }
 0x29a   : > { %v1558_v7 = vpop.f32.mrf.mxu3  ;;  %v2085_v32 = vpop.f32.mrf.mxu2 }
 0x29b   : > { %v1578_v17 = vadd.f32 %v1558_v7, %v1476_v24 }
 0x29d   : > { %v1669_v25 = vadd.f32 %v1649_v6, %v1578_v17 }
 0x29f   : > { %v1997_v55 = vpop.f32.mrf.mxu1  ;;  %v1752_v56 = vadd.f32 %v1732_v43, %v1669_v25  ;;  %v1826_v6 = vpop.f32.mrf.mxu0 }
 0x2a1   : > { %v1843_v1 = vadd.f32 %v1823_v41, %v1752_v56 }
 0x2a2   : > { %v1561_v38 = vpop.f32.mrf.mxu3 }
 0x2aa   : > { %v1564_v45 = vpop.f32.mrf.mxu3 }
 0x2b2   : > { %v3848_v49 = vpop.f32.mrf.mxu3 }
 0x2ba   : > { %v3854_v20 = vpop.f32.mrf.mxu3 }
 0x2c2   : > { %v3857_v44 = vpop.f32.mrf.mxu3 }
 0x2ca   : > { %v1908_v12 = vpop.f32.mrf.mxu3 }
 0x2cb   : > { %v1932_v47 = vadd.f32 %v1908_v12, %v1841_v39  ;;  %v1479_v12 = vadd.f32 %v1478_v21, %v3796_v60  ;;  %v2088_v39 = vpop.f32.mrf.mxu2  ;;  %v1482_v60 = vadd.f32 %v3825_v54, %v3804_v2  ;;  %v1829_v54 = vpop.f32.mrf.mxu0 }
 0x2cd   : > { %v2015_v30 = vadd.f32 %v1991_v61, %v1932_v47  ;;  %v1579_v11 = vadd.f32 %v1561_v38, %v1479_v12  ;;  %v1580_v36 = vadd.f32 %v1564_v45, %v1482_v60  ;;  %v1485_v45 = vadd.f32 %v3834_v35, %v3809_v57 }
 0x2cf   : > { %v2106_v59 = vadd.f32 %v2082_v63, %v2015_v30  ;;  %v1670_v7 = vadd.f32 %v1652_v22, %v1579_v11  ;;  %v1671_v63 = vadd.f32 %v3830_v15, %v1580_v36  ;;  %v1581_v26 = vadd.f32 %v3848_v49, %v1485_v45  ;;  %v2502_v11 = vld [vmem:[%s4309_s15 + $0x38] sm:$0xff] }
 0x2d0   : > { %v1488_v49 = vadd.f32 %v3840_v33, %v3817_v42  ;;  %v2501_v42 = vld [vmem:[%s4309_s15 + $0x30] sm:$0xff]  ;;  %2539 = vmatpush.msrb.mxu3 %v2502_v11 }
 0x2d1   : > { %v3867_v18 = vadd.f32 %v3864_v3, %v2106_v59 }
 0x2d2   : > { %v1911_v4 = vpop.f32.mrf.mxu3  ;;  %2540 = vmatpush.msrb.mxu3 %v2501_v42 }
 0x2d3   : > { %v2126_v47 = vmax.f32 %v3867_v18, 0.0  ;;  %v1933_v24 = vadd.f32 %v1911_v4, %v1842_v13  ;;  %v2091_v43 = vpop.f32.mrf.mxu2  ;;  %v1672_v13 = vadd.f32 %v3836_v28, %v1581_v26 }
 0x2d5   : > { %v2016_v16 = vadd.f32 %v1994_v48, %v1933_v24  ;;  %2908 = vmatmul.msk.f32.vlgmr.msrb.gmra.mxu0 %vm2140_vm5, %v2126_v47  ;;  %v2000_v48 = vpop.f32.mrf.mxu1  ;;  %v1832_v24 = vpop.f32.mrf.mxu0  ;;  %v1755_v28 = vadd.f32 %v3838_v62, %v1672_v13 }
 0x2d7   : > { %v2107_v0 = vadd.f32 %v2085_v32, %v2016_v16  ;;  %v1753_v32 = vadd.f32 %v3823_v10, %v1670_v7  ;;  %v1754_v10 = vadd.f32 %v3832_v27, %v1671_v63 }
 0x2d9   : > { %v3875_v5 = vadd.f32 %v3864_v3, %v2107_v0  ;;  %v1844_v2 = vadd.f32 %v1826_v6, %v1753_v32  ;;  %v1845_v57 = vadd.f32 %v1829_v54, %v1754_v10  ;;  %v1846_v0 = vadd.f32 %v1832_v24, %v1755_v28  ;;  %v2499_v6 = vld [vmem:[%s4309_s15 + $0x20] sm:$0xff]  ;;  %v2496_v24 = vld [vmem:[%s4309_s15 + $0x8] sm:$0xff] }
 0x2da   : > { %v1914_v50 = vpop.f32.mrf.mxu3 }
 0x2db   : > { %v2127_v21 = vmax.f32 %v3875_v5, 0.0  ;;  %v1934_v38 = vadd.f32 %v1914_v50, %v1843_v1  ;;  %v2094_v25 = vpop.f32.mrf.mxu2  ;;  %v1491_v50 = vadd.f32 %v3846_v29, %v3821_v52 }
 0x2dd   : > { %v2017_v61 = vadd.f32 %v1997_v55, %v1934_v38  ;;  %2909 = vmatmul.msk.f32.gmra.mxu0 %vm2140_vm5, %v2127_v21  ;;  %v2003_v15 = vpop.f32.mrf.mxu1 }
 0x2df   : > { %v2108_v22 = vadd.f32 %v2088_v39, %v2017_v61  ;;  %v1582_v39 = vadd.f32 %v3854_v20, %v1488_v49  ;;  %v2500_v20 = vld [vmem:[%s4309_s15 + $0x28] sm:$0xff]  ;;  %v1835_v61 = vpop.f32.mrf.mxu0  ;;  %v4371_v49 = vmov 0.0  }
 0x2e0   : > { %2541 = vmatpush.msrb.mxu3 %v2500_v20  ;;  %2216 = vst.msk [vmem:[#allocation4 + $0x8] sm:$0xff] %vm2214_vm6, %v4371_v49 }
 0x2e1   : > { %v3886_v14 = vadd.f32 %v3864_v3, %v2108_v22  ;;  %v1673_v56 = vadd.f32 %v3842_v40, %v1582_v39  ;;  %v1583_v40 = vadd.f32 %v3857_v44, %v1491_v50  ;;  %2217 = vst.msk [vmem:[#allocation4 + $0x10] sm:$0xff] %vm2214_vm6, %v4371_v49  ;;  %v3987_v39 = vld [vmem:[%s4306_s12] ss:$0 sm:$0xff] }
 0x2e2   : > { %v1917_v23 = vpop.f32.mrf.mxu3  ;;  %2542 = vmatpush.msrb.mxu3 %v2499_v6  ;;  %2215 = vst.msk [vmem:[#allocation4] sm:$0xff] %vm2214_vm6, %v4371_v49 }
 0x2e3   : > { %v2128_v17 = vmax.f32 %v3886_v14, 0.0  ;;  %v1935_v30 = vadd.f32 %v1917_v23, %v1844_v2  ;;  %v2097_v7 = vpop.f32.mrf.mxu2  ;;  %v1756_v36 = vadd.f32 %v3844_v8, %v1673_v56  ;;  %2218 = vst.msk [vmem:[#allocation4 + $0x18] sm:$0xff] %vm2214_vm6, %v4371_v49  ;;  %v4003_v56 = vld [vmem:[%s4307_s13 + $0x1] ss:$0 sm:$0xff] }
 0x2e4   : > { %2219 = vst.msk [vmem:[#allocation4 + $0x20] sm:$0xff] %vm2214_vm6, %v4371_v49 }
 0x2e5   : > { %v2018_v41 = vadd.f32 %v2000_v48, %v1935_v30  ;;  %2910 = vmatmul.msk.f32.gmra.mxu0 %vm2140_vm5, %v2128_v17  ;;  %v2006_v16 = vpop.f32.mrf.mxu1  ;;  %v1847_v52 = vadd.f32 %v1835_v61, %v1756_v36  ;;  %2220 = vst.msk [vmem:[#allocation4 + $0x28] sm:$0xff] %vm2214_vm6, %v4371_v49 }
 0x2e6   : > { %2221 = vst.msk [vmem:[#allocation4 + $0x30] sm:$0xff] %vm2214_vm6, %v4371_v49 }
 0x2e7   : > { %v2109_v59 = vadd.f32 %v2091_v43, %v2018_v41  ;;  %v1674_v43 = vadd.f32 %v3850_v53, %v1583_v40  ;;  %v1838_v30 = vpop.f32.mrf.mxu0  ;;  %2222 = vst.msk [vmem:[#allocation4 + $0x38] sm:$0xff] %vm2214_vm6, %v4371_v49  ;;  %v4011_v40 = vld [vmem:[%s4307_s13 + $0x2] ss:$0 sm:$0xff] }
 0x2e8   : > { %2223 = vst.msk [vmem:[#allocation4 + $0x40] sm:$0xff] %vm2214_vm6, %v4371_v49 }
 0x2e9   : > { %v3898_v55 = vadd.f32 %v3864_v3, %v2109_v59  ;;  %v1757_v8 = vadd.f32 %v3852_v9, %v1674_v43  ;;  %2224 = vst.msk [vmem:[#allocation4 + $0x48] sm:$0xff] %vm2214_vm6, %v4371_v49  ;;  %v2235_v42 = vld [vmem:[#allocation4] sm:$0xff] }
 0x2ea   : > { %v1920_v35 = vpop.f32.mrf.mxu3  ;;  %v2243_v20 = vmul.f32 %v3218_v19, %v2235_v42  ;;  %2226 = vst.msk [vmem:[#allocation4 + $0x50] sm:$0x3] %vm2225_vm7, %v4371_v49 }
 0x2eb   : > { %v2129_v4 = vmax.f32 %v3898_v55, 0.0  ;;  %v1936_v12 = vadd.f32 %v1920_v35, %v1845_v57  ;;  %v2100_v54 = vpop.f32.mrf.mxu2  ;;  %v1848_v26 = vadd.f32 %v1838_v30, %v1757_v8 }
 0x2ed   : > { %v2019_v27 = vadd.f32 %v2003_v15, %v1936_v12  ;;  %2911 = vmatmul.msk.f32.gmra.mxu0 %vm2140_vm5, %v2129_v4  ;;  %v2009_v29 = vpop.f32.mrf.mxu1  ;;  %v2498_v12 = vld [vmem:[%s4309_s15 + $0x18] sm:$0xff] }
 0x2ee   : > { %2543 = vmatpush.msrb.mxu3 %v2498_v12 }
 0x2ef   : > { %v2110_v33 = vadd.f32 %v2094_v25, %v2019_v27  ;;  %v2495_v27 = vld [vmem:[%s4309_s15] sm:$0xff] }
 0x2f1   : > { %v3919_v62 = vadd.f32 %v3864_v3, %v2110_v33 }
 0x2f2   : > { %v1923_v1 = vpop.f32.mrf.mxu3 }
 0x2f3   : > { %v2130_v60 = vmax.f32 %v3919_v62, 0.0  ;;  %v1937_v38 = vadd.f32 %v1923_v1, %v1846_v0  ;;  %v2103_v25 = vpop.f32.mrf.mxu2  ;;  %v2269_v0 = vld [vmem:[#allocation4 + $0x1] sm:$0xff] }
 0x2f4   : > { %v2279_v50 = vmul.f32 %v4003_v56, %v2269_v0 }
 0x2f5   : > { %v2020_v48 = vadd.f32 %v2006_v16, %v1937_v38  ;;  %2912 = vmatmul.msk.f32.gmra.mxu0 %vm2140_vm5, %v2130_v60  ;;  %v2012_v10 = vpop.f32.mrf.mxu1  ;;  %v3998_v16 = vld [vmem:[%s4307_s13] ss:$0 sm:$0xff] }
 0x2f6   : > { %v2253_v1 = vmul.f32 %v3998_v16, %v2243_v20 }
 0x2f7   : > { %v2111_v32 = vadd.f32 %v2097_v7, %v2020_v48 }
 0x2f8   : > { %v2287_v61 = vadd.f32 %v2279_v50, %v2253_v1  ;;  %v4055_v50 = vld [vmem:[%s4307_s13 + $0x7] ss:$0 sm:$0xff] }
 0x2f9   : > { %v3934_v22 = vadd.f32 %v3864_v3, %v2111_v32 }
 0x2fa   : > { %v1926_v63 = vpop.f32.mrf.mxu3 }
 0x2fb   : > { %v2131_v2 = vmax.f32 %v3934_v22, 0.0  ;;  %v1938_v44 = vadd.f32 %v1926_v63, %v1847_v52  ;;  %v4019_v52 = vld [vmem:[%s4307_s13 + $0x3] ss:$0 sm:$0xff] }
 0x2fd   : > { %v2021_v23 = vadd.f32 %v2009_v29, %v1938_v44  ;;  %2913 = vmatmul.msk.f32.gmra.mxu0 %vm2140_vm5, %v2131_v2 }
 0x2ff   : > { %v2112_v45 = vadd.f32 %v2100_v54, %v2021_v23 }
 0x301   : > { %v3942_v53 = vadd.f32 %v3864_v3, %v2112_v45  ;;  %v4028_v45 = vld [vmem:[%s4307_s13 + $0x4] ss:$0 sm:$0xff] }
 0x302   : > { %v1929_v41 = vpop.f32.mrf.mxu3 }
 0x303   : > { %v2132_v15 = vmax.f32 %v3942_v53, 0.0  ;;  %v1939_v59 = vadd.f32 %v1929_v41, %v1848_v26 }
 0x305   : > { %v2022_v13 = vadd.f32 %v2012_v10, %v1939_v59  ;;  %2914 = vmatmul.msk.f32.gmra.mxu0 %vm2140_vm5, %v2132_v15  ;;  %v4033_v10 = vld [vmem:[%s4307_s13 + $0x5] ss:$0 sm:$0xff] }
 0x307   : > { %v2113_v57 = vadd.f32 %v2103_v25, %v2022_v13 }
 0x309   : > { %v3949_v9 = vadd.f32 %v3864_v3, %v2113_v57  ;;  %v2497_v3 = vld [vmem:[%s4309_s15 + $0x10] sm:$0xff] }
 0x30a   : > { %2544 = vmatpush.msrb.mxu3 %v2497_v3 }
 0x30b   : > { %v2133_v35 = vmax.f32 %v3949_v9, 0.0 }
 0x30c   : > { %2545 = vmatpush.msrb.mxu3 %v2496_v24  ;;  %v4043_v24 = vld [vmem:[%s4307_s13 + $0x6] ss:$0 sm:$0xff] }
 0x30d   : > { %2915 = vmatmul.msk.f32.gmra.mxu0 %vm2140_vm5, %v2133_v35 }
 0x30e   : > { %2546 = vmatpush.msrb.mxu3 %v2495_v27 }
 0x352   : > { %v2182_v28 = vpop.f32.mrf.mxu0 }
 0x353   : > { %v2183_v11 = vadd.f32 %v3987_v39, %v2182_v28 }
 0x355   : > { %v2206_v33 = vmax.f32 %v2183_v11, 0.0 }
 0x357   : > { %2227 = vst.msk [vmem:[#allocation4 + $0x9] sm:$0xff] %vm2214_vm6, %v2206_v33 }
 0x35a   : > { %v2185_v6 = vpop.f32.mrf.mxu0 }
 0x35b   : > { %v2186_v7 = vadd.f32 %v3987_v39, %v2185_v6 }
 0x35d   : > { %v2207_v38 = vmax.f32 %v2186_v7, 0.0 }
 0x35e   : > { %v2236_v48 = vld [vmem:[#allocation4 + $0x8] sm:$0xff] }
 0x35f   : > { %v2295_v36 = vld [vmem:[#allocation4 + $0x2] sm:$0xff]  ;;  %2228 = vst.msk [vmem:[#allocation4 + $0x11] sm:$0xff] %vm2214_vm6, %v2207_v38  ;;  %v2330_v43 = vmul.f32 %v3218_v19, %v2236_v48  ;;  %v2244_v44 = vmul.f32 %v3251_v37, %v2236_v48 }
 0x360   : > { %v2303_v32 = vmul.f32 %v3243_v34, %v2295_v36  ;;  %v2270_v30 = vld [vmem:[#allocation4 + $0x9] sm:$0xff] }
 0x361   : > { %v2340_v8 = vmul.f32 %v4019_v52, %v2330_v43  ;;  %v2254_v13 = vmul.f32 %v3998_v16, %v2244_v44  ;;  %v2359_v57 = vmul.f32 %v4028_v45, %v2270_v30  ;;  %v2280_v27 = vmul.f32 %v4003_v56, %v2270_v30 }
 0x362   : > { %v2313_v29 = vmul.f32 %v4011_v40, %v2303_v32  ;;  %v2188_v63 = vpop.f32.mrf.mxu0 }
 0x363   : > { %v2189_v54 = vadd.f32 %v3987_v39, %v2188_v63  ;;  %v2288_v0 = vadd.f32 %v2280_v27, %v2254_v13 }
 0x364   : > { %v2321_v23 = vadd.f32 %v2313_v29, %v2287_v61  ;;  %v4062_v29 = vld [vmem:[%s4307_s13 + $0x8] ss:$0 sm:$0xff] }
 0x365   : > { %v2208_v26 = vmax.f32 %v2189_v54, 0.0 }
 0x366   : > { %v2348_v41 = vadd.f32 %v2340_v8, %v2321_v23  ;;  %v2237_v59 = vld [vmem:[#allocation4 + $0x10] sm:$0xff] }
 0x367   : > { %v2296_v25 = vld [vmem:[#allocation4 + $0xa] sm:$0xff]  ;;  %2229 = vst.msk [vmem:[#allocation4 + $0x19] sm:$0xff] %vm2214_vm6, %v2208_v26  ;;  %v2403_v3 = vmul.f32 %v3218_v19, %v2237_v59  ;;  %v2331_v11 = vmul.f32 %v3251_v37, %v2237_v59  ;;  %v2245_v38 = vmul.f32 %v3276_v58, %v2237_v59 }
 0x368   : > { %v2376_v12 = vmul.f32 %v3243_v34, %v2296_v25  ;;  %v2304_v28 = vmul.f32 %v3266_v51, %v2296_v25  ;;  %v2367_v42 = vadd.f32 %v2359_v57, %v2348_v41  ;;  %v2271_v48 = vld [vmem:[#allocation4 + $0x11] sm:$0xff]  ;;  %v4075_v57 = vld [vmem:[%s4308_s14] ss:$0 sm:$0xff] }
 0x369   : > { %v2413_v1 = vmul.f32 %v4043_v24, %v2403_v3  ;;  %v2341_v61 = vmul.f32 %v4019_v52, %v2331_v11  ;;  %v2432_v23 = vmul.f32 %v4055_v50, %v2271_v48  ;;  %v2255_v30 = vmul.f32 %v3998_v16, %v2245_v38 }
 0x36a   : > { %v2386_v33 = vmul.f32 %v4033_v10, %v2376_v12  ;;  %v2191_v20 = vpop.f32.mrf.mxu0  ;;  %v2314_v6 = vmul.f32 %v4011_v40, %v2304_v28  ;;  %v2360_v41 = vmul.f32 %v4028_v45, %v2271_v48 }
 0x36b   : > { %v2192_v19 = vadd.f32 %v3987_v39, %v2191_v20 }
 0x36c   : > { %v2394_v7 = vadd.f32 %v2386_v33, %v2367_v42  ;;  %v2322_v36 = vadd.f32 %v2314_v6, %v2288_v0 }
 0x36d   : > { %v2209_v32 = vmax.f32 %v2192_v19, 0.0 }
 0x36e   : > { %v2421_v43 = vadd.f32 %v2413_v1, %v2394_v7  ;;  %v2297_v63 = vld [vmem:[#allocation4 + $0x12] sm:$0xff]  ;;  %v2349_v54 = vadd.f32 %v2341_v61, %v2322_v36 }
 0x36f   : > { %v2238_v44 = vld [vmem:[#allocation4 + $0x18] sm:$0xff]  ;;  %2230 = vst.msk [vmem:[#allocation4 + $0x21] sm:$0xff] %vm2214_vm6, %v2209_v32  ;;  %v2449_v8 = vmul.f32 %v3243_v34, %v2297_v63  ;;  %v2377_v59 = vmul.f32 %v3266_v51, %v2297_v63  ;;  %v2281_v34 = vmul.f32 %v4003_v56, %v2271_v48  ;;  %v2305_v33 = vmul.f32 %v3311_v31, %v2297_v63 }
 0x370   : > { %v2246_v26 = vmul.f32 %v3332_v46, %v2238_v44  ;;  %v2440_v25 = vadd.f32 %v2432_v23, %v2421_v43  ;;  %v2404_v12 = vmul.f32 %v3251_v37, %v2238_v44  ;;  %v2272_v27 = vld [vmem:[#allocation4 + $0x19] sm:$0xff]  ;;  %v2332_v28 = vmul.f32 %v3276_v58, %v2238_v44 }
 0x371   : > { %v2459_v13 = vmul.f32 %v4062_v29, %v2449_v8  ;;  %v2368_v11 = vadd.f32 %v2360_v41, %v2349_v54  ;;  %v2387_v42 = vmul.f32 %v4033_v10, %v2377_v59  ;;  %v2289_v6 = vadd.f32 %v2281_v34, %v2255_v30  ;;  %v4372_v8 = vld [vmem:[#allocation5_spill] sm:$0xff] }
 0x372   : > { %v2194_v3 = vpop.f32.mrf.mxu0  ;;  %v2256_v19 = vmul.f32 %v3998_v16, %v2246_v26  ;;  %v2414_v37 = vmul.f32 %v4043_v24, %v2404_v12  ;;  %v2315_v1 = vmul.f32 %v4011_v40, %v2305_v33  ;;  %v2282_v36 = vmul.f32 %v4003_v56, %v2272_v27 }
 0x373   : > { %v2195_v20 = vadd.f32 %v3987_v39, %v2194_v3  ;;  %v2467_v0 = vadd.f32 %v2459_v13, %v2440_v25  ;;  %v2395_v7 = vadd.f32 %v2387_v42, %v2368_v11  ;;  %v2433_v43 = vmul.f32 %v4055_v50, %v2272_v27  ;;  %v4373_v13 = vld [vmem:[#allocation6_spill] sm:$0xff] }
 0x374   : > { %v2323_v44 = vadd.f32 %v2315_v1, %v2289_v6  ;;  %v2342_v54 = vmul.f32 %v4019_v52, %v2332_v28  ;;  %v2290_v59 = vadd.f32 %v2282_v36, %v2256_v19  ;;  %v2361_v25 = vmul.f32 %v4028_v45, %v2272_v27 }
 0x375   : > { %v2210_v38 = vmax.f32 %v2195_v20, 0.0  ;;  %v2479_v48 = vadd.f32 %v4075_v57, %v2467_v0  ;;  %v2422_v32 = vadd.f32 %v2414_v37, %v2395_v7 }
 0x376   : > { %v2298_v61 = vld [vmem:[#allocation4 + $0x1a] sm:$0xff]  ;;  %v2350_v42 = vadd.f32 %v2342_v54, %v2323_v44 }
 0x377   : > { %v2239_v63 = vld [vmem:[#allocation4 + $0x20] sm:$0xff]  ;;  %2231 = vst.msk [vmem:[#allocation4 + $0x29] sm:$0xff] %vm2214_vm6, %v2210_v38  ;;  %v2487_v23 = vmax.f32 %v2479_v48, 0.0  ;;  %v2306_v30 = vmul.f32 %v4372_v8, %v2298_v61  ;;  %v2378_v26 = vmul.f32 %v3311_v31, %v2298_v61  ;;  %v2450_v41 = vmul.f32 %v3266_v51, %v2298_v61 }
 0x378   : > { %v2247_v12 = vmul.f32 %v4373_v13, %v2239_v63  ;;  %v2333_v34 = vmul.f32 %v3332_v46, %v2239_v63  ;;  %v2441_v28 = vadd.f32 %v2433_v43, %v2422_v32  ;;  %v2405_v51 = vmul.f32 %v3276_v58, %v2239_v63  ;;  %v2273_v6 = vld [vmem:[#allocation4 + $0x21] sm:$0xff] }
 0x379   : > { %2916 = vmatmul.msk.f32.vlgmr.msrb.gmra.mxu3 %vm2214_vm6, %v2487_v23  ;;  %v2316_v3 = vmul.f32 %v4011_v40, %v2306_v30  ;;  %v2460_v11 = vmul.f32 %v4062_v29, %v2450_v41  ;;  %v2388_v20 = vmul.f32 %v4033_v10, %v2378_v26  ;;  %v2369_v19 = vadd.f32 %v2361_v25, %v2350_v42  ;;  %v4374_v23 = vld [vmem:[#allocation7_spill] sm:$0xff] }
 0x37a   : > { %v2197_v33 = vpop.f32.mrf.mxu0  ;;  %v2257_v37 = vmul.f32 %v3998_v16, %v2247_v12  ;;  %v2343_v1 = vmul.f32 %v4019_v52, %v2333_v34  ;;  %v2415_v61 = vmul.f32 %v4043_v24, %v2405_v51  ;;  %v2283_v32 = vmul.f32 %v4003_v56, %v2273_v6  ;;  %v4375_v12 = vld [vmem:[#allocation8_spill] sm:$0xff] }
 0x37b   : > { %v2198_v0 = vadd.f32 %v3987_v39, %v2197_v33  ;;  %v2468_v27 = vadd.f32 %v2460_v11, %v2441_v28  ;;  %v2324_v7 = vadd.f32 %v2316_v3, %v2290_v59  ;;  %v2396_v36 = vadd.f32 %v2388_v20, %v2369_v19 }
 0x37c   : > { %v2434_v58 = vmul.f32 %v4055_v50, %v2273_v6  ;;  %v2362_v59 = vmul.f32 %v4028_v45, %v2273_v6  ;;  %v2291_v28 = vadd.f32 %v2283_v32, %v2257_v37 }
 0x37d   : > { %v2211_v38 = vmax.f32 %v2198_v0, 0.0  ;;  %v2480_v48 = vadd.f32 %v4075_v57, %v2468_v27  ;;  %v2351_v44 = vadd.f32 %v2343_v1, %v2324_v7  ;;  %v2423_v41 = vadd.f32 %v2415_v61, %v2396_v36 }
 0x37e   : > { %v2299_v43 = vld [vmem:[#allocation4 + $0x22] sm:$0xff] }
 0x37f   : > { %v2240_v63 = vld [vmem:[#allocation4 + $0x28] sm:$0xff]  ;;  %2232 = vst.msk [vmem:[#allocation4 + $0x31] sm:$0xff] %vm2214_vm6, %v2211_v38  ;;  %v2488_v54 = vmax.f32 %v2480_v48, 0.0  ;;  %v2307_v30 = vmul.f32 %v4374_v23, %v2299_v43  ;;  %v2379_v26 = vmul.f32 %v4372_v8, %v2299_v43  ;;  %v2451_v25 = vmul.f32 %v3311_v31, %v2299_v43 }
 0x380   : > { %v2248_v34 = vmul.f32 %v4375_v12, %v2240_v63  ;;  %v2334_v3 = vmul.f32 %v4373_v13, %v2240_v63  ;;  %v2442_v42 = vadd.f32 %v2434_v58, %v2423_v41  ;;  %v2370_v51 = vadd.f32 %v2362_v59, %v2351_v44  ;;  %v2274_v19 = vld [vmem:[#allocation4 + $0x29] sm:$0xff]  ;;  %v4376_v44 = vld [vmem:[#allocation9_spill] sm:$0xff] }
 0x381   : > { %2917 = vmatmul.msk.f32.gmra.mxu3 %vm2214_vm6, %v2488_v54  ;;  %v2317_v11 = vmul.f32 %v4011_v40, %v2307_v30  ;;  %v2461_v20 = vmul.f32 %v4062_v29, %v2451_v25  ;;  %v2389_v0 = vmul.f32 %v4033_v10, %v2379_v26  ;;  %v2406_v27 = vmul.f32 %v3332_v46, %v2240_v63 }
 0x382   : > { %v2200_v33 = vpop.f32.mrf.mxu0  ;;  %v2258_v6 = vmul.f32 %v3998_v16, %v2248_v34  ;;  %v2344_v48 = vmul.f32 %v4019_v52, %v2334_v3  ;;  %v2284_v32 = vmul.f32 %v4003_v56, %v2274_v19  ;;  %v2435_v26 = vmul.f32 %v4055_v50, %v2274_v19 }
 0x383   : > { %v2201_v31 = vadd.f32 %v3987_v39, %v2200_v33  ;;  %v2325_v7 = vadd.f32 %v2317_v11, %v2291_v28  ;;  %v2469_v1 = vadd.f32 %v2461_v20, %v2442_v42  ;;  %v2397_v38 = vadd.f32 %v2389_v0, %v2370_v51  ;;  %v4377_v42 = vld [vmem:[#allocation10_spill] sm:$0xff] }
 0x384   : > { %v2416_v37 = vmul.f32 %v4043_v24, %v2406_v27  ;;  %v2292_v25 = vadd.f32 %v2284_v32, %v2258_v6  ;;  %v2363_v34 = vmul.f32 %v4028_v45, %v2274_v19 }
 0x385   : > { %v2212_v36 = vmax.f32 %v2201_v31, 0.0  ;;  %v2481_v61 = vadd.f32 %v4075_v57, %v2469_v1  ;;  %v2352_v63 = vadd.f32 %v2344_v48, %v2325_v7 }
 0x386   : > { %v2300_v43 = vld [vmem:[#allocation4 + $0x2a] sm:$0xff]  ;;  %v2424_v46 = vadd.f32 %v2416_v37, %v2397_v38 }
 0x387   : > { %v2241_v58 = vld [vmem:[#allocation4 + $0x30] sm:$0xff]  ;;  %2233 = vst.msk [vmem:[#allocation4 + $0x39] sm:$0xff] %vm2214_vm6, %v2212_v36  ;;  %v2308_v54 = vmul.f32 %v4376_v44, %v2300_v43  ;;  %v2380_v30 = vmul.f32 %v4374_v23, %v2300_v43  ;;  %v2452_v41 = vmul.f32 %v4372_v8, %v2300_v43  ;;  %v2489_v59 = vmax.f32 %v2481_v61, 0.0 }
 0x388   : > { %v2335_v3 = vmul.f32 %v4375_v12, %v2241_v58  ;;  %v2443_v11 = vadd.f32 %v2435_v26, %v2424_v46  ;;  %v2249_v33 = vmul.f32 %v4377_v42, %v2241_v58  ;;  %v2371_v51 = vadd.f32 %v2363_v34, %v2352_v63  ;;  %v2275_v6 = vld [vmem:[#allocation4 + $0x31] sm:$0xff]  ;;  %v4378_v63 = vld [vmem:[#allocation11_spill] sm:$0xff] }
 0x389   : > { %v2318_v28 = vmul.f32 %v4011_v40, %v2308_v54  ;;  %v2462_v49 = vmul.f32 %v4062_v29, %v2452_v41  ;;  %2918 = vmatmul.msk.f32.gmra.mxu3 %vm2214_vm6, %v2489_v59  ;;  %v2390_v0 = vmul.f32 %v4033_v10, %v2380_v30  ;;  %v2407_v8 = vmul.f32 %v4373_v13, %v2241_v58  ;;  %v4379_v59 = vld [vmem:[#allocation12_spill] sm:$0xff] }
 0x38a   : > { %v2203_v20 = vpop.f32.mrf.mxu0  ;;  %v2345_v38 = vmul.f32 %v4019_v52, %v2335_v3  ;;  %v2259_v36 = vmul.f32 %v3998_v16, %v2249_v33  ;;  %v2285_v61 = vmul.f32 %v4003_v56, %v2275_v6  ;;  %v2436_v13 = vmul.f32 %v4055_v50, %v2275_v6 }
 0x38b   : > { %v2204_v27 = vadd.f32 %v3987_v39, %v2203_v20  ;;  %v2470_v31 = vadd.f32 %v2462_v49, %v2443_v11  ;;  %v2326_v19 = vadd.f32 %v2318_v28, %v2292_v25  ;;  %v2398_v7 = vadd.f32 %v2390_v0, %v2371_v51  ;;  %v2665_v51 = vld [vmem:[%s4313_s19] sm:$0xff]  ;;  %v2587_v0 = vld [vmem:[%s4311_s17 + $0x38] sm:$0xff] }
 0x38c   : > { %v2417_v1 = vmul.f32 %v4043_v24, %v2407_v8  ;;  %v2364_v41 = vmul.f32 %v4028_v45, %v2275_v6  ;;  %v2293_v3 = vadd.f32 %v2285_v61, %v2259_v36  ;;  %2681 = vmatpush.msrb.mxu2 %v2665_v51  ;;  %2624 = vmatpush.msrb.mxu1 %v2587_v0  ;;  %v2585_v36 = vld [vmem:[%s4311_s17 + $0x28] sm:$0xff]  ;;  %v2583_v0 = vld [vmem:[%s4311_s17 + $0x18] sm:$0xff] }
 0x38d   : > { %v2213_v37 = vmax.f32 %v2204_v27, 0.0  ;;  %v2482_v48 = vadd.f32 %v4075_v57, %v2470_v31  ;;  %v2353_v46 = vadd.f32 %v2345_v38, %v2326_v19  ;;  %v2586_v19 = vld [vmem:[%s4311_s17 + $0x30] sm:$0xff]  ;;  %v2978_v38 = vld [vmem:[%s3119_s4] sm:$0xff] }
 0x38e   : > { %v2301_v32 = vld [vmem:[#allocation4 + $0x32] sm:$0xff]  ;;  %v2425_v43 = vadd.f32 %v2417_v1, %v2398_v7  ;;  %2932 = vmatmul.msk.f32.vlgmr.msrb.gmra.mxu2 %vm799_vm0, %v2978_v38  ;;  %2625 = vmatpush.msrb.mxu1 %v2586_v19 }
 0x38f   : > { %v2242_v39 = vld [vmem:[#allocation4 + $0x38] sm:$0xff]  ;;  %2234 = vst.msk [vmem:[#allocation4 + $0x41] sm:$0xff] %vm2214_vm6, %v2213_v37  ;;  %v2490_v58 = vmax.f32 %v2482_v48, 0.0  ;;  %v2309_v54 = vmul.f32 %v4378_v63, %v2301_v32  ;;  %v2381_v30 = vmul.f32 %v4376_v44, %v2301_v32  ;;  %v2453_v26 = vmul.f32 %v4374_v23, %v2301_v32 }
 0x390   : > { %v2250_v25 = vmul.f32 %v4379_v59, %v2242_v39  ;;  %v2336_v34 = vmul.f32 %v4377_v42, %v2242_v39  ;;  %v2444_v11 = vadd.f32 %v2436_v13, %v2425_v43  ;;  %v2372_v33 = vadd.f32 %v2364_v41, %v2353_v46  ;;  %v2276_v27 = vld [vmem:[#allocation4 + $0x39] sm:$0xff]  ;;  %2626 = vmatpush.msrb.mxu1 %v2585_v36 }
 0x391   : > { %v2319_v28 = vmul.f32 %v4011_v40, %v2309_v54  ;;  %v2463_v49 = vmul.f32 %v4062_v29, %v2453_v26  ;;  %2919 = vmatmul.msk.f32.gmra.mxu3 %vm2214_vm6, %v2490_v58  ;;  %v2391_v20 = vmul.f32 %v4033_v10, %v2381_v30  ;;  %v2408_v23 = vmul.f32 %v4375_v12, %v2242_v39  ;;  %v4380_v58 = vld [vmem:[#allocation13_spill] sm:$0xff] }
 0x392   : > { %v2346_v6 = vmul.f32 %v4019_v52, %v2336_v34  ;;  %v2260_v12 = vmul.f32 %v3998_v16, %v2250_v25  ;;  %v2286_v61 = vmul.f32 %v4003_v56, %v2276_v27  ;;  %v2365_v43 = vmul.f32 %v4028_v45, %v2276_v27 }
 0x393   : > { %v2471_v8 = vadd.f32 %v2463_v49, %v2444_v11  ;;  %v2327_v31 = vadd.f32 %v2319_v28, %v2293_v3  ;;  %v2399_v7 = vadd.f32 %v2391_v20, %v2372_v33  ;;  %v2418_v1 = vmul.f32 %v4043_v24, %v2408_v23  ;;  %v2584_v3 = vld [vmem:[%s4311_s17 + $0x20] sm:$0xff] }
 0x394   : > { %v2437_v13 = vmul.f32 %v4055_v50, %v2276_v27  ;;  %v2294_v25 = vadd.f32 %v2286_v61, %v2260_v12  ;;  %2627 = vmatpush.msrb.mxu1 %v2584_v3  ;;  %v2582_v12 = vld [vmem:[%s4311_s17 + $0x10] sm:$0xff]  ;;  %v2581_v61 = vld [vmem:[%s4311_s17 + $0x8] sm:$0xff]  ;;  %v2981_v3 = vld [vmem:[%s3119_s4 + $0x18] sm:$0xff] }
 0x395   : > { %v2483_v37 = vadd.f32 %v4075_v57, %v2471_v8  ;;  %v2354_v48 = vadd.f32 %v2346_v6, %v2327_v31  ;;  %v2426_v16 = vadd.f32 %v2418_v1, %v2399_v7 }
 0x396   : > { %v2302_v32 = vld [vmem:[#allocation4 + $0x3a] sm:$0xff]  ;;  %v2375_v41 = vld [vmem:[#allocation4 + $0x42] sm:$0xff]  ;;  %2628 = vmatpush.msrb.mxu1 %v2583_v0 }
 0x397   : > { %v2329_v39 = vld [vmem:[#allocation4 + $0x40] sm:$0xff]  ;;  %v2491_v46 = vmax.f32 %v2483_v37, 0.0  ;;  %v2310_v54 = vmul.f32 %v4380_v58, %v2302_v32  ;;  %v2382_v30 = vmul.f32 %v4378_v63, %v2302_v32  ;;  %v2454_v26 = vmul.f32 %v4376_v44, %v2302_v32  ;;  %v2402_v51 = vld [vmem:[#allocation4 + $0x48] sm:$0xff] }
 0x398   : > { %v2445_v34 = vadd.f32 %v2437_v13, %v2426_v16  ;;  %v2337_v56 = vmul.f32 %v4379_v59, %v2329_v39  ;;  %v2373_v49 = vadd.f32 %v2365_v43, %v2354_v48  ;;  %v2356_v44 = vld [vmem:[#allocation4 + $0x41] sm:$0xff]  ;;  %v2383_v20 = vmul.f32 %v4380_v58, %v2375_v41  ;;  %2629 = vmatpush.msrb.mxu1 %v2582_v12 }
 0x399   : > { %v2320_v28 = vmul.f32 %v4011_v40, %v2310_v54  ;;  %v2464_v11 = vmul.f32 %v4062_v29, %v2454_v26  ;;  %v2392_v33 = vmul.f32 %v4033_v10, %v2382_v30  ;;  %2920 = vmatmul.msk.f32.gmra.mxu3 %vm2214_vm6, %v2491_v46  ;;  %v2409_v23 = vmul.f32 %v4377_v42, %v2329_v39  ;;  %v2979_v42 = vld [vmem:[%s3119_s4 + $0x8] sm:$0xff]  ;;  %v2580_v39 = vld [vmem:[%s4311_s17] sm:$0xff] }
 0x39a   : > { %v2347_v31 = vmul.f32 %v4019_v52, %v2337_v56  ;;  %v2455_v19 = vmul.f32 %v4378_v63, %v2375_v41  ;;  %2933 = vmatmul.msk.f32.gmra.mxu2 %vm799_vm0, %v2979_v42  ;;  %v2366_v1 = vmul.f32 %v4028_v45, %v2356_v44  ;;  %v2410_v37 = vmul.f32 %v4379_v59, %v2402_v51  ;;  %v2448_v52 = vld [vmem:[#allocation4 + $0x4a] sm:$0xff] }
 0x39b   : > { %v2472_v8 = vadd.f32 %v2464_v11, %v2445_v34  ;;  %v2400_v40 = vadd.f32 %v2392_v33, %v2373_v49  ;;  %v2328_v27 = vadd.f32 %v2320_v28, %v2294_v25  ;;  %v2419_v6 = vmul.f32 %v4043_v24, %v2409_v23  ;;  %v2429_v63 = vld [vmem:[#allocation4 + $0x49] sm:$0xff]  ;;  %2630 = vmatpush.msrb.mxu1 %v2581_v61  ;;  %v2980_v25 = vld [vmem:[%s3119_s4 + $0x10] sm:$0xff] }
 0x39c   : > { %v2438_v36 = vmul.f32 %v4055_v50, %v2356_v44  ;;  %v2393_v16 = vmul.f32 %v4033_v10, %v2383_v20  ;;  %v2465_v13 = vmul.f32 %v4062_v29, %v2455_v19  ;;  %v2456_v59 = vmul.f32 %v4380_v58, %v2448_v52  ;;  %v2982_v11 = vld [vmem:[%s3119_s4 + $0x20] sm:$0xff]  ;;  %v2984_v49 = vld [vmem:[%s3119_s4 + $0x30] sm:$0xff]  ;;  %v2985_v33 = vld [vmem:[%s3119_s4 + $0x38] sm:$0xff] }
 0x39d   : > { %v2484_v7 = vadd.f32 %v4075_v57, %v2472_v8  ;;  %v2355_v38 = vadd.f32 %v2347_v31, %v2328_v27  ;;  %v2427_v48 = vadd.f32 %v2419_v6, %v2400_v40  ;;  %v2420_v54 = vmul.f32 %v4043_v24, %v2410_v37  ;;  %2631 = vmatpush.msrb.mxu1 %v2580_v39 }
 0x39e   : > { %v2439_v30 = vmul.f32 %v4055_v50, %v2429_v63  ;;  %v2466_v41 = vmul.f32 %v4062_v29, %v2456_v59  ;;  %v2983_v29 = vld [vmem:[%s3119_s4 + $0x28] sm:$0xff] }
 0x39f   : > { %v2492_v32 = vmax.f32 %v2484_v7, 0.0  ;;  %v2374_v43 = vadd.f32 %v2366_v1, %v2355_v38  ;;  %v2446_v45 = vadd.f32 %v2438_v36, %v2427_v48 }
 0x3a1   : > { %v2401_v46 = vadd.f32 %v2393_v16, %v2374_v43  ;;  %2921 = vmatmul.msk.f32.gmra.mxu3 %vm2214_vm6, %v2492_v32  ;;  %v2473_v10 = vadd.f32 %v2465_v13, %v2446_v45  ;;  %v2977_v45 = vld [vmem:[%s4312_s18] ss:$0 sm:$0xff] }
 0x3a2   : > { %2934 = vmatmul.msk.f32.gmra.mxu2 %vm799_vm0, %v2980_v25 }
 0x3a3   : > { %v2428_v26 = vadd.f32 %v2420_v54, %v2401_v46  ;;  %v2485_v58 = vadd.f32 %v4075_v57, %v2473_v10 }
 0x3a5   : > { %v2447_v24 = vadd.f32 %v2439_v30, %v2428_v26  ;;  %v2493_v34 = vmax.f32 %v2485_v58, 0.0 }
 0x3a7   : > { %v2474_v50 = vadd.f32 %v2466_v41, %v2447_v24 }
 0x3a9   : > { %2922 = vmatmul.msk.f32.gmra.mxu3 %vm2214_vm6, %v2493_v34  ;;  %v2486_v56 = vadd.f32 %v4075_v57, %v2474_v50  ;;  %v2976_v57 = vld [vmem:[%s4310_s16] ss:$0 sm:$0xff] }
 0x3aa   : > { %2935 = vmatmul.msk.f32.gmra.mxu2 %vm799_vm0, %v2981_v3 }
 0x3ab   : > { %v2494_v28 = vmax.f32 %v2486_v56, 0.0 }
 0x3b1   : > { %2923 = vmatmul.msk.f32.gmra.mxu3 %vm2214_vm6, %v2494_v28 }
 0x3b2   : > { %2936 = vmatmul.msk.f32.gmra.mxu2 %vm799_vm0, %v2982_v11 }
 0x3ba   : > { %2937 = vmatmul.msk.f32.gmra.mxu2 %vm799_vm0, %v2983_v29 }
 0x3c2   : > { %2938 = vmatmul.msk.f32.gmra.mxu2 %vm799_vm0, %v2984_v49 }
 0x3ca   : > { %2939 = vmatmul.msk.f32.gmra.mxu2 %vm799_vm0, %v2985_v33 }
 0x3fc   : > { %v2548_v44 = vpop.f32.mrf.mxu3 }
 0x3fd   : > { %v2549_v20 = vadd.f32 %v2976_v57, %v2548_v44 }
 0x3ff   : > { %v2572_v23 = vmax.f32 %v2549_v20, 0.0 }
 0x401   : > { %2924 = vmatmul.msk.f32.vlgmr.msrb.gmra.mxu1 %vm2214_vm6, %v2572_v23 }
 0x404   : > { %v2551_v51 = vpop.f32.mrf.mxu3 }
 0x405   : > { %v2552_v0 = vadd.f32 %v2976_v57, %v2551_v51 }
 0x407   : > { %v2573_v8 = vmax.f32 %v2552_v0, 0.0 }
 0x409   : > { %2925 = vmatmul.msk.f32.gmra.mxu1 %vm2214_vm6, %v2573_v8 }
 0x40c   : > { %v2554_v40 = vpop.f32.mrf.mxu3 }
 0x40d   : > { %v2555_v27 = vadd.f32 %v2976_v57, %v2554_v40 }
 0x40f   : > { %v2574_v31 = vmax.f32 %v2555_v27, 0.0 }
 0x411   : > { %2926 = vmatmul.msk.f32.gmra.mxu1 %vm2214_vm6, %v2574_v31  ;;  %v2683_v16 = vpop.f32.mrf.mxu2 }
 0x414   : > { %v2557_v6 = vpop.f32.mrf.mxu3 }
 0x415   : > { %v2558_v19 = vadd.f32 %v2976_v57, %v2557_v6 }
 0x417   : > { %v2575_v12 = vmax.f32 %v2558_v19, 0.0 }
 0x419   : > { %2927 = vmatmul.msk.f32.gmra.mxu1 %vm2214_vm6, %v2575_v12 }
 0x41c   : > { %v2560_v42 = vpop.f32.mrf.mxu3 }
 0x41d   : > { %v2561_v7 = vadd.f32 %v2976_v57, %v2560_v42  ;;  %v2686_v13 = vpop.f32.mrf.mxu2 }
 0x41f   : > { %v2576_v1 = vmax.f32 %v2561_v7, 0.0 }
 0x421   : > { %2928 = vmatmul.msk.f32.gmra.mxu1 %vm2214_vm6, %v2576_v1 }
 0x424   : > { %v2563_v38 = vpop.f32.mrf.mxu3 }
 0x425   : > { %v2564_v37 = vadd.f32 %v2976_v57, %v2563_v38  ;;  %v2689_v26 = vpop.f32.mrf.mxu2 }
 0x427   : > { %v2577_v52 = vmax.f32 %v2564_v37, 0.0 }
 0x429   : > { %2929 = vmatmul.msk.f32.gmra.mxu1 %vm2214_vm6, %v2577_v52 }
 0x42c   : > { %v2566_v48 = vpop.f32.mrf.mxu3 }
 0x42d   : > { %v2567_v36 = vadd.f32 %v2976_v57, %v2566_v48  ;;  %v2692_v25 = vpop.f32.mrf.mxu2 }
 0x42f   : > { %v2578_v63 = vmax.f32 %v2567_v36, 0.0 }
 0x431   : > { %2930 = vmatmul.msk.f32.gmra.mxu1 %vm2214_vm6, %v2578_v63 }
 0x434   : > { %v2569_v61 = vpop.f32.mrf.mxu3 }
 0x435   : > { %v2570_v32 = vadd.f32 %v2976_v57, %v2569_v61 }
 0x437   : > { %v2579_v43 = vmax.f32 %v2570_v32, 0.0 }
 0x439   : > { %2931 = vmatmul.msk.f32.gmra.mxu1 %vm2214_vm6, %v2579_v43 }
 0x47e   : > { %v2633_v59 = vpop.f32.mrf.mxu1 }
 0x47f   : > { %v2634_v39 = vadd.f32 %v2977_v45, %v2633_v59 }
 0x481   : > { %v2657_v46 = vadd.f32 %v2634_v39, %v2126_v47 }
 0x483   : > { %v2707_v54 = vadd.f32 %v2683_v16, %v2657_v46 }
 0x485   : > { %2715 = vst.msk [vmem:[%s4259_s27] sm:$0xff] %vm2140_vm5, %v2707_v54 }
 0x486   : > { %v2636_v30 = vpop.f32.mrf.mxu1 }
 0x487   : > { %v2637_v10 = vadd.f32 %v2977_v45, %v2636_v30 }
 0x489   : > { %v2658_v18 = vadd.f32 %v2637_v10, %v2127_v21  ;;  %v2695_v21 = vpop.f32.mrf.mxu2 }
 0x48b   : > { %v2708_v47 = vadd.f32 %v2686_v13, %v2658_v18 }
 0x48d   : > { %2716 = vst.msk [vmem:[%s4259_s27 + $0x8] sm:$0xff] %vm2140_vm5, %v2708_v47 }
 0x48e   : > { %v2639_v58 = vpop.f32.mrf.mxu1 }
 0x48f   : > { %v2640_v41 = vadd.f32 %v2977_v45, %v2639_v58 }
 0x491   : > { %v2659_v24 = vadd.f32 %v2640_v41, %v2128_v17  ;;  %v2698_v29 = vpop.f32.mrf.mxu2 }
 0x493   : > { %v2709_v34 = vadd.f32 %v2689_v26, %v2659_v24 }
 0x495   : > { %2717 = vst.msk [vmem:[%s4259_s27 + $0x10] sm:$0xff] %vm2140_vm5, %v2709_v34 }
 0x496   : > { %v2642_v50 = vpop.f32.mrf.mxu1 }
 0x497   : > { %v2643_v56 = vadd.f32 %v2977_v45, %v2642_v50 }
 0x499   : > { %v2660_v5 = vadd.f32 %v2643_v56, %v2129_v4  ;;  %v2701_v44 = vpop.f32.mrf.mxu2 }
 0x49b   : > { %v2710_v3 = vadd.f32 %v2692_v25, %v2660_v5 }
 0x49d   : > { %2718 = vst.msk [vmem:[%s4259_s27 + $0x18] sm:$0xff] %vm2140_vm5, %v2710_v3 }
 0x49e   : > { %v2645_v28 = vpop.f32.mrf.mxu1 }
 0x49f   : > { %v2646_v11 = vadd.f32 %v2977_v45, %v2645_v28 }
 0x4a1   : > { %v2661_v14 = vadd.f32 %v2646_v11, %v2130_v60  ;;  %v2704_v0 = vpop.f32.mrf.mxu2 }
 0x4a3   : > { %v2711_v17 = vadd.f32 %v2695_v21, %v2661_v14 }
 0x4a5   : > { %2719 = vst.msk [vmem:[%s4259_s27 + $0x20] sm:$0xff] %vm2140_vm5, %v2711_v17 }
 0x4a6   : > { %v2648_v49 = vpop.f32.mrf.mxu1 }
 0x4a7   : > { %v2649_v33 = vadd.f32 %v2977_v45, %v2648_v49 }
 0x4a9   : > { %v2662_v55 = vadd.f32 %v2649_v33, %v2131_v2 }
 0x4ab   : > { %v2712_v4 = vadd.f32 %v2698_v29, %v2662_v55 }
 0x4ad   : > { %2720 = vst.msk [vmem:[%s4259_s27 + $0x28] sm:$0xff] %vm2140_vm5, %v2712_v4 }
 0x4ae   : > { %v2651_v57 = vpop.f32.mrf.mxu1 }
 0x4af   : > { %v2652_v20 = vadd.f32 %v2977_v45, %v2651_v57 }
 0x4b1   : > { %v2663_v62 = vadd.f32 %v2652_v20, %v2132_v15 }
 0x4b3   : > { %v2713_v60 = vadd.f32 %v2701_v44, %v2663_v62 }
 0x4b5   : > { %2721 = vst.msk [vmem:[%s4259_s27 + $0x30] sm:$0xff] %vm2140_vm5, %v2713_v60 }
 0x4b6   : > { %v2654_v23 = vpop.f32.mrf.mxu1 }
 0x4b7   : > { %v2655_v51 = vadd.f32 %v2977_v45, %v2654_v23 }
 0x4b9   : > { %v2664_v8 = vadd.f32 %v2655_v51, %v2133_v35 }
 0x4bb   : > { %v2714_v22 = vadd.f32 %v2704_v0, %v2664_v8 }
 0x4bd   : > { %2722 = vst.msk [vmem:[%s4259_s27 + $0x38] sm:$0xff] %vm2140_vm5, %v2714_v22 }
 0x4be PF: > { %s30_s1 = sadd.s32 1, %s2992_s1  }
 0x4bf   : > { %p27_p4 = scmp.ge.s32.totalorder %s30_s1, 4  }
 0x4c1   :  { %29 = sbr.rel (!%p27_p4) target bundleno = 6 (0x6), region = 138 }

// kernel: network_forward.7
= control target key start
LH: loop header
LB: loop body
LE: loop exit
PB: predicated region body
PF: predicated region fallthrough
CT: control target
= control target key end

     0   :  { %s5035_s0 = inlined_call_operand.vmem [shape: f32[128,16], index: 0, kind: input, shape index: {}]   ;;  %s5036_s1 = inlined_call_operand.vmem [shape: f32[16,64], index: 1, kind: input, shape index: {}]   ;;  %s5037_s2 = inlined_call_operand.vmem [shape: f32[1,64], index: 2, kind: input, shape index: {}]   ;;  %s5038_s3 = inlined_call_operand.vmem [shape: f32[9,64], index: 3, kind: input, shape index: {}]   ;;  %s5039_s4 = inlined_call_operand.hbm [shape: f32[1,64], index: 4, kind: input, shape index: {}]   ;;  %s5040_s5 = inlined_call_operand.vmem [shape: f32[64,64], index: 5, kind: input, shape index: {}]   ;;  %s5041_s6 = inlined_call_operand.hbm [shape: f32[1,64], index: 6, kind: input, shape index: {}]   ;;  %s5042_s7 = inlined_call_operand.vmem [shape: f32[64,16], index: 7, kind: input, shape index: {}]   ;;  %s5043_s8 = inlined_call_operand.hbm [shape: f32[1,16], index: 8, kind: input, shape index: {}]   ;;  %s5044_s9 = inlined_call_operand.vmem [shape: f32[9,16,24], index: 9, kind: input, shape index: {}]   ;;  %s5045_s10 = inlined_call_operand.hbm [shape: f32[1,24], index: 10, kind: input, shape index: {}]   ;;  %s5046_s11 = inlined_call_operand.vmem [shape: f32[24,96], index: 11, kind: input, shape index: {}]   ;;  %s5047_s12 = inlined_call_operand.hbm [shape: f32[1,96], index: 12, kind: input, shape index: {}]   ;;  %s5048_s13 = inlined_call_operand.vmem [shape: f32[9,96], index: 13, kind: input, shape index: {}]   ;;  %s5049_s14 = inlined_call_operand.hbm [shape: f32[1,96], index: 14, kind: input, shape index: {}]   ;;  %s5050_s15 = inlined_call_operand.vmem [shape: f32[96,96], index: 15, kind: input, shape index: {}]   ;;  %s5051_s16 = inlined_call_operand.hbm [shape: f32[1,96], index: 16, kind: input, shape index: {}]   ;;  %s5052_s17 = inlined_call_operand.vmem [shape: f32[96,24], index: 17, kind: input, shape index: {}]   ;;  %s5053_s18 = inlined_call_operand.hbm [shape: f32[1,24], index: 18, kind: input, shape index: {}]   ;;  %s5054_s19 = inlined_call_operand.vmem [shape: f32[16,24], index: 19, kind: input, shape index: {}]   ;;  %s5055_s20 = inlined_call_operand.vmem [shape: f32[128,24], index: 20, kind: output, shape index: {}]  }
   0x1   :  { %5081 = sst [smem:[#allocation33_spill]] %s5035_s0 }
   0x2   :  { %5082 = sst [smem:[#allocation34_spill]] %s5036_s1 }
   0x3   :  { %5083 = sst [smem:[#allocation35_spill]] %s5037_s2 }
   0x4   :  { %5084 = sst [smem:[#allocation36_spill]] %s5038_s3 }
   0x5   :  { %5085 = sst [smem:[#allocation37_spill]] %s5039_s4 }
   0x6   :  { %5086 = sst [smem:[#allocation38_spill]] %s5041_s6 }
   0x7   :  { %5087 = sst [smem:[#allocation39_spill]] %s5045_s10 }
   0x8   :  { %5088 = sst [smem:[#allocation40_spill]] %s5049_s14 }
   0x9   :  { %5089 = sst [smem:[#allocation41_spill]] %s5055_s20 }
   0xa   :  { %25 = vsyncpa [#allocation6], 0 }
   0xb   :  { %26 = vsyncpa [#allocation8], 0 }
   0xc   :  { %27 = vsyncpa [#allocation11], 0 }
   0xd   :  { %28 = vsyncpa [#allocation14], 0 }
   0xe   :  { %29 = vsyncpa [#allocation17], 0  ;;  %s3699_s1 = smov 0  }
   0xf LB: > { %s5090_s6 = sld [smem:[#allocation38_spill]]  ;;  %s5058_s2 = sadd.s32 4294967295, %s3583_s1   ;;  %s3583_s1 = sphi %s3699_s1, %s35_s1  }
  0x10   : > { %p3005_p0 = scmp.ge.s32.totalorder %s3583_s1, 1  ;;  %p491_p1 = scmp.lt.s32.totalorder %s3583_s1, 3 }
  0x11   : > { %p3712_p2 = scmp.eq.s32.totalorder %s5058_s2, 0  ;;  %s3585_s26 = smov [#allocation7]  }
  0x12   : > { %p3716_p3 = pnand %p3005_p0, %p491_p1  ;;  %s529_s27 = sshll.u32 %s3585_s26, 4  ;;  %s530_s27 = int_to_ptr.vmem [resolvable:$true] %s529_s27 }
  0x13   : > { %s5093_s10 = sld [smem:[#allocation39_spill]]  ;;  %s3586_s23 = smov [#allocation10]  }
  0x14   : > { %p3222_p4 = pneg %p3716_p3  ;;  %s5094_s14 = sld [smem:[#allocation40_spill]] }
  0x15   : > { %s527_s24 = sshll.u32 %s5090_s6, 4  ;;  %s559_s26 = sshll.u32 %s3586_s23, 4  ;;  %s528_s24 = int_to_ptr.hbm [resolvable:$true] %s527_s24  ;;  %s560_s26 = int_to_ptr.vmem [resolvable:$true] %s559_s26 }
  0x16   : > { %p3730_p5 = pnand %p3712_p2, %p3222_p4  ;;  %s3587_s28 = smov [#allocation13]  }
  0x17   : > { %s589_s4 = sshll.u32 %s3587_s28, 4  ;;  %s5096_s2 = sld [smem:[#allocation37_spill]]  ;;  %s590_s4 = int_to_ptr.vmem [resolvable:$true] %s589_s4 }
  0x18   : > { %3228 = dma.hbm_to_vmem [thread:$0]  (!%p3730_p5), %s528_s24, 16, %s530_s27, [#allocation8]  }
  0x19   : > { %s557_s29 = sshll.u32 %s5093_s10, 4  ;;  %s3588_s20 = smov [#allocation5]   ;;  %s558_s29 = int_to_ptr.hbm [resolvable:$true] %s557_s29 }
  0x1a   : > { %s587_s21 = sshll.u32 %s5094_s14, 4  ;;  %s542_s14 = sshll.u32 %s5043_s8, 4  ;;  %s588_s21 = int_to_ptr.hbm [resolvable:$true] %s587_s21  ;;  %s543_s14 = int_to_ptr.hbm [resolvable:$true] %s542_s14 }
  0x1b   : > { %3234 = dma.hbm_to_vmem [thread:$0]  (!%p3730_p5), %s558_s29, 16, %s560_s26, [#allocation11]  }
  0x1c   : > { %3240 = dma.hbm_to_vmem [thread:$0]  (!%p3730_p5), %s588_s21, 16, %s590_s4, [#allocation14]  }
  0x1d   : > { %s512_s6 = sshll.u32 %s5096_s2, 4  ;;  %s514_s24 = sshll.u32 %s3588_s20, 4  ;;  %s513_s6 = int_to_ptr.hbm [resolvable:$true] %s512_s6  ;;  %s515_s24 = int_to_ptr.vmem [resolvable:$true] %s514_s24 }
  0x1e   : > { %3225 = dma.hbm_to_vmem [thread:$0]  (!%p3730_p5), %s513_s6, 16, %s515_s24, [#allocation6]  }
  0x1f   : > { %s3589_s27 = smov [#allocation9]   ;;  %s572_s28 = sshll.u32 %s5047_s12, 4  ;;  %s573_s28 = int_to_ptr.hbm [resolvable:$true] %s572_s28 }
  0x20   : > { %s544_s29 = sshll.u32 %s3589_s27, 4  ;;  %s602_s20 = sshll.u32 %s5051_s16, 4  ;;  %s545_s29 = int_to_ptr.vmem [resolvable:$true] %s544_s29  ;;  %s603_s20 = int_to_ptr.hbm [resolvable:$true] %s602_s20 }
  0x21   : > { %3231 = dma.hbm_to_vmem [thread:$0]  (!%p3730_p5), %s543_s14, 16, %s545_s29, [#allocation8]  }
  0x22   : > { %s3590_s4 = smov [#allocation12]   ;;  %s3591_s6 = smov [#allocation15]  }
  0x23   : > { %s574_s30 = sshll.u32 %s3590_s4, 4  ;;  %s604_s0 = sshll.u32 %s3591_s6, 4  ;;  %s575_s30 = int_to_ptr.vmem [resolvable:$true] %s574_s30  ;;  %s605_s0 = int_to_ptr.vmem [resolvable:$true] %s604_s0 }
  0x24   : > { %3237 = dma.hbm_to_vmem [thread:$0]  (!%p3730_p5), %s573_s28, 16, %s575_s30, [#allocation11]  }
  0x25   : > { %s617_s27 = sshll.u32 %s5053_s18, 4  ;;  %s3592_s14 = smov [#allocation16]   ;;  %s618_s27 = int_to_ptr.hbm [resolvable:$true] %s617_s27 }
  0x26   : > { %3243 = dma.hbm_to_vmem [thread:$0]  (!%p3730_p5), %s603_s20, 16, %s605_s0, [#allocation14]  }
  0x27   : > { %s619_s29 = sshll.u32 %s3592_s14, 4  ;;  %644 = sbr.rel (%p3716_p3) target bundleno = 1253 (0x4e5), region = 100  ;;  %s620_s29 = int_to_ptr.vmem [resolvable:$true] %s619_s29 }
  0x28   : > { %3246 = dma.hbm_to_vmem [thread:$0]  (!%p3730_p5), %s618_s27, 16, %s620_s29, [#allocation17]  }
  0x2c   : > { %3562 = dma.done.wait (%p3712_p2), [#allocation6], 16  }
  0x2d   : > { %3564 = vsyncadd (%p3712_p2), [#allocation6], 4294967280 }
  0x2e   : > { %3566 = dma.done.wait (%p3712_p2), [#allocation8], 32  }
  0x2f   : > { %3568 = vsyncadd (%p3712_p2), [#allocation8], 4294967264 }
  0x30   : > { %3570 = dma.done.wait (%p3712_p2), [#allocation11], 32  }
  0x31   : > { %3572 = vsyncadd (%p3712_p2), [#allocation11], 4294967264 }
  0x32   : > { %3574 = dma.done.wait (%p3712_p2), [#allocation14], 32  }
  0x33   : > { %3576 = vsyncadd (%p3712_p2), [#allocation14], 4294967264 }
  0x34   : > { %3578 = dma.done.wait (%p3712_p2), [#allocation17], 16  }
  0x35   : > { %3580 = vsyncadd (%p3712_p2), [#allocation17], 4294967280  ;;  %s5097_s3 = sadd.s32 4294967295, %s3583_s1   ;;  %s5098_s10 = sld [smem:[#allocation33_spill]]  ;;  %vm917_vm0 = vcmask 130048   ;;  %v5059_v6 = vmov 0.0   ;;  %v750_v11 = vlaneseq }
  0x36   : > { %s3024_s22 = sshll.u32 %s5097_s3, 3  ;;  %s5099_s30 = sld [smem:[#allocation34_spill]]  ;;  %1442 = vst.msk [vmem:[#allocation3] sm:$0xff] %vm917_vm0, %v5059_v6  ;;  %vm991_vm1 = vcmask 523264   ;;  %v1279_v12 = vld [vmem:[%s5040_s5 + $0x38] sm:$0xff]  ;;  %v1278_v14 = vld [vmem:[%s5040_s5 + $0x30] sm:$0xff] }
  0x37   : > { %p739_p6 = scmp.lt.s32.totalorder %s3024_s22, 15  ;;  %1443 = vst.msk [vmem:[#allocation3 + $0x8] sm:$0xff] %vm917_vm0, %v5059_v6  ;;  %v3882_v13 = vshrl.u32 %v750_v11, 7  ;;  %1316 = vmatpush.msra.mxu1 %v1279_v12  ;;  %v1277_v15 = vld [vmem:[%s5040_s5 + $0x28] sm:$0xff]  ;;  %s5100_s28 = sld [smem:[#allocation35_spill]]  ;;  %v1276_v18 = vld [vmem:[%s5040_s5 + $0x20] sm:$0xff] }
  0x38   : > { %1444 = vst.msk [vmem:[#allocation3 + $0x10] sm:$0xff] %vm917_vm0, %v5059_v6  ;;  %v1275_v19 = vld [vmem:[%s5040_s5 + $0x18] sm:$0xff]  ;;  %v1274_v23 = vld [vmem:[%s5040_s5 + $0x10] sm:$0xff]  ;;  %v1273_v27 = vld [vmem:[%s5040_s5 + $0x8] sm:$0xff]  ;;  %s5101_s2 = sld [smem:[#allocation36_spill]]  ;;  %vm1002_vm14 = vcmask 517120  }
  0x39   : > { %s5141_s22 = smov (!%p739_p6, %s3024_s22), 15  ;;  %1445 = vst.msk [vmem:[#allocation3 + $0x18] sm:$0xff] %vm917_vm0, %v5059_v6  ;;  %1317 = vmatpush.msra.mxu1 %v1278_v14  ;;  %v763_v16 = vand.u32 7, %v3882_v13  ;;  %v752_v21 = vadd.s32 8, %v3882_v13  ;;  %v1272_v29 = vld [vmem:[%s5040_s5] sm:$0xff]  ;;  %v753_v36 = vadd.s32 16, %v3882_v13 }
  0x3a   : > { %s3025_s26 = sshll.u32 %s5141_s22, 3  ;;  %1446 = vst.msk [vmem:[#allocation3 + $0x20] sm:$0xff] %vm917_vm0, %v5059_v6  ;;  %v754_v52 = vadd.s32 24, %v3882_v13  ;;  %v755_v11 = vadd.s32 32, %v3882_v13  ;;  %s5139_s20 = sld [smem:[#allocation41_spill]] }
  0x3b   : > { %s3797_s21 = scalar_lea.vmem %s5098_s10, %s3025_s26  ;;  %1447 = vst.msk [vmem:[#allocation3 + $0x28] sm:$0xff] %vm917_vm0, %v5059_v6  ;;  %1318 = vmatpush.msra.mxu1 %v1277_v15  ;;  %vm855_vm2 = vcmp.gt.s32.totalorder %v763_v16, 0  ;;  %v770_v28 = vand.u32 7, %v752_v21  ;;  %vm879_vm3 = vcmp.lt.s32.totalorder %v763_v16, 7  ;;  %v777_v45 = vand.u32 7, %v753_v36 }
  0x3c   : > { %v912_v0 = vld [vmem:[%s5099_s30 + $0x8] sm:$0xff]  ;;  %v911_v1 = vld [vmem:[%s5099_s30] sm:$0xff]  ;;  %v3816_v4 = vld [vmem:[%s3797_s21 + $0x10] sm:$0xff]  ;;  %1448 = vst.msk [vmem:[#allocation3 + $0x30] sm:$0xff] %vm917_vm0, %v5059_v6  ;;  %v3908_v24 = vsel %vm855_vm2, 1.0, %v5059_v6  ;;  %v3933_v39 = vsel %vm879_vm3, 1.0, %v5059_v6 }
  0x3d   : > { %956 = vmatpush.msra.mxu0 %v912_v0  ;;  %v3806_v2 = vld [vmem:[%s3797_s21] sm:$0xff]  ;;  %v3811_v3 = vld [vmem:[%s3797_s21 + $0x8] sm:$0xff]  ;;  %v3821_v5 = vld [vmem:[%s3797_s21 + $0x18] sm:$0xff]  ;;  %1449 = vst.msk [vmem:[#allocation3 + $0x38] sm:$0xff] %vm917_vm0, %v5059_v6  ;;  %1319 = vmatpush.msra.mxu1 %v1276_v18  ;;  %vm856_vm4 = vcmp.gt.s32.totalorder %v770_v28, 0  ;;  %vm880_vm5 = vcmp.lt.s32.totalorder %v770_v28, 7 }
  0x3e   : > { %v3834_v7 = vld [vmem:[%s3797_s21 + $0x20] sm:$0xff]  ;;  %1450 = vst.msk [vmem:[#allocation3 + $0x40] sm:$0xff] %vm917_vm0, %v5059_v6  ;;  %v3851_v8 = vld [vmem:[%s3797_s21 + $0x28] sm:$0xff]  ;;  %v909_v9 = vld [vmem:[%s3797_s21 + $0x30] sm:$0xff]  ;;  %v3941_v42 = vsel %vm856_vm4, 1.0, %v5059_v6  ;;  %vm857_vm6 = vcmp.gt.s32.totalorder %v777_v45, 0 }
  0x3f   : > { %957 = vmatpush.msra.mxu0 %v911_v1  ;;  %1451 = vst.msk [vmem:[#allocation3 + $0x48] sm:$0xff] %vm917_vm0, %v5059_v6  ;;  %v910_v10 = vld [vmem:[%s3797_s21 + $0x38] sm:$0xff]  ;;  %v3894_v17 = vld [vmem:[%s5100_s28] ss:$0 sm:$0xff]  ;;  %1320 = vmatpush.msra.mxu1 %v1275_v19  ;;  %v3926_v32 = vld [vmem:[%s5101_s2 + $0x1] ss:$0 sm:$0xff] }
  0x40   : > { %3044 = vmatmul.msk.f32.vlgmr.msra.gmra.mxu0 %vm917_vm0, %v3806_v2  ;;  %993 = vst.msk [vmem:[#allocation2 + $0x8] sm:$0xff] %vm991_vm1, %v5059_v6  ;;  %v3921_v31 = vld [vmem:[%s5101_s2] ss:$0 sm:$0xff]  ;;  %v3938_v41 = vld [vmem:[%s5101_s2 + $0x2] ss:$0 sm:$0xff]  ;;  %v3956_v56 = vsel %vm880_vm5, 1.0, %v5059_v6  ;;  %s5000_s4 = scalar_lea.vmem %s5139_s20, %s3025_s26 }
  0x41   : > { %994 = vst.msk [vmem:[#allocation2 + $0x10] sm:$0xff] %vm991_vm1, %v5059_v6  ;;  %1321 = vmatpush.msra.mxu1 %v1274_v23  ;;  %v3949_v49 = vld [vmem:[%s5101_s2 + $0x3] ss:$0 sm:$0xff]  ;;  %v3962_v59 = vld [vmem:[%s5101_s2 + $0x4] ss:$0 sm:$0xff]  ;;  %v784_v61 = vand.u32 7, %v754_v52 }
  0x42   : > { %992 = vst.msk [vmem:[#allocation2] sm:$0xff] %vm991_vm1, %v5059_v6  ;;  %v3966_v63 = vsel %vm857_vm6, 1.0, %v5059_v6  ;;  %vm3975_vm7 = vcmp.lt.s32.totalorder %v777_v45, 7  ;;  %v3988_v21 = vld [vmem:[%s5101_s2 + $0x6] ss:$0 sm:$0xff]  ;;  %vm2276_vm5 = vcmask 195584  }
  0x43   : > { %995 = vst.msk [vmem:[#allocation2 + $0x18] sm:$0xff] %vm991_vm1, %v5059_v6  ;;  %1322 = vmatpush.msra.mxu1 %v1273_v27  ;;  %vm3991_vm8 = vcmp.gt.s32.totalorder %v784_v61, 0  ;;  %vm882_vm9 = vcmp.lt.s32.totalorder %v784_v61, 7  ;;  %v4006_v36 = vld [vmem:[%s5101_s2 + $0x7] ss:$0 sm:$0xff]  ;;  %vm2350_vm6 = vcmask 785408  }
  0x44   : > { %996 = vst.msk [vmem:[#allocation2 + $0x20] sm:$0xff] %vm991_vm1, %v5059_v6 }
  0x45   : > { %997 = vst.msk [vmem:[#allocation2 + $0x28] sm:$0xff] %vm991_vm1, %v5059_v6  ;;  %1323 = vmatpush.msra.mxu1 %v1272_v29 }
  0x46   : > { %998 = vst.msk [vmem:[#allocation2 + $0x30] sm:$0xff] %vm991_vm1, %v5059_v6 }
  0x47   : > { %999 = vst.msk [vmem:[#allocation2 + $0x38] sm:$0xff] %vm991_vm1, %v5059_v6 }
  0x48   : > { %3045 = vmatmul.msk.f32.gmra.mxu0 %vm917_vm0, %v3811_v3  ;;  %1000 = vst.msk [vmem:[#allocation2 + $0x40] sm:$0xff] %vm991_vm1, %v5059_v6 }
  0x49   : > { %1001 = vst.msk [vmem:[#allocation2 + $0x48] sm:$0xff] %vm991_vm1, %v5059_v6  ;;  %v1012_v25 = vld [vmem:[#allocation2] sm:$0xff] }
  0x4a   : > { %v1020_v30 = vmul.f32 %v3908_v24, %v1012_v25  ;;  %v1046_v33 = vld [vmem:[#allocation2 + $0x1] sm:$0xff]  ;;  %1003 = vst.msk [vmem:[#allocation2 + $0x50] sm:$0x3] %vm1002_vm14, %v5059_v6 }
  0x4b   : > { %v1056_v38 = vmul.f32 %v3926_v32, %v1046_v33 }
  0x4c   : > { %v1030_v37 = vmul.f32 %v3921_v31, %v1020_v30  ;;  %v791_v30 = vand.u32 7, %v755_v11 }
  0x4e   : > { %v1064_v46 = vadd.f32 %v1056_v38, %v1030_v37  ;;  %vm4028_vm10 = vcmp.gt.s32.totalorder %v791_v30, 0  ;;  %vm4053_vm11 = vcmp.lt.s32.totalorder %v791_v30, 7  ;;  %v4066_v30 = vadd.s32 48, %v3882_v13 }
  0x50   : > { %3046 = vmatmul.msk.f32.gmra.mxu0 %vm917_vm0, %v3816_v4 }
  0x58   : > { %3047 = vmatmul.msk.f32.gmra.mxu0 %vm917_vm0, %v3821_v5 }
  0x60   : > { %3048 = vmatmul.msk.f32.gmra.mxu0 %vm917_vm0, %v3834_v7 }
  0x68   : > { %3049 = vmatmul.msk.f32.gmra.mxu0 %vm917_vm0, %v3851_v8 }
  0x70   : > { %3050 = vmatmul.msk.f32.gmra.mxu0 %vm917_vm0, %v909_v9 }
  0x78   : > { %3051 = vmatmul.msk.f32.gmra.mxu0 %vm917_vm0, %v910_v10  ;;  %v3971_v10 = vld [vmem:[%s5101_s2 + $0x5] ss:$0 sm:$0xff] }
  0xbd   : > { %v959_v20 = vpop.f32.mrf.mxu0 }
  0xbe   : > { %v960_v22 = vadd.f32 %v3894_v17, %v959_v20 }
  0xc0   : > { %v983_v26 = vmax.f32 %v960_v22, 0.0 }
  0xc2   : > { %1004 = vst.msk [vmem:[#allocation2 + $0x9] sm:$0xff] %vm991_vm1, %v983_v26 }
  0xc5   : > { %v962_v34 = vpop.f32.mrf.mxu0 }
  0xc6   : > { %v963_v35 = vadd.f32 %v3894_v17, %v962_v34  ;;  %v4001_v34 = vsel %vm3975_vm7, 1.0, %v5059_v6  ;;  %vm2361_vm7 = vcmask 779264  }
  0xc7   : > { %5106 = vst [vmem:[#allocation23_spill] sm:$0xff] %v4001_v34 }
  0xc8   : > { %v984_v40 = vmax.f32 %v963_v35, 0.0 }
  0xc9   : > { %v1013_v43 = vld [vmem:[#allocation2 + $0x8] sm:$0xff] }
  0xca   : > { %v1072_v44 = vld [vmem:[#allocation2 + $0x2] sm:$0xff]  ;;  %1005 = vst.msk [vmem:[#allocation2 + $0x11] sm:$0xff] %vm991_vm1, %v984_v40  ;;  %v1107_v48 = vmul.f32 %v3908_v24, %v1013_v43  ;;  %v1021_v50 = vmul.f32 %v3941_v42, %v1013_v43 }
  0xcb   : > { %v1080_v47 = vmul.f32 %v3933_v39, %v1072_v44  ;;  %v1047_v57 = vld [vmem:[#allocation2 + $0x9] sm:$0xff]  ;;  %v4011_v44 = vadd.s32 40, %v3882_v13 }
  0xcc   : > { %v1117_v58 = vmul.f32 %v3949_v49, %v1107_v48  ;;  %v1031_v62 = vmul.f32 %v3921_v31, %v1021_v50  ;;  %v1057_v14 = vmul.f32 %v3926_v32, %v1047_v57  ;;  %v1136_v18 = vmul.f32 %v3962_v59, %v1047_v57 }
  0xcd   : > { %v1090_v51 = vmul.f32 %v3938_v41, %v1080_v47  ;;  %v965_v53 = vpop.f32.mrf.mxu0  ;;  %v4017_v47 = vld [vmem:[%s5101_s2 + $0x8] ss:$0 sm:$0xff]  ;;  %v4022_v48 = vsel %vm3991_vm8, 1.0, %v5059_v6  ;;  %v4025_v50 = vsel %vm882_vm9, 1.0, %v5059_v6  ;;  %v798_v11 = vand.u32 7, %v4011_v44 }
  0xce   : > { %v966_v54 = vadd.f32 %v3894_v17, %v965_v53  ;;  %v1065_v25 = vadd.f32 %v1057_v14, %v1031_v62  ;;  %5107 = vst [vmem:[#allocation24_spill] sm:$0xff] %v4025_v50 }
  0xcf   : > { %v1098_v55 = vadd.f32 %v1090_v51, %v1064_v46  ;;  %vm4061_vm12 = vcmp.gt.s32.totalorder %v798_v11, 0  ;;  %vm4095_vm13 = vcmp.lt.s32.totalorder %v798_v11, 7 }
  0xd0   : > { %v985_v60 = vmax.f32 %v966_v54, 0.0 }
  0xd1   : > { %v1014_v0 = vld [vmem:[#allocation2 + $0x10] sm:$0xff]  ;;  %v1125_v9 = vadd.f32 %v1117_v58, %v1098_v55 }
  0xd2   : > { %v1073_v1 = vld [vmem:[#allocation2 + $0xa] sm:$0xff]  ;;  %1006 = vst.msk [vmem:[#allocation2 + $0x19] sm:$0xff] %vm991_vm1, %v985_v60  ;;  %v1108_v16 = vmul.f32 %v3941_v42, %v1014_v0  ;;  %v1180_v20 = vmul.f32 %v3908_v24, %v1014_v0  ;;  %v1022_v22 = vmul.f32 %v3966_v63, %v1014_v0 }
  0xd3   : > { %v1081_v15 = vmul.f32 %v3956_v56, %v1073_v1  ;;  %v1153_v19 = vmul.f32 %v3933_v39, %v1073_v1  ;;  %v1144_v28 = vadd.f32 %v1136_v18, %v1125_v9  ;;  %v1048_v35 = vld [vmem:[#allocation2 + $0x11] sm:$0xff]  ;;  %v4043_v18 = vld [vmem:[#allocation5] ss:$0 sm:$0xff] }
  0xd4   : > { %v1190_v40 = vmul.f32 %v3988_v21, %v1180_v20  ;;  %v1118_v43 = vmul.f32 %v3949_v49, %v1108_v16  ;;  %v1032_v46 = vmul.f32 %v3921_v31, %v1022_v22  ;;  %v1058_v51 = vmul.f32 %v3926_v32, %v1048_v35 }
  0xd5   : > { %v1091_v26 = vmul.f32 %v3938_v41, %v1081_v15  ;;  %v968_v27 = vpop.f32.mrf.mxu0  ;;  %v1163_v29 = vmul.f32 %v3971_v10, %v1153_v19  ;;  %v1209_v61 = vmul.f32 %v4006_v36, %v1048_v35  ;;  %v1137_v0 = vmul.f32 %v3962_v59, %v1048_v35 }
  0xd6   : > { %v969_v33 = vadd.f32 %v3894_v17, %v968_v27  ;;  %v1066_v12 = vadd.f32 %v1058_v51, %v1032_v46 }
  0xd7   : > { %v1099_v37 = vadd.f32 %v1091_v26, %v1065_v25  ;;  %v1171_v38 = vadd.f32 %v1163_v29, %v1144_v28  ;;  %v4050_v25 = vsel %vm4028_vm10, 1.0, %v5059_v6 }
  0xd8   : > { %v986_v45 = vmax.f32 %v969_v33, 0.0  ;;  %5110 = vst [vmem:[#allocation25_spill] sm:$0xff] %v4050_v25 }
  0xd9   : > { %v1074_v52 = vld [vmem:[#allocation2 + $0x12] sm:$0xff]  ;;  %v1198_v53 = vadd.f32 %v1190_v40, %v1171_v38  ;;  %v1126_v55 = vadd.f32 %v1118_v43, %v1099_v37 }
  0xda   : > { %v1015_v54 = vld [vmem:[#allocation2 + $0x18] sm:$0xff]  ;;  %1007 = vst.msk [vmem:[#allocation2 + $0x21] sm:$0xff] %vm991_vm1, %v986_v45  ;;  %v1082_v58 = vmul.f32 %v4001_v34, %v1074_v52  ;;  %v1154_v60 = vmul.f32 %v3956_v56, %v1074_v52  ;;  %v1226_v62 = vmul.f32 %v3933_v39, %v1074_v52 }
  0xdb   : > { %v1023_v1 = vmul.f32 %v4022_v48, %v1015_v54  ;;  %v1109_v9 = vmul.f32 %v3966_v63, %v1015_v54  ;;  %v1217_v15 = vadd.f32 %v1209_v61, %v1198_v53  ;;  %v1145_v20 = vadd.f32 %v1137_v0, %v1126_v55  ;;  %v1049_v28 = vld [vmem:[#allocation2 + $0x19] sm:$0xff] }
  0xdc   : > { %v1092_v14 = vmul.f32 %v3938_v41, %v1082_v58  ;;  %v1236_v16 = vmul.f32 %v4017_v47, %v1226_v62  ;;  %v1164_v22 = vmul.f32 %v3971_v10, %v1154_v60  ;;  %v1181_v23 = vmul.f32 %v3941_v42, %v1015_v54 }
  0xdd   : > { %v971_v19 = vpop.f32.mrf.mxu0  ;;  %v1033_v35 = vmul.f32 %v3921_v31, %v1023_v1  ;;  %v1119_v40 = vmul.f32 %v3949_v49, %v1109_v9  ;;  %v1059_v46 = vmul.f32 %v3926_v32, %v1049_v28  ;;  %v1210_v53 = vmul.f32 %v4006_v36, %v1049_v28 }
  0xde   : > { %v972_v26 = vadd.f32 %v3894_v17, %v971_v19  ;;  %v1244_v27 = vadd.f32 %v1236_v16, %v1217_v15  ;;  %v1100_v33 = vadd.f32 %v1092_v14, %v1066_v12  ;;  %v1172_v37 = vadd.f32 %v1164_v22, %v1145_v20 }
  0xdf   : > { %v1191_v38 = vmul.f32 %v3988_v21, %v1181_v23  ;;  %v1067_v62 = vadd.f32 %v1059_v46, %v1033_v35  ;;  %v1138_v0 = vmul.f32 %v3962_v59, %v1049_v28  ;;  %v4078_v1 = vsel %vm4053_vm11, 1.0, %v5059_v6 }
  0xe0   : > { %v987_v43 = vmax.f32 %v972_v26, 0.0  ;;  %v1256_v44 = vadd.f32 %v4043_v18, %v1244_v27  ;;  %v1127_v55 = vadd.f32 %v1119_v40, %v1100_v33  ;;  %5115 = vst [vmem:[#allocation26_spill] sm:$0xff] %v4078_v1  ;;  %v4090_v27 = vsel %vm4061_vm12, 1.0, %v5059_v6 }
  0xe1   : > { %v1075_v51 = vld [vmem:[#allocation2 + $0x1a] sm:$0xff]  ;;  %v1199_v52 = vadd.f32 %v1191_v38, %v1172_v37  ;;  %5116 = vst [vmem:[#allocation27_spill] sm:$0xff] %v4090_v27  ;;  %v805_v35 = vand.u32 7, %v4066_v30 }
  0xe2   : > { %v1016_v54 = vld [vmem:[#allocation2 + $0x20] sm:$0xff]  ;;  %1008 = vst.msk [vmem:[#allocation2 + $0x29] sm:$0xff] %vm991_vm1, %v987_v43  ;;  %v1264_v57 = vmax.f32 %v1256_v44, 0.0  ;;  %v1083_v58 = vmul.f32 %v4025_v50, %v1075_v51  ;;  %v1155_v60 = vmul.f32 %v4001_v34, %v1075_v51  ;;  %v1227_v61 = vmul.f32 %v3956_v56, %v1075_v51 }
  0xe3   : > { %v1110_v9 = vmul.f32 %v4022_v48, %v1016_v54  ;;  %v1218_v14 = vadd.f32 %v1210_v53, %v1199_v52  ;;  %v1024_v16 = vmul.f32 %v4050_v25, %v1016_v54  ;;  %v1050_v20 = vld [vmem:[#allocation2 + $0x21] sm:$0xff]  ;;  %v1146_v22 = vadd.f32 %v1138_v0, %v1127_v55 }
  0xe4   : > { %3052 = vmatmul.msk.f32.vlgmr.msra.gmra.mxu1 %vm991_vm1, %v1264_v57  ;;  %v1093_v12 = vmul.f32 %v3938_v41, %v1083_v58  ;;  %v1237_v15 = vmul.f32 %v4017_v47, %v1227_v61  ;;  %v1165_v23 = vmul.f32 %v3971_v10, %v1155_v60  ;;  %v1182_v26 = vmul.f32 %v3966_v63, %v1016_v54 }
  0xe5   : > { %v974_v19 = vpop.f32.mrf.mxu0  ;;  %v1120_v43 = vmul.f32 %v3949_v49, %v1110_v9  ;;  %v1034_v46 = vmul.f32 %v3921_v31, %v1024_v16  ;;  %v1060_v51 = vmul.f32 %v3926_v32, %v1050_v20  ;;  %v1211_v30 = vmul.f32 %v4006_v36, %v1050_v20 }
  0xe6   : > { %v975_v28 = vadd.f32 %v3894_v17, %v974_v19  ;;  %v1245_v29 = vadd.f32 %v1237_v15, %v1218_v14  ;;  %v1101_v33 = vadd.f32 %v1093_v12, %v1067_v62  ;;  %v1173_v37 = vadd.f32 %v1165_v23, %v1146_v22 }
  0xe7   : > { %v1192_v38 = vmul.f32 %v3988_v21, %v1182_v26  ;;  %v1139_v61 = vmul.f32 %v3962_v59, %v1050_v20  ;;  %v4112_v9 = vadd.s32 56, %v3882_v13  ;;  %v1068_v12 = vadd.f32 %v1060_v51, %v1034_v46 }
  0xe8   : > { %v988_v44 = vmax.f32 %v975_v28, 0.0  ;;  %v1257_v45 = vadd.f32 %v4043_v18, %v1245_v29  ;;  %v1128_v55 = vadd.f32 %v1120_v43, %v1101_v33  ;;  %vm861_vm15 = vcmp.gt.s32.totalorder %v805_v35, 0 }
  0xe9   : > { %v1076_v52 = vld [vmem:[#allocation2 + $0x22] sm:$0xff]  ;;  %v1200_v53 = vadd.f32 %v1192_v38, %v1173_v37  ;;  %v4124_v28 = vsel %vm4095_vm13, 1.0, %v5059_v6  ;;  %v4131_v51 = vsel %vm861_vm15, 1.0, %v5059_v6  ;;  %vm4141_vm2 = vcmp.lt.s32.totalorder %v805_v35, 7 }
  0xea   : > { %v1017_v54 = vld [vmem:[#allocation2 + $0x28] sm:$0xff]  ;;  %1009 = vst.msk [vmem:[#allocation2 + $0x31] sm:$0xff] %vm991_vm1, %v988_v44  ;;  %v1265_v11 = vmax.f32 %v1257_v45, 0.0  ;;  %v1084_v57 = vmul.f32 %v4078_v1, %v1076_v52  ;;  %v1156_v58 = vmul.f32 %v4025_v50, %v1076_v52  ;;  %v1228_v60 = vmul.f32 %v4001_v34, %v1076_v52 }
  0xeb   : > { %v1025_v62 = vmul.f32 %v4090_v27, %v1017_v54  ;;  %v1111_v0 = vmul.f32 %v4050_v25, %v1017_v54  ;;  %v1219_v15 = vadd.f32 %v1211_v30, %v1200_v53  ;;  %v1147_v22 = vadd.f32 %v1139_v61, %v1128_v55  ;;  %5119 = vst [vmem:[#allocation28_spill] sm:$0xff] %v4124_v28  ;;  %v1051_v29 = vld [vmem:[#allocation2 + $0x29] sm:$0xff] }
  0xec   : > { %3053 = vmatmul.msk.f32.gmra.mxu1 %vm991_vm1, %v1265_v11  ;;  %v1094_v14 = vmul.f32 %v3938_v41, %v1084_v57  ;;  %v1238_v16 = vmul.f32 %v4017_v47, %v1228_v60  ;;  %v1166_v20 = vmul.f32 %v3971_v10, %v1156_v58  ;;  %v1183_v23 = vmul.f32 %v4022_v48, %v1017_v54 }
  0xed   : > { %v977_v19 = vpop.f32.mrf.mxu0  ;;  %v1035_v37 = vmul.f32 %v3921_v31, %v1025_v62  ;;  %v1121_v44 = vmul.f32 %v3949_v49, %v1111_v0  ;;  %5120 = vst [vmem:[#allocation29_spill] sm:$0xff] %v4131_v51  ;;  %v812_v52 = vand.u32 7, %v4112_v9  ;;  %v1061_v40 = vmul.f32 %v3926_v32, %v1051_v29 }
  0xee   : > { %v978_v13 = vadd.f32 %v3894_v17, %v977_v19  ;;  %v1246_v26 = vadd.f32 %v1238_v16, %v1219_v15  ;;  %v1102_v33 = vadd.f32 %v1094_v14, %v1068_v12  ;;  %v1174_v38 = vadd.f32 %v1166_v20, %v1147_v22 }
  0xef   : > { %v1193_v43 = vmul.f32 %v3988_v21, %v1183_v23  ;;  %v1212_v54 = vmul.f32 %v4006_v36, %v1051_v29  ;;  %v1069_v62 = vadd.f32 %v1061_v40, %v1035_v37  ;;  %v1140_v0 = vmul.f32 %v3962_v59, %v1051_v29 }
  0xf0   : > { %v989_v45 = vmax.f32 %v978_v13, 0.0  ;;  %v1258_v46 = vadd.f32 %v4043_v18, %v1246_v26  ;;  %v1129_v11 = vadd.f32 %v1121_v44, %v1102_v33  ;;  %vm862_vm3 = vcmp.gt.s32.totalorder %v812_v52, 0 }
  0xf1   : > { %v1077_v53 = vld [vmem:[#allocation2 + $0x2a] sm:$0xff]  ;;  %v1201_v30 = vadd.f32 %v1193_v43, %v1174_v38  ;;  %v4156_v37 = vsel %vm4141_vm2, 1.0, %v5059_v6  ;;  %vm4172_vm4 = vcmp.lt.s32.totalorder %v812_v52, 7 }
  0xf2   : > { %v1018_v55 = vld [vmem:[#allocation2 + $0x30] sm:$0xff]  ;;  %1010 = vst.msk [vmem:[#allocation2 + $0x39] sm:$0xff] %vm991_vm1, %v989_v45  ;;  %v1266_v57 = vmax.f32 %v1258_v46, 0.0  ;;  %v1085_v58 = vmul.f32 %v4124_v28, %v1077_v53  ;;  %v1157_v60 = vmul.f32 %v4078_v1, %v1077_v53  ;;  %v1229_v61 = vmul.f32 %v4025_v50, %v1077_v53 }
  0xf3   : > { %v1112_v12 = vmul.f32 %v4090_v27, %v1018_v55  ;;  %v1220_v15 = vadd.f32 %v1212_v54, %v1201_v30  ;;  %v1026_v19 = vmul.f32 %v4131_v51, %v1018_v55  ;;  %v1148_v20 = vadd.f32 %v1140_v0, %v1129_v11  ;;  %v1052_v29 = vld [vmem:[#allocation2 + $0x31] sm:$0xff]  ;;  %5123 = vst [vmem:[#allocation30_spill] sm:$0xff] %v4156_v37 }
  0xf4   : > { %3054 = vmatmul.msk.f32.gmra.mxu1 %vm991_vm1, %v1266_v57  ;;  %v1095_v14 = vmul.f32 %v3938_v41, %v1085_v58  ;;  %v1239_v16 = vmul.f32 %v4017_v47, %v1229_v61  ;;  %v1167_v23 = vmul.f32 %v3971_v10, %v1157_v60  ;;  %v1184_v35 = vmul.f32 %v4050_v25, %v1018_v55  ;;  %v1363_v52 = vld [vmem:[%s5042_s7 + $0x30] sm:$0xff] }
  0xf5   : > { %v980_v22 = vpop.f32.mrf.mxu0  ;;  %v1122_v44 = vmul.f32 %v3949_v49, %v1112_v12  ;;  %v1036_v40 = vmul.f32 %v3921_v31, %v1026_v19  ;;  %v1062_v53 = vmul.f32 %v3926_v32, %v1052_v29  ;;  %v1213_v55 = vmul.f32 %v4006_v36, %v1052_v29 }
  0xf6   : > { %v981_v13 = vadd.f32 %v3894_v17, %v980_v22  ;;  %v1247_v26 = vadd.f32 %v1239_v16, %v1220_v15  ;;  %v1103_v33 = vadd.f32 %v1095_v14, %v1069_v62  ;;  %v1175_v38 = vadd.f32 %v1167_v23, %v1148_v20  ;;  %v1364_v20 = vld [vmem:[%s5042_s7 + $0x38] sm:$0xff] }
  0xf7   : > { %v1194_v43 = vmul.f32 %v3988_v21, %v1184_v35  ;;  %v4163_v17 = vsel %vm862_vm3, 1.0, %v5059_v6  ;;  %v1141_v0 = vmul.f32 %v3962_v59, %v1052_v29  ;;  %v1070_v15 = vadd.f32 %v1062_v53, %v1036_v40  ;;  %1401 = vmatpush.msra.mxu2 %v1364_v20 }
  0xf8   : > { %v990_v45 = vmax.f32 %v981_v13, 0.0  ;;  %v1259_v46 = vadd.f32 %v4043_v18, %v1247_v26  ;;  %5124 = vst [vmem:[#allocation31_spill] sm:$0xff] %v4163_v17  ;;  %v1130_v57 = vadd.f32 %v1122_v44, %v1103_v33  ;;  %v4196_v44 = vsel %vm4172_vm4, 1.0, %v5059_v6 }
  0xf9   : > { %v1078_v30 = vld [vmem:[#allocation2 + $0x32] sm:$0xff]  ;;  %v1202_v54 = vadd.f32 %v1194_v43, %v1175_v38  ;;  %v1362_v43 = vld [vmem:[%s5042_s7 + $0x28] sm:$0xff]  ;;  %5127 = vst [vmem:[#allocation32_spill] sm:$0xff] %v4196_v44  ;;  %1402 = vmatpush.msra.mxu2 %v1363_v52 }
  0xfa   : > { %v1019_v11 = vld [vmem:[#allocation2 + $0x38] sm:$0xff]  ;;  %1011 = vst.msk [vmem:[#allocation2 + $0x41] sm:$0xff] %vm991_vm1, %v990_v45  ;;  %v1267_v58 = vmax.f32 %v1259_v46, 0.0  ;;  %v1086_v60 = vmul.f32 %v4156_v37, %v1078_v30  ;;  %v1158_v61 = vmul.f32 %v4124_v28, %v1078_v30  ;;  %v1230_v62 = vmul.f32 %v4078_v1, %v1078_v30 }
  0xfb   : > { %v1027_v12 = vmul.f32 %v4163_v17, %v1019_v11  ;;  %v1113_v14 = vmul.f32 %v4131_v51, %v1019_v11  ;;  %v1221_v19 = vadd.f32 %v1213_v55, %v1202_v54  ;;  %v1149_v23 = vadd.f32 %v1141_v0, %v1130_v57  ;;  %v1053_v29 = vld [vmem:[#allocation2 + $0x39] sm:$0xff]  ;;  %1403 = vmatpush.msra.mxu2 %v1362_v43 }
  0xfc   : > { %3055 = vmatmul.msk.f32.gmra.mxu1 %vm991_vm1, %v1267_v58  ;;  %v1096_v16 = vmul.f32 %v3938_v41, %v1086_v60  ;;  %v1240_v22 = vmul.f32 %v4017_v47, %v1230_v62  ;;  %v1168_v35 = vmul.f32 %v3971_v10, %v1158_v61  ;;  %v1185_v13 = vmul.f32 %v4090_v27, %v1019_v11  ;;  %v1361_v54 = vld [vmem:[%s5042_s7 + $0x20] sm:$0xff] }
  0xfd   : > { %v1123_v38 = vmul.f32 %v3949_v49, %v1113_v14  ;;  %v1037_v45 = vmul.f32 %v3921_v31, %v1027_v12  ;;  %v1063_v55 = vmul.f32 %v3926_v32, %v1053_v29  ;;  %v1142_v57 = vmul.f32 %v3962_v59, %v1053_v29  ;;  %v1360_v32 = vld [vmem:[%s5042_s7 + $0x18] sm:$0xff]  ;;  %1404 = vmatpush.msra.mxu2 %v1361_v54 }
  0xfe   : > { %v1248_v26 = vadd.f32 %v1240_v22, %v1221_v19  ;;  %v1104_v33 = vadd.f32 %v1096_v16, %v1070_v15  ;;  %v1176_v46 = vadd.f32 %v1168_v35, %v1149_v23  ;;  %v1195_v40 = vmul.f32 %v3988_v21, %v1185_v13 }
  0xff   : > { %v1214_v60 = vmul.f32 %v4006_v36, %v1053_v29  ;;  %v1071_v14 = vadd.f32 %v1063_v55, %v1037_v45  ;;  %1405 = vmatpush.msra.mxu2 %v1360_v32 }
 0x100   : > { %v1260_v53 = vadd.f32 %v4043_v18, %v1248_v26  ;;  %v1131_v30 = vadd.f32 %v1123_v38, %v1104_v33  ;;  %v1203_v58 = vadd.f32 %v1195_v40, %v1176_v46  ;;  %v1225_v46 = vld [vmem:[#allocation2 + $0x4a] sm:$0xff] }
 0x101   : > { %v1079_v11 = vld [vmem:[#allocation2 + $0x3a] sm:$0xff]  ;;  %v1152_v12 = vld [vmem:[#allocation2 + $0x42] sm:$0xff] }
 0x102   : > { %v1106_v31 = vld [vmem:[#allocation2 + $0x40] sm:$0xff]  ;;  %v1268_v61 = vmax.f32 %v1260_v53, 0.0  ;;  %v1087_v62 = vmul.f32 %v4196_v44, %v1079_v11  ;;  %v1159_v0 = vmul.f32 %v4156_v37, %v1079_v11  ;;  %v1231_v9 = vmul.f32 %v4124_v28, %v1079_v11  ;;  %v1179_v26 = vld [vmem:[#allocation2 + $0x48] sm:$0xff] }
 0x103   : > { %v1222_v15 = vadd.f32 %v1214_v60, %v1203_v58  ;;  %v1114_v16 = vmul.f32 %v4163_v17, %v1106_v31  ;;  %v1150_v20 = vadd.f32 %v1142_v57, %v1131_v30  ;;  %v1133_v23 = vld [vmem:[#allocation2 + $0x41] sm:$0xff]  ;;  %v1160_v35 = vmul.f32 %v4196_v44, %v1152_v12  ;;  %v1206_v57 = vld [vmem:[#allocation2 + $0x49] sm:$0xff] }
 0x104   : > { %3056 = vmatmul.msk.f32.gmra.mxu1 %vm991_vm1, %v1268_v61  ;;  %v1097_v19 = vmul.f32 %v3938_v41, %v1087_v62  ;;  %v1241_v22 = vmul.f32 %v4017_v47, %v1231_v9  ;;  %v1169_v52 = vmul.f32 %v3971_v10, %v1159_v0  ;;  %v1186_v13 = vmul.f32 %v4131_v51, %v1106_v31 }
 0x105   : > { %v1124_v43 = vmul.f32 %v3949_v49, %v1114_v16  ;;  %v1232_v41 = vmul.f32 %v4156_v37, %v1152_v12  ;;  %v1143_v53 = vmul.f32 %v3962_v59, %v1133_v23  ;;  %v1187_v54 = vmul.f32 %v4163_v17, %v1179_v26 }
 0x106   : > { %v1249_v29 = vadd.f32 %v1241_v22, %v1222_v15  ;;  %v1177_v33 = vadd.f32 %v1169_v52, %v1150_v20  ;;  %v1105_v38 = vadd.f32 %v1097_v19, %v1071_v14  ;;  %v1196_v45 = vmul.f32 %v3988_v21, %v1186_v13  ;;  %v3291_v52 = vld [vmem:[#allocation7] ss:$0 sm:$0xff] }
 0x107   : > { %v1215_v11 = vmul.f32 %v4006_v36, %v1133_v23  ;;  %v1170_v49 = vmul.f32 %v3971_v10, %v1160_v35  ;;  %v1233_v31 = vmul.f32 %v4196_v44, %v1225_v46  ;;  %v1242_v62 = vmul.f32 %v4017_v47, %v1232_v41 }
 0x108   : > { %v1261_v40 = vadd.f32 %v4043_v18, %v1249_v29  ;;  %v1132_v30 = vadd.f32 %v1124_v43, %v1105_v38  ;;  %v1204_v55 = vadd.f32 %v1196_v45, %v1177_v33  ;;  %v1197_v59 = vmul.f32 %v3988_v21, %v1187_v54  ;;  %v1359_v21 = vld [vmem:[%s5042_s7 + $0x10] sm:$0xff] }
 0x109   : > { %v1216_v9 = vmul.f32 %v4006_v36, %v1206_v57  ;;  %v1243_v14 = vmul.f32 %v4017_v47, %v1233_v31  ;;  %v1358_v36 = vld [vmem:[%s5042_s7 + $0x8] sm:$0xff]  ;;  %1406 = vmatpush.msra.mxu2 %v1359_v21  ;;  %v1357_v47 = vld [vmem:[%s5042_s7] sm:$0xff] }
 0x10a   : > { %v1269_v58 = vmax.f32 %v1261_v40, 0.0  ;;  %v1151_v60 = vadd.f32 %v1143_v53, %v1132_v30  ;;  %v1223_v61 = vadd.f32 %v1215_v11, %v1204_v55 }
 0x10b   : > { %1407 = vmatpush.msra.mxu2 %v1358_v36 }
 0x10c   : > { %3057 = vmatmul.msk.f32.gmra.mxu1 %vm991_vm1, %v1269_v58  ;;  %v1178_v0 = vadd.f32 %v1170_v49, %v1151_v60  ;;  %v1250_v12 = vadd.f32 %v1242_v62, %v1223_v61  ;;  %v3069_v62 = vld [vmem:[%s5044_s9 + $0x18] sm:$0xff] }
 0x10d   : > { %1408 = vmatpush.msra.mxu2 %v1357_v47  ;;  %1529 = vmatpush.msra.mxu3 %v3069_v62 }
 0x10e   : > { %v1205_v32 = vadd.f32 %v1197_v59, %v1178_v0  ;;  %v1262_v15 = vadd.f32 %v4043_v18, %v1250_v12  ;;  %v3068_v0 = vld [vmem:[%s5044_s9 + $0x10] sm:$0xff]  ;;  %v1479_v59 = vld [vmem:[%s5044_s9 + $0x8] sm:$0xff]  ;;  %v1478_v12 = vld [vmem:[%s5044_s9] sm:$0xff] }
 0x10f   : > { %1594 = vmatpush.msrb.mxu0 %v1479_v59  ;;  %1530 = vmatpush.msra.mxu3 %v3068_v0  ;;  %v3116_v0 = vld [vmem:[%s5044_s9 + $0x50] sm:$0xff]  ;;  %v3147_v59 = vld [vmem:[%s5044_s9 + $0x88] sm:$0xff] }
 0x110   : > { %v1224_v16 = vadd.f32 %v1216_v9, %v1205_v32  ;;  %v1270_v10 = vmax.f32 %v1262_v15, 0.0  ;;  %v1480_v9 = vld [vmem:[#allocation3 + $0x1] sm:$0xff]  ;;  %v3087_v32 = vld [vmem:[%s5044_s9 + $0x28] sm:$0xff] }
 0x111   : > { %1595 = vmatpush.msrb.mxu0 %v1478_v12  ;;  %3070 = vmatmul.msk.f32.vlgmr.msra.gmra.mxu3 %vm917_vm0, %v1480_v9  ;;  %v3137_v9 = vld [vmem:[%s5044_s9 + $0x78] sm:$0xff]  ;;  %v3146_v12 = vld [vmem:[%s5044_s9 + $0x80] sm:$0xff] }
 0x112   : > { %v1251_v19 = vadd.f32 %v1243_v14, %v1224_v16  ;;  %v1462_v14 = vld [vmem:[#allocation3] sm:$0xff]  ;;  %1678 = vmatpush.msrb.mxu3 %v3087_v32  ;;  %v3107_v16 = vld [vmem:[%s5044_s9 + $0x48] sm:$0xff] }
 0x113   : > { %v1470_v15 = vmul.f32 %v3908_v24, %v1462_v14  ;;  %1854 = vmatpush.msrb.mxu2 %v3107_v16 }
 0x114   : > { %3058 = vmatmul.msk.f32.gmra.mxu1 %vm991_vm1, %v1270_v10  ;;  %v1263_v22 = vadd.f32 %v4043_v18, %v1251_v19  ;;  %v3097_v10 = vld [vmem:[%s5044_s9 + $0x38] sm:$0xff]  ;;  %v3106_v19 = vld [vmem:[%s5044_s9 + $0x40] sm:$0xff] }
 0x115   : > { %3078 = vmatmul.msk.f32.vlgmr.msrb.gmra.mxu0 %vm917_vm0, %v1470_v15  ;;  %1770 = vmatpush.msrb.mxu1 %v3097_v10 }
 0x116   : > { %v1271_v20 = vmax.f32 %v1263_v22, 0.0  ;;  %v3096_v22 = vld [vmem:[%s5044_s9 + $0x30] sm:$0xff]  ;;  %1855 = vmatpush.msrb.mxu2 %v3106_v19 }
 0x117   : > { %1771 = vmatpush.msrb.mxu1 %v3096_v22 }
 0x119   : > { %2122 = vmatpush.msra.mxu1 %v3137_v9 }
 0x11c   : > { %3059 = vmatmul.msk.f32.gmra.mxu1 %vm991_vm1, %v1271_v20  ;;  %v4285_v20 = vld [vmem:[#allocation9] ss:$0 sm:$0xff] }
 0x161   : > { %v1325_v18 = vpop.f32.mrf.mxu1 }
 0x162   : > { %v1326_v23 = vadd.f32 %v3291_v52, %v1325_v18 }
 0x164   : > { %v1349_v35 = vmax.f32 %v1326_v23, 0.0 }
 0x166   : > { %3060 = vmatmul.msk.f32.vlgmr.msra.gmra.mxu2 %vm991_vm1, %v1349_v35 }
 0x167   : > { %2214 = vmatpush.msra.mxu2 %v3147_v59 }
 0x169   : > { %v1328_v13 = vpop.f32.mrf.mxu1  ;;  %2215 = vmatpush.msra.mxu2 %v3146_v12 }
 0x16a   : > { %v1329_v26 = vadd.f32 %v3291_v52, %v1328_v13 }
 0x16c   : > { %v1350_v29 = vmax.f32 %v1329_v26, 0.0 }
 0x16e   : > { %3061 = vmatmul.msk.f32.gmra.mxu2 %vm991_vm1, %v1350_v29 }
 0x171   : > { %v1331_v33 = vpop.f32.mrf.mxu1 }
 0x172   : > { %v1332_v38 = vadd.f32 %v3291_v52, %v1331_v33 }
 0x174   : > { %v1351_v43 = vmax.f32 %v1332_v38, 0.0 }
 0x176   : > { %3062 = vmatmul.msk.f32.gmra.mxu2 %vm991_vm1, %v1351_v43 }
 0x179   : > { %v1334_v45 = vpop.f32.mrf.mxu1 }
 0x17a   : > { %v1335_v41 = vadd.f32 %v3291_v52, %v1334_v45 }
 0x17c   : > { %v1352_v46 = vmax.f32 %v1335_v41, 0.0 }
 0x17e   : > { %3063 = vmatmul.msk.f32.gmra.mxu2 %vm991_vm1, %v1352_v46 }
 0x181   : > { %v1337_v40 = vpop.f32.mrf.mxu1 }
 0x182   : > { %v1338_v53 = vadd.f32 %v3291_v52, %v1337_v40 }
 0x184   : > { %v1353_v30 = vmax.f32 %v1338_v53, 0.0 }
 0x186   : > { %3064 = vmatmul.msk.f32.gmra.mxu2 %vm991_vm1, %v1353_v30 }
 0x189   : > { %v1340_v54 = vpop.f32.mrf.mxu1 }
 0x18a   : > { %v1341_v55 = vadd.f32 %v3291_v52, %v1340_v54 }
 0x18c   : > { %v1354_v11 = vmax.f32 %v1341_v55, 0.0 }
 0x18e   : > { %3065 = vmatmul.msk.f32.gmra.mxu2 %vm991_vm1, %v1354_v11 }
 0x191   : > { %v1343_v57 = vpop.f32.mrf.mxu1 }
 0x192   : > { %v1344_v58 = vadd.f32 %v3291_v52, %v1343_v57 }
 0x194   : > { %v1355_v60 = vmax.f32 %v1344_v58, 0.0 }
 0x196   : > { %3066 = vmatmul.msk.f32.gmra.mxu2 %vm991_vm1, %v1355_v60 }
 0x199   : > { %v1346_v49 = vpop.f32.mrf.mxu1 }
 0x19a   : > { %v1347_v31 = vadd.f32 %v3291_v52, %v1346_v49  ;;  %v3086_v52 = vld [vmem:[%s5044_s9 + $0x20] sm:$0xff] }
 0x19b   : > { %1679 = vmatpush.msrb.mxu3 %v3086_v52 }
 0x19c   : > { %v1356_v61 = vmax.f32 %v1347_v31, 0.0 }
 0x19e   : > { %3067 = vmatmul.msk.f32.gmra.mxu2 %vm991_vm1, %v1356_v61  ;;  %vm1452_vm1 = vcmask 123904  }
 0x19f   : > { %1453 = vst.msk [vmem:[#allocation3 + $0x50] sm:$0x3] %vm1452_vm1, %v5059_v6 }
 0x1e9   : > { %v1410_v21 = vpop.f32.mrf.mxu2 }
 0x1ea   : > { %v1411_v36 = vadd.f32 %v4285_v20, %v1410_v21 }
 0x1ec   : > { %v1434_v47 = vadd.f32 %v1411_v36, %v3806_v2 }
 0x1ee   : > { %1454 = vst.msk [vmem:[#allocation3 + $0x9] sm:$0xff] %vm917_vm0, %v1434_v47  ;;  %v3307_v47 = vld [vmem:[%s3797_s21 + $0x30] sm:$0xff] }
 0x1f1   : > { %v1413_v18 = vpop.f32.mrf.mxu2 }
 0x1f2   : > { %v1414_v23 = vadd.f32 %v4285_v20, %v1413_v18 }
 0x1f4   : > { %v1435_v35 = vadd.f32 %v1414_v23, %v3811_v3 }
 0x1f5   : > { %v1481_v13 = vld [vmem:[#allocation3 + $0x9] sm:$0xff] }
 0x1f6   : > { %v1463_v26 = vld [vmem:[#allocation3 + $0x8] sm:$0xff]  ;;  %1455 = vst.msk [vmem:[#allocation3 + $0x11] sm:$0xff] %vm917_vm0, %v1435_v35  ;;  %3071 = vmatmul.msk.f32.gmra.mxu3 %vm917_vm0, %v1481_v13  ;;  %3108 = vmatmul.msk.f32.vlgmr.msrb.gmra.mxu2 %vm917_vm0, %v1481_v13 }
 0x1f7   : > { %v1471_v2 = vmul.f32 %v3941_v42, %v1463_v26  ;;  %v1721_v29 = vmul.f32 %v3908_v24, %v1463_v26 }
 0x1f9   : > { %3079 = vmatmul.msk.f32.gmra.mxu0 %vm917_vm0, %v1471_v2  ;;  %3098 = vmatmul.msk.f32.vlgmr.msrb.gmra.mxu1 %vm917_vm0, %v1721_v29  ;;  %v1416_v33 = vpop.f32.mrf.mxu2  ;;  %v3308_v29 = vld [vmem:[%s3797_s21 + $0x38] sm:$0xff] }
 0x1fa   : > { %v1417_v38 = vadd.f32 %v4285_v20, %v1416_v33 }
 0x1fc   : > { %v1436_v3 = vadd.f32 %v1417_v38, %v3816_v4 }
 0x1fd   : > { %v4304_v43 = vld [vmem:[#allocation3 + $0x11] sm:$0xff] }
 0x1fe   : > { %v4306_v45 = vld [vmem:[#allocation3 + $0x10] sm:$0xff]  ;;  %1456 = vst.msk [vmem:[#allocation3 + $0x19] sm:$0xff] %vm917_vm0, %v1436_v3  ;;  %3072 = vmatmul.msk.f32.gmra.mxu3 %vm917_vm0, %v4304_v43  ;;  %3109 = vmatmul.msk.f32.gmra.mxu2 %vm917_vm0, %v4304_v43 }
 0x1ff   : > { %v1472_v41 = vmul.f32 %v3966_v63, %v4306_v45  ;;  %v1722_v46 = vmul.f32 %v3941_v42, %v4306_v45 }
 0x201   : > { %3080 = vmatmul.msk.f32.gmra.mxu0 %vm917_vm0, %v1472_v41  ;;  %3099 = vmatmul.msk.f32.gmra.mxu1 %vm917_vm0, %v1722_v46  ;;  %v1419_v4 = vpop.f32.mrf.mxu2  ;;  %v1621_v46 = vld [vmem:[#allocation3 + $0x2] sm:$0xff] }
 0x202   : > { %v1420_v40 = vadd.f32 %v4285_v20, %v1419_v4  ;;  %v1889_v4 = vld [vmem:[#allocation3 + $0xa] sm:$0xff] }
 0x204   : > { %v1437_v53 = vadd.f32 %v1420_v40, %v3821_v5  ;;  %v3117_v5 = vld [vmem:[%s5044_s9 + $0x58] sm:$0xff]  ;;  %v1629_v40 = vmul.f32 %v3933_v39, %v1621_v46 }
 0x205   : > { %v4321_v30 = vld [vmem:[#allocation3 + $0x19] sm:$0xff]  ;;  %1946 = vmatpush.msra.mxu0 %v3117_v5  ;;  %v1897_v5 = vmul.f32 %v3933_v39, %v1889_v4 }
 0x206   : > { %v4323_v54 = vld [vmem:[#allocation3 + $0x18] sm:$0xff]  ;;  %1457 = vst.msk [vmem:[#allocation3 + $0x21] sm:$0xff] %vm917_vm0, %v1437_v53  ;;  %3073 = vmatmul.msk.f32.gmra.mxu3 %vm917_vm0, %v4321_v30  ;;  %3110 = vmatmul.msk.f32.gmra.mxu2 %vm917_vm0, %v4321_v30 }
 0x207   : > { %v1473_v55 = vmul.f32 %v4022_v48, %v4323_v54  ;;  %v1723_v11 = vmul.f32 %v3966_v63, %v4323_v54  ;;  %1947 = vmatpush.msra.mxu0 %v3116_v0 }
 0x209   : > { %3081 = vmatmul.msk.f32.gmra.mxu0 %vm917_vm0, %v1473_v55  ;;  %3100 = vmatmul.msk.f32.gmra.mxu1 %vm917_vm0, %v1723_v11  ;;  %v1422_v57 = vpop.f32.mrf.mxu2 }
 0x20a   : > { %v1423_v58 = vadd.f32 %v4285_v20, %v1422_v57  ;;  %v3126_v57 = vld [vmem:[%s5044_s9 + $0x60] sm:$0xff] }
 0x20c   : > { %v1438_v60 = vadd.f32 %v1423_v58, %v3834_v7  ;;  %v3127_v7 = vld [vmem:[%s5044_s9 + $0x68] sm:$0xff] }
 0x20d   : > { %v4341_v49 = vld [vmem:[#allocation3 + $0x21] sm:$0xff]  ;;  %2038 = vmatpush.msra.mxu3 %v3127_v7  ;;  %v2157_v58 = vld [vmem:[#allocation3 + $0x12] sm:$0xff] }
 0x20e   : > { %v4343_v31 = vld [vmem:[#allocation3 + $0x20] sm:$0xff]  ;;  %1458 = vst.msk [vmem:[#allocation3 + $0x29] sm:$0xff] %vm917_vm0, %v1438_v60  ;;  %3074 = vmatmul.msk.f32.gmra.mxu3 %vm917_vm0, %v4341_v49  ;;  %3111 = vmatmul.msk.f32.gmra.mxu2 %vm917_vm0, %v4341_v49  ;;  %v1630_v60 = vmul.f32 %v3956_v56, %v1889_v4  ;;  %v1631_v0 = vmul.f32 %v4001_v34, %v2157_v58 }
 0x20f   : > { %v1474_v61 = vmul.f32 %v4050_v25, %v4343_v31  ;;  %v1724_v62 = vmul.f32 %v4022_v48, %v4343_v31  ;;  %2039 = vmatpush.msra.mxu3 %v3126_v57  ;;  %v2158_v7 = vld [vmem:[#allocation3 + $0x1a] sm:$0xff] }
 0x210   : > { %v2166_v59 = vmul.f32 %v3956_v56, %v2158_v7  ;;  %v1899_v9 = vmul.f32 %v4001_v34, %v2158_v7 }
 0x211   : > { %3082 = vmatmul.msk.f32.gmra.mxu0 %vm917_vm0, %v1474_v61  ;;  %3101 = vmatmul.msk.f32.gmra.mxu1 %vm917_vm0, %v1724_v62  ;;  %v1425_v32 = vpop.f32.mrf.mxu2  ;;  %v2165_v61 = vmul.f32 %v3933_v39, %v2157_v58  ;;  %v1898_v62 = vmul.f32 %v3956_v56, %v2157_v58 }
 0x212   : > { %v1426_v14 = vadd.f32 %v4285_v20, %v1425_v32  ;;  %v1632_v32 = vmul.f32 %v4025_v50, %v2158_v7 }
 0x214   : > { %v1439_v15 = vadd.f32 %v1426_v14, %v3851_v8  ;;  %v3136_v8 = vld [vmem:[%s5044_s9 + $0x70] sm:$0xff] }
 0x215   : > { %v4373_v16 = vld [vmem:[#allocation3 + $0x29] sm:$0xff]  ;;  %2123 = vmatpush.msra.mxu1 %v3136_v8 }
 0x216   : > { %v4375_v10 = vld [vmem:[#allocation3 + $0x28] sm:$0xff]  ;;  %1459 = vst.msk [vmem:[#allocation3 + $0x31] sm:$0xff] %vm917_vm0, %v1439_v15  ;;  %3075 = vmatmul.msk.f32.gmra.mxu3 %vm917_vm0, %v4373_v16  ;;  %3112 = vmatmul.msk.f32.gmra.mxu2 %vm917_vm0, %v4373_v16 }
 0x217   : > { %v1475_v19 = vmul.f32 %v4090_v27, %v4375_v10  ;;  %v1725_v22 = vmul.f32 %v4050_v25, %v4375_v10  ;;  %v2159_v12 = vld [vmem:[#allocation3 + $0x22] sm:$0xff] }
 0x218   : > { %v1900_v14 = vmul.f32 %v4025_v50, %v2159_v12 }
 0x219   : > { %3083 = vmatmul.msk.f32.gmra.mxu0 %vm917_vm0, %v1475_v19  ;;  %3102 = vmatmul.msk.f32.gmra.mxu1 %vm917_vm0, %v1725_v22  ;;  %v1428_v21 = vpop.f32.mrf.mxu2  ;;  %v1633_v19 = vmul.f32 %v4078_v1, %v2159_v12 }
 0x21a   : > { %v1429_v36 = vadd.f32 %v4285_v20, %v1428_v21 }
 0x21c   : > { %v1440_v52 = vadd.f32 %v3307_v47, %v1429_v36 }
 0x21d   : > { %v4393_v18 = vld [vmem:[#allocation3 + $0x31] sm:$0xff] }
 0x21e   : > { %v4395_v23 = vld [vmem:[#allocation3 + $0x30] sm:$0xff]  ;;  %1460 = vst.msk [vmem:[#allocation3 + $0x39] sm:$0xff] %vm917_vm0, %v1440_v52  ;;  %3076 = vmatmul.msk.f32.gmra.mxu3 %vm917_vm0, %v4393_v18  ;;  %3113 = vmatmul.msk.f32.gmra.mxu2 %vm917_vm0, %v4393_v18 }
 0x21f   : > { %v1476_v35 = vmul.f32 %v4131_v51, %v4395_v23  ;;  %v1726_v13 = vmul.f32 %v4090_v27, %v4395_v23  ;;  %v2160_v15 = vld [vmem:[#allocation3 + $0x2a] sm:$0xff]  ;;  %v1993_v4 = vmul.f32 %v4050_v25, %v4395_v23 }
 0x220   : > { %v1901_v22 = vmul.f32 %v4078_v1, %v2160_v15  ;;  %v1634_v21 = vmul.f32 %v4124_v28, %v2160_v15 }
 0x221   : > { %3084 = vmatmul.msk.f32.gmra.mxu0 %vm917_vm0, %v1476_v35  ;;  %3103 = vmatmul.msk.f32.gmra.mxu1 %vm917_vm0, %v1726_v13  ;;  %v1431_v26 = vpop.f32.mrf.mxu2 }
 0x222   : > { %v1432_v2 = vadd.f32 %v4285_v20, %v1431_v26 }
 0x224   : > { %v1441_v33 = vadd.f32 %v3308_v29, %v1432_v2  ;;  %v1989_v29 = vmul.f32 %v3908_v24, %v4306_v45  ;;  %v1992_v45 = vmul.f32 %v4022_v48, %v4375_v10  ;;  %v1597_v10 = vpop.f32.mrf.mxu0 }
 0x225   : > { %v4410_v38 = vld [vmem:[#allocation3 + $0x39] sm:$0xff] }
 0x226   : > { %v4412_v3 = vld [vmem:[#allocation3 + $0x38] sm:$0xff]  ;;  %1461 = vst.msk [vmem:[#allocation3 + $0x41] sm:$0xff] %vm917_vm0, %v1441_v33  ;;  %3077 = vmatmul.msk.f32.gmra.mxu3 %vm917_vm0, %v4410_v38  ;;  %3114 = vmatmul.msk.f32.gmra.mxu2 %vm917_vm0, %v4410_v38  ;;  %v4500_v33 = vpop.f32.mrf.mxu3 }
 0x227   : > { %v1477_v41 = vmul.f32 %v4163_v17, %v4412_v3  ;;  %v1727_v20 = vmul.f32 %v4131_v51, %v4412_v3  ;;  %v2161_v8 = vld [vmem:[#allocation3 + $0x32] sm:$0xff] }
 0x228   : > { %v1902_v36 = vmul.f32 %v4124_v28, %v2161_v8  ;;  %v1635_v52 = vmul.f32 %v4156_v37, %v2161_v8 }
 0x229   : > { %3085 = vmatmul.msk.f32.gmra.mxu0 %vm917_vm0, %v1477_v41  ;;  %3104 = vmatmul.msk.f32.gmra.mxu1 %vm917_vm0, %v1727_v20  ;;  %v1991_v20 = vmul.f32 %v3966_v63, %v4343_v31 }
 0x22d   : > { %v4426_v53 = vld [vmem:[#allocation3 + $0x41] sm:$0xff] }
 0x22e   : > { %v4428_v55 = vld [vmem:[#allocation3 + $0x40] sm:$0xff]  ;;  %3088 = vmatmul.msk.f32.vlgmr.msrb.gmra.mxu3 %vm917_vm0, %v1629_v40  ;;  %3115 = vmatmul.msk.f32.gmra.mxu2 %vm917_vm0, %v4426_v53  ;;  %v2164_v40 = vld [vmem:[#allocation3 + $0x4a] sm:$0xff] }
 0x22f   : > { %v1728_v11 = vmul.f32 %v4163_v17, %v4428_v55  ;;  %v2162_v47 = vld [vmem:[#allocation3 + $0x3a] sm:$0xff]  ;;  %v2163_v13 = vld [vmem:[#allocation3 + $0x42] sm:$0xff]  ;;  %v2172_v31 = vmul.f32 %v4196_v44, %v2164_v40 }
 0x230   : > { %v1903_v35 = vmul.f32 %v4156_v37, %v2162_v47  ;;  %v1636_v26 = vmul.f32 %v4196_v44, %v2162_v47  ;;  %v1904_v2 = vmul.f32 %v4196_v44, %v2163_v13 }
 0x231   : > { %3105 = vmatmul.msk.f32.gmra.mxu1 %vm917_vm0, %v1728_v11  ;;  %3118 = vmatmul.msk.f32.vlgmr.msra.gmra.mxu0 %vm917_vm0, %v1897_v5  ;;  %v1994_v5 = vmul.f32 %v4090_v27, %v4412_v3 }
 0x236   : > { %3089 = vmatmul.msk.f32.gmra.mxu3 %vm917_vm0, %v1630_v60  ;;  %3148 = vmatmul.msk.f32.vlgmr.msra.gmra.mxu2 %vm917_vm0, %v2165_v61  ;;  %v1995_v61 = vmul.f32 %v4131_v51, %v4428_v55 }
 0x239   : > { %3119 = vmatmul.msk.f32.gmra.mxu0 %vm917_vm0, %v1898_v62  ;;  %3138 = vmatmul.msk.f32.vlgmr.msra.gmra.mxu1 %vm917_vm0, %v4304_v43  ;;  %v2167_v43 = vmul.f32 %v4001_v34, %v2159_v12  ;;  %v2271_v62 = vld [vmem:[%s5046_s11 + $0x10] sm:$0xff] }
 0x23a   : > { %2314 = vmatpush.msrb.mxu0 %v2271_v62 }
 0x23e   : > { %3090 = vmatmul.msk.f32.gmra.mxu3 %vm917_vm0, %v1631_v0  ;;  %3149 = vmatmul.msk.f32.gmra.mxu2 %vm917_vm0, %v2166_v59  ;;  %v1988_v59 = vld [vmem:[#allocation3 + $0x48] sm:$0xff] }
 0x241   : > { %3120 = vmatmul.msk.f32.gmra.mxu0 %vm917_vm0, %v1899_v9  ;;  %3139 = vmatmul.msk.f32.gmra.mxu1 %vm917_vm0, %v4321_v30  ;;  %v2168_v30 = vmul.f32 %v4025_v50, %v2160_v15  ;;  %v1996_v9 = vmul.f32 %v4163_v17, %v1988_v59 }
 0x246   : > { %3091 = vmatmul.msk.f32.gmra.mxu3 %vm917_vm0, %v1632_v32  ;;  %3150 = vmatmul.msk.f32.gmra.mxu2 %vm917_vm0, %v2167_v43 }
 0x249   : > { %3121 = vmatmul.msk.f32.gmra.mxu0 %vm917_vm0, %v1900_v14  ;;  %3140 = vmatmul.msk.f32.gmra.mxu1 %vm917_vm0, %v4341_v49  ;;  %v2169_v49 = vmul.f32 %v4078_v1, %v2161_v8 }
 0x24e   : > { %3092 = vmatmul.msk.f32.gmra.mxu3 %vm917_vm0, %v1633_v19  ;;  %3151 = vmatmul.msk.f32.gmra.mxu2 %vm917_vm0, %v2168_v30  ;;  %v2270_v30 = vld [vmem:[%s5046_s11 + $0x8] sm:$0xff] }
 0x24f   : > { %2315 = vmatpush.msrb.mxu0 %v2270_v30 }
 0x251   : > { %3122 = vmatmul.msk.f32.gmra.mxu0 %vm917_vm0, %v1901_v22  ;;  %3141 = vmatmul.msk.f32.gmra.mxu1 %vm917_vm0, %v4373_v16  ;;  %v2170_v16 = vmul.f32 %v4124_v28, %v2162_v47 }
 0x256   : > { %3093 = vmatmul.msk.f32.gmra.mxu3 %vm917_vm0, %v1634_v21  ;;  %3152 = vmatmul.msk.f32.gmra.mxu2 %vm917_vm0, %v2169_v49 }
 0x259   : > { %3123 = vmatmul.msk.f32.gmra.mxu0 %vm917_vm0, %v1902_v36  ;;  %3142 = vmatmul.msk.f32.gmra.mxu1 %vm917_vm0, %v4393_v18  ;;  %v2171_v18 = vmul.f32 %v4156_v37, %v2163_v13 }
 0x25e   : > { %3094 = vmatmul.msk.f32.gmra.mxu3 %vm917_vm0, %v1635_v52  ;;  %3153 = vmatmul.msk.f32.gmra.mxu2 %vm917_vm0, %v2170_v16  ;;  %v2269_v16 = vld [vmem:[%s5046_s11] sm:$0xff] }
 0x25f   : > { %2316 = vmatpush.msrb.mxu0 %v2269_v16 }
 0x261   : > { %3124 = vmatmul.msk.f32.gmra.mxu0 %vm917_vm0, %v1903_v35  ;;  %3143 = vmatmul.msk.f32.gmra.mxu1 %vm917_vm0, %v4410_v38  ;;  %v1990_v38 = vmul.f32 %v3941_v42, %v4323_v54 }
 0x266   : > { %3095 = vmatmul.msk.f32.gmra.mxu3 %vm917_vm0, %v1636_v26  ;;  %3154 = vmatmul.msk.f32.gmra.mxu2 %vm917_vm0, %v2171_v18 }
 0x269   : > { %3125 = vmatmul.msk.f32.gmra.mxu0 %vm917_vm0, %v1904_v2  ;;  %3144 = vmatmul.msk.f32.gmra.mxu1 %vm917_vm0, %v4426_v53  ;;  %v2080_v53 = vld [vmem:[#allocation3 + $0x49] sm:$0xff] }
 0x26e   : > { %3128 = vmatmul.msk.f32.vlgmr.msra.gmra.mxu3 %vm917_vm0, %v1989_v29  ;;  %3155 = vmatmul.msk.f32.gmra.mxu2 %vm917_vm0, %v2172_v31 }
 0x271   : > { %3145 = vmatmul.msk.f32.gmra.mxu1 %vm917_vm0, %v2080_v53 }
 0x276   : > { %3129 = vmatmul.msk.f32.gmra.mxu3 %vm917_vm0, %v1990_v38  ;;  %v1773_v57 = vpop.f32.mrf.mxu1  ;;  %v1600_v60 = vpop.f32.mrf.mxu0 }
 0x279   : > { %v4505_v41 = vpop.f32.mrf.mxu3  ;;  %v1857_v23 = vpop.f32.mrf.mxu2 }
 0x27a   : > { %v1601_v16 = vadd.f32 %v1600_v60, %v4505_v41 }
 0x27e   : > { %3130 = vmatmul.msk.f32.gmra.mxu3 %vm917_vm0, %v1991_v20  ;;  %v1776_v7 = vpop.f32.mrf.mxu1  ;;  %v1603_v12 = vpop.f32.mrf.mxu0 }
 0x281   : > { %v4510_v46 = vpop.f32.mrf.mxu3  ;;  %v1860_v0 = vpop.f32.mrf.mxu2 }
 0x282   : > { %v1604_v25 = vadd.f32 %v1603_v12, %v4510_v46 }
 0x286   : > { %3131 = vmatmul.msk.f32.gmra.mxu3 %vm917_vm0, %v1992_v45  ;;  %v1779_v32 = vpop.f32.mrf.mxu1  ;;  %v1606_v14 = vpop.f32.mrf.mxu0 }
 0x289   : > { %v4516_v54 = vpop.f32.mrf.mxu3  ;;  %v4543_v55 = vpop.f32.mrf.mxu2 }
 0x28e   : > { %3132 = vmatmul.msk.f32.gmra.mxu3 %vm917_vm0, %v1993_v4  ;;  %v4545_v19 = vpop.f32.mrf.mxu1  ;;  %v4552_v8 = vpop.f32.mrf.mxu0 }
 0x291   : > { %v4524_v11 = vpop.f32.mrf.mxu3  ;;  %v4550_v22 = vpop.f32.mrf.mxu2 }
 0x296   : > { %3133 = vmatmul.msk.f32.gmra.mxu3 %vm917_vm0, %v1994_v5  ;;  %v4554_v49 = vpop.f32.mrf.mxu1  ;;  %v4558_v52 = vpop.f32.mrf.mxu0  ;;  %v1598_v5 = vadd.f32 %v1597_v10, %v4500_v33 }
 0x299   : > { %v4529_v58 = vpop.f32.mrf.mxu3  ;;  %v4556_v36 = vpop.f32.mrf.mxu2 }
 0x29e   : > { %3134 = vmatmul.msk.f32.gmra.mxu3 %vm917_vm0, %v1995_v61  ;;  %v4563_v35 = vpop.f32.mrf.mxu1  ;;  %v4567_v18 = vpop.f32.mrf.mxu0 }
 0x2a1   : > { %v4537_v3 = vpop.f32.mrf.mxu3  ;;  %v4565_v13 = vpop.f32.mrf.mxu2 }
 0x2a6   : > { %3135 = vmatmul.msk.f32.gmra.mxu3 %vm917_vm0, %v1996_v9  ;;  %v4569_v2 = vpop.f32.mrf.mxu1  ;;  %v4573_v20 = vpop.f32.mrf.mxu0 }
 0x2a9   : > { %v4541_v43 = vpop.f32.mrf.mxu3  ;;  %v4571_v38 = vpop.f32.mrf.mxu2 }
 0x2ae   : > { %v4577_v4 = vpop.f32.mrf.mxu1  ;;  %v1949_v31 = vpop.f32.mrf.mxu0 }
 0x2b1   : > { %v1681_v15 = vpop.f32.mrf.mxu3  ;;  %v4579_v40 = vpop.f32.mrf.mxu2 }
 0x2b2   : > { %v1705_v61 = vadd.f32 %v1681_v15, %v1598_v5  ;;  %v4588_v15 = vld [vmem:[#allocation10] ss:$0 sm:$0xff] }
 0x2b4   : > { %v1797_v9 = vadd.f32 %v1773_v57, %v1705_v61 }
 0x2b6   : > { %v2125_v62 = vpop.f32.mrf.mxu1  ;;  %v1952_v6 = vpop.f32.mrf.mxu0  ;;  %v1881_v17 = vadd.f32 %v1857_v23, %v1797_v9 }
 0x2b8   : > { %v1973_v28 = vadd.f32 %v1949_v31, %v1881_v17  ;;  %v1607_v17 = vadd.f32 %v1606_v14, %v4516_v54  ;;  %v1610_v14 = vadd.f32 %v4552_v8, %v4524_v11 }
 0x2b9   : > { %v1684_v21 = vpop.f32.mrf.mxu3  ;;  %v2217_v59 = vpop.f32.mrf.mxu2 }
 0x2ba   : > { %v1706_v44 = vadd.f32 %v1684_v21, %v1601_v16 }
 0x2bc   : > { %v1798_v51 = vadd.f32 %v1776_v7, %v1706_v44 }
 0x2be   : > { %v2128_v37 = vpop.f32.mrf.mxu1  ;;  %v1882_v57 = vadd.f32 %v1860_v0, %v1798_v51  ;;  %v1955_v5 = vpop.f32.mrf.mxu0 }
 0x2c0   : > { %v1974_v23 = vadd.f32 %v1952_v6, %v1882_v57 }
 0x2c1   : > { %v1687_v47 = vpop.f32.mrf.mxu3  ;;  %v2220_v27 = vpop.f32.mrf.mxu2 }
 0x2c2   : > { %v1707_v33 = vadd.f32 %v1687_v47, %v1604_v25 }
 0x2c4   : > { %v1799_v34 = vadd.f32 %v1779_v32, %v1707_v33 }
 0x2c6   : > { %v2131_v60 = vpop.f32.mrf.mxu1  ;;  %v1883_v51 = vadd.f32 %v4543_v55, %v1799_v34  ;;  %v1958_v0 = vpop.f32.mrf.mxu0 }
 0x2c8   : > { %v1975_v54 = vadd.f32 %v1955_v5, %v1883_v51 }
 0x2c9   : > { %v1690_v26 = vpop.f32.mrf.mxu3  ;;  %v2223_v25 = vpop.f32.mrf.mxu2 }
 0x2ce   : > { %v2134_v47 = vpop.f32.mrf.mxu1  ;;  %v1961_v8 = vpop.f32.mrf.mxu0 }
 0x2d1   : > { %v1693_v29 = vpop.f32.mrf.mxu3 }
 0x2d9   : > { %v4575_v45 = vpop.f32.mrf.mxu3 }
 0x2e1   : > { %v4581_v53 = vpop.f32.mrf.mxu3 }
 0x2e9   : > { %v4584_v30 = vpop.f32.mrf.mxu3 }
 0x2f1   : > { %v2041_v1 = vpop.f32.mrf.mxu3 }
 0x2f2   : > { %v2065_v50 = vadd.f32 %v2041_v1, %v1973_v28 }
 0x2f4   : > { %v2149_v10 = vadd.f32 %v2125_v62, %v2065_v50  ;;  %v1708_v50 = vadd.f32 %v1690_v26, %v1607_v17  ;;  %v1709_v26 = vadd.f32 %v1693_v29, %v1610_v14  ;;  %v1613_v29 = vadd.f32 %v4558_v52, %v4529_v58  ;;  %v1964_v17 = vpop.f32.mrf.mxu0 }
 0x2f6   : > { %v2241_v61 = vadd.f32 %v2217_v59, %v2149_v10  ;;  %v1800_v6 = vadd.f32 %v4545_v19, %v1708_v50  ;;  %v1801_v19 = vadd.f32 %v4554_v49, %v1709_v26  ;;  %v1710_v33 = vadd.f32 %v4575_v45, %v1613_v29  ;;  %v2137_v49 = vpop.f32.mrf.mxu1 }
 0x2f7   : > { %v1616_v45 = vadd.f32 %v4567_v18, %v4537_v3  ;;  %v2641_v3 = vld [vmem:[%s5050_s15 + $0x50] sm:$0xff] }
 0x2f8   : > { %v4591_v41 = vadd.f32 %v4588_v15, %v2241_v61  ;;  %v1884_v34 = vadd.f32 %v4550_v22, %v1800_v6  ;;  %v1885_v22 = vadd.f32 %v4556_v36, %v1801_v19  ;;  %v1802_v61 = vadd.f32 %v4563_v35, %v1710_v33 }
 0x2f9   : > { %v2044_v44 = vpop.f32.mrf.mxu3 }
 0x2fa   : > { %v2261_v46 = vmax.f32 %v4591_v41, 0.0  ;;  %v2066_v1 = vadd.f32 %v2044_v44, %v1974_v23  ;;  %v1976_v11 = vadd.f32 %v1958_v0, %v1884_v34  ;;  %v1977_v58 = vadd.f32 %v1961_v8, %v1885_v22 }
 0x2fb   : > { %v1886_v35 = vadd.f32 %v4565_v13, %v1802_v61 }
 0x2fc   : > { %v2150_v28 = vadd.f32 %v2128_v37, %v2066_v1  ;;  %3156 = vmatmul.msk.f32.vlgmr.msrb.gmra.mxu0 %vm2276_vm5, %v2261_v46  ;;  %v1711_v1 = vadd.f32 %v4581_v53, %v1616_v45  ;;  %v2640_v53 = vld [vmem:[%s5050_s15 + $0x48] sm:$0xff]  ;;  %v5128_v45 = vmov 0.0  }
 0x2fd   : > { %v1978_v51 = vadd.f32 %v1964_v17, %v1886_v35  ;;  %2352 = vst.msk [vmem:[#allocation4 + $0x8] sm:$0xff] %vm2350_vm6, %v5128_v45  ;;  %v2635_v17 = vld [vmem:[%s5050_s15 + $0x20] sm:$0xff]  ;;  %v4719_v35 = vld [vmem:[#allocation12] ss:$0 sm:$0xff] }
 0x2fe   : > { %v2242_v7 = vadd.f32 %v2220_v27, %v2150_v28  ;;  %v2226_v27 = vpop.f32.mrf.mxu2  ;;  %v2140_v50 = vpop.f32.mrf.mxu1  ;;  %v1803_v28 = vadd.f32 %v4569_v2, %v1711_v1  ;;  %v2638_v2 = vld [vmem:[%s5050_s15 + $0x38] sm:$0xff]  ;;  %2353 = vst.msk [vmem:[#allocation4 + $0x10] sm:$0xff] %vm2350_vm6, %v5128_v45 }
 0x2ff   : > { %2351 = vst.msk [vmem:[#allocation4] sm:$0xff] %vm2350_vm6, %v5128_v45  ;;  %v2634_v1 = vld [vmem:[%s5050_s15 + $0x18] sm:$0xff] }
 0x300   : > { %v4601_v12 = vadd.f32 %v4588_v15, %v2242_v7  ;;  %v2639_v7 = vld [vmem:[%s5050_s15 + $0x40] sm:$0xff]  ;;  %v1887_v26 = vadd.f32 %v4571_v38, %v1803_v28  ;;  %2354 = vst.msk [vmem:[#allocation4 + $0x18] sm:$0xff] %vm2350_vm6, %v5128_v45 }
 0x301   : > { %v2047_v32 = vpop.f32.mrf.mxu3  ;;  %2355 = vst.msk [vmem:[#allocation4 + $0x20] sm:$0xff] %vm2350_vm6, %v5128_v45  ;;  %v2631_v28 = vld [vmem:[%s5050_s15] sm:$0xff] }
 0x302   : > { %v2262_v37 = vmax.f32 %v4601_v12, 0.0  ;;  %v2067_v21 = vadd.f32 %v2047_v32, %v1975_v54  ;;  %v1619_v54 = vadd.f32 %v4573_v20, %v4541_v43  ;;  %2356 = vst.msk [vmem:[#allocation4 + $0x28] sm:$0xff] %vm2350_vm6, %v5128_v45 }
 0x303   : > { %2357 = vst.msk [vmem:[#allocation4 + $0x30] sm:$0xff] %vm2350_vm6, %v5128_v45 }
 0x304   : > { %v2151_v31 = vadd.f32 %v2131_v60, %v2067_v21  ;;  %3157 = vmatmul.msk.f32.gmra.mxu0 %vm2276_vm5, %v2262_v37  ;;  %v1712_v21 = vadd.f32 %v4584_v30, %v1619_v54  ;;  %2358 = vst.msk [vmem:[#allocation4 + $0x38] sm:$0xff] %vm2350_vm6, %v5128_v45 }
 0x305   : > { %2359 = vst.msk [vmem:[#allocation4 + $0x40] sm:$0xff] %vm2350_vm6, %v5128_v45 }
 0x306   : > { %v2243_v55 = vadd.f32 %v2223_v25, %v2151_v31  ;;  %v2229_v5 = vpop.f32.mrf.mxu2  ;;  %v2642_v25 = vld [vmem:[%s5050_s15 + $0x58] sm:$0xff]  ;;  %v1967_v31 = vpop.f32.mrf.mxu0  ;;  %v1804_v20 = vadd.f32 %v4577_v4, %v1712_v21  ;;  %2360 = vst.msk [vmem:[#allocation4 + $0x48] sm:$0xff] %vm2350_vm6, %v5128_v45 }
 0x307   : > { %2675 = vmatpush.msrb.mxu3 %v2642_v25  ;;  %v2632_v25 = vld [vmem:[%s5050_s15 + $0x8] sm:$0xff]  ;;  %2362 = vst.msk [vmem:[#allocation4 + $0x50] sm:$0x3] %vm2361_vm7, %v5128_v45 }
 0x308   : > { %v4612_v62 = vadd.f32 %v4588_v15, %v2243_v55  ;;  %v2143_v55 = vpop.f32.mrf.mxu1  ;;  %v1888_v38 = vadd.f32 %v4579_v40, %v1804_v20 }
 0x309   : > { %v2050_v59 = vpop.f32.mrf.mxu3  ;;  %2676 = vmatpush.msrb.mxu3 %v2641_v3 }
 0x30a   : > { %v2263_v9 = vmax.f32 %v4612_v62, 0.0  ;;  %v2068_v16 = vadd.f32 %v2050_v59, %v1976_v11 }
 0x30b   : > { %2677 = vmatpush.msrb.mxu3 %v2640_v53  ;;  %v2371_v53 = vld [vmem:[#allocation4] sm:$0xff] }
 0x30c   : > { %v2152_v10 = vadd.f32 %v2134_v47, %v2068_v16  ;;  %3158 = vmatmul.msk.f32.gmra.mxu0 %vm2276_vm5, %v2263_v9 }
 0x30d   : > { %2678 = vmatpush.msrb.mxu3 %v2639_v7  ;;  %v4733_v7 = vld [vmem:[%s5048_s13] ss:$0 sm:$0xff] }
 0x30e   : > { %v2244_v57 = vadd.f32 %v2226_v27, %v2152_v10  ;;  %v2232_v0 = vpop.f32.mrf.mxu2  ;;  %v1979_v27 = vadd.f32 %v1967_v31, %v1887_v26  ;;  %v1970_v16 = vpop.f32.mrf.mxu0  ;;  %v4746_v26 = vld [vmem:[%s5048_s13 + $0x2] ss:$0 sm:$0xff] }
 0x30f   : > { %2679 = vmatpush.msrb.mxu3 %v2638_v2  ;;  %v1980_v33 = vadd.f32 %v1970_v16, %v1888_v38 }
 0x310   : > { %v4624_v23 = vadd.f32 %v4588_v15, %v2244_v57  ;;  %v2146_v22 = vpop.f32.mrf.mxu1 }
 0x311   : > { %v2053_v52 = vpop.f32.mrf.mxu3 }
 0x312   : > { %v2264_v60 = vmax.f32 %v4624_v23, 0.0  ;;  %v2069_v44 = vadd.f32 %v2053_v52, %v1977_v58 }
 0x314   : > { %v2153_v36 = vadd.f32 %v2137_v49, %v2069_v44  ;;  %3159 = vmatmul.msk.f32.gmra.mxu0 %vm2276_vm5, %v2264_v60  ;;  %v2637_v44 = vld [vmem:[%s5050_s15 + $0x30] sm:$0xff] }
 0x315   : > { %2680 = vmatpush.msrb.mxu3 %v2637_v44 }
 0x316   : > { %v2245_v18 = vadd.f32 %v2229_v5, %v2153_v36  ;;  %v2235_v8 = vpop.f32.mrf.mxu2  ;;  %v2633_v36 = vld [vmem:[%s5050_s15 + $0x10] sm:$0xff] }
 0x318   : > { %v4645_v13 = vadd.f32 %v4588_v15, %v2245_v18 }
 0x319   : > { %v2056_v6 = vpop.f32.mrf.mxu3 }
 0x31a   : > { %v2265_v32 = vmax.f32 %v4645_v13, 0.0  ;;  %v2070_v14 = vadd.f32 %v2056_v6, %v1978_v51  ;;  %v2379_v51 = vmul.f32 %v3908_v24, %v2371_v53  ;;  %v2405_v6 = vld [vmem:[#allocation4 + $0x1] sm:$0xff] }
 0x31c   : > { %v2154_v47 = vadd.f32 %v2140_v50, %v2070_v14  ;;  %3160 = vmatmul.msk.f32.gmra.mxu0 %vm2276_vm5, %v2265_v32  ;;  %v2389_v2 = vmul.f32 %v4733_v7, %v2379_v51 }
 0x31e   : > { %v2246_v43 = vadd.f32 %v2232_v0, %v2154_v47  ;;  %v2238_v5 = vpop.f32.mrf.mxu2  ;;  %v4738_v0 = vld [vmem:[%s5048_s13 + $0x1] ss:$0 sm:$0xff] }
 0x31f   : > { %v2415_v21 = vmul.f32 %v4738_v0, %v2405_v6 }
 0x320   : > { %v4663_v34 = vadd.f32 %v4588_v15, %v2246_v43 }
 0x321   : > { %v2059_v19 = vpop.f32.mrf.mxu3  ;;  %v2423_v20 = vadd.f32 %v2415_v21, %v2389_v2  ;;  %v4790_v2 = vld [vmem:[%s5048_s13 + $0x7] ss:$0 sm:$0xff] }
 0x322   : > { %v2266_v30 = vmax.f32 %v4663_v34, 0.0  ;;  %v2071_v11 = vadd.f32 %v2059_v19, %v1979_v27  ;;  %v4754_v19 = vld [vmem:[%s5048_s13 + $0x3] ss:$0 sm:$0xff] }
 0x324   : > { %v2155_v59 = vadd.f32 %v2143_v55, %v2071_v11  ;;  %3161 = vmatmul.msk.f32.gmra.mxu0 %vm2276_vm5, %v2266_v30 }
 0x326   : > { %v2247_v29 = vadd.f32 %v2235_v8, %v2155_v59 }
 0x328   : > { %v4671_v4 = vadd.f32 %v4588_v15, %v2247_v29 }
 0x329   : > { %v2062_v10 = vpop.f32.mrf.mxu3 }
 0x32a   : > { %v2267_v49 = vmax.f32 %v4671_v4, 0.0  ;;  %v2072_v57 = vadd.f32 %v2062_v10, %v1980_v33  ;;  %v4763_v33 = vld [vmem:[%s5048_s13 + $0x4] ss:$0 sm:$0xff] }
 0x32c   : > { %v2156_v61 = vadd.f32 %v2146_v22, %v2072_v57  ;;  %3162 = vmatmul.msk.f32.gmra.mxu0 %vm2276_vm5, %v2267_v49 }
 0x32e   : > { %v2248_v58 = vadd.f32 %v2238_v5, %v2156_v61  ;;  %v4768_v5 = vld [vmem:[%s5048_s13 + $0x5] ss:$0 sm:$0xff] }
 0x330   : > { %v4678_v40 = vadd.f32 %v4588_v15, %v2248_v58  ;;  %v2636_v15 = vld [vmem:[%s5050_s15 + $0x28] sm:$0xff] }
 0x331   : > { %2681 = vmatpush.msrb.mxu3 %v2636_v15 }
 0x332   : > { %v2268_v52 = vmax.f32 %v4678_v40, 0.0 }
 0x333   : > { %2682 = vmatpush.msrb.mxu3 %v2635_v17 }
 0x334   : > { %3163 = vmatmul.msk.f32.gmra.mxu0 %vm2276_vm5, %v2268_v52 }
 0x335   : > { %2683 = vmatpush.msrb.mxu3 %v2634_v1 }
 0x337   : > { %2684 = vmatpush.msrb.mxu3 %v2633_v36  ;;  %v4778_v36 = vld [vmem:[%s5048_s13 + $0x6] ss:$0 sm:$0xff] }
 0x339   : > { %2685 = vmatpush.msrb.mxu3 %v2632_v25 }
 0x33b   : > { %2686 = vmatpush.msrb.mxu3 %v2631_v28 }
 0x379   : > { %v2318_v3 = vpop.f32.mrf.mxu0 }
 0x37a   : > { %v2319_v18 = vadd.f32 %v4719_v35, %v2318_v3 }
 0x37c   : > { %v2342_v50 = vmax.f32 %v2319_v18, 0.0 }
 0x37e   : > { %2363 = vst.msk [vmem:[#allocation4 + $0x9] sm:$0xff] %vm2350_vm6, %v2342_v50 }
 0x381   : > { %v2321_v54 = vpop.f32.mrf.mxu0 }
 0x382   : > { %v2322_v14 = vadd.f32 %v4719_v35, %v2321_v54 }
 0x384   : > { %v2343_v47 = vmax.f32 %v2322_v14, 0.0 }
 0x385   : > { %v2372_v31 = vld [vmem:[#allocation4 + $0x8] sm:$0xff] }
 0x386   : > { %v2431_v43 = vld [vmem:[#allocation4 + $0x2] sm:$0xff]  ;;  %2364 = vst.msk [vmem:[#allocation4 + $0x11] sm:$0xff] %vm2350_vm6, %v2343_v47  ;;  %v2466_v55 = vmul.f32 %v3908_v24, %v2372_v31  ;;  %v2380_v59 = vmul.f32 %v3941_v42, %v2372_v31 }
 0x387   : > { %v2439_v27 = vmul.f32 %v3933_v39, %v2431_v43  ;;  %v2406_v10 = vld [vmem:[#allocation4 + $0x9] sm:$0xff] }
 0x388   : > { %v2476_v16 = vmul.f32 %v4754_v19, %v2466_v55  ;;  %v2390_v44 = vmul.f32 %v4733_v7, %v2380_v59  ;;  %v2495_v15 = vmul.f32 %v4763_v33, %v2406_v10  ;;  %v2416_v25 = vmul.f32 %v4738_v0, %v2406_v10  ;;  %v4797_v55 = vld [vmem:[%s5048_s13 + $0x8] ss:$0 sm:$0xff] }
 0x389   : > { %v2449_v11 = vmul.f32 %v4746_v26, %v2439_v27  ;;  %v2324_v8 = vpop.f32.mrf.mxu0 }
 0x38a   : > { %v2325_v38 = vadd.f32 %v4719_v35, %v2324_v8  ;;  %v2424_v51 = vadd.f32 %v2416_v25, %v2390_v44  ;;  %v4807_v44 = vld [vmem:[#allocation13] ss:$0 sm:$0xff] }
 0x38b   : > { %v2457_v29 = vadd.f32 %v2449_v11, %v2423_v20 }
 0x38c   : > { %v2344_v22 = vmax.f32 %v2325_v38, 0.0 }
 0x38d   : > { %v2484_v57 = vadd.f32 %v2476_v16, %v2457_v29  ;;  %v2373_v61 = vld [vmem:[#allocation4 + $0x10] sm:$0xff] }
 0x38e   : > { %v2432_v58 = vld [vmem:[#allocation4 + $0xa] sm:$0xff]  ;;  %2365 = vst.msk [vmem:[#allocation4 + $0x19] sm:$0xff] %vm2350_vm6, %v2344_v22  ;;  %v2539_v1 = vmul.f32 %v3908_v24, %v2373_v61  ;;  %v2467_v18 = vmul.f32 %v3941_v42, %v2373_v61  ;;  %v2381_v21 = vmul.f32 %v3966_v63, %v2373_v61 }
 0x38f   : > { %v2512_v17 = vmul.f32 %v3933_v39, %v2432_v58  ;;  %v2440_v3 = vmul.f32 %v3956_v56, %v2432_v58  ;;  %v2503_v53 = vadd.f32 %v2495_v15, %v2484_v57  ;;  %v2407_v47 = vld [vmem:[#allocation4 + $0x11] sm:$0xff] }
 0x390   : > { %v2549_v14 = vmul.f32 %v4778_v36, %v2539_v1  ;;  %v2477_v43 = vmul.f32 %v4754_v19, %v2467_v18  ;;  %v2568_v38 = vmul.f32 %v4790_v2, %v2407_v47  ;;  %v2391_v16 = vmul.f32 %v4733_v7, %v2381_v21 }
 0x391   : > { %v2522_v50 = vmul.f32 %v4768_v5, %v2512_v17  ;;  %v2327_v28 = vpop.f32.mrf.mxu0  ;;  %v2450_v6 = vmul.f32 %v4746_v26, %v2440_v3  ;;  %v2496_v22 = vmul.f32 %v4763_v33, %v2407_v47  ;;  %v2417_v17 = vmul.f32 %v4738_v0, %v2407_v47 }
 0x392   : > { %v2328_v24 = vadd.f32 %v4719_v35, %v2327_v28 }
 0x393   : > { %v2530_v54 = vadd.f32 %v2522_v50, %v2503_v53  ;;  %v2458_v31 = vadd.f32 %v2450_v6, %v2424_v51  ;;  %v5129_v53 = vld [vmem:[#allocation23_spill] sm:$0xff]  ;;  %v2425_v6 = vadd.f32 %v2417_v17, %v2391_v16 }
 0x394   : > { %v2345_v20 = vmax.f32 %v2328_v24, 0.0 }
 0x395   : > { %v2557_v27 = vadd.f32 %v2549_v14, %v2530_v54  ;;  %v2433_v11 = vld [vmem:[#allocation4 + $0x12] sm:$0xff]  ;;  %v2485_v59 = vadd.f32 %v2477_v43, %v2458_v31 }
 0x396   : > { %v2374_v8 = vld [vmem:[#allocation4 + $0x18] sm:$0xff]  ;;  %2366 = vst.msk [vmem:[#allocation4 + $0x21] sm:$0xff] %vm2350_vm6, %v2345_v20  ;;  %v2585_v29 = vmul.f32 %v3933_v39, %v2433_v11  ;;  %v2513_v57 = vmul.f32 %v3956_v56, %v2433_v11  ;;  %v2441_v50 = vmul.f32 %v5129_v53, %v2433_v11 }
 0x397   : > { %v2382_v10 = vmul.f32 %v4022_v48, %v2374_v8  ;;  %v2576_v61 = vadd.f32 %v2568_v38, %v2557_v27  ;;  %v2540_v15 = vmul.f32 %v3941_v42, %v2374_v8  ;;  %v2408_v25 = vld [vmem:[#allocation4 + $0x19] sm:$0xff]  ;;  %v2468_v39 = vmul.f32 %v3966_v63, %v2374_v8 }
 0x398   : > { %v2595_v58 = vmul.f32 %v4797_v55, %v2585_v29  ;;  %v2504_v3 = vadd.f32 %v2496_v22, %v2485_v59  ;;  %v2523_v18 = vmul.f32 %v4768_v5, %v2513_v57  ;;  %v2451_v14 = vmul.f32 %v4746_v26, %v2441_v50  ;;  %v5130_v29 = vld [vmem:[#allocation24_spill] sm:$0xff] }
 0x399   : > { %v2330_v1 = vpop.f32.mrf.mxu0  ;;  %v2392_v24 = vmul.f32 %v4733_v7, %v2382_v10  ;;  %v2550_v42 = vmul.f32 %v4778_v36, %v2540_v15  ;;  %v2418_v31 = vmul.f32 %v4738_v0, %v2408_v25  ;;  %v2569_v27 = vmul.f32 %v4790_v2, %v2408_v25 }
 0x39a   : > { %v2331_v28 = vadd.f32 %v4719_v35, %v2330_v1  ;;  %v2603_v51 = vadd.f32 %v2595_v58, %v2576_v61  ;;  %v2531_v54 = vadd.f32 %v2523_v18, %v2504_v3  ;;  %v2459_v8 = vadd.f32 %v2451_v14, %v2425_v6  ;;  %v5131_v58 = vld [vmem:[#allocation25_spill] sm:$0xff] }
 0x39b   : > { %v2478_v59 = vmul.f32 %v4754_v19, %v2468_v39  ;;  %v2426_v57 = vadd.f32 %v2418_v31, %v2392_v24  ;;  %v2497_v61 = vmul.f32 %v4763_v33, %v2408_v25 }
 0x39c   : > { %v2346_v21 = vmax.f32 %v2331_v28, 0.0  ;;  %v2615_v47 = vadd.f32 %v4807_v44, %v2603_v51  ;;  %v2558_v20 = vadd.f32 %v2550_v42, %v2531_v54 }
 0x39d   : > { %v2434_v43 = vld [vmem:[#allocation4 + $0x1a] sm:$0xff]  ;;  %v2486_v18 = vadd.f32 %v2478_v59, %v2459_v8 }
 0x39e   : > { %v2375_v11 = vld [vmem:[#allocation4 + $0x20] sm:$0xff]  ;;  %2367 = vst.msk [vmem:[#allocation4 + $0x29] sm:$0xff] %vm2350_vm6, %v2346_v21  ;;  %v2623_v38 = vmax.f32 %v2615_v47, 0.0  ;;  %v2442_v16 = vmul.f32 %v5130_v29, %v2434_v43  ;;  %v2514_v10 = vmul.f32 %v5129_v53, %v2434_v43  ;;  %v2586_v22 = vmul.f32 %v3956_v56, %v2434_v43 }
 0x39f   : > { %v2383_v15 = vmul.f32 %v5131_v58, %v2375_v11  ;;  %v2469_v17 = vmul.f32 %v4022_v48, %v2375_v11  ;;  %v2577_v39 = vadd.f32 %v2569_v27, %v2558_v20  ;;  %v2541_v56 = vmul.f32 %v3966_v63, %v2375_v11  ;;  %v2409_v6 = vld [vmem:[#allocation4 + $0x21] sm:$0xff] }
 0x3a0   : > { %3164 = vmatmul.msk.f32.vlgmr.msrb.gmra.mxu3 %vm2350_vm6, %v2623_v38  ;;  %v2452_v1 = vmul.f32 %v4746_v26, %v2442_v16  ;;  %v2596_v3 = vmul.f32 %v4797_v55, %v2586_v22  ;;  %v2524_v28 = vmul.f32 %v4768_v5, %v2514_v10  ;;  %v2505_v24 = vadd.f32 %v2497_v61, %v2486_v18  ;;  %v5132_v38 = vld [vmem:[#allocation26_spill] sm:$0xff] }
 0x3a1   : > { %v2333_v50 = vpop.f32.mrf.mxu0  ;;  %v2393_v42 = vmul.f32 %v4733_v7, %v2383_v15  ;;  %v2479_v14 = vmul.f32 %v4754_v19, %v2469_v17  ;;  %v2551_v43 = vmul.f32 %v4778_v36, %v2541_v56  ;;  %v2419_v20 = vmul.f32 %v4738_v0, %v2409_v6  ;;  %v5133_v15 = vld [vmem:[#allocation27_spill] sm:$0xff] }
 0x3a2   : > { %v2334_v51 = vadd.f32 %v4719_v35, %v2333_v50  ;;  %v2604_v25 = vadd.f32 %v2596_v3, %v2577_v39  ;;  %v2460_v54 = vadd.f32 %v2452_v1, %v2426_v57  ;;  %v2532_v31 = vadd.f32 %v2524_v28, %v2505_v24 }
 0x3a3   : > { %v2570_v63 = vmul.f32 %v4790_v2, %v2409_v6  ;;  %v2498_v57 = vmul.f32 %v4763_v33, %v2409_v6  ;;  %v2427_v39 = vadd.f32 %v2419_v20, %v2393_v42 }
 0x3a4   : > { %v2347_v21 = vmax.f32 %v2334_v51, 0.0  ;;  %v2616_v47 = vadd.f32 %v4807_v44, %v2604_v25  ;;  %v2487_v8 = vadd.f32 %v2479_v14, %v2460_v54  ;;  %v2559_v22 = vadd.f32 %v2551_v43, %v2532_v31 }
 0x3a5   : > { %v2435_v27 = vld [vmem:[#allocation4 + $0x22] sm:$0xff] }
 0x3a6   : > { %v2376_v11 = vld [vmem:[#allocation4 + $0x28] sm:$0xff]  ;;  %2368 = vst.msk [vmem:[#allocation4 + $0x31] sm:$0xff] %vm2350_vm6, %v2347_v21  ;;  %v2624_v59 = vmax.f32 %v2616_v47, 0.0  ;;  %v2443_v16 = vmul.f32 %v5132_v38, %v2435_v27  ;;  %v2515_v10 = vmul.f32 %v5130_v29, %v2435_v27  ;;  %v2587_v61 = vmul.f32 %v5129_v53, %v2435_v27 }
 0x3a7   : > { %v2384_v17 = vmul.f32 %v5133_v15, %v2376_v11  ;;  %v2470_v1 = vmul.f32 %v5131_v58, %v2376_v11  ;;  %v2578_v18 = vadd.f32 %v2570_v63, %v2559_v22  ;;  %v2506_v56 = vadd.f32 %v2498_v57, %v2487_v8  ;;  %v2410_v24 = vld [vmem:[#allocation4 + $0x29] sm:$0xff] }
 0x3a8   : > { %3165 = vmatmul.msk.f32.gmra.mxu3 %vm2350_vm6, %v2624_v59  ;;  %v2453_v3 = vmul.f32 %v4746_v26, %v2443_v16  ;;  %v2597_v28 = vmul.f32 %v4797_v55, %v2587_v61  ;;  %v2525_v51 = vmul.f32 %v4768_v5, %v2515_v10  ;;  %v2542_v25 = vmul.f32 %v4022_v48, %v2376_v11  ;;  %v5134_v8 = vld [vmem:[#allocation28_spill] sm:$0xff] }
 0x3a9   : > { %v2336_v50 = vpop.f32.mrf.mxu0  ;;  %v2394_v6 = vmul.f32 %v4733_v7, %v2384_v17  ;;  %v2480_v47 = vmul.f32 %v4754_v19, %v2470_v1  ;;  %v2420_v20 = vmul.f32 %v4738_v0, %v2410_v24  ;;  %v2571_v10 = vmul.f32 %v4790_v2, %v2410_v24 }
 0x3aa   : > { %v2337_v53 = vadd.f32 %v4719_v35, %v2336_v50  ;;  %v2461_v54 = vadd.f32 %v2453_v3, %v2427_v39  ;;  %v2605_v14 = vadd.f32 %v2597_v28, %v2578_v18  ;;  %v2533_v21 = vadd.f32 %v2525_v51, %v2506_v56  ;;  %v5135_v18 = vld [vmem:[#allocation29_spill] sm:$0xff] }
 0x3ab   : > { %v2552_v42 = vmul.f32 %v4778_v36, %v2542_v25  ;;  %v2428_v61 = vadd.f32 %v2420_v20, %v2394_v6  ;;  %v2499_v17 = vmul.f32 %v4763_v33, %v2410_v24 }
 0x3ac   : > { %v2348_v31 = vmax.f32 %v2337_v53, 0.0  ;;  %v2617_v43 = vadd.f32 %v4807_v44, %v2605_v14  ;;  %v2488_v11 = vadd.f32 %v2480_v47, %v2461_v54 }
 0x3ad   : > { %v2436_v27 = vld [vmem:[#allocation4 + $0x2a] sm:$0xff]  ;;  %v2560_v48 = vadd.f32 %v2552_v42, %v2533_v21 }
 0x3ae   : > { %v2377_v63 = vld [vmem:[#allocation4 + $0x30] sm:$0xff]  ;;  %2369 = vst.msk [vmem:[#allocation4 + $0x39] sm:$0xff] %vm2350_vm6, %v2348_v31  ;;  %v2444_v59 = vmul.f32 %v5134_v8, %v2436_v27  ;;  %v2516_v16 = vmul.f32 %v5132_v38, %v2436_v27  ;;  %v2588_v22 = vmul.f32 %v5130_v29, %v2436_v27  ;;  %v2625_v57 = vmax.f32 %v2617_v43, 0.0 }
 0x3af   : > { %v2471_v1 = vmul.f32 %v5133_v15, %v2377_v63  ;;  %v2579_v3 = vadd.f32 %v2571_v10, %v2560_v48  ;;  %v2385_v50 = vmul.f32 %v5135_v18, %v2377_v63  ;;  %v2507_v56 = vadd.f32 %v2499_v17, %v2488_v11  ;;  %v2411_v6 = vld [vmem:[#allocation4 + $0x31] sm:$0xff]  ;;  %v5136_v11 = vld [vmem:[#allocation30_spill] sm:$0xff] }
 0x3b0   : > { %v2454_v39 = vmul.f32 %v4746_v26, %v2444_v59  ;;  %v2598_v45 = vmul.f32 %v4797_v55, %v2588_v22  ;;  %3166 = vmatmul.msk.f32.gmra.mxu3 %vm2350_vm6, %v2625_v57  ;;  %v2526_v51 = vmul.f32 %v4768_v5, %v2516_v16  ;;  %v2543_v29 = vmul.f32 %v5131_v58, %v2377_v63  ;;  %v5137_v57 = vld [vmem:[#allocation31_spill] sm:$0xff] }
 0x3b1   : > { %v2339_v28 = vpop.f32.mrf.mxu0  ;;  %v2481_v21 = vmul.f32 %v4754_v19, %v2471_v1  ;;  %v2395_v31 = vmul.f32 %v4733_v7, %v2385_v50  ;;  %v2421_v43 = vmul.f32 %v4738_v0, %v2411_v6  ;;  %v2572_v58 = vmul.f32 %v4790_v2, %v2411_v6 }
 0x3b2   : > { %v2340_v25 = vadd.f32 %v4719_v35, %v2339_v28  ;;  %v2606_v53 = vadd.f32 %v2598_v45, %v2579_v3  ;;  %v2462_v24 = vadd.f32 %v2454_v39, %v2428_v61  ;;  %v2534_v54 = vadd.f32 %v2526_v51, %v2507_v56  ;;  %v2810_v51 = vld [vmem:[%s5054_s19 + $0x8] sm:$0xff] }
 0x3b3   : > { %v2553_v14 = vmul.f32 %v4778_v36, %v2543_v29  ;;  %v2500_v22 = vmul.f32 %v4763_v33, %v2411_v6  ;;  %v2429_v1 = vadd.f32 %v2421_v43, %v2395_v31  ;;  %v2731_v29 = vld [vmem:[%s5052_s17 + $0x58] sm:$0xff]  ;;  %2825 = vmatpush.msrb.mxu2 %v2810_v51  ;;  %v2729_v43 = vld [vmem:[%s5052_s17 + $0x48] sm:$0xff] }
 0x3b4   : > { %v2349_v42 = vmax.f32 %v2340_v25, 0.0  ;;  %v2618_v47 = vadd.f32 %v4807_v44, %v2606_v53  ;;  %v2489_v48 = vadd.f32 %v2481_v21, %v2462_v24  ;;  %v2730_v24 = vld [vmem:[%s5052_s17 + $0x50] sm:$0xff]  ;;  %2764 = vmatpush.msrb.mxu1 %v2731_v29  ;;  %v2809_v21 = vld [vmem:[%s5054_s19] sm:$0xff]  ;;  %v2727_v29 = vld [vmem:[%s5052_s17 + $0x38] sm:$0xff] }
 0x3b5   : > { %v2437_v20 = vld [vmem:[#allocation4 + $0x32] sm:$0xff]  ;;  %v2561_v27 = vadd.f32 %v2553_v14, %v2534_v54  ;;  %2826 = vmatpush.msrb.mxu2 %v2809_v21 }
 0x3b6   : > { %v2378_v35 = vld [vmem:[#allocation4 + $0x38] sm:$0xff]  ;;  %2370 = vst.msk [vmem:[#allocation4 + $0x41] sm:$0xff] %vm2350_vm6, %v2349_v42  ;;  %v2626_v63 = vmax.f32 %v2618_v47, 0.0  ;;  %v2445_v59 = vmul.f32 %v5136_v11, %v2437_v20  ;;  %v2517_v16 = vmul.f32 %v5134_v8, %v2437_v20  ;;  %v2589_v10 = vmul.f32 %v5132_v38, %v2437_v20  ;;  %2765 = vmatpush.msrb.mxu1 %v2730_v24 }
 0x3b7   : > { %v2386_v61 = vmul.f32 %v5137_v57, %v2378_v35  ;;  %v2472_v17 = vmul.f32 %v5135_v18, %v2378_v35  ;;  %v2580_v3 = vadd.f32 %v2572_v58, %v2561_v27  ;;  %v2412_v50 = vld [vmem:[#allocation4 + $0x39] sm:$0xff]  ;;  %v2508_v28 = vadd.f32 %v2500_v22, %v2489_v48  ;;  %v3309_v48 = vld [vmem:[%s3797_s21] sm:$0xff] }
 0x3b8   : > { %v2455_v39 = vmul.f32 %v4746_v26, %v2445_v59  ;;  %v2599_v45 = vmul.f32 %v4797_v55, %v2589_v10  ;;  %3167 = vmatmul.msk.f32.gmra.mxu3 %vm2350_vm6, %v2626_v63  ;;  %v2527_v56 = vmul.f32 %v4768_v5, %v2517_v16  ;;  %v2544_v38 = vmul.f32 %v5133_v15, %v2378_v35  ;;  %v5138_v59 = vld [vmem:[#allocation32_spill] sm:$0xff] }
 0x3b9   : > { %v2482_v6 = vmul.f32 %v4754_v19, %v2472_v17  ;;  %v2396_v54 = vmul.f32 %v4733_v7, %v2386_v61  ;;  %v2422_v47 = vmul.f32 %v4738_v0, %v2412_v50  ;;  %v2501_v20 = vmul.f32 %v4763_v33, %v2412_v50  ;;  %3180 = vmatmul.msk.f32.vlgmr.msrb.gmra.mxu2 %vm917_vm0, %v3309_v48  ;;  %v2724_v48 = vld [vmem:[%s5052_s17 + $0x20] sm:$0xff] }
 0x3ba   : > { %v2607_v25 = vadd.f32 %v2599_v45, %v2580_v3  ;;  %v2463_v53 = vadd.f32 %v2455_v39, %v2429_v1  ;;  %v2535_v15 = vadd.f32 %v2527_v56, %v2508_v28  ;;  %v2554_v14 = vmul.f32 %v4778_v36, %v2544_v38  ;;  %2766 = vmatpush.msrb.mxu1 %v2729_v43  ;;  %v2728_v39 = vld [vmem:[%s5052_s17 + $0x40] sm:$0xff] }
 0x3bb   : > { %v2573_v58 = vmul.f32 %v4790_v2, %v2412_v50  ;;  %v2430_v61 = vadd.f32 %v2422_v47, %v2396_v54  ;;  %v2584_v47 = vld [vmem:[#allocation4 + $0x4a] sm:$0xff] }
 0x3bc   : > { %v2619_v42 = vadd.f32 %v4807_v44, %v2607_v25  ;;  %v2490_v31 = vadd.f32 %v2482_v6, %v2463_v53  ;;  %v2562_v27 = vadd.f32 %v2554_v14, %v2535_v15  ;;  %2767 = vmatpush.msrb.mxu1 %v2728_v39  ;;  %v2565_v43 = vld [vmem:[#allocation4 + $0x49] sm:$0xff] }
 0x3bd   : > { %v2438_v7 = vld [vmem:[#allocation4 + $0x3a] sm:$0xff]  ;;  %v2511_v22 = vld [vmem:[#allocation4 + $0x42] sm:$0xff] }
 0x3be   : > { %v2465_v35 = vld [vmem:[#allocation4 + $0x40] sm:$0xff]  ;;  %v2627_v63 = vmax.f32 %v2619_v42, 0.0  ;;  %v2446_v0 = vmul.f32 %v5138_v59, %v2438_v7  ;;  %v2518_v16 = vmul.f32 %v5136_v11, %v2438_v7  ;;  %v2590_v10 = vmul.f32 %v5134_v8, %v2438_v7  ;;  %v2538_v51 = vld [vmem:[#allocation4 + $0x48] sm:$0xff]  ;;  %2768 = vmatpush.msrb.mxu1 %v2727_v29  ;;  %v3310_v7 = vld [vmem:[%s3797_s21 + $0x8] sm:$0xff] }
 0x3bf   : > { %v2581_v17 = vadd.f32 %v2573_v58, %v2562_v27  ;;  %v2473_v1 = vmul.f32 %v5137_v57, %v2465_v35  ;;  %v2509_v50 = vadd.f32 %v2501_v20, %v2490_v31  ;;  %v2492_v8 = vld [vmem:[#allocation4 + $0x41] sm:$0xff]  ;;  %v2519_v56 = vmul.f32 %v5138_v59, %v2511_v22 }
 0x3c0   : > { %v2456_v3 = vmul.f32 %v4746_v26, %v2446_v0  ;;  %v2600_v45 = vmul.f32 %v4797_v55, %v2590_v10  ;;  %v2528_v28 = vmul.f32 %v4768_v5, %v2518_v16  ;;  %3168 = vmatmul.msk.f32.gmra.mxu3 %vm2350_vm6, %v2627_v63  ;;  %v2545_v38 = vmul.f32 %v5135_v18, %v2465_v35  ;;  %v2726_v18 = vld [vmem:[%s5052_s17 + $0x30] sm:$0xff]  ;;  %v2723_v10 = vld [vmem:[%s5052_s17 + $0x18] sm:$0xff] }
 0x3c1   : > { %v2483_v6 = vmul.f32 %v4754_v19, %v2473_v1  ;;  %v2591_v54 = vmul.f32 %v5136_v11, %v2511_v22  ;;  %v2502_v14 = vmul.f32 %v4763_v33, %v2492_v8  ;;  %v2546_v42 = vmul.f32 %v5137_v57, %v2538_v51  ;;  %v2725_v11 = vld [vmem:[%s5052_s17 + $0x28] sm:$0xff]  ;;  %3181 = vmatmul.msk.f32.gmra.mxu2 %vm917_vm0, %v3310_v7  ;;  %v3311_v1 = vld [vmem:[%s3797_s21 + $0x10] sm:$0xff] }
 0x3c2   : > { %v2608_v25 = vadd.f32 %v2600_v45, %v2581_v17  ;;  %v2536_v53 = vadd.f32 %v2528_v28, %v2509_v50  ;;  %v2464_v26 = vadd.f32 %v2456_v3, %v2430_v61  ;;  %v2555_v24 = vmul.f32 %v4778_v36, %v2545_v38  ;;  %2769 = vmatpush.msrb.mxu1 %v2726_v18  ;;  %v2721_v17 = vld [vmem:[%s5052_s17 + $0x8] sm:$0xff]  ;;  %v3312_v45 = vld [vmem:[%s3797_s21 + $0x18] sm:$0xff]  ;;  %v3313_v28 = vld [vmem:[%s3797_s21 + $0x20] sm:$0xff] }
 0x3c3   : > { %v2574_v19 = vmul.f32 %v4790_v2, %v2492_v8  ;;  %v2529_v33 = vmul.f32 %v4768_v5, %v2519_v56  ;;  %v2601_v57 = vmul.f32 %v4797_v55, %v2591_v54  ;;  %v2592_v35 = vmul.f32 %v5138_v59, %v2584_v47  ;;  %v3314_v8 = vld [vmem:[%s3797_s21 + $0x28] sm:$0xff]  ;;  %v3315_v56 = vld [vmem:[%s3797_s21 + $0x30] sm:$0xff]  ;;  %v3316_v38 = vld [vmem:[%s3797_s21 + $0x38] sm:$0xff] }
 0x3c4   : > { %v2620_v15 = vadd.f32 %v4807_v44, %v2608_v25  ;;  %v2491_v21 = vadd.f32 %v2483_v6, %v2464_v26  ;;  %v2563_v31 = vadd.f32 %v2555_v24, %v2536_v53  ;;  %v2556_v0 = vmul.f32 %v4778_v36, %v2546_v42  ;;  %2770 = vmatpush.msrb.mxu1 %v2725_v11  ;;  %v2722_v36 = vld [vmem:[%s5052_s17 + $0x10] sm:$0xff] }
 0x3c5   : > { %v2575_v16 = vmul.f32 %v4790_v2, %v2565_v43  ;;  %v2602_v61 = vmul.f32 %v4797_v55, %v2592_v35  ;;  %v3305_v51 = vld [vmem:[#allocation15] ss:$0 sm:$0xff] }
 0x3c6   : > { %v2628_v20 = vmax.f32 %v2620_v15, 0.0  ;;  %v2510_v27 = vadd.f32 %v2502_v14, %v2491_v21  ;;  %v2582_v58 = vadd.f32 %v2574_v19, %v2563_v31  ;;  %2771 = vmatpush.msrb.mxu1 %v2724_v48 }
 0x3c8   : > { %v2537_v63 = vadd.f32 %v2529_v33, %v2510_v27  ;;  %3169 = vmatmul.msk.f32.gmra.mxu3 %vm2350_vm6, %v2628_v20  ;;  %v2609_v5 = vadd.f32 %v2601_v57, %v2582_v58  ;;  %2772 = vmatpush.msrb.mxu1 %v2723_v10 }
 0x3c9   : > { %3182 = vmatmul.msk.f32.gmra.mxu2 %vm917_vm0, %v3311_v1 }
 0x3ca   : > { %v2564_v22 = vadd.f32 %v2556_v0, %v2537_v63  ;;  %v2621_v59 = vadd.f32 %v4807_v44, %v2609_v5  ;;  %2773 = vmatpush.msrb.mxu1 %v2722_v36  ;;  %v3306_v63 = vld [vmem:[#allocation16] ss:$0 sm:$0xff] }
 0x3cc   : > { %v2583_v2 = vadd.f32 %v2575_v16, %v2564_v22  ;;  %v2629_v39 = vmax.f32 %v2621_v59, 0.0  ;;  %2774 = vmatpush.msrb.mxu1 %v2721_v17 }
 0x3ce   : > { %v2610_v55 = vadd.f32 %v2602_v61, %v2583_v2 }
 0x3d0   : > { %3170 = vmatmul.msk.f32.gmra.mxu3 %vm2350_vm6, %v2629_v39  ;;  %v2622_v3 = vadd.f32 %v4807_v44, %v2610_v55  ;;  %v2720_v44 = vld [vmem:[%s5052_s17] sm:$0xff] }
 0x3d1   : > { %3183 = vmatmul.msk.f32.gmra.mxu2 %vm917_vm0, %v3312_v45  ;;  %2775 = vmatpush.msrb.mxu1 %v2720_v44 }
 0x3d2   : > { %v2630_v50 = vmax.f32 %v2622_v3, 0.0 }
 0x3d8   : > { %3171 = vmatmul.msk.f32.gmra.mxu3 %vm2350_vm6, %v2630_v50 }
 0x3d9   : > { %3184 = vmatmul.msk.f32.gmra.mxu2 %vm917_vm0, %v3313_v28 }
 0x3e1   : > { %3185 = vmatmul.msk.f32.gmra.mxu2 %vm917_vm0, %v3314_v8 }
 0x3e9   : > { %3186 = vmatmul.msk.f32.gmra.mxu2 %vm917_vm0, %v3315_v56 }
 0x3f1   : > { %3187 = vmatmul.msk.f32.gmra.mxu2 %vm917_vm0, %v3316_v38 }
 0x423   : > { %v2688_v29 = vpop.f32.mrf.mxu3 }
 0x424   : > { %v2689_v25 = vadd.f32 %v3305_v51, %v2688_v29 }
 0x426   : > { %v2712_v53 = vmax.f32 %v2689_v25, 0.0 }
 0x428   : > { %3172 = vmatmul.msk.f32.vlgmr.msrb.gmra.mxu1 %vm2350_vm6, %v2712_v53 }
 0x42b   : > { %v2691_v26 = vpop.f32.mrf.mxu3 }
 0x42c   : > { %v2692_v6 = vadd.f32 %v3305_v51, %v2691_v26 }
 0x42e   : > { %v2713_v24 = vmax.f32 %v2692_v6, 0.0 }
 0x430   : > { %3173 = vmatmul.msk.f32.gmra.mxu1 %vm2350_vm6, %v2713_v24 }
 0x433   : > { %v2694_v54 = vpop.f32.mrf.mxu3 }
 0x434   : > { %v2695_v18 = vadd.f32 %v3305_v51, %v2694_v54 }
 0x436   : > { %v2714_v15 = vmax.f32 %v2695_v18, 0.0 }
 0x438   : > { %3174 = vmatmul.msk.f32.gmra.mxu1 %vm2350_vm6, %v2714_v15 }
 0x43b   : > { %v2697_v14 = vpop.f32.mrf.mxu3 }
 0x43c   : > { %v2698_v21 = vadd.f32 %v3305_v51, %v2697_v14  ;;  %v2828_v48 = vpop.f32.mrf.mxu2 }
 0x43e   : > { %v2715_v42 = vmax.f32 %v2698_v21, 0.0 }
 0x440   : > { %3175 = vmatmul.msk.f32.gmra.mxu1 %vm2350_vm6, %v2715_v42 }
 0x443   : > { %v2700_v47 = vpop.f32.mrf.mxu3 }
 0x444   : > { %v2701_v31 = vadd.f32 %v3305_v51, %v2700_v47  ;;  %v2831_v0 = vpop.f32.mrf.mxu2 }
 0x446   : > { %v2716_v19 = vmax.f32 %v2701_v31, 0.0 }
 0x448   : > { %3176 = vmatmul.msk.f32.gmra.mxu1 %vm2350_vm6, %v2716_v19 }
 0x44b   : > { %v2703_v43 = vpop.f32.mrf.mxu3 }
 0x44c   : > { %v2704_v11 = vadd.f32 %v3305_v51, %v2703_v43  ;;  %v2834_v36 = vpop.f32.mrf.mxu2 }
 0x44e   : > { %v2717_v7 = vmax.f32 %v2704_v11, 0.0 }
 0x450   : > { %3177 = vmatmul.msk.f32.gmra.mxu1 %vm2350_vm6, %v2717_v7 }
 0x453   : > { %v2706_v20 = vpop.f32.mrf.mxu3 }
 0x454   : > { %v2707_v27 = vadd.f32 %v3305_v51, %v2706_v20  ;;  %v2837_v1 = vpop.f32.mrf.mxu2 }
 0x456   : > { %v2718_v33 = vmax.f32 %v2707_v27, 0.0 }
 0x458   : > { %3178 = vmatmul.msk.f32.gmra.mxu1 %vm2350_vm6, %v2718_v33 }
 0x45b   : > { %v2709_v58 = vpop.f32.mrf.mxu3 }
 0x45c   : > { %v2710_v57 = vadd.f32 %v3305_v51, %v2709_v58 }
 0x45e   : > { %v2719_v35 = vmax.f32 %v2710_v57, 0.0 }
 0x460   : > { %3179 = vmatmul.msk.f32.gmra.mxu1 %vm2350_vm6, %v2719_v35 }
 0x4a5   : > { %v2777_v16 = vpop.f32.mrf.mxu1 }
 0x4a6   : > { %v2778_v5 = vadd.f32 %v3306_v63, %v2777_v16 }
 0x4a8   : > { %v2801_v10 = vadd.f32 %v2778_v5, %v2261_v46 }
 0x4aa   : > { %v2852_v22 = vadd.f32 %v2828_v48, %v2801_v10 }
 0x4ac   : > { %2860 = vst.msk [vmem:[%s5000_s4] sm:$0xff] %vm2276_vm5, %v2852_v22 }
 0x4ad   : > { %v2780_v59 = vpop.f32.mrf.mxu1 }
 0x4ae   : > { %v2781_v61 = vadd.f32 %v3306_v63, %v2780_v59 }
 0x4b0   : > { %v2802_v41 = vadd.f32 %v2781_v61, %v2262_v37  ;;  %v2840_v37 = vpop.f32.mrf.mxu2 }
 0x4b2   : > { %v2853_v46 = vadd.f32 %v2831_v0, %v2802_v41 }
 0x4b4   : > { %2861 = vst.msk [vmem:[%s5000_s4 + $0x8] sm:$0xff] %vm2276_vm5, %v2853_v46 }
 0x4b5   : > { %v2783_v2 = vpop.f32.mrf.mxu1 }
 0x4b6   : > { %v2784_v17 = vadd.f32 %v3306_v63, %v2783_v2 }
 0x4b8   : > { %v2803_v39 = vadd.f32 %v2784_v17, %v2263_v9  ;;  %v2843_v56 = vpop.f32.mrf.mxu2 }
 0x4ba   : > { %v2854_v55 = vadd.f32 %v2834_v36, %v2803_v39 }
 0x4bc   : > { %2862 = vst.msk [vmem:[%s5000_s4 + $0x10] sm:$0xff] %vm2276_vm5, %v2854_v55 }
 0x4bd   : > { %v2786_v3 = vpop.f32.mrf.mxu1 }
 0x4be   : > { %v2787_v45 = vadd.f32 %v3306_v63, %v2786_v3 }
 0x4c0   : > { %v2804_v12 = vadd.f32 %v2787_v45, %v2264_v60  ;;  %v2846_v29 = vpop.f32.mrf.mxu2 }
 0x4c2   : > { %v2855_v50 = vadd.f32 %v2837_v1, %v2804_v12 }
 0x4c4   : > { %2863 = vst.msk [vmem:[%s5000_s4 + $0x18] sm:$0xff] %vm2276_vm5, %v2855_v50 }
 0x4c5   : > { %v2789_v28 = vpop.f32.mrf.mxu1 }
 0x4c6   : > { %v2790_v8 = vadd.f32 %v3306_v63, %v2789_v28 }
 0x4c8   : > { %v2805_v62 = vadd.f32 %v2790_v8, %v2265_v32  ;;  %v2849_v6 = vpop.f32.mrf.mxu2 }
 0x4ca   : > { %v2856_v9 = vadd.f32 %v2840_v37, %v2805_v62 }
 0x4cc   : > { %2864 = vst.msk [vmem:[%s5000_s4 + $0x20] sm:$0xff] %vm2276_vm5, %v2856_v9 }
 0x4cd   : > { %v2792_v38 = vpop.f32.mrf.mxu1 }
 0x4ce   : > { %v2793_v44 = vadd.f32 %v3306_v63, %v2792_v38 }
 0x4d0   : > { %v2806_v23 = vadd.f32 %v2793_v44, %v2266_v30 }
 0x4d2   : > { %v2857_v60 = vadd.f32 %v2843_v56, %v2806_v23 }
 0x4d4   : > { %2865 = vst.msk [vmem:[%s5000_s4 + $0x28] sm:$0xff] %vm2276_vm5, %v2857_v60 }
 0x4d5   : > { %v2795_v51 = vpop.f32.mrf.mxu1 }
 0x4d6   : > { %v2796_v25 = vadd.f32 %v3306_v63, %v2795_v51 }
 0x4d8   : > { %v2807_v13 = vadd.f32 %v2796_v25, %v2267_v49 }
 0x4da   : > { %v2858_v32 = vadd.f32 %v2846_v29, %v2807_v13 }
 0x4dc   : > { %2866 = vst.msk [vmem:[%s5000_s4 + $0x30] sm:$0xff] %vm2276_vm5, %v2858_v32 }
 0x4dd   : > { %v2798_v53 = vpop.f32.mrf.mxu1 }
 0x4de   : > { %v2799_v26 = vadd.f32 %v3306_v63, %v2798_v53 }
 0x4e0   : > { %v2808_v24 = vadd.f32 %v2799_v26, %v2268_v52 }
 0x4e2   : > { %v2859_v34 = vadd.f32 %v2849_v6, %v2808_v24 }
 0x4e4   : > { %2867 = vst.msk [vmem:[%s5000_s4 + $0x38] sm:$0xff] %vm2276_vm5, %v2859_v34 }
 0x4e5 PF: > { %s35_s1 = sadd.s32 1, %s3583_s1  }
 0x4e6   : > { %p32_p7 = scmp.ge.s32.totalorder %s35_s1, 4  }
 0x4e8   :  { %34 = sbr.rel (!%p32_p7) target bundleno = 15 (0xf), region = 171 }
 0x4ed   :  { %2890 = vsyncpa [#allocation6], 1 }
 0x4ee   :  { %2892 = vsyncpa [#allocation6 + $0x1], 1 }
 0x4ef   :  { %2893 = vsyncpa [#allocation8], 1 }
 0x4f0   :  { %2894 = vsyncpa [#allocation11], 1 }
 0x4f1   :  { %2895 = vsyncpa [#allocation14], 1 }
 0x4f2   :  { %2896 = vsyncpa [#allocation17], 1 }

// kernel: network_forward.8
= control target key start
LH: loop header
LB: loop body
LE: loop exit
PB: predicated region body
PF: predicated region fallthrough
CT: control target
= control target key end

     0   :  { %s5171_s0 = inlined_call_operand.vmem [shape: f32[128,24], index: 0, kind: input, shape index: {}]   ;;  %s5172_s1 = inlined_call_operand.vmem [shape: f32[24,96], index: 1, kind: input, shape index: {}]   ;;  %s5173_s2 = inlined_call_operand.hbm [shape: f32[1,96], index: 2, kind: input, shape index: {}]   ;;  %s5174_s3 = inlined_call_operand.vmem [shape: f32[9,96], index: 3, kind: input, shape index: {}]   ;;  %s5175_s4 = inlined_call_operand.hbm [shape: f32[1,96], index: 4, kind: input, shape index: {}]   ;;  %s5176_s5 = inlined_call_operand.vmem [shape: f32[96,96], index: 5, kind: input, shape index: {}]   ;;  %s5177_s6 = inlined_call_operand.hbm [shape: f32[1,96], index: 6, kind: input, shape index: {}]   ;;  %s5178_s7 = inlined_call_operand.vmem [shape: f32[96,24], index: 7, kind: input, shape index: {}]   ;;  %s5179_s8 = inlined_call_operand.hbm [shape: f32[1,24], index: 8, kind: input, shape index: {}]   ;;  %s5180_s9 = inlined_call_operand.vmem [shape: f32[9,24,32], index: 9, kind: input, shape index: {}]   ;;  %s5181_s10 = inlined_call_operand.hbm [shape: f32[1,32], index: 10, kind: input, shape index: {}]   ;;  %s5182_s11 = inlined_call_operand.vmem [shape: f32[32,128], index: 11, kind: input, shape index: {}]   ;;  %s5183_s12 = inlined_call_operand.hbm [shape: f32[1,128], index: 12, kind: input, shape index: {}]   ;;  %s5184_s13 = inlined_call_operand.vmem [shape: f32[9,128], index: 13, kind: input, shape index: {}]   ;;  %s5185_s14 = inlined_call_operand.hbm [shape: f32[1,128], index: 14, kind: input, shape index: {}]   ;;  %s5186_s15 = inlined_call_operand.vmem [shape: f32[128,128], index: 15, kind: input, shape index: {}]   ;;  %s5187_s16 = inlined_call_operand.hbm [shape: f32[1,128], index: 16, kind: input, shape index: {}]   ;;  %s5188_s17 = inlined_call_operand.vmem [shape: f32[128,32], index: 17, kind: input, shape index: {}]   ;;  %s5189_s18 = inlined_call_operand.hbm [shape: f32[1,32], index: 18, kind: input, shape index: {}]   ;;  %s5190_s19 = inlined_call_operand.vmem [shape: f32[24,32], index: 19, kind: input, shape index: {}]   ;;  %s5191_s20 = inlined_call_operand.vmem [shape: f32[128,32], index: 20, kind: output, shape index: {}]  }
   0x1   :  { %5218 = sst [smem:[#allocation35_spill]] %s5171_s0 }
   0x2   :  { %5219 = sst [smem:[#allocation36_spill]] %s5172_s1 }
   0x3   :  { %5220 = sst [smem:[#allocation37_spill]] %s5173_s2 }
   0x4   :  { %5221 = sst [smem:[#allocation38_spill]] %s5174_s3 }
   0x5   :  { %5222 = sst [smem:[#allocation39_spill]] %s5175_s4 }
   0x6   :  { %5223 = sst [smem:[#allocation40_spill]] %s5179_s8 }
   0x7   :  { %5224 = sst [smem:[#allocation41_spill]] %s5183_s12 }
   0x8   :  { %5225 = sst [smem:[#allocation42_spill]] %s5188_s17 }
   0x9   :  { %5226 = sst [smem:[#allocation43_spill]] %s5191_s20 }
   0xa   :  { %25 = vsyncpa [#allocation6], 0 }
   0xb   :  { %26 = vsyncpa [#allocation8], 0 }
   0xc   :  { %27 = vsyncpa [#allocation11], 0 }
   0xd   :  { %28 = vsyncpa [#allocation14], 0 }
   0xe   :  { %29 = vsyncpa [#allocation17], 0  ;;  %s3764_s1 = smov 0  }
   0xf LB: > { %s5227_s24 = sld [smem:[#allocation39_spill]]  ;;  %s5194_s25 = sadd.s32 4294967295, %s3647_s1   ;;  %s3647_s1 = sphi %s3764_s1, %s35_s1  }
  0x10   : > { %p3013_p0 = scmp.ge.s32.totalorder %s3647_s1, 1  ;;  %p491_p1 = scmp.lt.s32.totalorder %s3647_s1, 3 }
  0x11   : > { %p3777_p2 = scmp.eq.s32.totalorder %s5194_s25, 0  ;;  %s3649_s27 = smov [#allocation7]  }
  0x12   : > { %p3781_p3 = pnand %p3013_p0, %p491_p1  ;;  %s523_s28 = sshll.u32 %s3649_s27, 4  ;;  %s524_s28 = int_to_ptr.vmem [resolvable:$true] %s523_s28 }
  0x13   : > { %s5230_s8 = sld [smem:[#allocation40_spill]]  ;;  %s3651_s4 = smov [#allocation13]  }
  0x14   : > { %p3243_p4 = pneg %p3781_p3  ;;  %s5231_s12 = sld [smem:[#allocation41_spill]] }
  0x15   : > { %s521_s2 = sshll.u32 %s5227_s24, 4  ;;  %s3650_s24 = smov [#allocation10]   ;;  %s522_s2 = int_to_ptr.hbm [resolvable:$true] %s521_s2 }
  0x16   : > { %p3795_p5 = pnand %p3777_p2, %p3243_p4  ;;  %s553_s27 = sshll.u32 %s3650_s24, 4  ;;  %s554_s27 = int_to_ptr.vmem [resolvable:$true] %s553_s27 }
  0x17   : > { %s583_s29 = sshll.u32 %s3651_s4, 4  ;;  %s611_s25 = sshll.u32 %s5187_s16, 4  ;;  %s584_s29 = int_to_ptr.vmem [resolvable:$true] %s583_s29  ;;  %s612_s25 = int_to_ptr.hbm [resolvable:$true] %s611_s25 }
  0x18   : > { %3249 = dma.hbm_to_vmem [thread:$0]  (!%p3795_p5), %s522_s2, 16, %s524_s28, [#allocation8]  }
  0x19   : > { %s551_s30 = sshll.u32 %s5230_s8, 4  ;;  %s3652_s17 = smov [#allocation16]   ;;  %s552_s30 = int_to_ptr.hbm [resolvable:$true] %s551_s30 }
  0x1a   : > { %s581_s22 = sshll.u32 %s5231_s12, 4  ;;  %s5233_s12 = sld [smem:[#allocation37_spill]]  ;;  %s582_s22 = int_to_ptr.hbm [resolvable:$true] %s581_s22 }
  0x1b   : > { %3255 = dma.hbm_to_vmem [thread:$0]  (!%p3795_p5), %s552_s30, 16, %s554_s27, [#allocation11]  }
  0x1c   : > { %3261 = dma.hbm_to_vmem [thread:$0]  (!%p3795_p5), %s582_s22, 16, %s584_s29, [#allocation14]  }
  0x1d   : > { %s613_s2 = sshll.u32 %s3652_s17, 4  ;;  %s3653_s28 = smov [#allocation5]   ;;  %s614_s2 = int_to_ptr.vmem [resolvable:$true] %s613_s2 }
  0x1e   : > { %3267 = dma.hbm_to_vmem [thread:$0]  (!%p3795_p5), %s612_s25, 16, %s614_s2, [#allocation17]  }
  0x1f   : > { %s508_s30 = sshll.u32 %s3653_s28, 4  ;;  %s536_s0 = sshll.u32 %s5177_s6, 4  ;;  %s509_s30 = int_to_ptr.vmem [resolvable:$true] %s508_s30  ;;  %s537_s0 = int_to_ptr.hbm [resolvable:$true] %s536_s0 }
  0x20   : > { %s506_s20 = sshll.u32 %s5233_s12, 4  ;;  %s566_s22 = sshll.u32 %s5181_s10, 4  ;;  %s507_s20 = int_to_ptr.hbm [resolvable:$true] %s506_s20  ;;  %s567_s22 = int_to_ptr.hbm [resolvable:$true] %s566_s22 }
  0x21   : > { %3246 = dma.hbm_to_vmem [thread:$0]  (!%p3795_p5), %s507_s20, 16, %s509_s30, [#allocation6]  }
  0x22   : > { %s3654_s17 = smov [#allocation9]   ;;  %s3655_s25 = smov [#allocation12]  }
  0x23   : > { %s538_s29 = sshll.u32 %s3654_s17, 4  ;;  %s568_s21 = sshll.u32 %s3655_s25, 4  ;;  %s539_s29 = int_to_ptr.vmem [resolvable:$true] %s538_s29  ;;  %s569_s21 = int_to_ptr.vmem [resolvable:$true] %s568_s21 }
  0x24   : > { %3252 = dma.hbm_to_vmem [thread:$0]  (!%p3795_p5), %s537_s0, 16, %s539_s29, [#allocation8]  }
  0x25   : > { %s596_s28 = sshll.u32 %s5185_s14, 4  ;;  %s626_s27 = sshll.u32 %s5189_s18, 4  ;;  %s597_s28 = int_to_ptr.hbm [resolvable:$true] %s596_s28  ;;  %s627_s27 = int_to_ptr.hbm [resolvable:$true] %s626_s27 }
  0x26   : > { %3258 = dma.hbm_to_vmem [thread:$0]  (!%p3795_p5), %s567_s22, 16, %s569_s21, [#allocation11]  }
  0x27   : > { %s3656_s4 = smov [#allocation15]   ;;  %s3657_s0 = smov [#allocation18]  }
  0x28   : > { %s598_s8 = sshll.u32 %s3656_s4, 4  ;;  %s628_s12 = sshll.u32 %s3657_s0, 4  ;;  %s599_s8 = int_to_ptr.vmem [resolvable:$true] %s598_s8  ;;  %s629_s12 = int_to_ptr.vmem [resolvable:$true] %s628_s12 }
  0x29   : > { %3264 = dma.hbm_to_vmem [thread:$0]  (!%p3795_p5), %s597_s28, 16, %s599_s8, [#allocation14]  }
  0x2a   : > { %3270 = dma.hbm_to_vmem [thread:$0]  (!%p3795_p5), %s627_s27, 16, %s629_s12, [#allocation17]  }
  0x2b   : > { %653 = sbr.rel (%p3781_p3) target bundleno = 1267 (0x4f3), region = 100 }
  0x30   : > { %3626 = dma.done.wait (%p3777_p2), [#allocation6], 16  }
  0x31   : > { %3628 = vsyncadd (%p3777_p2), [#allocation6], 4294967280 }
  0x32   : > { %3630 = dma.done.wait (%p3777_p2), [#allocation8], 32  }
  0x33   : > { %3632 = vsyncadd (%p3777_p2), [#allocation8], 4294967264 }
  0x34   : > { %3634 = dma.done.wait (%p3777_p2), [#allocation11], 32  }
  0x35   : > { %3636 = vsyncadd (%p3777_p2), [#allocation11], 4294967264 }
  0x36   : > { %3638 = dma.done.wait (%p3777_p2), [#allocation14], 32  }
  0x37   : > { %3640 = vsyncadd (%p3777_p2), [#allocation14], 4294967264 }
  0x38   : > { %3642 = dma.done.wait (%p3777_p2), [#allocation17], 32  }
  0x39   : > { %3644 = vsyncadd (%p3777_p2), [#allocation17], 4294967264  ;;  %s5234_s26 = sadd.s32 4294967295, %s3647_s1   ;;  %s5235_s25 = sld [smem:[#allocation35_spill]]  ;;  %vm932_vm0 = vcmask 195584   ;;  %v1298_v7 = vld [vmem:[%s5176_s5 + $0x58] sm:$0xff]  ;;  %v764_v20 = vlaneseq }
  0x3a   : > { %s3034_s23 = sshll.u32 %s5234_s26, 3  ;;  %s5236_s28 = sld [smem:[#allocation36_spill]]  ;;  %v1297_v8 = vld [vmem:[%s5176_s5 + $0x50] sm:$0xff]  ;;  %v3658_v9 = vmov 0.0   ;;  %3192 = vmatpush.msra.mxu1 %v1298_v7  ;;  %v1296_v10 = vld [vmem:[%s5176_s5 + $0x48] sm:$0xff]  ;;  %v1295_v11 = vld [vmem:[%s5176_s5 + $0x40] sm:$0xff] }
  0x3b   : > { %p753_p6 = scmp.lt.s32.totalorder %s3034_s23, 15  ;;  %1465 = vst.msk [vmem:[#allocation3] sm:$0xff] %vm932_vm0, %v3658_v9  ;;  %v1294_v13 = vld [vmem:[%s5176_s5 + $0x38] sm:$0xff]  ;;  %vm1006_vm1 = vcmask 785408   ;;  %v1293_v17 = vld [vmem:[%s5176_s5 + $0x30] sm:$0xff]  ;;  %v1292_v18 = vld [vmem:[%s5176_s5 + $0x28] sm:$0xff] }
  0x3c   : > { %1466 = vst.msk [vmem:[#allocation3 + $0x8] sm:$0xff] %vm932_vm0, %v3658_v9  ;;  %3193 = vmatpush.msra.mxu1 %v1297_v8  ;;  %v1291_v19 = vld [vmem:[%s5176_s5 + $0x20] sm:$0xff]  ;;  %v1290_v21 = vld [vmem:[%s5176_s5 + $0x18] sm:$0xff]  ;;  %v1289_v22 = vld [vmem:[%s5176_s5 + $0x10] sm:$0xff]  ;;  %v3975_v23 = vshrl.u32 %v764_v20, 7  ;;  %s5237_s3 = sld [smem:[#allocation38_spill]] }
  0x3d   : > { %s5281_s23 = smov (!%p753_p6, %s3034_s23), 15  ;;  %1467 = vst.msk [vmem:[#allocation3 + $0x10] sm:$0xff] %vm932_vm0, %v3658_v9  ;;  %v3978_v25 = vld [vmem:[#allocation5] ss:$0 sm:$0xff]  ;;  %v1287_v34 = vld [vmem:[%s5176_s5] sm:$0xff]  ;;  %vm1017_vm14 = vcmask 779264  }
  0x3e   : > { %s3035_s22 = sshll.u32 %s5281_s23, 3  ;;  %1468 = vst.msk [vmem:[#allocation3 + $0x18] sm:$0xff] %vm932_vm0, %v3658_v9  ;;  %3194 = vmatpush.msra.mxu1 %v1296_v10  ;;  %v777_v24 = vand.u32 7, %v3975_v23  ;;  %v1288_v26 = vld [vmem:[%s5176_s5 + $0x8] sm:$0xff]  ;;  %v766_v29 = vadd.s32 8, %v3975_v23  ;;  %v767_v42 = vadd.s32 16, %v3975_v23 }
  0x3f   : > { %s3867_s21 = scalar_lea.vmem %s5235_s25, %s3035_s22  ;;  %1469 = vst.msk [vmem:[#allocation3 + $0x20] sm:$0xff] %vm932_vm0, %v3658_v9  ;;  %v768_v53 = vadd.s32 24, %v3975_v23  ;;  %s5277_s27 = sld [smem:[#allocation42_spill]] }
  0x40   : > { %v927_v0 = vld [vmem:[%s5236_s28 + $0x10] sm:$0xff]  ;;  %v926_v1 = vld [vmem:[%s5236_s28 + $0x8] sm:$0xff]  ;;  %v925_v2 = vld [vmem:[%s5236_s28] sm:$0xff]  ;;  %1470 = vst.msk [vmem:[#allocation3 + $0x28] sm:$0xff] %vm932_vm0, %v3658_v9  ;;  %3195 = vmatpush.msra.mxu1 %v1295_v11  ;;  %vm869_vm2 = vcmp.gt.s32.totalorder %v777_v24, 0  ;;  %v784_v35 = vand.u32 7, %v766_v29 }
  0x41   : > { %970 = vmatpush.msra.mxu0 %v927_v0  ;;  %v917_v3 = vld [vmem:[%s3867_s21] sm:$0xff]  ;;  %v918_v4 = vld [vmem:[%s3867_s21 + $0x8] sm:$0xff]  ;;  %v919_v5 = vld [vmem:[%s3867_s21 + $0x10] sm:$0xff]  ;;  %1471 = vst.msk [vmem:[#allocation3 + $0x30] sm:$0xff] %vm932_vm0, %v3658_v9  ;;  %v3986_v30 = vsel %vm869_vm2, 1.0, %v3658_v9  ;;  %vm893_vm3 = vcmp.lt.s32.totalorder %v777_v24, 7 }
  0x42   : > { %v920_v6 = vld [vmem:[%s3867_s21 + $0x18] sm:$0xff]  ;;  %v921_v12 = vld [vmem:[%s3867_s21 + $0x20] sm:$0xff]  ;;  %1472 = vst.msk [vmem:[#allocation3 + $0x38] sm:$0xff] %vm932_vm0, %v3658_v9  ;;  %3196 = vmatpush.msra.mxu1 %v1294_v13  ;;  %v922_v14 = vld [vmem:[%s3867_s21 + $0x28] sm:$0xff]  ;;  %vm870_vm4 = vcmp.gt.s32.totalorder %v784_v35, 0  ;;  %v4008_v44 = vsel %vm893_vm3, 1.0, %v3658_v9 }
  0x43   : > { %971 = vmatpush.msra.mxu0 %v926_v1  ;;  %1473 = vst.msk [vmem:[#allocation3 + $0x40] sm:$0xff] %vm932_vm0, %v3658_v9  ;;  %v923_v15 = vld [vmem:[%s3867_s21 + $0x30] sm:$0xff]  ;;  %v924_v16 = vld [vmem:[%s3867_s21 + $0x38] sm:$0xff]  ;;  %v3991_v33 = vld [vmem:[%s5237_s3 + $0x1] ss:$0 sm:$0xff]  ;;  %v4016_v49 = vsel %vm870_vm4, 1.0, %v3658_v9 }
  0x44   : > { %1474 = vst.msk [vmem:[#allocation3 + $0x48] sm:$0xff] %vm932_vm0, %v3658_v9  ;;  %3197 = vmatpush.msra.mxu1 %v1293_v17  ;;  %v4001_v37 = vld [vmem:[%s5237_s3] ss:$0 sm:$0xff]  ;;  %v4013_v46 = vld [vmem:[%s5237_s3 + $0x2] ss:$0 sm:$0xff]  ;;  %v791_v50 = vand.u32 7, %v767_v42 }
  0x45   : > { %972 = vmatpush.msra.mxu0 %v925_v2  ;;  %2383 = vst [vmem:[#allocation4] sm:$0xff] %v3658_v9  ;;  %v4025_v55 = vld [vmem:[%s5237_s3 + $0x3] ss:$0 sm:$0xff]  ;;  %vm894_vm5 = vcmp.lt.s32.totalorder %v784_v35, 7  ;;  %v798_v61 = vand.u32 7, %v768_v53  ;;  %s5279_s30 = sld [smem:[#allocation43_spill]] }
  0x46   : > { %3054 = vmatmul.msk.f32.vlgmr.msra.gmra.mxu0 %vm932_vm0, %v917_v3  ;;  %2384 = vst [vmem:[#allocation4 + $0x8] sm:$0xff] %v3658_v9  ;;  %3198 = vmatpush.msra.mxu1 %v1292_v18  ;;  %vm871_vm6 = vcmp.gt.s32.totalorder %v791_v50, 0  ;;  %v4031_v62 = vsel %vm894_vm5, 1.0, %v3658_v9  ;;  %v4037_v1 = vld [vmem:[%s5237_s3 + $0x4] ss:$0 sm:$0xff]  ;;  %vm4050_vm7 = vcmp.lt.s32.totalorder %v791_v50, 7 }
  0x47   : > { %1331 = vmatpush.msrb.mxu0 %v1298_v7  ;;  %2385 = vst [vmem:[#allocation4 + $0x10] sm:$0xff] %v3658_v9  ;;  %vm4056_vm8 = vcmp.gt.s32.totalorder %v798_v61, 0  ;;  %vm4068_vm9 = vcmp.lt.s32.totalorder %v798_v61, 7  ;;  %vm2309_vm5 = vcmask 261120  }
  0x48   : > { %2386 = vst [vmem:[#allocation4 + $0x18] sm:$0xff] %v3658_v9  ;;  %3199 = vmatpush.msra.mxu1 %v1291_v19 }
  0x49   : > { %1332 = vmatpush.msrb.mxu0 %v1297_v8  ;;  %2387 = vst [vmem:[#allocation4 + $0x20] sm:$0xff] %v3658_v9 }
  0x4a   : > { %2388 = vst [vmem:[#allocation4 + $0x28] sm:$0xff] %v3658_v9  ;;  %3200 = vmatpush.msra.mxu1 %v1290_v21 }
  0x4b   : > { %1333 = vmatpush.msrb.mxu0 %v1296_v10  ;;  %2389 = vst [vmem:[#allocation4 + $0x30] sm:$0xff] %v3658_v9  ;;  %v4047_v10 = vld [vmem:[%s5237_s3 + $0x5] ss:$0 sm:$0xff]  ;;  %s5136_s4 = scalar_lea.vmem %s5279_s30, %s3035_s22 }
  0x4c   : > { %2390 = vst [vmem:[#allocation4 + $0x38] sm:$0xff] %v3658_v9  ;;  %3201 = vmatpush.msra.mxu1 %v1289_v22 }
  0x4d   : > { %1334 = vmatpush.msrb.mxu0 %v1295_v11  ;;  %2391 = vst [vmem:[#allocation4 + $0x40] sm:$0xff] %v3658_v9 }
  0x4e   : > { %3055 = vmatmul.msk.f32.gmra.mxu0 %vm932_vm0, %v918_v4  ;;  %2392 = vst [vmem:[#allocation4 + $0x48] sm:$0xff] %v3658_v9  ;;  %3202 = vmatpush.msra.mxu1 %v1288_v26  ;;  %v769_v4 = vadd.s32 32, %v3975_v23 }
  0x4f   : > { %1335 = vmatpush.msrb.mxu0 %v1294_v13  ;;  %2393 = vst [vmem:[#allocation4 + $0x50] sm:$0x3] %v3658_v9 }
  0x50   : > { %1008 = vst.msk [vmem:[#allocation2 + $0x8] sm:$0xff] %vm1006_vm1, %v3658_v9  ;;  %3203 = vmatpush.msra.mxu1 %v1287_v34  ;;  %v805_v24 = vand.u32 7, %v769_v4 }
  0x51   : > { %1009 = vst.msk [vmem:[#allocation2 + $0x10] sm:$0xff] %vm1006_vm1, %v3658_v9  ;;  %1336 = vmatpush.msrb.mxu0 %v1293_v17 }
  0x52   : > { %1007 = vst.msk [vmem:[#allocation2] sm:$0xff] %vm1006_vm1, %v3658_v9  ;;  %vm4107_vm10 = vcmp.gt.s32.totalorder %v805_v24, 0  ;;  %vm4111_vm11 = vcmp.lt.s32.totalorder %v805_v24, 7 }
  0x53   : > { %1010 = vst.msk [vmem:[#allocation2 + $0x18] sm:$0xff] %vm1006_vm1, %v3658_v9  ;;  %1337 = vmatpush.msrb.mxu0 %v1292_v18  ;;  %v4066_v18 = vld [vmem:[%s5237_s3 + $0x6] ss:$0 sm:$0xff] }
  0x54   : > { %1011 = vst.msk [vmem:[#allocation2 + $0x20] sm:$0xff] %vm1006_vm1, %v3658_v9 }
  0x55   : > { %1012 = vst.msk [vmem:[#allocation2 + $0x28] sm:$0xff] %vm1006_vm1, %v3658_v9  ;;  %1338 = vmatpush.msrb.mxu0 %v1291_v19 }
  0x56   : > { %3056 = vmatmul.msk.f32.gmra.mxu0 %vm932_vm0, %v919_v5  ;;  %1013 = vst.msk [vmem:[#allocation2 + $0x30] sm:$0xff] %vm1006_vm1, %v3658_v9  ;;  %v4042_v5 = vsel %vm871_vm6, 1.0, %v3658_v9 }
  0x57   : > { %1014 = vst.msk [vmem:[#allocation2 + $0x38] sm:$0xff] %vm1006_vm1, %v3658_v9  ;;  %1339 = vmatpush.msrb.mxu0 %v1290_v21 }
  0x58   : > { %1015 = vst.msk [vmem:[#allocation2 + $0x40] sm:$0xff] %vm1006_vm1, %v3658_v9 }
  0x59   : > { %1016 = vst.msk [vmem:[#allocation2 + $0x48] sm:$0xff] %vm1006_vm1, %v3658_v9  ;;  %1340 = vmatpush.msrb.mxu0 %v1289_v22  ;;  %v1027_v31 = vld [vmem:[#allocation2] sm:$0xff] }
  0x5a   : > { %v1035_v36 = vmul.f32 %v3986_v30, %v1027_v31  ;;  %v1061_v38 = vld [vmem:[#allocation2 + $0x1] sm:$0xff]  ;;  %v4077_v31 = vadd.s32 40, %v3975_v23  ;;  %1018 = vst.msk [vmem:[#allocation2 + $0x50] sm:$0x3] %vm1017_vm14, %v3658_v9 }
  0x5b   : > { %1341 = vmatpush.msrb.mxu0 %v1288_v26  ;;  %v1071_v40 = vmul.f32 %v3991_v33, %v1061_v38 }
  0x5c   : > { %v1045_v43 = vmul.f32 %v4001_v37, %v1035_v36  ;;  %v4088_v36 = vsel %vm4050_vm7, 1.0, %v3658_v9 }
  0x5d   : > { %1342 = vmatpush.msrb.mxu0 %v1287_v34  ;;  %v4083_v34 = vld [vmem:[%s5237_s3 + $0x7] ss:$0 sm:$0xff]  ;;  %5244 = vst [vmem:[#allocation24_spill] sm:$0xff] %v4088_v36 }
  0x5e   : > { %3057 = vmatmul.msk.f32.gmra.mxu0 %vm932_vm0, %v920_v6  ;;  %v1079_v51 = vadd.f32 %v1071_v40, %v1045_v43  ;;  %v4099_v43 = vld [vmem:[%s5237_s3 + $0x8] ss:$0 sm:$0xff] }
  0x66   : > { %3058 = vmatmul.msk.f32.gmra.mxu0 %vm932_vm0, %v921_v12 }
  0x6e   : > { %3059 = vmatmul.msk.f32.gmra.mxu0 %vm932_vm0, %v922_v14 }
  0x76   : > { %3060 = vmatmul.msk.f32.gmra.mxu0 %vm932_vm0, %v923_v15 }
  0x7e   : > { %3061 = vmatmul.msk.f32.gmra.mxu0 %vm932_vm0, %v924_v16 }
  0xc3   : > { %v974_v27 = vpop.f32.mrf.mxu0 }
  0xc4   : > { %v975_v28 = vadd.f32 %v3978_v25, %v974_v27 }
  0xc6   : > { %v998_v32 = vmax.f32 %v975_v28, 0.0 }
  0xc8   : > { %1019 = vst.msk [vmem:[#allocation2 + $0x9] sm:$0xff] %vm1006_vm1, %v998_v32 }
  0xcb   : > { %v977_v39 = vpop.f32.mrf.mxu0 }
  0xcc   : > { %v978_v41 = vadd.f32 %v3978_v25, %v977_v39 }
  0xce   : > { %v999_v45 = vmax.f32 %v978_v41, 0.0  ;;  %v4094_v41 = vsel %vm4056_vm8, 1.0, %v3658_v9 }
  0xcf   : > { %v1028_v47 = vld [vmem:[#allocation2 + $0x8] sm:$0xff]  ;;  %5245 = vst [vmem:[#allocation25_spill] sm:$0xff] %v4094_v41 }
  0xd0   : > { %v1087_v48 = vld [vmem:[#allocation2 + $0x2] sm:$0xff]  ;;  %1020 = vst.msk [vmem:[#allocation2 + $0x11] sm:$0xff] %vm1006_vm1, %v999_v45  ;;  %v1122_v54 = vmul.f32 %v3986_v30, %v1028_v47  ;;  %v1036_v57 = vmul.f32 %v4016_v49, %v1028_v47  ;;  %v4104_v45 = vsel %vm4068_vm9, 1.0, %v3658_v9 }
  0xd1   : > { %v1095_v52 = vmul.f32 %v4008_v44, %v1087_v48  ;;  %v1062_v63 = vld [vmem:[#allocation2 + $0x9] sm:$0xff]  ;;  %5246 = vst [vmem:[#allocation26_spill] sm:$0xff] %v4104_v45 }
  0xd2   : > { %v1132_v0 = vmul.f32 %v4025_v55, %v1122_v54  ;;  %v1046_v3 = vmul.f32 %v4001_v37, %v1036_v57  ;;  %v1072_v12 = vmul.f32 %v3991_v33, %v1062_v63  ;;  %v1151_v15 = vmul.f32 %v4037_v1, %v1062_v63 }
  0xd3   : > { %v1105_v56 = vmul.f32 %v4013_v46, %v1095_v52  ;;  %v980_v58 = vpop.f32.mrf.mxu0 }
  0xd4   : > { %v981_v59 = vadd.f32 %v3978_v25, %v980_v58  ;;  %v1080_v20 = vadd.f32 %v1072_v12, %v1046_v3  ;;  %v4133_v12 = vsel %vm4107_vm10, 1.0, %v3658_v9 }
  0xd5   : > { %v1113_v60 = vadd.f32 %v1105_v56, %v1079_v51  ;;  %v812_v56 = vand.u32 7, %v4077_v31  ;;  %5251 = vst [vmem:[#allocation27_spill] sm:$0xff] %v4133_v12 }
  0xd6   : > { %v1000_v2 = vmax.f32 %v981_v59, 0.0 }
  0xd7   : > { %v1029_v6 = vld [vmem:[#allocation2 + $0x10] sm:$0xff]  ;;  %v1140_v8 = vadd.f32 %v1132_v0, %v1113_v60  ;;  %vm4145_vm12 = vcmp.gt.s32.totalorder %v812_v56, 0  ;;  %vm4174_vm13 = vcmp.lt.s32.totalorder %v812_v56, 7 }
  0xd8   : > { %v1088_v7 = vld [vmem:[#allocation2 + $0xa] sm:$0xff]  ;;  %1021 = vst.msk [vmem:[#allocation2 + $0x19] sm:$0xff] %vm1006_vm1, %v1000_v2  ;;  %v1195_v17 = vmul.f32 %v3986_v30, %v1029_v6  ;;  %v1123_v22 = vmul.f32 %v4016_v49, %v1029_v6  ;;  %v1037_v27 = vmul.f32 %v4042_v5, %v1029_v6 }
  0xd9   : > { %v1096_v13 = vmul.f32 %v4031_v62, %v1088_v7  ;;  %v1168_v16 = vmul.f32 %v4008_v44, %v1088_v7  ;;  %v1159_v28 = vadd.f32 %v1151_v15, %v1140_v8  ;;  %v1063_v38 = vld [vmem:[#allocation2 + $0x11] sm:$0xff]  ;;  %v4126_v6 = vld [vmem:[#allocation7] ss:$0 sm:$0xff] }
  0xda   : > { %v1205_v40 = vmul.f32 %v4066_v18, %v1195_v17  ;;  %v1133_v47 = vmul.f32 %v4025_v55, %v1123_v22  ;;  %v1047_v54 = vmul.f32 %v4001_v37, %v1037_v27  ;;  %v1224_v58 = vmul.f32 %v4083_v34, %v1063_v38 }
  0xdb   : > { %v1106_v21 = vmul.f32 %v4013_v46, %v1096_v13  ;;  %v983_v26 = vpop.f32.mrf.mxu0  ;;  %v1178_v29 = vmul.f32 %v4047_v10, %v1168_v16  ;;  %v1073_v61 = vmul.f32 %v3991_v33, %v1063_v38  ;;  %v1152_v2 = vmul.f32 %v4037_v1, %v1063_v38 }
  0xdc   : > { %v984_v32 = vadd.f32 %v3978_v25, %v983_v26  ;;  %v4138_v13 = vsel %vm4111_vm11, 1.0, %v3658_v9  ;;  %v4184_v27 = vadd.s32 56, %v3975_v23 }
  0xdd   : > { %v1114_v35 = vadd.f32 %v1106_v21, %v1080_v20  ;;  %v1186_v39 = vadd.f32 %v1178_v29, %v1159_v28  ;;  %5252 = vst [vmem:[#allocation28_spill] sm:$0xff] %v4138_v13  ;;  %v1081_v14 = vadd.f32 %v1073_v61, %v1047_v54 }
  0xde   : > { %v1001_v42 = vmax.f32 %v984_v32, 0.0 }
  0xdf   : > { %v1089_v50 = vld [vmem:[#allocation2 + $0x12] sm:$0xff]  ;;  %v1213_v51 = vadd.f32 %v1205_v40, %v1186_v39  ;;  %v1141_v60 = vadd.f32 %v1133_v47, %v1114_v35  ;;  %v4154_v47 = vadd.s32 48, %v3975_v23 }
  0xe0   : > { %v1030_v52 = vld [vmem:[#allocation2 + $0x18] sm:$0xff]  ;;  %1022 = vst.msk [vmem:[#allocation2 + $0x21] sm:$0xff] %vm1006_vm1, %v1001_v42  ;;  %v1097_v57 = vmul.f32 %v4088_v36, %v1089_v50  ;;  %v1241_v59 = vmul.f32 %v4008_v44, %v1089_v50  ;;  %v1169_v7 = vmul.f32 %v4031_v62, %v1089_v50 }
  0xe1   : > { %v1038_v63 = vmul.f32 %v4094_v41, %v1030_v52  ;;  %v1124_v0 = vmul.f32 %v4042_v5, %v1030_v52  ;;  %v1232_v3 = vadd.f32 %v1224_v58, %v1213_v51  ;;  %v1196_v8 = vmul.f32 %v4016_v49, %v1030_v52  ;;  %v1064_v19 = vld [vmem:[#allocation2 + $0x19] sm:$0xff] }
  0xe2   : > { %v1251_v4 = vmul.f32 %v4099_v43, %v1241_v59  ;;  %v1107_v15 = vmul.f32 %v4013_v46, %v1097_v57  ;;  %v1160_v20 = vadd.f32 %v1152_v2, %v1141_v60  ;;  %v1179_v21 = vmul.f32 %v4047_v10, %v1169_v7 }
  0xe3   : > { %v986_v11 = vpop.f32.mrf.mxu0  ;;  %v1048_v22 = vmul.f32 %v4001_v37, %v1038_v63  ;;  %v1134_v26 = vmul.f32 %v4025_v55, %v1124_v0  ;;  %v1206_v32 = vmul.f32 %v4066_v18, %v1196_v8  ;;  %v1074_v35 = vmul.f32 %v3991_v33, %v1064_v19 }
  0xe4   : > { %v987_v16 = vadd.f32 %v3978_v25, %v986_v11  ;;  %v1259_v17 = vadd.f32 %v1251_v4, %v1232_v3  ;;  %v1115_v24 = vadd.f32 %v1107_v15, %v1081_v14  ;;  %v1187_v31 = vadd.f32 %v1179_v21, %v1160_v20 }
  0xe5   : > { %v1225_v39 = vmul.f32 %v4083_v34, %v1064_v19  ;;  %v1153_v53 = vmul.f32 %v4037_v1, %v1064_v19  ;;  %v4165_v58 = vsel %vm4145_vm12, 1.0, %v3658_v9  ;;  %v1082_v59 = vadd.f32 %v1074_v35, %v1048_v22 }
  0xe6   : > { %v1002_v28 = vmax.f32 %v987_v16, 0.0  ;;  %v1271_v29 = vadd.f32 %v4126_v6, %v1259_v17  ;;  %v1142_v42 = vadd.f32 %v1134_v26, %v1115_v24  ;;  %v1214_v52 = vadd.f32 %v1206_v32, %v1187_v31  ;;  %5255 = vst [vmem:[#allocation29_spill] sm:$0xff] %v4165_v58 }
  0xe7   : > { %v1090_v38 = vld [vmem:[#allocation2 + $0x1a] sm:$0xff]  ;;  %v819_v16 = vand.u32 7, %v4154_v47 }
  0xe8   : > { %v1031_v40 = vld [vmem:[#allocation2 + $0x20] sm:$0xff]  ;;  %1023 = vst.msk [vmem:[#allocation2 + $0x29] sm:$0xff] %vm1006_vm1, %v1002_v28  ;;  %v1279_v48 = vmax.f32 %v1271_v29, 0.0  ;;  %v1098_v50 = vmul.f32 %v4104_v45, %v1090_v38  ;;  %v1170_v51 = vmul.f32 %v4088_v36, %v1090_v38  ;;  %v1242_v54 = vmul.f32 %v4031_v62, %v1090_v38 }
  0xe9   : > { %v1125_v57 = vmul.f32 %v4094_v41, %v1031_v40  ;;  %v1233_v61 = vadd.f32 %v1225_v39, %v1214_v52  ;;  %v1039_v63 = vmul.f32 %v4133_v12, %v1031_v40  ;;  %v1065_v3 = vld [vmem:[#allocation2 + $0x21] sm:$0xff]  ;;  %v1161_v4 = vadd.f32 %v1153_v53, %v1142_v42 }
  0xea   : > { %3062 = vmatmul.msk.f32.vlgmr.msrb.gmra.mxu0 %vm1006_vm1, %v1279_v48  ;;  %v1108_v60 = vmul.f32 %v4013_v46, %v1098_v50  ;;  %v1252_v2 = vmul.f32 %v4099_v43, %v1242_v54  ;;  %v1180_v7 = vmul.f32 %v4047_v10, %v1170_v51  ;;  %v1197_v8 = vmul.f32 %v4042_v5, %v1031_v40 }
  0xeb   : > { %v989_v0 = vpop.f32.mrf.mxu0  ;;  %v1135_v21 = vmul.f32 %v4025_v55, %v1125_v57  ;;  %v1049_v24 = vmul.f32 %v4001_v37, %v1039_v63  ;;  %v1075_v26 = vmul.f32 %v3991_v33, %v1065_v3  ;;  %v1226_v39 = vmul.f32 %v4083_v34, %v1065_v3 }
  0xec   : > { %v990_v11 = vadd.f32 %v3978_v25, %v989_v0  ;;  %v1116_v15 = vadd.f32 %v1108_v60, %v1082_v59  ;;  %v1260_v17 = vadd.f32 %v1252_v2, %v1233_v61  ;;  %v1188_v19 = vadd.f32 %v1180_v7, %v1161_v4 }
  0xed   : > { %v1207_v20 = vmul.f32 %v4066_v18, %v1197_v8  ;;  %v1154_v23 = vmul.f32 %v4037_v1, %v1065_v3  ;;  %v1083_v50 = vadd.f32 %v1075_v26, %v1049_v24  ;;  %vm875_vm15 = vcmp.gt.s32.totalorder %v819_v16, 0 }
  0xee   : > { %v1003_v22 = vmax.f32 %v990_v11, 0.0  ;;  %v1272_v56 = vadd.f32 %v4126_v6, %v1260_v17  ;;  %v1143_v32 = vadd.f32 %v1135_v21, %v1116_v15  ;;  %v4205_v0 = vsel %vm4174_vm13, 1.0, %v3658_v9 }
  0xef   : > { %v1091_v28 = vld [vmem:[#allocation2 + $0x22] sm:$0xff]  ;;  %v1215_v29 = vadd.f32 %v1207_v20, %v1188_v19  ;;  %5258 = vst [vmem:[#allocation30_spill] sm:$0xff] %v4205_v0  ;;  %v4212_v19 = vsel %vm875_vm15, 1.0, %v3658_v9  ;;  %v826_v20 = vand.u32 7, %v4184_v27  ;;  %vm4222_vm2 = vcmp.lt.s32.totalorder %v819_v16, 7 }
  0xf0   : > { %v1032_v31 = vld [vmem:[#allocation2 + $0x28] sm:$0xff]  ;;  %1024 = vst.msk [vmem:[#allocation2 + $0x31] sm:$0xff] %vm1006_vm1, %v1003_v22  ;;  %v1099_v35 = vmul.f32 %v4138_v13, %v1091_v28  ;;  %v1171_v38 = vmul.f32 %v4104_v45, %v1091_v28  ;;  %v1243_v40 = vmul.f32 %v4088_v36, %v1091_v28  ;;  %v1280_v42 = vmax.f32 %v1272_v56, 0.0 }
  0xf1   : > { %v1040_v47 = vmul.f32 %v4165_v58, %v1032_v31  ;;  %v1126_v48 = vmul.f32 %v4133_v12, %v1032_v31  ;;  %v1234_v52 = vadd.f32 %v1226_v39, %v1215_v29  ;;  %v1162_v57 = vadd.f32 %v1154_v23, %v1143_v32  ;;  %v1066_v2 = vld [vmem:[#allocation2 + $0x29] sm:$0xff]  ;;  %5259 = vst [vmem:[#allocation31_spill] sm:$0xff] %v4212_v19 }
  0xf2   : > { %v1109_v51 = vmul.f32 %v4013_v46, %v1099_v35  ;;  %v1253_v53 = vmul.f32 %v4099_v43, %v1243_v40  ;;  %3063 = vmatmul.msk.f32.vlgmr.msra.gmra.mxu1 %vm1006_vm1, %v1280_v42  ;;  %v1181_v59 = vmul.f32 %v4047_v10, %v1171_v38  ;;  %v1198_v60 = vmul.f32 %v4094_v41, %v1032_v31 }
  0xf3   : > { %v992_v54 = vpop.f32.mrf.mxu0  ;;  %v1050_v4 = vmul.f32 %v4001_v37, %v1040_v47  ;;  %v1136_v11 = vmul.f32 %v4025_v55, %v1126_v48  ;;  %v1076_v14 = vmul.f32 %v3991_v33, %v1066_v2  ;;  %v1227_v24 = vmul.f32 %v4083_v34, %v1066_v2 }
  0xf4   : > { %v993_v61 = vadd.f32 %v3978_v25, %v992_v54  ;;  %v1261_v63 = vadd.f32 %v1253_v53, %v1234_v52  ;;  %v1117_v3 = vadd.f32 %v1109_v51, %v1083_v50  ;;  %v1189_v7 = vadd.f32 %v1181_v59, %v1162_v57 }
  0xf5   : > { %v1208_v8 = vmul.f32 %v4066_v18, %v1198_v60  ;;  %v1084_v35 = vadd.f32 %v1076_v14, %v1050_v4  ;;  %v1155_v27 = vmul.f32 %v4037_v1, %v1066_v2  ;;  %vm876_vm3 = vcmp.gt.s32.totalorder %v826_v20, 0 }
  0xf6   : > { %v1004_v15 = vmax.f32 %v993_v61, 0.0  ;;  %v1273_v17 = vadd.f32 %v4126_v6, %v1261_v63  ;;  %v1144_v56 = vadd.f32 %v1136_v11, %v1117_v3  ;;  %v4237_v59 = vsel %vm4222_vm2, 1.0, %v3658_v9 }
  0xf7   : > { %v1092_v21 = vld [vmem:[#allocation2 + $0x2a] sm:$0xff]  ;;  %v1216_v22 = vadd.f32 %v1208_v8, %v1189_v7  ;;  %5262 = vst [vmem:[#allocation32_spill] sm:$0xff] %v4237_v59  ;;  %vm4253_vm4 = vcmp.lt.s32.totalorder %v826_v20, 7 }
  0xf8   : > { %v1033_v26 = vld [vmem:[#allocation2 + $0x30] sm:$0xff]  ;;  %1025 = vst.msk [vmem:[#allocation2 + $0x39] sm:$0xff] %vm1006_vm1, %v1004_v15  ;;  %v1281_v28 = vmax.f32 %v1273_v17, 0.0  ;;  %v1100_v29 = vmul.f32 %v4205_v0, %v1092_v21  ;;  %v1172_v31 = vmul.f32 %v4138_v13, %v1092_v21  ;;  %v1244_v32 = vmul.f32 %v4104_v45, %v1092_v21 }
  0xf9   : > { %v1127_v39 = vmul.f32 %v4165_v58, %v1033_v26  ;;  %v1235_v42 = vadd.f32 %v1227_v24, %v1216_v22  ;;  %v1041_v47 = vmul.f32 %v4212_v19, %v1033_v26  ;;  %v1163_v50 = vadd.f32 %v1155_v27, %v1144_v56  ;;  %v1067_v54 = vld [vmem:[#allocation2 + $0x31] sm:$0xff] }
  0xfa   : > { %v1110_v40 = vmul.f32 %v4013_v46, %v1100_v29  ;;  %v1254_v23 = vmul.f32 %v4099_v43, %v1244_v32  ;;  %3064 = vmatmul.msk.f32.gmra.mxu1 %vm1006_vm1, %v1281_v28  ;;  %v1182_v51 = vmul.f32 %v4047_v10, %v1172_v31  ;;  %v1199_v16 = vmul.f32 %v4133_v12, %v1033_v26 }
  0xfb   : > { %v995_v48 = vpop.f32.mrf.mxu0  ;;  %v1137_v63 = vmul.f32 %v4025_v55, %v1127_v39  ;;  %v1051_v4 = vmul.f32 %v4001_v37, %v1041_v47  ;;  %v1077_v7 = vmul.f32 %v3991_v33, %v1067_v54  ;;  %v1228_v15 = vmul.f32 %v4083_v34, %v1067_v54 }
  0xfc   : > { %v996_v52 = vadd.f32 %v3978_v25, %v995_v48  ;;  %v1262_v53 = vadd.f32 %v1254_v23, %v1235_v42  ;;  %v1118_v57 = vadd.f32 %v1110_v40, %v1084_v35  ;;  %v1190_v60 = vadd.f32 %v1182_v51, %v1163_v50  ;;  %v1387_v42 = vld [vmem:[%s5178_s7 + $0x58] sm:$0xff]  ;;  %v1386_v23 = vld [vmem:[%s5178_s7 + $0x50] sm:$0xff] }
  0xfd   : > { %v1209_v61 = vmul.f32 %v4066_v18, %v1199_v16  ;;  %v4244_v25 = vsel %vm876_vm3, 1.0, %v3658_v9  ;;  %v1156_v56 = vmul.f32 %v4037_v1, %v1067_v54  ;;  %v1085_v32 = vadd.f32 %v1077_v7, %v1051_v4  ;;  %1420 = vmatpush.msra.mxu2 %v1387_v42  ;;  %v1384_v7 = vld [vmem:[%s5178_s7 + $0x40] sm:$0xff] }
  0xfe   : > { %v1005_v2 = vmax.f32 %v996_v52, 0.0  ;;  %v1274_v3 = vadd.f32 %v4126_v6, %v1262_v53  ;;  %5263 = vst [vmem:[#allocation33_spill] sm:$0xff] %v4244_v25  ;;  %v1145_v14 = vadd.f32 %v1137_v63, %v1118_v57  ;;  %v4274_v16 = vsel %vm4253_vm4, 1.0, %v3658_v9  ;;  %v1385_v57 = vld [vmem:[%s5178_s7 + $0x48] sm:$0xff] }
  0xff   : > { %v1093_v8 = vld [vmem:[#allocation2 + $0x32] sm:$0xff]  ;;  %v1217_v11 = vadd.f32 %v1209_v61, %v1190_v60  ;;  %5266 = vst [vmem:[#allocation34_spill] sm:$0xff] %v4274_v16  ;;  %1421 = vmatpush.msra.mxu2 %v1386_v23 }
 0x100   : > { %v1034_v17 = vld [vmem:[#allocation2 + $0x38] sm:$0xff]  ;;  %1026 = vst.msk [vmem:[#allocation2 + $0x41] sm:$0xff] %vm1006_vm1, %v1005_v2  ;;  %v1282_v21 = vmax.f32 %v1274_v3, 0.0  ;;  %v1101_v22 = vmul.f32 %v4237_v59, %v1093_v8  ;;  %v1173_v24 = vmul.f32 %v4205_v0, %v1093_v8  ;;  %v1245_v26 = vmul.f32 %v4138_v13, %v1093_v8 }
 0x101   : > { %v1042_v29 = vmul.f32 %v4244_v25, %v1034_v17  ;;  %v1128_v31 = vmul.f32 %v4212_v19, %v1034_v17  ;;  %v1236_v27 = vadd.f32 %v1228_v15, %v1217_v11  ;;  %v1164_v39 = vadd.f32 %v1156_v56, %v1145_v14  ;;  %v1068_v48 = vld [vmem:[#allocation2 + $0x39] sm:$0xff]  ;;  %1422 = vmatpush.msra.mxu2 %v1385_v57  ;;  %v1221_v57 = vld [vmem:[#allocation2 + $0x49] sm:$0xff] }
 0x102   : > { %v1111_v35 = vmul.f32 %v4013_v46, %v1101_v22  ;;  %v1255_v38 = vmul.f32 %v4099_v43, %v1245_v26  ;;  %3065 = vmatmul.msk.f32.gmra.mxu1 %vm1006_vm1, %v1282_v21  ;;  %v1183_v40 = vmul.f32 %v4047_v10, %v1173_v24  ;;  %v1200_v20 = vmul.f32 %v4165_v58, %v1034_v17  ;;  %v1383_v24 = vld [vmem:[%s5178_s7 + $0x38] sm:$0xff] }
 0x103   : > { %v1138_v51 = vmul.f32 %v4025_v55, %v1128_v31  ;;  %v1052_v52 = vmul.f32 %v4001_v37, %v1042_v29  ;;  %v1078_v63 = vmul.f32 %v3991_v33, %v1068_v48  ;;  %v1157_v3 = vmul.f32 %v4037_v1, %v1068_v48  ;;  %1423 = vmatpush.msra.mxu2 %v1384_v7 }
 0x104   : > { %v1263_v47 = vadd.f32 %v1255_v38, %v1236_v27  ;;  %v1119_v50 = vadd.f32 %v1111_v35, %v1085_v32  ;;  %v1191_v53 = vadd.f32 %v1183_v40, %v1164_v39  ;;  %v1210_v54 = vmul.f32 %v4066_v18, %v1200_v20  ;;  %v1382_v38 = vld [vmem:[%s5178_s7 + $0x30] sm:$0xff] }
 0x105   : > { %v1229_v4 = vmul.f32 %v4083_v34, %v1068_v48  ;;  %v1086_v33 = vadd.f32 %v1078_v63, %v1052_v52  ;;  %1424 = vmatpush.msra.mxu2 %v1383_v24  ;;  %v1377_v24 = vld [vmem:[%s5178_s7 + $0x8] sm:$0xff] }
 0x106   : > { %v1275_v60 = vadd.f32 %v4126_v6, %v1263_v47  ;;  %v1146_v61 = vadd.f32 %v1138_v51, %v1119_v50  ;;  %v1218_v9 = vadd.f32 %v1210_v54, %v1191_v53  ;;  %v1381_v47 = vld [vmem:[%s5178_s7 + $0x28] sm:$0xff] }
 0x107   : > { %v1094_v2 = vld [vmem:[#allocation2 + $0x3a] sm:$0xff]  ;;  %v1167_v14 = vld [vmem:[#allocation2 + $0x42] sm:$0xff]  ;;  %v1240_v53 = vld [vmem:[#allocation2 + $0x4a] sm:$0xff]  ;;  %1425 = vmatpush.msra.mxu2 %v1382_v38 }
 0x108   : > { %v1121_v37 = vld [vmem:[#allocation2 + $0x40] sm:$0xff]  ;;  %v1283_v8 = vmax.f32 %v1275_v60, 0.0  ;;  %v1102_v11 = vmul.f32 %v4274_v16, %v1094_v2  ;;  %v1174_v15 = vmul.f32 %v4237_v59, %v1094_v2  ;;  %v1246_v17 = vmul.f32 %v4205_v0, %v1094_v2  ;;  %v1194_v27 = vld [vmem:[#allocation2 + $0x48] sm:$0xff] }
 0x109   : > { %v1237_v21 = vadd.f32 %v1229_v4, %v1218_v9  ;;  %v1129_v22 = vmul.f32 %v4244_v25, %v1121_v37  ;;  %v1165_v28 = vadd.f32 %v1157_v3, %v1146_v61  ;;  %v1148_v31 = vld [vmem:[#allocation2 + $0x41] sm:$0xff]  ;;  %v1175_v32 = vmul.f32 %v4274_v16, %v1167_v14  ;;  %1426 = vmatpush.msra.mxu2 %v1381_v47  ;;  %v1379_v4 = vld [vmem:[%s5178_s7 + $0x18] sm:$0xff] }
 0x10a   : > { %v1112_v26 = vmul.f32 %v4013_v46, %v1102_v11  ;;  %v1256_v56 = vmul.f32 %v4099_v43, %v1246_v17  ;;  %v1184_v29 = vmul.f32 %v4047_v10, %v1174_v15  ;;  %3066 = vmatmul.msk.f32.gmra.mxu1 %vm1006_vm1, %v1283_v8  ;;  %v1201_v35 = vmul.f32 %v4212_v19, %v1121_v37  ;;  %v1380_v60 = vld [vmem:[%s5178_s7 + $0x20] sm:$0xff] }
 0x10b   : > { %v1139_v20 = vmul.f32 %v4025_v55, %v1129_v22  ;;  %v1247_v23 = vmul.f32 %v4237_v59, %v1167_v14  ;;  %v1158_v50 = vmul.f32 %v4037_v1, %v1148_v31  ;;  %v1202_v52 = vmul.f32 %v4244_v25, %v1194_v27  ;;  %1427 = vmatpush.msra.mxu2 %v1380_v60  ;;  %v3080_v60 = vld [vmem:[%s5180_s9 + $0x28] sm:$0xff] }
 0x10c   : > { %v1264_v39 = vadd.f32 %v1256_v56, %v1237_v21  ;;  %v1192_v46 = vadd.f32 %v1184_v29, %v1165_v28  ;;  %v1120_v40 = vadd.f32 %v1112_v26, %v1086_v33  ;;  %v1211_v42 = vmul.f32 %v4066_v18, %v1201_v35  ;;  %v3318_v26 = vld [vmem:[#allocation9] ss:$0 sm:$0xff]  ;;  %1553 = vmatpush.msra.mxu3 %v3080_v60 }
 0x10d   : > { %v1230_v55 = vmul.f32 %v4083_v34, %v1148_v31  ;;  %v1185_v2 = vmul.f32 %v4047_v10, %v1175_v32  ;;  %v1257_v1 = vmul.f32 %v4099_v43, %v1247_v23  ;;  %v1248_v9 = vmul.f32 %v4274_v16, %v1240_v53  ;;  %1428 = vmatpush.msra.mxu2 %v1379_v4  ;;  %v1485_v4 = vld [vmem:[#allocation3] sm:$0xff]  ;;  %v3132_v60 = vld [vmem:[%s5180_s9 + $0x88] sm:$0xff] }
 0x10e   : > { %v1276_v48 = vadd.f32 %v4126_v6, %v1264_v39  ;;  %v1147_v51 = vadd.f32 %v1139_v20, %v1120_v40  ;;  %v1219_v54 = vadd.f32 %v1211_v42, %v1192_v46  ;;  %v1212_v7 = vmul.f32 %v4066_v18, %v1202_v52 }
 0x10f   : > { %v1231_v8 = vmul.f32 %v4083_v34, %v1221_v57  ;;  %v1258_v17 = vmul.f32 %v4099_v43, %v1248_v9  ;;  %v1378_v34 = vld [vmem:[%s5178_s7 + $0x10] sm:$0xff]  ;;  %v1376_v43 = vld [vmem:[%s5178_s7] sm:$0xff] }
 0x110   : > { %v1284_v61 = vmax.f32 %v1276_v48, 0.0  ;;  %v1166_v63 = vadd.f32 %v1158_v50, %v1147_v51  ;;  %v1238_v3 = vadd.f32 %v1230_v55, %v1219_v54  ;;  %1429 = vmatpush.msra.mxu2 %v1378_v34  ;;  %v1501_v9 = vld [vmem:[%s5180_s9] sm:$0xff] }
 0x111   : > { %v3334_v34 = vld [vmem:[%s3867_s21] sm:$0xff] }
 0x112   : > { %v1193_v37 = vadd.f32 %v1185_v2, %v1166_v63  ;;  %3067 = vmatmul.msk.f32.gmra.mxu1 %vm1006_vm1, %v1284_v61  ;;  %v1265_v11 = vadd.f32 %v1257_v1, %v1238_v3  ;;  %1430 = vmatpush.msra.mxu2 %v1377_v24  ;;  %v3079_v61 = vld [vmem:[%s5180_s9 + $0x20] sm:$0xff]  ;;  %v1503_v63 = vld [vmem:[%s5180_s9 + $0x10] sm:$0xff]  ;;  %v3078_v2 = vld [vmem:[%s5180_s9 + $0x18] sm:$0xff] }
 0x113   : > { %1618 = vmatpush.msra.mxu0 %v1503_v63  ;;  %v1502_v3 = vld [vmem:[%s5180_s9 + $0x8] sm:$0xff]  ;;  %1554 = vmatpush.msra.mxu3 %v3079_v61  ;;  %v1504_v1 = vld [vmem:[#allocation3 + $0x1] sm:$0xff] }
 0x114   : > { %v1220_v10 = vadd.f32 %v1212_v7, %v1193_v37  ;;  %v1277_v15 = vadd.f32 %v4126_v6, %v1265_v11  ;;  %1431 = vmatpush.msra.mxu2 %v1376_v43  ;;  %v3099_v37 = vld [vmem:[%s5180_s9 + $0x40] sm:$0xff]  ;;  %v1493_v7 = vmul.f32 %v3986_v30, %v1485_v4  ;;  %v3110_v11 = vld [vmem:[%s5180_s9 + $0x58] sm:$0xff]  ;;  %v3164_v61 = vld [vmem:[%s5180_s9 + $0xc8] sm:$0xff] }
 0x115   : > { %1619 = vmatpush.msra.mxu0 %v1502_v3  ;;  %1555 = vmatpush.msra.mxu3 %v3078_v2  ;;  %v3131_v2 = vld [vmem:[%s5180_s9 + $0x80] sm:$0xff] }
 0x116   : > { %v1239_v14 = vadd.f32 %v1231_v8, %v1220_v10  ;;  %v1285_v33 = vmax.f32 %v1277_v15, 0.0  ;;  %3081 = vmatmul.msk.f32.vlgmr.msra.gmra.mxu3 %vm932_vm0, %v1504_v1  ;;  %v3121_v8 = vld [vmem:[%s5180_s9 + $0x70] sm:$0xff]  ;;  %v3120_v10 = vld [vmem:[%s5180_s9 + $0x68] sm:$0xff]  ;;  %1796 = vmatpush.msrb.mxu1 %v3110_v11  ;;  %v3163_v1 = vld [vmem:[%s5180_s9 + $0xc0] sm:$0xff] }
 0x117   : > { %1620 = vmatpush.msra.mxu0 %v1501_v9  ;;  %1703 = vmatpush.msrb.mxu3 %v3099_v37  ;;  %v3109_v15 = vld [vmem:[%s5180_s9 + $0x50] sm:$0xff]  ;;  %v3338_v9 = vld [vmem:[%s3867_s21 + $0x20] sm:$0xff] }
 0x118   : > { %v1266_v21 = vadd.f32 %v1258_v17, %v1239_v14  ;;  %3089 = vmatmul.msk.f32.vlgmr.msra.gmra.mxu0 %vm932_vm0, %v1493_v7  ;;  %1881 = vmatpush.msrb.mxu2 %v3121_v8  ;;  %v3119_v17 = vld [vmem:[%s5180_s9 + $0x60] sm:$0xff]  ;;  %v3108_v14 = vld [vmem:[%s5180_s9 + $0x48] sm:$0xff] }
 0x119   : > { %1797 = vmatpush.msrb.mxu1 %v3109_v15  ;;  %1974 = vmatpush.msrb.mxu0 %v3132_v60  ;;  %v3154_v15 = vld [vmem:[%s5180_s9 + $0xb8] sm:$0xff] }
 0x11a   : > { %3068 = vmatmul.msk.f32.gmra.mxu1 %vm1006_vm1, %v1285_v33  ;;  %v1278_v22 = vadd.f32 %v4126_v6, %v1266_v21  ;;  %1882 = vmatpush.msrb.mxu2 %v3120_v10  ;;  %v4390_v33 = vld [vmem:[#allocation10] ss:$0 sm:$0xff]  ;;  %v3098_v21 = vld [vmem:[%s5180_s9 + $0x38] sm:$0xff] }
 0x11b   : > { %1798 = vmatpush.msrb.mxu1 %v3108_v14  ;;  %1704 = vmatpush.msrb.mxu3 %v3098_v21 }
 0x11c   : > { %v1286_v18 = vmax.f32 %v1278_v22, 0.0  ;;  %1883 = vmatpush.msrb.mxu2 %v3119_v17  ;;  %1975 = vmatpush.msrb.mxu0 %v3131_v2 }
 0x11d   : > { %2152 = vmatpush.msra.mxu1 %v3154_v15 }
 0x122   : > { %3069 = vmatmul.msk.f32.gmra.mxu1 %vm1006_vm1, %v1286_v18 }
 0x167   : > { %v1344_v6 = vpop.f32.mrf.mxu0 }
 0x168   : > { %v1345_v56 = vadd.f32 %v3318_v26, %v1344_v6  ;;  %v3335_v6 = vld [vmem:[%s3867_s21 + $0x8] sm:$0xff] }
 0x16a   : > { %v1368_v28 = vmax.f32 %v1345_v56, 0.0 }
 0x16c   : > { %3070 = vmatmul.msk.f32.vlgmr.msra.gmra.mxu2 %vm1006_vm1, %v1368_v28 }
 0x16f   : > { %v1347_v29 = vpop.f32.mrf.mxu1 }
 0x170   : > { %v1348_v31 = vadd.f32 %v3318_v26, %v1347_v29 }
 0x172   : > { %v1369_v32 = vmax.f32 %v1348_v31, 0.0 }
 0x174   : > { %3071 = vmatmul.msk.f32.gmra.mxu2 %vm1006_vm1, %v1369_v32 }
 0x177   : > { %v1350_v35 = vpop.f32.mrf.mxu1 }
 0x178   : > { %v1351_v27 = vadd.f32 %v3318_v26, %v1350_v35 }
 0x17a   : > { %v1370_v38 = vmax.f32 %v1351_v27, 0.0 }
 0x17c   : > { %3072 = vmatmul.msk.f32.gmra.mxu2 %vm1006_vm1, %v1370_v38  ;;  %v3336_v38 = vld [vmem:[%s3867_s21 + $0x10] sm:$0xff] }
 0x17f   : > { %v1353_v39 = vpop.f32.mrf.mxu1 }
 0x180   : > { %v1354_v46 = vadd.f32 %v3318_v26, %v1353_v39 }
 0x182   : > { %v1371_v40 = vmax.f32 %v1354_v46, 0.0 }
 0x184   : > { %3073 = vmatmul.msk.f32.gmra.mxu2 %vm1006_vm1, %v1371_v40 }
 0x187   : > { %v1356_v20 = vpop.f32.mrf.mxu1 }
 0x188   : > { %v1357_v42 = vadd.f32 %v3318_v26, %v1356_v20 }
 0x18a   : > { %v1372_v23 = vmax.f32 %v1357_v42, 0.0 }
 0x18c   : > { %3074 = vmatmul.msk.f32.gmra.mxu2 %vm1006_vm1, %v1372_v23  ;;  %v3097_v23 = vld [vmem:[%s5180_s9 + $0x30] sm:$0xff] }
 0x18d   : > { %1705 = vmatpush.msrb.mxu3 %v3097_v23 }
 0x18f   : > { %v1359_v47 = vpop.f32.mrf.mxu1  ;;  %3204 = vmatpush.msra.mxu3 %v3121_v8 }
 0x190   : > { %v1360_v48 = vadd.f32 %v3318_v26, %v1359_v47 }
 0x191   : > { %3205 = vmatpush.msra.mxu3 %v3120_v10  ;;  %v3130_v10 = vld [vmem:[%s5180_s9 + $0x78] sm:$0xff] }
 0x192   : > { %v1373_v50 = vmax.f32 %v1360_v48, 0.0  ;;  %1976 = vmatpush.msrb.mxu0 %v3130_v10 }
 0x193   : > { %3206 = vmatpush.msra.mxu3 %v3119_v17  ;;  %v3153_v17 = vld [vmem:[%s5180_s9 + $0xb0] sm:$0xff] }
 0x194   : > { %3075 = vmatmul.msk.f32.gmra.mxu2 %vm1006_vm1, %v1373_v50  ;;  %v3337_v50 = vld [vmem:[%s3867_s21 + $0x18] sm:$0xff]  ;;  %2153 = vmatpush.msra.mxu1 %v3153_v17 }
 0x197   : > { %v1362_v51 = vpop.f32.mrf.mxu1 }
 0x198   : > { %v1363_v52 = vadd.f32 %v3318_v26, %v1362_v51 }
 0x19a   : > { %v1374_v53 = vmax.f32 %v1363_v52, 0.0 }
 0x19c   : > { %3076 = vmatmul.msk.f32.gmra.mxu2 %vm1006_vm1, %v1374_v53 }
 0x19f   : > { %v1365_v54 = vpop.f32.mrf.mxu1 }
 0x1a0   : > { %v1366_v55 = vadd.f32 %v3318_v26, %v1365_v54 }
 0x1a2   : > { %v1375_v57 = vmax.f32 %v1366_v55, 0.0 }
 0x1a4   : > { %3077 = vmatmul.msk.f32.gmra.mxu2 %vm1006_vm1, %v1375_v57  ;;  %v3165_v57 = vld [vmem:[%s5180_s9 + $0xd0] sm:$0xff]  ;;  %vm1475_vm1 = vcmask 189440  }
 0x1a5   : > { %2245 = vmatpush.msra.mxu2 %v3165_v57 }
 0x1a7   : > { %2246 = vmatpush.msra.mxu2 %v3164_v61 }
 0x1a9   : > { %2247 = vmatpush.msra.mxu2 %v3163_v1 }
 0x1ef   : > { %v1433_v22 = vpop.f32.mrf.mxu2 }
 0x1f0   : > { %v1434_v18 = vadd.f32 %v4390_v33, %v1433_v22  ;;  %v3339_v22 = vld [vmem:[%s3867_s21 + $0x28] sm:$0xff] }
 0x1f2   : > { %v1457_v24 = vadd.f32 %v3334_v34, %v1434_v18 }
 0x1f4   : > { %1477 = vst.msk [vmem:[#allocation3 + $0x9] sm:$0xff] %vm932_vm0, %v1457_v24 }
 0x1f7   : > { %v1436_v43 = vpop.f32.mrf.mxu2 }
 0x1f8   : > { %v1437_v26 = vadd.f32 %v4390_v33, %v1436_v43 }
 0x1fa   : > { %v1458_v56 = vadd.f32 %v3335_v6, %v1437_v26  ;;  %v3152_v6 = vld [vmem:[%s5180_s9 + $0xa8] sm:$0xff] }
 0x1fb   : > { %v1505_v28 = vld [vmem:[#allocation3 + $0x9] sm:$0xff]  ;;  %2154 = vmatpush.msra.mxu1 %v3152_v6  ;;  %v3142_v6 = vld [vmem:[%s5180_s9 + $0x98] sm:$0xff] }
 0x1fc   : > { %v1486_v29 = vld [vmem:[#allocation3 + $0x8] sm:$0xff]  ;;  %3082 = vmatmul.msk.f32.gmra.mxu3 %vm932_vm0, %v1505_v28  ;;  %3122 = vmatmul.msk.f32.vlgmr.msrb.gmra.mxu2 %vm932_vm0, %v1505_v28  ;;  %1478 = vst.msk [vmem:[#allocation3 + $0x11] sm:$0xff] %vm932_vm0, %v1458_v56 }
 0x1fd   : > { %v1494_v31 = vmul.f32 %v4016_v49, %v1486_v29  ;;  %v1747_v32 = vmul.f32 %v3986_v30, %v1486_v29  ;;  %v3340_v29 = vld [vmem:[%s3867_s21 + $0x30] sm:$0xff] }
 0x1ff   : > { %3090 = vmatmul.msk.f32.gmra.mxu0 %vm932_vm0, %v1494_v31  ;;  %3111 = vmatmul.msk.f32.vlgmr.msrb.gmra.mxu1 %vm932_vm0, %v1747_v32  ;;  %v1439_v35 = vpop.f32.mrf.mxu2 }
 0x200   : > { %v1440_v27 = vadd.f32 %v4390_v33, %v1439_v35 }
 0x202   : > { %v1459_v39 = vadd.f32 %v3336_v38, %v1440_v27 }
 0x203   : > { %v4409_v46 = vld [vmem:[#allocation3 + $0x11] sm:$0xff] }
 0x204   : > { %v4411_v40 = vld [vmem:[#allocation3 + $0x10] sm:$0xff]  ;;  %1479 = vst.msk [vmem:[#allocation3 + $0x19] sm:$0xff] %vm932_vm0, %v1459_v39  ;;  %3083 = vmatmul.msk.f32.gmra.mxu3 %vm932_vm0, %v4409_v46  ;;  %3123 = vmatmul.msk.f32.gmra.mxu2 %vm932_vm0, %v4409_v46 }
 0x205   : > { %v1495_v20 = vmul.f32 %v4042_v5, %v4411_v40  ;;  %v1748_v42 = vmul.f32 %v4016_v49, %v4411_v40 }
 0x207   : > { %3091 = vmatmul.msk.f32.gmra.mxu0 %vm932_vm0, %v1495_v20  ;;  %3112 = vmatmul.msk.f32.gmra.mxu1 %vm932_vm0, %v1748_v42  ;;  %v1442_v47 = vpop.f32.mrf.mxu2  ;;  %v3341_v42 = vld [vmem:[%s3867_s21 + $0x38] sm:$0xff] }
 0x208   : > { %v1443_v48 = vadd.f32 %v4390_v33, %v1442_v47 }
 0x20a   : > { %v1460_v51 = vadd.f32 %v3337_v50, %v1443_v48 }
 0x20b   : > { %v4429_v52 = vld [vmem:[#allocation3 + $0x19] sm:$0xff] }
 0x20c   : > { %v4431_v53 = vld [vmem:[#allocation3 + $0x18] sm:$0xff]  ;;  %1480 = vst.msk [vmem:[#allocation3 + $0x21] sm:$0xff] %vm932_vm0, %v1460_v51  ;;  %3084 = vmatmul.msk.f32.gmra.mxu3 %vm932_vm0, %v4429_v52  ;;  %3124 = vmatmul.msk.f32.gmra.mxu2 %vm932_vm0, %v4429_v52  ;;  %v1646_v51 = vld [vmem:[#allocation3 + $0x2] sm:$0xff] }
 0x20d   : > { %v1496_v54 = vmul.f32 %v4094_v41, %v4431_v53  ;;  %v1749_v55 = vmul.f32 %v4042_v5, %v4431_v53  ;;  %v1654_v57 = vmul.f32 %v4008_v44, %v1646_v51 }
 0x20f   : > { %3092 = vmatmul.msk.f32.gmra.mxu0 %vm932_vm0, %v1496_v54  ;;  %3113 = vmatmul.msk.f32.gmra.mxu1 %vm932_vm0, %v1749_v55  ;;  %v1445_v63 = vpop.f32.mrf.mxu2  ;;  %v2188_v54 = vld [vmem:[#allocation3 + $0x12] sm:$0xff]  ;;  %v1917_v55 = vld [vmem:[#allocation3 + $0xa] sm:$0xff] }
 0x210   : > { %v1446_v3 = vadd.f32 %v4390_v33, %v1445_v63  ;;  %v2196_v60 = vmul.f32 %v4008_v44, %v2188_v54  ;;  %v1925_v2 = vmul.f32 %v4008_v44, %v1917_v55  ;;  %v1655_v1 = vmul.f32 %v4031_v62, %v1917_v55 }
 0x212   : > { %v1461_v4 = vadd.f32 %v3338_v9, %v1446_v3 }
 0x213   : > { %v4461_v37 = vld [vmem:[#allocation3 + $0x21] sm:$0xff] }
 0x214   : > { %v4463_v7 = vld [vmem:[#allocation3 + $0x20] sm:$0xff]  ;;  %1481 = vst.msk [vmem:[#allocation3 + $0x29] sm:$0xff] %vm932_vm0, %v1461_v4  ;;  %3085 = vmatmul.msk.f32.gmra.mxu3 %vm932_vm0, %v4461_v37  ;;  %3125 = vmatmul.msk.f32.gmra.mxu2 %vm932_vm0, %v4461_v37  ;;  %v1926_v4 = vmul.f32 %v4031_v62, %v2188_v54 }
 0x215   : > { %v1497_v8 = vmul.f32 %v4133_v12, %v4463_v7  ;;  %v1750_v11 = vmul.f32 %v4094_v41, %v4463_v7  ;;  %v2189_v3 = vld [vmem:[#allocation3 + $0x1a] sm:$0xff] }
 0x216   : > { %v2197_v9 = vmul.f32 %v4031_v62, %v2189_v3  ;;  %v1927_v15 = vmul.f32 %v4088_v36, %v2189_v3 }
 0x217   : > { %3093 = vmatmul.msk.f32.gmra.mxu0 %vm932_vm0, %v1497_v8  ;;  %3114 = vmatmul.msk.f32.gmra.mxu1 %vm932_vm0, %v1750_v11  ;;  %v1448_v14 = vpop.f32.mrf.mxu2  ;;  %v1656_v11 = vmul.f32 %v4088_v36, %v2188_v54  ;;  %v2020_v54 = vmul.f32 %v4042_v5, %v4463_v7 }
 0x218   : > { %v1449_v21 = vadd.f32 %v4390_v33, %v1448_v14  ;;  %v1657_v14 = vmul.f32 %v4104_v45, %v2189_v3 }
 0x21a   : > { %v1462_v18 = vadd.f32 %v3339_v22, %v1449_v21 }
 0x21b   : > { %v4487_v34 = vld [vmem:[#allocation3 + $0x29] sm:$0xff] }
 0x21c   : > { %v4489_v24 = vld [vmem:[#allocation3 + $0x28] sm:$0xff]  ;;  %1482 = vst.msk [vmem:[#allocation3 + $0x31] sm:$0xff] %vm932_vm0, %v1462_v18  ;;  %3086 = vmatmul.msk.f32.gmra.mxu3 %vm932_vm0, %v4487_v34  ;;  %3126 = vmatmul.msk.f32.gmra.mxu2 %vm932_vm0, %v4487_v34 }
 0x21d   : > { %v1498_v43 = vmul.f32 %v4165_v58, %v4489_v24  ;;  %v1751_v26 = vmul.f32 %v4133_v12, %v4489_v24  ;;  %v2190_v8 = vld [vmem:[#allocation3 + $0x22] sm:$0xff] }
 0x21e   : > { %v2198_v10 = vmul.f32 %v4088_v36, %v2190_v8  ;;  %v1928_v21 = vmul.f32 %v4104_v45, %v2190_v8  ;;  %v1658_v18 = vmul.f32 %v4138_v13, %v2190_v8 }
 0x21f   : > { %3094 = vmatmul.msk.f32.gmra.mxu0 %vm932_vm0, %v1498_v43  ;;  %3115 = vmatmul.msk.f32.gmra.mxu1 %vm932_vm0, %v1751_v26  ;;  %v1451_v56 = vpop.f32.mrf.mxu2  ;;  %v3143_v26 = vld [vmem:[%s5180_s9 + $0xa0] sm:$0xff] }
 0x220   : > { %v1452_v28 = vadd.f32 %v4390_v33, %v1451_v56 }
 0x222   : > { %v1463_v31 = vadd.f32 %v3340_v29, %v1452_v28 }
 0x223   : > { %v4507_v32 = vld [vmem:[#allocation3 + $0x31] sm:$0xff] }
 0x224   : > { %v4509_v35 = vld [vmem:[#allocation3 + $0x30] sm:$0xff]  ;;  %1483 = vst.msk [vmem:[#allocation3 + $0x39] sm:$0xff] %vm932_vm0, %v1463_v31  ;;  %3087 = vmatmul.msk.f32.gmra.mxu3 %vm932_vm0, %v4507_v32  ;;  %3127 = vmatmul.msk.f32.gmra.mxu2 %vm932_vm0, %v4507_v32 }
 0x225   : > { %v1499_v27 = vmul.f32 %v4212_v19, %v4509_v35  ;;  %v1752_v38 = vmul.f32 %v4165_v58, %v4509_v35  ;;  %v2191_v17 = vld [vmem:[#allocation3 + $0x2a] sm:$0xff]  ;;  %v2022_v7 = vmul.f32 %v4133_v12, %v4509_v35 }
 0x226   : > { %v1929_v43 = vmul.f32 %v4138_v13, %v2191_v17  ;;  %v1659_v28 = vmul.f32 %v4205_v0, %v2191_v17 }
 0x227   : > { %3095 = vmatmul.msk.f32.gmra.mxu0 %vm932_vm0, %v1499_v27  ;;  %3116 = vmatmul.msk.f32.gmra.mxu1 %vm932_vm0, %v1752_v38  ;;  %v1454_v39 = vpop.f32.mrf.mxu2 }
 0x228   : > { %v1455_v20 = vadd.f32 %v4390_v33, %v1454_v39 }
 0x22a   : > { %v1464_v23 = vadd.f32 %v3341_v42, %v1455_v20 }
 0x22b   : > { %v4524_v47 = vld [vmem:[#allocation3 + $0x39] sm:$0xff] }
 0x22c   : > { %v4526_v48 = vld [vmem:[#allocation3 + $0x38] sm:$0xff]  ;;  %1484 = vst.msk [vmem:[#allocation3 + $0x41] sm:$0xff] %vm932_vm0, %v1464_v23  ;;  %3088 = vmatmul.msk.f32.gmra.mxu3 %vm932_vm0, %v4524_v47  ;;  %3128 = vmatmul.msk.f32.gmra.mxu2 %vm932_vm0, %v4524_v47  ;;  %v4613_v23 = vpop.f32.mrf.mxu3 }
 0x22d   : > { %v1500_v50 = vmul.f32 %v4244_v25, %v4526_v48  ;;  %v1753_v33 = vmul.f32 %v4212_v19, %v4526_v48  ;;  %v2192_v22 = vld [vmem:[#allocation3 + $0x32] sm:$0xff] }
 0x22e   : > { %v1930_v31 = vmul.f32 %v4205_v0, %v2192_v22  ;;  %v1660_v27 = vmul.f32 %v4237_v59, %v2192_v22 }
 0x22f   : > { %3096 = vmatmul.msk.f32.gmra.mxu0 %vm932_vm0, %v1500_v50  ;;  %3117 = vmatmul.msk.f32.gmra.mxu1 %vm932_vm0, %v1753_v33  ;;  %v2018_v50 = vmul.f32 %v3986_v30, %v4411_v40  ;;  %v2019_v33 = vmul.f32 %v4016_v49, %v4431_v53  ;;  %v2021_v40 = vmul.f32 %v4094_v41, %v4489_v24  ;;  %v1622_v24 = vpop.f32.mrf.mxu0 }
 0x233   : > { %v4541_v61 = vld [vmem:[#allocation3 + $0x40] sm:$0xff] }
 0x234   : > { %3100 = vmatmul.msk.f32.vlgmr.msrb.gmra.mxu3 %vm932_vm0, %v1654_v57  ;;  %3166 = vmatmul.msk.f32.vlgmr.msra.gmra.mxu2 %vm932_vm0, %v2196_v60  ;;  %v1754_v63 = vmul.f32 %v4244_v25, %v4541_v61  ;;  %v2193_v56 = vld [vmem:[#allocation3 + $0x3a] sm:$0xff]  ;;  %v2024_v8 = vmul.f32 %v4212_v19, %v4541_v61 }
 0x235   : > { %2067 = vmatpush.msrb.mxu3 %v3143_v26  ;;  %v2201_v29 = vmul.f32 %v4205_v0, %v2193_v56  ;;  %v1931_v39 = vmul.f32 %v4237_v59, %v2193_v56  ;;  %v1661_v20 = vmul.f32 %v4274_v16, %v2193_v56  ;;  %v2109_v42 = vld [vmem:[#allocation3 + $0x41] sm:$0xff]  ;;  %v4632_v57 = vld [vmem:[#allocation4] sm:$0xff] }
 0x236   : > { %1476 = vst.msk [vmem:[#allocation3 + $0x50] sm:$0x3] %vm1475_vm1, %v4632_v57 }
 0x237   : > { %3118 = vmatmul.msk.f32.gmra.mxu1 %vm932_vm0, %v1754_v63  ;;  %3133 = vmatmul.msk.f32.vlgmr.msrb.gmra.mxu0 %vm932_vm0, %v1925_v2 }
 0x238   : > { %2068 = vmatpush.msrb.mxu3 %v3142_v6 }
 0x23c   : > { %3101 = vmatmul.msk.f32.gmra.mxu3 %vm932_vm0, %v1655_v1  ;;  %3167 = vmatmul.msk.f32.gmra.mxu2 %vm932_vm0, %v2197_v9  ;;  %v2023_v1 = vmul.f32 %v4165_v58, %v4526_v48  ;;  %v2017_v48 = vld [vmem:[#allocation3 + $0x48] sm:$0xff] }
 0x23d   : > { %v2195_v60 = vld [vmem:[#allocation3 + $0x4a] sm:$0xff] }
 0x23e   : > { %v2203_v63 = vmul.f32 %v4274_v16, %v2195_v60  ;;  %v2110_v2 = vld [vmem:[#allocation3 + $0x49] sm:$0xff] }
 0x23f   : > { %3134 = vmatmul.msk.f32.gmra.mxu0 %vm932_vm0, %v1926_v4  ;;  %3155 = vmatmul.msk.f32.vlgmr.msra.gmra.mxu1 %vm932_vm0, %v4409_v46  ;;  %v2199_v46 = vmul.f32 %v4104_v45, %v2191_v17 }
 0x244   : > { %3102 = vmatmul.msk.f32.gmra.mxu3 %vm932_vm0, %v1656_v11  ;;  %3168 = vmatmul.msk.f32.gmra.mxu2 %vm932_vm0, %v2198_v10  ;;  %v2304_v11 = vld [vmem:[%s5182_s11 + $0x18] sm:$0xff] }
 0x245   : > { %2346 = vmatpush.msra.mxu0 %v2304_v11 }
 0x247   : > { %3135 = vmatmul.msk.f32.gmra.mxu0 %vm932_vm0, %v1927_v15  ;;  %3156 = vmatmul.msk.f32.gmra.mxu1 %vm932_vm0, %v4429_v52  ;;  %v2200_v52 = vmul.f32 %v4138_v13, %v2192_v22 }
 0x24c   : > { %3103 = vmatmul.msk.f32.gmra.mxu3 %vm932_vm0, %v1657_v14  ;;  %3169 = vmatmul.msk.f32.gmra.mxu2 %vm932_vm0, %v2199_v46  ;;  %v2025_v14 = vmul.f32 %v4244_v25, %v2017_v48 }
 0x24f   : > { %3136 = vmatmul.msk.f32.gmra.mxu0 %vm932_vm0, %v1928_v21  ;;  %3157 = vmatmul.msk.f32.gmra.mxu1 %vm932_vm0, %v4461_v37  ;;  %v3141_v37 = vld [vmem:[%s5180_s9 + $0x90] sm:$0xff] }
 0x250   : > { %2069 = vmatpush.msrb.mxu3 %v3141_v37 }
 0x254   : > { %3104 = vmatmul.msk.f32.gmra.mxu3 %vm932_vm0, %v1658_v18  ;;  %3170 = vmatmul.msk.f32.gmra.mxu2 %vm932_vm0, %v2200_v52  ;;  %v2303_v18 = vld [vmem:[%s5182_s11 + $0x10] sm:$0xff] }
 0x255   : > { %2347 = vmatpush.msra.mxu0 %v2303_v18 }
 0x257   : > { %3137 = vmatmul.msk.f32.gmra.mxu0 %vm932_vm0, %v1929_v43  ;;  %3158 = vmatmul.msk.f32.gmra.mxu1 %vm932_vm0, %v4487_v34  ;;  %v2194_v34 = vld [vmem:[#allocation3 + $0x42] sm:$0xff] }
 0x258   : > { %v2202_v38 = vmul.f32 %v4237_v59, %v2194_v34 }
 0x25c   : > { %3105 = vmatmul.msk.f32.gmra.mxu3 %vm932_vm0, %v1659_v28  ;;  %3171 = vmatmul.msk.f32.gmra.mxu2 %vm932_vm0, %v2201_v29  ;;  %v2302_v28 = vld [vmem:[%s5182_s11 + $0x8] sm:$0xff] }
 0x25d   : > { %2348 = vmatpush.msra.mxu0 %v2302_v28 }
 0x25f   : > { %3138 = vmatmul.msk.f32.gmra.mxu0 %vm932_vm0, %v1930_v31  ;;  %3159 = vmatmul.msk.f32.gmra.mxu1 %vm932_vm0, %v4507_v32  ;;  %v1932_v32 = vmul.f32 %v4274_v16, %v2194_v34 }
 0x264   : > { %3106 = vmatmul.msk.f32.gmra.mxu3 %vm932_vm0, %v1660_v27  ;;  %3172 = vmatmul.msk.f32.gmra.mxu2 %vm932_vm0, %v2202_v38 }
 0x267   : > { %3139 = vmatmul.msk.f32.gmra.mxu0 %vm932_vm0, %v1931_v39  ;;  %3160 = vmatmul.msk.f32.gmra.mxu1 %vm932_vm0, %v4524_v47 }
 0x26c   : > { %3107 = vmatmul.msk.f32.gmra.mxu3 %vm932_vm0, %v1661_v20  ;;  %3173 = vmatmul.msk.f32.gmra.mxu2 %vm932_vm0, %v2203_v63 }
 0x26f   : > { %3140 = vmatmul.msk.f32.gmra.mxu0 %vm932_vm0, %v1932_v32  ;;  %3161 = vmatmul.msk.f32.gmra.mxu1 %vm932_vm0, %v2109_v42  ;;  %v2301_v32 = vld [vmem:[%s5182_s11] sm:$0xff] }
 0x270   : > { %2349 = vmatpush.msra.mxu0 %v2301_v32 }
 0x274   : > { %3129 = vmatmul.msk.f32.vlgmr.msra.gmra.mxu3 %vm932_vm0, %v2109_v42 }
 0x277   : > { %3162 = vmatmul.msk.f32.gmra.mxu1 %vm932_vm0, %v2110_v2 }
 0x27c   : > { %3144 = vmatmul.msk.f32.vlgmr.msrb.gmra.mxu3 %vm932_vm0, %v2018_v50  ;;  %v1800_v9 = vpop.f32.mrf.mxu1  ;;  %v1625_v35 = vpop.f32.mrf.mxu0 }
 0x27f   : > { %v4618_v47 = vpop.f32.mrf.mxu3  ;;  %v1885_v15 = vpop.f32.mrf.mxu2 }
 0x280   : > { %v1626_v32 = vadd.f32 %v1625_v35, %v4618_v47 }
 0x284   : > { %3145 = vmatmul.msk.f32.gmra.mxu3 %vm932_vm0, %v2019_v33  ;;  %v1803_v10 = vpop.f32.mrf.mxu1  ;;  %v1628_v46 = vpop.f32.mrf.mxu0 }
 0x287   : > { %v4623_v51 = vpop.f32.mrf.mxu3  ;;  %v1888_v61 = vpop.f32.mrf.mxu2 }
 0x288   : > { %v1629_v45 = vadd.f32 %v1628_v46, %v4623_v51 }
 0x28c   : > { %3146 = vmatmul.msk.f32.gmra.mxu3 %vm932_vm0, %v2020_v54  ;;  %v1806_v21 = vpop.f32.mrf.mxu1  ;;  %v1631_v52 = vpop.f32.mrf.mxu0 }
 0x28f   : > { %v4628_v55 = vpop.f32.mrf.mxu3  ;;  %v1891_v6 = vpop.f32.mrf.mxu2 }
 0x294   : > { %3147 = vmatmul.msk.f32.gmra.mxu3 %vm932_vm0, %v2021_v40  ;;  %v4664_v26 = vpop.f32.mrf.mxu1  ;;  %v4666_v37 = vpop.f32.mrf.mxu0 }
 0x297   : > { %v4636_v53 = vpop.f32.mrf.mxu3  ;;  %v4673_v31 = vpop.f32.mrf.mxu2 }
 0x29c   : > { %3148 = vmatmul.msk.f32.gmra.mxu3 %vm932_vm0, %v2022_v7  ;;  %v4671_v29 = vpop.f32.mrf.mxu1  ;;  %v4675_v27 = vpop.f32.mrf.mxu0 }
 0x29f   : > { %v4644_v3 = vpop.f32.mrf.mxu3  ;;  %v4679_v39 = vpop.f32.mrf.mxu2 }
 0x2a4   : > { %3149 = vmatmul.msk.f32.gmra.mxu3 %vm932_vm0, %v2023_v1  ;;  %v4677_v38 = vpop.f32.mrf.mxu1  ;;  %v4684_v42 = vpop.f32.mrf.mxu0 }
 0x2a7   : > { %v4649_v4 = vpop.f32.mrf.mxu3  ;;  %v4690_v54 = vpop.f32.mrf.mxu2 }
 0x2ac   : > { %3150 = vmatmul.msk.f32.gmra.mxu3 %vm932_vm0, %v2024_v8  ;;  %v4686_v50 = vpop.f32.mrf.mxu1  ;;  %v4692_v40 = vpop.f32.mrf.mxu0  ;;  %v1623_v8 = vadd.f32 %v1622_v24, %v4613_v23 }
 0x2af   : > { %v4657_v17 = vpop.f32.mrf.mxu3  ;;  %v4698_v63 = vpop.f32.mrf.mxu2 }
 0x2b4   : > { %3151 = vmatmul.msk.f32.gmra.mxu3 %vm932_vm0, %v2025_v14  ;;  %v4696_v7 = vpop.f32.mrf.mxu1  ;;  %v1978_v2 = vpop.f32.mrf.mxu0 }
 0x2b7   : > { %v1707_v22 = vpop.f32.mrf.mxu3  ;;  %v2249_v14 = vpop.f32.mrf.mxu2 }
 0x2b8   : > { %v1731_v11 = vadd.f32 %v1707_v22, %v1623_v8  ;;  %v4707_v22 = vld [vmem:[#allocation12] ss:$0 sm:$0xff] }
 0x2ba   : > { %v1824_v18 = vadd.f32 %v1800_v9, %v1731_v11 }
 0x2bc   : > { %v2156_v48 = vpop.f32.mrf.mxu1  ;;  %v1981_v16 = vpop.f32.mrf.mxu0  ;;  %v1909_v59 = vadd.f32 %v1885_v15, %v1824_v18 }
 0x2be   : > { %v2002_v58 = vadd.f32 %v1978_v2, %v1909_v59  ;;  %v1632_v59 = vadd.f32 %v1631_v52, %v4628_v55  ;;  %v1635_v52 = vadd.f32 %v4666_v37, %v4636_v53 }
 0x2bf   : > { %v1710_v43 = vpop.f32.mrf.mxu3  ;;  %v2252_v13 = vpop.f32.mrf.mxu2 }
 0x2c0   : > { %v1732_v25 = vadd.f32 %v1710_v43, %v1626_v32 }
 0x2c2   : > { %v1825_v19 = vadd.f32 %v1803_v10, %v1732_v25 }
 0x2c4   : > { %v2159_v0 = vpop.f32.mrf.mxu1  ;;  %v1910_v9 = vadd.f32 %v1888_v61, %v1825_v19  ;;  %v1984_v8 = vpop.f32.mrf.mxu0 }
 0x2c6   : > { %v2003_v35 = vadd.f32 %v1981_v16, %v1910_v9 }
 0x2c7   : > { %v1713_v56 = vpop.f32.mrf.mxu3 }
 0x2c8   : > { %v1733_v23 = vadd.f32 %v1713_v56, %v1629_v45  ;;  %v2255_v45 = vpop.f32.mrf.mxu2 }
 0x2ca   : > { %v1826_v36 = vadd.f32 %v1806_v21, %v1733_v23 }
 0x2cc   : > { %v2162_v15 = vpop.f32.mrf.mxu1  ;;  %v1911_v19 = vadd.f32 %v1891_v6, %v1826_v36  ;;  %v1987_v46 = vpop.f32.mrf.mxu0 }
 0x2ce   : > { %v2004_v61 = vadd.f32 %v1984_v8, %v1911_v19 }
 0x2cf   : > { %v1716_v34 = vpop.f32.mrf.mxu3 }
 0x2d4   : > { %v2165_v56 = vpop.f32.mrf.mxu1  ;;  %v1990_v37 = vpop.f32.mrf.mxu0 }
 0x2d7   : > { %v1719_v20 = vpop.f32.mrf.mxu3 }
 0x2df   : > { %v4688_v33 = vpop.f32.mrf.mxu3 }
 0x2e7   : > { %v4694_v60 = vpop.f32.mrf.mxu3 }
 0x2ef   : > { %v4700_v1 = vpop.f32.mrf.mxu3 }
 0x2f7   : > { %v4703_v28 = vpop.f32.mrf.mxu3 }
 0x2ff   : > { %v2071_v12 = vpop.f32.mrf.mxu3 }
 0x300   : > { %v2095_v41 = vadd.f32 %v2071_v12, %v2002_v58 }
 0x302   : > { %v2180_v24 = vadd.f32 %v2156_v48, %v2095_v41  ;;  %v1734_v41 = vadd.f32 %v1716_v34, %v1632_v59  ;;  %v1735_v34 = vadd.f32 %v1719_v20, %v1635_v52  ;;  %v1638_v20 = vadd.f32 %v4675_v27, %v4644_v3  ;;  %v1993_v59 = vpop.f32.mrf.mxu0  ;;  %v2680_v52 = vld [vmem:[%s5186_s15 + $0x58] sm:$0xff] }
 0x304   : > { %v2273_v11 = vadd.f32 %v2249_v14, %v2180_v24  ;;  %v1827_v16 = vadd.f32 %v4664_v26, %v1734_v41  ;;  %v1828_v6 = vadd.f32 %v4671_v29, %v1735_v34  ;;  %v1736_v23 = vadd.f32 %v4688_v33, %v1638_v20  ;;  %v2679_v34 = vld [vmem:[%s5186_s15 + $0x50] sm:$0xff] }
 0x305   : > { %v1641_v33 = vadd.f32 %v4684_v42, %v4649_v4  ;;  %v2683_v4 = vld [vmem:[%s5186_s15 + $0x70] sm:$0xff] }
 0x306   : > { %v4710_v47 = vadd.f32 %v4707_v22, %v2273_v11  ;;  %v1912_v36 = vadd.f32 %v4673_v31, %v1827_v16  ;;  %v1913_v29 = vadd.f32 %v4679_v39, %v1828_v6  ;;  %v2168_v31 = vpop.f32.mrf.mxu1  ;;  %v1829_v11 = vadd.f32 %v4677_v38, %v1736_v23 }
 0x307   : > { %v2074_v25 = vpop.f32.mrf.mxu3 }
 0x308   : > { %v2293_v51 = vmax.f32 %v4710_v47, 0.0  ;;  %v2096_v12 = vadd.f32 %v2074_v25, %v2003_v35  ;;  %v2005_v53 = vadd.f32 %v1987_v46, %v1912_v36  ;;  %v2006_v3 = vadd.f32 %v1990_v37, %v1913_v29 }
 0x309   : > { %v1914_v38 = vadd.f32 %v4690_v54, %v1829_v11 }
 0x30a   : > { %v2181_v58 = vadd.f32 %v2159_v0, %v2096_v12  ;;  %3174 = vmatmul.msk.f32.vlgmr.msra.gmra.mxu0 %vm2309_vm5, %v2293_v51  ;;  %v1737_v12 = vadd.f32 %v4694_v60, %v1641_v33  ;;  %v2682_v60 = vld [vmem:[%s5186_s15 + $0x68] sm:$0xff] }
 0x30b   : > { %v2007_v19 = vadd.f32 %v1993_v59, %v1914_v38  ;;  %v2677_v59 = vld [vmem:[%s5186_s15 + $0x40] sm:$0xff] }
 0x30c   : > { %v2274_v10 = vadd.f32 %v2252_v13, %v2181_v58  ;;  %v2258_v13 = vpop.f32.mrf.mxu2  ;;  %v1830_v58 = vadd.f32 %v4686_v50, %v1737_v12  ;;  %v1644_v50 = vadd.f32 %v4692_v40, %v4657_v17  ;;  %v2678_v17 = vld [vmem:[%s5186_s15 + $0x48] sm:$0xff]  ;;  %v2676_v12 = vld [vmem:[%s5186_s15 + $0x38] sm:$0xff]  ;;  %v2673_v38 = vld [vmem:[%s5186_s15 + $0x20] sm:$0xff] }
 0x30e   : > { %v4719_v21 = vadd.f32 %v4707_v22, %v2274_v10  ;;  %v2171_v41 = vpop.f32.mrf.mxu1  ;;  %v2681_v10 = vld [vmem:[%s5186_s15 + $0x60] sm:$0xff]  ;;  %v1738_v36 = vadd.f32 %v4700_v1, %v1644_v50 }
 0x30f   : > { %v2077_v55 = vpop.f32.mrf.mxu3 }
 0x310   : > { %v2294_v43 = vmax.f32 %v4719_v21, 0.0  ;;  %v2097_v0 = vadd.f32 %v2077_v55, %v2004_v61 }
 0x312   : > { %v2182_v2 = vadd.f32 %v2162_v15, %v2097_v0  ;;  %3175 = vmatmul.msk.f32.gmra.mxu0 %vm2309_vm5, %v2294_v43 }
 0x314   : > { %v2275_v26 = vadd.f32 %v2255_v45, %v2182_v2  ;;  %v2261_v8 = vpop.f32.mrf.mxu2  ;;  %v2684_v45 = vld [vmem:[%s5186_s15 + $0x78] sm:$0xff]  ;;  %v1996_v2 = vpop.f32.mrf.mxu0 }
 0x315   : > { %2689 = vmatpush.msra.mxu3 %v2684_v45  ;;  %v2672_v45 = vld [vmem:[%s5186_s15 + $0x18] sm:$0xff] }
 0x316   : > { %v4730_v48 = vadd.f32 %v4707_v22, %v2275_v26  ;;  %v2174_v6 = vpop.f32.mrf.mxu1 }
 0x317   : > { %v2080_v14 = vpop.f32.mrf.mxu3  ;;  %2690 = vmatpush.msra.mxu3 %v2683_v4  ;;  %v4826_v4 = vld [vmem:[#allocation13] ss:$0 sm:$0xff] }
 0x318   : > { %v2295_v18 = vmax.f32 %v4730_v48, 0.0  ;;  %v2098_v32 = vadd.f32 %v2080_v14, %v2005_v53  ;;  %v1831_v53 = vadd.f32 %v4696_v7, %v1738_v36 }
 0x319   : > { %2691 = vmatpush.msra.mxu3 %v2682_v60  ;;  %v2670_v60 = vld [vmem:[%s5186_s15 + $0x8] sm:$0xff] }
 0x31a   : > { %v2183_v24 = vadd.f32 %v2165_v56, %v2098_v32  ;;  %3176 = vmatmul.msk.f32.gmra.mxu0 %vm2309_vm5, %v2295_v18  ;;  %v1915_v56 = vadd.f32 %v4698_v63, %v1830_v58  ;;  %v1916_v1 = vadd.f32 %v4703_v28, %v1831_v53 }
 0x31b   : > { %2692 = vmatpush.msra.mxu3 %v2681_v10  ;;  %v2669_v10 = vld [vmem:[%s5186_s15] sm:$0xff] }
 0x31c   : > { %v2276_v9 = vadd.f32 %v2258_v13, %v2183_v24  ;;  %v2264_v46 = vpop.f32.mrf.mxu2  ;;  %v2008_v26 = vadd.f32 %v1996_v2, %v1915_v56  ;;  %v1999_v24 = vpop.f32.mrf.mxu0  ;;  %v4856_v2 = vld [vmem:[%s5184_s13 + $0x2] ss:$0 sm:$0xff] }
 0x31d   : > { %2693 = vmatpush.msra.mxu3 %v2680_v52  ;;  %v4848_v52 = vld [vmem:[%s5184_s13 + $0x1] ss:$0 sm:$0xff] }
 0x31e   : > { %v4742_v35 = vadd.f32 %v4707_v22, %v2276_v9 }
 0x31f   : > { %v2083_v27 = vpop.f32.mrf.mxu3  ;;  %2694 = vmatpush.msra.mxu3 %v2679_v34 }
 0x320   : > { %v2296_v15 = vmax.f32 %v4742_v35, 0.0  ;;  %v2099_v25 = vadd.f32 %v2083_v27, %v2006_v3 }
 0x321   : > { %2695 = vmatpush.msra.mxu3 %v2678_v17 }
 0x322   : > { %v2184_v39 = vadd.f32 %v2168_v31, %v2099_v25  ;;  %3177 = vmatmul.msk.f32.gmra.mxu0 %vm2309_vm5, %v2296_v15  ;;  %v2009_v31 = vadd.f32 %v1999_v24, %v1916_v1  ;;  %v4872_v24 = vld [vmem:[%s5184_s13 + $0x4] ss:$0 sm:$0xff] }
 0x323   : > { %2696 = vmatpush.msra.mxu3 %v2677_v59 }
 0x324   : > { %v2277_v42 = vadd.f32 %v2261_v8, %v2184_v39  ;;  %v2267_v20 = vpop.f32.mrf.mxu2  ;;  %v2177_v8 = vpop.f32.mrf.mxu1  ;;  %v2674_v39 = vld [vmem:[%s5186_s15 + $0x28] sm:$0xff] }
 0x325   : > { %2697 = vmatpush.msra.mxu3 %v2676_v12 }
 0x326   : > { %v4763_v54 = vadd.f32 %v4707_v22, %v2277_v42  ;;  %v2671_v42 = vld [vmem:[%s5186_s15 + $0x10] sm:$0xff] }
 0x327   : > { %v2086_v16 = vpop.f32.mrf.mxu3 }
 0x328   : > { %v2297_v61 = vmax.f32 %v4763_v54, 0.0  ;;  %v2100_v55 = vadd.f32 %v2086_v16, %v2007_v19  ;;  %v4843_v16 = vld [vmem:[%s5184_s13] ss:$0 sm:$0xff] }
 0x32a   : > { %v2185_v0 = vadd.f32 %v2171_v41, %v2100_v55  ;;  %3178 = vmatmul.msk.f32.gmra.mxu0 %vm2309_vm5, %v2297_v61  ;;  %v2436_v55 = vld [vmem:[#allocation4 + $0x1] sm:$0xff] }
 0x32b   : > { %v2446_v34 = vmul.f32 %v4848_v52, %v2436_v55 }
 0x32c   : > { %v2278_v13 = vadd.f32 %v2264_v46, %v2185_v0  ;;  %v2270_v3 = vpop.f32.mrf.mxu2  ;;  %v2410_v46 = vmul.f32 %v4632_v57, %v3986_v30 }
 0x32e   : > { %v4786_v40 = vadd.f32 %v4707_v22, %v2278_v13  ;;  %v2420_v56 = vmul.f32 %v4843_v16, %v2410_v46 }
 0x32f   : > { %v2089_v63 = vpop.f32.mrf.mxu3 }
 0x330   : > { %v2298_v37 = vmax.f32 %v4786_v40, 0.0  ;;  %v2101_v14 = vadd.f32 %v2089_v63, %v2008_v26  ;;  %v2454_v17 = vadd.f32 %v2446_v34, %v2420_v56  ;;  %v4863_v63 = vld [vmem:[%s5184_s13 + $0x3] ss:$0 sm:$0xff] }
 0x332   : > { %v2186_v32 = vadd.f32 %v2174_v6, %v2101_v14  ;;  %3179 = vmatmul.msk.f32.gmra.mxu0 %vm2309_vm5, %v2298_v37 }
 0x334   : > { %v2279_v23 = vadd.f32 %v2267_v20, %v2186_v32 }
 0x336   : > { %v4795_v29 = vadd.f32 %v4707_v22, %v2279_v23 }
 0x337   : > { %v2092_v9 = vpop.f32.mrf.mxu3 }
 0x338   : > { %v2299_v7 = vmax.f32 %v4795_v29, 0.0  ;;  %v2102_v11 = vadd.f32 %v2092_v9, %v2009_v31 }
 0x33a   : > { %v2187_v27 = vadd.f32 %v2177_v8, %v2102_v11  ;;  %3180 = vmatmul.msk.f32.gmra.mxu0 %vm2309_vm5, %v2299_v7  ;;  %v4879_v8 = vld [vmem:[%s5184_s13 + $0x5] ss:$0 sm:$0xff] }
 0x33c   : > { %v2280_v28 = vadd.f32 %v2270_v3, %v2187_v27 }
 0x33e   : > { %v4802_v33 = vadd.f32 %v4707_v22, %v2280_v28  ;;  %v2675_v22 = vld [vmem:[%s5186_s15 + $0x30] sm:$0xff] }
 0x33f   : > { %2698 = vmatpush.msra.mxu3 %v2675_v22  ;;  %v4889_v22 = vld [vmem:[%s5184_s13 + $0x6] ss:$0 sm:$0xff] }
 0x340   : > { %v2300_v25 = vmax.f32 %v4802_v33, 0.0 }
 0x341   : > { %2699 = vmatpush.msra.mxu3 %v2674_v39 }
 0x342   : > { %3181 = vmatmul.msk.f32.gmra.mxu0 %vm2309_vm5, %v2300_v25 }
 0x343   : > { %2700 = vmatpush.msra.mxu3 %v2673_v38 }
 0x345   : > { %2701 = vmatpush.msra.mxu3 %v2672_v45 }
 0x347   : > { %2702 = vmatpush.msra.mxu3 %v2671_v42 }
 0x349   : > { %2703 = vmatpush.msra.mxu3 %v2670_v60 }
 0x34b   : > { %2704 = vmatpush.msra.mxu3 %v2669_v10 }
 0x387   : > { %v2351_v41 = vpop.f32.mrf.mxu0 }
 0x388   : > { %v2352_v58 = vadd.f32 %v4826_v4, %v2351_v41 }
 0x38a   : > { %v2375_v19 = vmax.f32 %v2352_v58, 0.0 }
 0x38c   : > { %2394 = vst [vmem:[#allocation4 + $0x9] sm:$0xff] %v2375_v19  ;;  %v2526_v28 = vmul.f32 %v4872_v24, %v2375_v19  ;;  %v2447_v39 = vmul.f32 %v4848_v52, %v2375_v19  ;;  %v4902_v19 = vld [vmem:[%s5184_s13 + $0x7] ss:$0 sm:$0xff] }
 0x38f   : > { %v2354_v50 = vpop.f32.mrf.mxu0 }
 0x390   : > { %v2355_v0 = vadd.f32 %v4826_v4, %v2354_v50 }
 0x392   : > { %v2376_v57 = vmax.f32 %v2355_v0, 0.0 }
 0x393   : > { %v2403_v36 = vld [vmem:[#allocation4 + $0x8] sm:$0xff] }
 0x394   : > { %v2462_v13 = vld [vmem:[#allocation4 + $0x2] sm:$0xff]  ;;  %2395 = vst [vmem:[#allocation4 + $0x11] sm:$0xff] %v2376_v57  ;;  %v2497_v6 = vmul.f32 %v3986_v30, %v2403_v36  ;;  %v2411_v20 = vmul.f32 %v4016_v49, %v2403_v36 }
 0x395   : > { %v2470_v26 = vmul.f32 %v4008_v44, %v2462_v13  ;;  %v4910_v13 = vld [vmem:[%s5184_s13 + $0x8] ss:$0 sm:$0xff] }
 0x396   : > { %v2507_v23 = vmul.f32 %v4863_v63, %v2497_v6  ;;  %v2421_v27 = vmul.f32 %v4843_v16, %v2411_v20 }
 0x397   : > { %v2480_v53 = vmul.f32 %v4856_v2, %v2470_v26  ;;  %v2357_v14 = vpop.f32.mrf.mxu0 }
 0x398   : > { %v2358_v1 = vadd.f32 %v4826_v4, %v2357_v14  ;;  %v2455_v10 = vadd.f32 %v2447_v39, %v2421_v27  ;;  %v2599_v14 = vmul.f32 %v4902_v19, %v2376_v57 }
 0x399   : > { %v2488_v32 = vadd.f32 %v2480_v53, %v2454_v17 }
 0x39a   : > { %v4874_v31 = vmax.f32 %v2358_v1, 0.0  ;;  %v5267_v1 = vld [vmem:[#allocation24_spill] sm:$0xff] }
 0x39b   : > { %v2515_v9 = vadd.f32 %v2507_v23, %v2488_v32  ;;  %v2404_v11 = vld [vmem:[#allocation4 + $0x10] sm:$0xff]  ;;  %v2448_v23 = vmul.f32 %v4848_v52, %v2376_v57 }
 0x39c   : > { %v2463_v3 = vld [vmem:[#allocation4 + $0xa] sm:$0xff]  ;;  %2396 = vst [vmem:[#allocation4 + $0x19] sm:$0xff] %v4874_v31  ;;  %v2570_v12 = vmul.f32 %v3986_v30, %v2404_v11  ;;  %v2498_v45 = vmul.f32 %v4016_v49, %v2404_v11  ;;  %v2412_v41 = vmul.f32 %v4042_v5, %v2404_v11  ;;  %v2527_v11 = vmul.f32 %v4872_v24, %v2376_v57 }
 0x39d   : > { %v2543_v59 = vmul.f32 %v4008_v44, %v2463_v3  ;;  %v2471_v38 = vmul.f32 %v4031_v62, %v2463_v3  ;;  %v2534_v42 = vadd.f32 %v2526_v28, %v2515_v9 }
 0x39e   : > { %v2580_v50 = vmul.f32 %v4889_v22, %v2570_v12  ;;  %v2508_v56 = vmul.f32 %v4863_v63, %v2498_v45  ;;  %v2422_v17 = vmul.f32 %v4843_v16, %v2412_v41  ;;  %v4923_v12 = vld [vmem:[#allocation15] ss:$0 sm:$0xff]  ;;  %v5268_v45 = vld [vmem:[#allocation25_spill] sm:$0xff] }
 0x39f   : > { %v2553_v60 = vmul.f32 %v4879_v8, %v2543_v59  ;;  %v2360_v58 = vpop.f32.mrf.mxu0  ;;  %v2481_v30 = vmul.f32 %v4856_v2, %v2471_v38 }
 0x3a0   : > { %v2361_v46 = vadd.f32 %v4826_v4, %v2360_v58  ;;  %v2456_v39 = vadd.f32 %v2448_v23, %v2422_v17  ;;  %v2449_v23 = vmul.f32 %v4848_v52, %v4874_v31 }
 0x3a1   : > { %v2561_v55 = vadd.f32 %v2553_v60, %v2534_v42  ;;  %v2489_v0 = vadd.f32 %v2481_v30, %v2455_v10 }
 0x3a2   : > { %v4905_v34 = vmax.f32 %v2361_v46, 0.0 }
 0x3a3   : > { %v2588_v36 = vadd.f32 %v2580_v50, %v2561_v55  ;;  %v2615_v26 = vld [vmem:[#allocation4 + $0x12] sm:$0xff]  ;;  %v2516_v53 = vadd.f32 %v2508_v56, %v2489_v0 }
 0x3a4   : > { %v2405_v6 = vld [vmem:[#allocation4 + $0x18] sm:$0xff]  ;;  %2397 = vst [vmem:[#allocation4 + $0x21] sm:$0xff] %v4905_v34  ;;  %v2623_v20 = vmul.f32 %v4008_v44, %v2615_v26  ;;  %v2472_v32 = vmul.f32 %v5267_v1, %v2615_v26  ;;  %v2544_v3 = vmul.f32 %v4031_v62, %v2615_v26 }
 0x3a5   : > { %v2499_v9 = vmul.f32 %v4042_v5, %v2405_v6  ;;  %v2571_v27 = vmul.f32 %v4016_v49, %v2405_v6  ;;  %v2607_v28 = vadd.f32 %v2599_v14, %v2588_v36  ;;  %v2413_v42 = vmul.f32 %v5268_v45, %v2405_v6 }
 0x3a6   : > { %v2633_v59 = vmul.f32 %v4910_v13, %v2623_v20  ;;  %v2482_v44 = vmul.f32 %v4856_v2, %v2472_v32  ;;  %v2535_v60 = vadd.f32 %v2527_v11, %v2516_v53  ;;  %v2554_v41 = vmul.f32 %v4879_v8, %v2544_v3  ;;  %v5269_v20 = vld [vmem:[#allocation26_spill] sm:$0xff] }
 0x3a7   : > { %v2363_v38 = vpop.f32.mrf.mxu0  ;;  %v2581_v49 = vmul.f32 %v4889_v22, %v2571_v27  ;;  %v2509_v46 = vmul.f32 %v4863_v63, %v2499_v9  ;;  %v2423_v0 = vmul.f32 %v4843_v16, %v2413_v42  ;;  %v2600_v53 = vmul.f32 %v4902_v19, %v4874_v31 }
 0x3a8   : > { %v2364_v57 = vadd.f32 %v4826_v4, %v2363_v38  ;;  %v2641_v58 = vadd.f32 %v2633_v59, %v2607_v28  ;;  %v2490_v10 = vadd.f32 %v2482_v44, %v2456_v39  ;;  %v2562_v30 = vadd.f32 %v2554_v41, %v2535_v60  ;;  %v5270_v59 = vld [vmem:[#allocation27_spill] sm:$0xff] }
 0x3a9   : > { %v2528_v9 = vmul.f32 %v4872_v24, %v4874_v31  ;;  %v2457_v38 = vadd.f32 %v2449_v23, %v2423_v0  ;;  %v2450_v0 = vmul.f32 %v4848_v52, %v4905_v34 }
 0x3aa   : > { %v4931_v55 = vmax.f32 %v2364_v57, 0.0  ;;  %v2653_v50 = vadd.f32 %v4923_v12, %v2641_v58  ;;  %v2589_v56 = vadd.f32 %v2581_v49, %v2562_v30  ;;  %v2517_v26 = vadd.f32 %v2509_v46, %v2490_v10 }
 0x3ab   : > { %v2616_v36 = vld [vmem:[#allocation4 + $0x1a] sm:$0xff] }
 0x3ac   : > { %v2406_v17 = vld [vmem:[#allocation4 + $0x20] sm:$0xff]  ;;  %2398 = vst [vmem:[#allocation4 + $0x29] sm:$0xff] %v4931_v55  ;;  %v2661_v6 = vmax.f32 %v2653_v50, 0.0  ;;  %v2624_v14 = vmul.f32 %v4031_v62, %v2616_v36  ;;  %v2473_v32 = vmul.f32 %v5269_v20, %v2616_v36  ;;  %v2545_v3 = vmul.f32 %v5267_v1, %v2616_v36 }
 0x3ad   : > { %v2500_v11 = vmul.f32 %v5268_v45, %v2406_v17  ;;  %v2608_v27 = vadd.f32 %v2600_v53, %v2589_v56  ;;  %v2414_v39 = vmul.f32 %v5270_v59, %v2406_v17  ;;  %v2572_v62 = vmul.f32 %v4042_v5, %v2406_v17 }
 0x3ae   : > { %2705 = vmatmul.f32.vlgmr.msra.gmra.mxu3 %v2661_v6  ;;  %v2634_v28 = vmul.f32 %v4910_v13, %v2624_v14  ;;  %v2536_v42 = vadd.f32 %v2528_v9, %v2517_v26  ;;  %v2555_v60 = vmul.f32 %v4879_v8, %v2545_v3  ;;  %v2483_v41 = vmul.f32 %v4856_v2, %v2473_v32  ;;  %v5271_v32 = vld [vmem:[#allocation28_spill] sm:$0xff] }
 0x3af   : > { %v2366_v44 = vpop.f32.mrf.mxu0  ;;  %v2582_v10 = vmul.f32 %v4889_v22, %v2572_v62  ;;  %v2510_v49 = vmul.f32 %v4863_v63, %v2500_v11  ;;  %v2424_v50 = vmul.f32 %v4843_v16, %v2414_v39  ;;  %v2601_v53 = vmul.f32 %v4902_v19, %v4905_v34 }
 0x3b0   : > { %v2367_v31 = vadd.f32 %v4826_v4, %v2366_v44  ;;  %v2642_v57 = vadd.f32 %v2634_v28, %v2608_v27  ;;  %v2563_v58 = vadd.f32 %v2555_v60, %v2536_v42  ;;  %v2491_v30 = vadd.f32 %v2483_v41, %v2457_v38  ;;  %v5272_v38 = vld [vmem:[#allocation29_spill] sm:$0xff] }
 0x3b1   : > { %v2529_v9 = vmul.f32 %v4872_v24, %v4905_v34  ;;  %v2458_v27 = vadd.f32 %v2450_v0, %v2424_v50  ;;  %v2602_v0 = vmul.f32 %v4902_v19, %v4931_v55 }
 0x3b2   : > { %v4954_v46 = vmax.f32 %v2367_v31, 0.0  ;;  %v2654_v5 = vadd.f32 %v4923_v12, %v2642_v57  ;;  %v2590_v56 = vadd.f32 %v2582_v10, %v2563_v58  ;;  %v2518_v26 = vadd.f32 %v2510_v49, %v2491_v30 }
 0x3b3   : > { %v2617_v36 = vld [vmem:[#allocation4 + $0x22] sm:$0xff] }
 0x3b4   : > { %v2407_v17 = vld [vmem:[#allocation4 + $0x28] sm:$0xff]  ;;  %2399 = vst [vmem:[#allocation4 + $0x31] sm:$0xff] %v4954_v46  ;;  %v2662_v6 = vmax.f32 %v2654_v5, 0.0  ;;  %v2625_v14 = vmul.f32 %v5267_v1, %v2617_v36  ;;  %v2474_v23 = vmul.f32 %v5271_v32, %v2617_v36  ;;  %v2546_v3 = vmul.f32 %v5269_v20, %v2617_v36 }
 0x3b5   : > { %v2501_v11 = vmul.f32 %v5270_v59, %v2407_v17  ;;  %v2609_v28 = vadd.f32 %v2601_v53, %v2590_v56  ;;  %v2573_v62 = vmul.f32 %v5268_v45, %v2407_v17  ;;  %v2415_v42 = vmul.f32 %v5272_v38, %v2407_v17  ;;  %v5273_v53 = vld [vmem:[#allocation31_spill] sm:$0xff] }
 0x3b6   : > { %2708 = vmatmul.f32.gmra.mxu3 %v2662_v6  ;;  %v2635_v39 = vmul.f32 %v4910_v13, %v2625_v14  ;;  %v2537_v1 = vadd.f32 %v2529_v9, %v2518_v26  ;;  %v2556_v60 = vmul.f32 %v4879_v8, %v2546_v3  ;;  %v2484_v41 = vmul.f32 %v4856_v2, %v2474_v23  ;;  %v5274_v23 = vld [vmem:[#allocation30_spill] sm:$0xff] }
 0x3b7   : > { %v2369_v44 = vpop.f32.mrf.mxu0  ;;  %v2583_v58 = vmul.f32 %v4889_v22, %v2573_v62  ;;  %v2511_v30 = vmul.f32 %v4863_v63, %v2501_v11  ;;  %v2425_v5 = vmul.f32 %v4843_v16, %v2415_v42  ;;  %v2451_v11 = vmul.f32 %v4848_v52, %v4931_v55 }
 0x3b8   : > { %v2370_v34 = vadd.f32 %v4826_v4, %v2369_v44  ;;  %v2643_v31 = vadd.f32 %v2635_v39, %v2609_v28  ;;  %v2564_v57 = vadd.f32 %v2556_v60, %v2537_v1  ;;  %v2492_v10 = vadd.f32 %v2484_v41, %v2458_v27 }
 0x3b9   : > { %v2530_v3 = vmul.f32 %v4872_v24, %v4931_v55  ;;  %v2459_v42 = vadd.f32 %v2451_v11, %v2425_v5  ;;  %v2452_v5 = vmul.f32 %v4848_v52, %v4954_v46 }
 0x3ba   : > { %v4977_v49 = vmax.f32 %v2370_v34, 0.0  ;;  %v2655_v45 = vadd.f32 %v4923_v12, %v2643_v31  ;;  %v2591_v50 = vadd.f32 %v2583_v58, %v2564_v57  ;;  %v2519_v17 = vadd.f32 %v2511_v30, %v2492_v10 }
 0x3bb   : > { %v2618_v56 = vld [vmem:[#allocation4 + $0x2a] sm:$0xff] }
 0x3bc   : > { %v2408_v36 = vld [vmem:[#allocation4 + $0x30] sm:$0xff]  ;;  %2400 = vst [vmem:[#allocation4 + $0x39] sm:$0xff] %v4977_v49  ;;  %v2663_v26 = vmax.f32 %v2655_v45, 0.0  ;;  %v2626_v6 = vmul.f32 %v5269_v20, %v2618_v56  ;;  %v2475_v9 = vmul.f32 %v5274_v23, %v2618_v56  ;;  %v2547_v28 = vmul.f32 %v5271_v32, %v2618_v56 }
 0x3bd   : > { %v2416_v14 = vmul.f32 %v5273_v53, %v2408_v36  ;;  %v2502_v27 = vmul.f32 %v5272_v38, %v2408_v36  ;;  %v2610_v39 = vadd.f32 %v2602_v0, %v2591_v50  ;;  %v2574_v20 = vmul.f32 %v5270_v59, %v2408_v36 }
 0x3be   : > { %2711 = vmatmul.f32.gmra.mxu3 %v2663_v26  ;;  %v2636_v62 = vmul.f32 %v4910_v13, %v2626_v6  ;;  %v2538_v1 = vadd.f32 %v2530_v3, %v2519_v17  ;;  %v2557_v60 = vmul.f32 %v4879_v8, %v2547_v28  ;;  %v2485_v41 = vmul.f32 %v4856_v2, %v2475_v9  ;;  %v5276_v3 = vld [vmem:[#allocation33_spill] sm:$0xff] }
 0x3bf   : > { %v2372_v44 = vpop.f32.mrf.mxu0  ;;  %v2426_v31 = vmul.f32 %v4843_v16, %v2416_v14  ;;  %v2584_v58 = vmul.f32 %v4889_v22, %v2574_v20  ;;  %v2512_v30 = vmul.f32 %v4863_v63, %v2502_v27  ;;  %v2531_v50 = vmul.f32 %v4872_v24, %v4954_v46  ;;  %v5275_v14 = vld [vmem:[#allocation32_spill] sm:$0xff] }
 0x3c0   : > { %v2373_v34 = vadd.f32 %v4826_v4, %v2372_v44  ;;  %v2644_v55 = vadd.f32 %v2636_v62, %v2610_v39  ;;  %v2565_v57 = vadd.f32 %v2557_v60, %v2538_v1  ;;  %v2493_v10 = vadd.f32 %v2485_v41, %v2459_v42  ;;  %v2752_v41 = vld [vmem:[%s5277_s27 + $0x70] sm:$0xff] }
 0x3c1   : > { %v2603_v26 = vmul.f32 %v4902_v19, %v4954_v46  ;;  %v2460_v11 = vadd.f32 %v2452_v5, %v2426_v31  ;;  %v2809_v46 = vld [vmem:[%s5190_s19 + $0x10] sm:$0xff]  ;;  %v2807_v5 = vld [vmem:[%s5190_s19] sm:$0xff] }
 0x3c2   : > { %v5001_v45 = vmax.f32 %v2373_v34, 0.0  ;;  %v2656_v59 = vadd.f32 %v4923_v12, %v2644_v55  ;;  %v2592_v4 = vadd.f32 %v2584_v58, %v2565_v57  ;;  %v2520_v36 = vadd.f32 %v2512_v30, %v2493_v10  ;;  %2823 = vmatpush.msrb.mxu2 %v2809_v46  ;;  %v2808_v55 = vld [vmem:[%s5190_s19 + $0x8] sm:$0xff] }
 0x3c3   : > { %v2619_v0 = vld [vmem:[#allocation4 + $0x32] sm:$0xff] }
 0x3c4   : > { %v2409_v56 = vld [vmem:[#allocation4 + $0x38] sm:$0xff]  ;;  %2401 = vst [vmem:[#allocation4 + $0x41] sm:$0xff] %v5001_v45  ;;  %v2664_v17 = vmax.f32 %v2656_v59, 0.0  ;;  %v2627_v6 = vmul.f32 %v5271_v32, %v2619_v0  ;;  %v2476_v9 = vmul.f32 %v5275_v14, %v2619_v0  ;;  %v2548_v39 = vmul.f32 %v5274_v23, %v2619_v0  ;;  %v2753_v32 = vld [vmem:[%s5277_s27 + $0x78] sm:$0xff]  ;;  %2824 = vmatpush.msrb.mxu2 %v2808_v55  ;;  %v2748_v55 = vld [vmem:[%s5277_s27 + $0x50] sm:$0xff] }
 0x3c5   : > { %v2417_v27 = vmul.f32 %v5276_v3, %v2409_v56  ;;  %v2503_v28 = vmul.f32 %v5273_v53, %v2409_v56  ;;  %v2611_v62 = vadd.f32 %v2603_v26, %v2592_v4  ;;  %v2575_v44 = vmul.f32 %v5272_v38, %v2409_v56  ;;  %2758 = vmatpush.msrb.mxu1 %v2753_v32  ;;  %v2751_v10 = vld [vmem:[%s5277_s27 + $0x68] sm:$0xff]  ;;  %v2749_v32 = vld [vmem:[%s5277_s27 + $0x58] sm:$0xff] }
 0x3c6   : > { %2714 = vmatmul.f32.gmra.mxu3 %v2664_v17  ;;  %v2637_v20 = vmul.f32 %v4910_v13, %v2627_v6  ;;  %v2486_v42 = vmul.f32 %v4856_v2, %v2476_v9  ;;  %v2539_v1 = vadd.f32 %v2531_v50, %v2520_v36  ;;  %v2558_v60 = vmul.f32 %v4879_v8, %v2548_v39  ;;  %v5278_v6 = vld [vmem:[#allocation34_spill] sm:$0xff] }
 0x3c7   : > { %v2585_v57 = vmul.f32 %v4889_v22, %v2575_v44  ;;  %v2513_v58 = vmul.f32 %v4863_v63, %v2503_v28  ;;  %v2427_v59 = vmul.f32 %v4843_v16, %v2417_v27  ;;  %2759 = vmatpush.msrb.mxu1 %v2752_v41  ;;  %v2453_v50 = vmul.f32 %v4848_v52, %v4977_v49  ;;  %v2750_v52 = vld [vmem:[%s5277_s27 + $0x60] sm:$0xff] }
 0x3c8   : > { %v2645_v34 = vadd.f32 %v2637_v20, %v2611_v62  ;;  %v2494_v38 = vadd.f32 %v2486_v42, %v2460_v11  ;;  %v2566_v31 = vadd.f32 %v2558_v60, %v2539_v1  ;;  %v2604_v0 = vmul.f32 %v4902_v19, %v4977_v49  ;;  %2825 = vmatpush.msrb.mxu2 %v2807_v5  ;;  %v3343_v27 = vld [vmem:[%s3867_s21] sm:$0xff]  ;;  %v2747_v5 = vld [vmem:[%s5277_s27 + $0x48] sm:$0xff] }
 0x3c9   : > { %2760 = vmatpush.msrb.mxu1 %v2751_v10  ;;  %3182 = vmatmul.msk.f32.vlgmr.msrb.gmra.mxu2 %vm932_vm0, %v3343_v27  ;;  %v2532_v28 = vmul.f32 %v4872_v24, %v4977_v49  ;;  %v2461_v20 = vadd.f32 %v2453_v50, %v2427_v59 }
 0x3ca   : > { %v2657_v30 = vadd.f32 %v4923_v12, %v2645_v34  ;;  %v2593_v4 = vadd.f32 %v2585_v57, %v2566_v31  ;;  %v2521_v17 = vadd.f32 %v2513_v58, %v2494_v38  ;;  %v2622_v58 = vld [vmem:[#allocation4 + $0x4a] sm:$0xff] }
 0x3cb   : > { %v2620_v56 = vld [vmem:[#allocation4 + $0x3a] sm:$0xff]  ;;  %v2569_v49 = vld [vmem:[#allocation4 + $0x48] sm:$0xff]  ;;  %2761 = vmatpush.msrb.mxu1 %v2750_v52 }
 0x3cc   : > { %v2496_v36 = vld [vmem:[#allocation4 + $0x40] sm:$0xff]  ;;  %v2665_v26 = vmax.f32 %v2657_v30, 0.0  ;;  %v2628_v16 = vmul.f32 %v5274_v23, %v2620_v56  ;;  %v2477_v9 = vmul.f32 %v5278_v6, %v2620_v56  ;;  %v2549_v39 = vmul.f32 %v5275_v14, %v2620_v56 }
 0x3cd   : > { %v2504_v11 = vmul.f32 %v5276_v3, %v2496_v36  ;;  %v2576_v62 = vmul.f32 %v5273_v53, %v2496_v36  ;;  %v2621_v23 = vld [vmem:[#allocation4 + $0x42] sm:$0xff]  ;;  %v2612_v44 = vadd.f32 %v2604_v0, %v2593_v4  ;;  %v2540_v1 = vadd.f32 %v2532_v28, %v2521_v17  ;;  %2762 = vmatpush.msrb.mxu1 %v2749_v32  ;;  %v2739_v32 = vld [vmem:[%s5277_s27 + $0x8] sm:$0xff] }
 0x3ce   : > { %2717 = vmatmul.f32.gmra.mxu3 %v2665_v26  ;;  %v2638_v42 = vmul.f32 %v4910_v13, %v2628_v16  ;;  %v2487_v46 = vmul.f32 %v4856_v2, %v2477_v9  ;;  %v2559_v60 = vmul.f32 %v4879_v8, %v2549_v39  ;;  %v2550_v38 = vmul.f32 %v5278_v6, %v2621_v23  ;;  %v2744_v28 = vld [vmem:[%s5277_s27 + $0x30] sm:$0xff] }
 0x3cf   : > { %v2514_v53 = vmul.f32 %v4863_v63, %v2504_v11  ;;  %v2586_v31 = vmul.f32 %v4889_v22, %v2576_v62  ;;  %v2629_v57 = vmul.f32 %v5275_v14, %v2621_v23  ;;  %v2533_v30 = vmul.f32 %v4872_v24, %v5001_v45  ;;  %v2596_v14 = vld [vmem:[#allocation4 + $0x49] sm:$0xff]  ;;  %2763 = vmatpush.msrb.mxu1 %v2748_v55 }
 0x3d0   : > { %v2646_v41 = vadd.f32 %v2638_v42, %v2612_v44  ;;  %v2495_v34 = vadd.f32 %v2487_v46, %v2461_v20  ;;  %v2567_v2 = vadd.f32 %v2559_v60, %v2540_v1  ;;  %v2577_v59 = vmul.f32 %v5276_v3, %v2569_v49  ;;  %v2746_v24 = vld [vmem:[%s5277_s27 + $0x40] sm:$0xff]  ;;  %v3344_v3 = vld [vmem:[%s3867_s21 + $0x8] sm:$0xff]  ;;  %v3345_v20 = vld [vmem:[%s3867_s21 + $0x10] sm:$0xff] }
 0x3d1   : > { %v2605_v4 = vmul.f32 %v4902_v19, %v5001_v45  ;;  %v2560_v36 = vmul.f32 %v4879_v8, %v2550_v38  ;;  %v2630_v17 = vmul.f32 %v5278_v6, %v2622_v58  ;;  %3183 = vmatmul.msk.f32.gmra.mxu2 %vm932_vm0, %v3344_v3  ;;  %v2639_v16 = vmul.f32 %v4910_v13, %v2629_v57  ;;  %v2745_v6 = vld [vmem:[%s5277_s27 + $0x38] sm:$0xff]  ;;  %v2740_v46 = vld [vmem:[%s5277_s27 + $0x10] sm:$0xff]  ;;  %v3347_v49 = vld [vmem:[%s3867_s21 + $0x20] sm:$0xff] }
 0x3d2   : > { %v2658_v10 = vadd.f32 %v4923_v12, %v2646_v41  ;;  %v2522_v63 = vadd.f32 %v2514_v53, %v2495_v34  ;;  %v2594_v50 = vadd.f32 %v2586_v31, %v2567_v2  ;;  %2764 = vmatpush.msrb.mxu1 %v2747_v5  ;;  %v2587_v9 = vmul.f32 %v4889_v22, %v2577_v59  ;;  %v2741_v44 = vld [vmem:[%s5277_s27 + $0x18] sm:$0xff]  ;;  %v3349_v41 = vld [vmem:[%s3867_s21 + $0x30] sm:$0xff]  ;;  %v2738_v53 = vld [vmem:[%s5277_s27] sm:$0xff] }
 0x3d3   : > { %v2606_v8 = vmul.f32 %v4902_v19, %v2596_v14  ;;  %v2640_v27 = vmul.f32 %v4910_v13, %v2630_v17  ;;  %v2743_v19 = vld [vmem:[%s5277_s27 + $0x28] sm:$0xff]  ;;  %v2742_v13 = vld [vmem:[%s5277_s27 + $0x20] sm:$0xff]  ;;  %v3346_v60 = vld [vmem:[%s3867_s21 + $0x18] sm:$0xff] }
 0x3d4   : > { %v2666_v0 = vmax.f32 %v2658_v10, 0.0  ;;  %v2541_v56 = vadd.f32 %v2533_v30, %v2522_v63  ;;  %v2613_v26 = vadd.f32 %v2605_v4, %v2594_v50  ;;  %2765 = vmatpush.msrb.mxu1 %v2746_v24  ;;  %v3350_v34 = vld [vmem:[%s3867_s21 + $0x38] sm:$0xff]  ;;  %v3332_v38 = vld [vmem:[#allocation16] ss:$0 sm:$0xff] }
 0x3d6   : > { %2720 = vmatmul.f32.gmra.mxu3 %v2666_v0  ;;  %v2568_v45 = vadd.f32 %v2560_v36, %v2541_v56  ;;  %v2647_v11 = vadd.f32 %v2639_v16, %v2613_v26  ;;  %2766 = vmatpush.msrb.mxu1 %v2745_v6 }
 0x3d8   : > { %v2595_v52 = vadd.f32 %v2587_v9, %v2568_v45  ;;  %v2659_v39 = vadd.f32 %v4923_v12, %v2647_v11  ;;  %2767 = vmatpush.msrb.mxu1 %v2744_v28  ;;  %v3333_v11 = vld [vmem:[#allocation18] ss:$0 sm:$0xff] }
 0x3d9   : > { %3184 = vmatmul.msk.f32.gmra.mxu2 %vm932_vm0, %v3345_v20 }
 0x3da   : > { %v2614_v22 = vadd.f32 %v2606_v8, %v2595_v52  ;;  %v2667_v62 = vmax.f32 %v2659_v39, 0.0  ;;  %2768 = vmatpush.msrb.mxu1 %v2743_v19 }
 0x3dc   : > { %v2648_v23 = vadd.f32 %v2640_v27, %v2614_v22  ;;  %2769 = vmatpush.msrb.mxu1 %v2742_v13 }
 0x3de   : > { %2723 = vmatmul.f32.gmra.mxu3 %v2667_v62  ;;  %v2660_v42 = vadd.f32 %v4923_v12, %v2648_v23  ;;  %2770 = vmatpush.msrb.mxu1 %v2741_v44  ;;  %v3348_v12 = vld [vmem:[%s3867_s21 + $0x28] sm:$0xff] }
 0x3e0   : > { %2771 = vmatpush.msrb.mxu1 %v2740_v46  ;;  %v2668_v1 = vmax.f32 %v2660_v42, 0.0 }
 0x3e1   : > { %3185 = vmatmul.msk.f32.gmra.mxu2 %vm932_vm0, %v3346_v60 }
 0x3e2   : > { %2772 = vmatpush.msrb.mxu1 %v2739_v32 }
 0x3e4   : > { %2773 = vmatpush.msrb.mxu1 %v2738_v53 }
 0x3e6   : > { %2726 = vmatmul.f32.gmra.mxu3 %v2668_v1 }
 0x3e9   : > { %3186 = vmatmul.msk.f32.gmra.mxu2 %vm932_vm0, %v3347_v49 }
 0x3f1   : > { %3187 = vmatmul.msk.f32.gmra.mxu2 %vm932_vm0, %v3348_v12 }
 0x3f9   : > { %3188 = vmatmul.msk.f32.gmra.mxu2 %vm932_vm0, %v3349_v41 }
 0x401   : > { %3189 = vmatmul.msk.f32.gmra.mxu2 %vm932_vm0, %v3350_v34 }
 0x431   : > { %v2706_v55 = vpop.f32.mrf.mxu3 }
 0x432   : > { %v2707_v2 = vadd.f32 %v3332_v38, %v2706_v55 }
 0x434   : > { %v2730_v31 = vmax.f32 %v2707_v2, 0.0 }
 0x436   : > { %2774 = vmatmul.f32.vlgmr.msrb.gmra.mxu1 %v2730_v31 }
 0x439   : > { %v2709_v57 = vpop.f32.mrf.mxu3 }
 0x43a   : > { %v2710_v58 = vadd.f32 %v3332_v38, %v2709_v57 }
 0x43c   : > { %v2731_v10 = vmax.f32 %v2710_v58, 0.0 }
 0x43e   : > { %2777 = vmatmul.f32.gmra.mxu1 %v2731_v10 }
 0x441   : > { %v2712_v30 = vpop.f32.mrf.mxu3 }
 0x442   : > { %v2713_v63 = vadd.f32 %v3332_v38, %v2712_v30 }
 0x444   : > { %v2732_v59 = vmax.f32 %v2713_v63, 0.0 }
 0x446   : > { %2780 = vmatmul.f32.gmra.mxu1 %v2732_v59 }
 0x449   : > { %v2715_v5 = vpop.f32.mrf.mxu3 }
 0x44a   : > { %v2716_v50 = vadd.f32 %v3332_v38, %v2715_v5 }
 0x44c   : > { %v2733_v4 = vmax.f32 %v2716_v50, 0.0  ;;  %v2827_v6 = vpop.f32.mrf.mxu2 }
 0x44e   : > { %2783 = vmatmul.f32.gmra.mxu1 %v2733_v4 }
 0x451   : > { %v2718_v14 = vpop.f32.mrf.mxu3 }
 0x452   : > { %v2719_v0 = vadd.f32 %v3332_v38, %v2718_v14 }
 0x454   : > { %v2734_v56 = vmax.f32 %v2719_v0, 0.0  ;;  %v2830_v52 = vpop.f32.mrf.mxu2 }
 0x456   : > { %2786 = vmatmul.f32.gmra.mxu1 %v2734_v56 }
 0x459   : > { %v2721_v36 = vpop.f32.mrf.mxu3 }
 0x45a   : > { %v2722_v17 = vadd.f32 %v3332_v38, %v2721_v36 }
 0x45c   : > { %v2735_v24 = vmax.f32 %v2722_v17, 0.0  ;;  %v2833_v62 = vpop.f32.mrf.mxu2 }
 0x45e   : > { %2789 = vmatmul.f32.gmra.mxu1 %v2735_v24 }
 0x461   : > { %v2724_v3 = vpop.f32.mrf.mxu3 }
 0x462   : > { %v2725_v26 = vadd.f32 %v3332_v38, %v2724_v3 }
 0x464   : > { %v2736_v16 = vmax.f32 %v2725_v26, 0.0  ;;  %v2836_v44 = vpop.f32.mrf.mxu2 }
 0x466   : > { %2792 = vmatmul.f32.gmra.mxu1 %v2736_v16 }
 0x469   : > { %v2727_v45 = vpop.f32.mrf.mxu3 }
 0x46a   : > { %v2728_v9 = vadd.f32 %v3332_v38, %v2727_v45 }
 0x46c   : > { %v2737_v8 = vmax.f32 %v2728_v9, 0.0 }
 0x46e   : > { %2795 = vmatmul.f32.gmra.mxu1 %v2737_v8 }
 0x4b3   : > { %v2775_v27 = vpop.f32.mrf.mxu1 }
 0x4b4   : > { %v2776_v28 = vadd.f32 %v3333_v11, %v2775_v27 }
 0x4b6   : > { %v2799_v39 = vadd.f32 %v2776_v28, %v2293_v51 }
 0x4b8   : > { %v2851_v22 = vadd.f32 %v2827_v6, %v2799_v39 }
 0x4ba   : > { %2859 = vst.msk [vmem:[%s5136_s4] sm:$0xff] %vm2309_vm5, %v2851_v22 }
 0x4bb   : > { %v2778_v19 = vpop.f32.mrf.mxu1 }
 0x4bc   : > { %v2779_v23 = vadd.f32 %v3333_v11, %v2778_v19 }
 0x4be   : > { %v2800_v47 = vadd.f32 %v2779_v23, %v2294_v43  ;;  %v2839_v43 = vpop.f32.mrf.mxu2 }
 0x4c0   : > { %v2852_v51 = vadd.f32 %v2830_v52, %v2800_v47 }
 0x4c2   : > { %2860 = vst.msk [vmem:[%s5136_s4 + $0x8] sm:$0xff] %vm2309_vm5, %v2852_v51 }
 0x4c3   : > { %v2781_v13 = vpop.f32.mrf.mxu1 }
 0x4c4   : > { %v2782_v20 = vadd.f32 %v3333_v11, %v2781_v13 }
 0x4c6   : > { %v2801_v42 = vadd.f32 %v2782_v20, %v2295_v18  ;;  %v2842_v41 = vpop.f32.mrf.mxu2 }
 0x4c8   : > { %v2853_v46 = vadd.f32 %v2833_v62, %v2801_v42 }
 0x4ca   : > { %2861 = vst.msk [vmem:[%s5136_s4 + $0x10] sm:$0xff] %vm2309_vm5, %v2853_v46 }
 0x4cb   : > { %v2784_v32 = vpop.f32.mrf.mxu1 }
 0x4cc   : > { %v2785_v1 = vadd.f32 %v3333_v11, %v2784_v32 }
 0x4ce   : > { %v2802_v21 = vadd.f32 %v2785_v1, %v2296_v15  ;;  %v2845_v55 = vpop.f32.mrf.mxu2 }
 0x4d0   : > { %v2854_v60 = vadd.f32 %v2836_v44, %v2802_v21 }
 0x4d2   : > { %2862 = vst.msk [vmem:[%s5136_s4 + $0x18] sm:$0xff] %vm2309_vm5, %v2854_v60 }
 0x4d3   : > { %v2787_v49 = vpop.f32.mrf.mxu1 }
 0x4d4   : > { %v2788_v12 = vadd.f32 %v3333_v11, %v2787_v49 }
 0x4d6   : > { %v2803_v48 = vadd.f32 %v2788_v12, %v2297_v61  ;;  %v2848_v58 = vpop.f32.mrf.mxu2 }
 0x4d8   : > { %v2855_v18 = vadd.f32 %v2839_v43, %v2803_v48 }
 0x4da   : > { %2863 = vst.msk [vmem:[%s5136_s4 + $0x20] sm:$0xff] %vm2309_vm5, %v2855_v18 }
 0x4db   : > { %v2790_v34 = vpop.f32.mrf.mxu1 }
 0x4dc   : > { %v2791_v53 = vadd.f32 %v3333_v11, %v2790_v34 }
 0x4de   : > { %v2804_v35 = vadd.f32 %v2791_v53, %v2298_v37 }
 0x4e0   : > { %v2856_v15 = vadd.f32 %v2842_v41, %v2804_v35 }
 0x4e2   : > { %2864 = vst.msk [vmem:[%s5136_s4 + $0x28] sm:$0xff] %vm2309_vm5, %v2856_v15 }
 0x4e3   : > { %v2793_v38 = vpop.f32.mrf.mxu1 }
 0x4e4   : > { %v2794_v2 = vadd.f32 %v3333_v11, %v2793_v38 }
 0x4e6   : > { %v2805_v54 = vadd.f32 %v2794_v2, %v2299_v7 }
 0x4e8   : > { %v2857_v61 = vadd.f32 %v2845_v55, %v2805_v54 }
 0x4ea   : > { %2865 = vst.msk [vmem:[%s5136_s4 + $0x30] sm:$0xff] %vm2309_vm5, %v2857_v61 }
 0x4eb   : > { %v2796_v31 = vpop.f32.mrf.mxu1 }
 0x4ec   : > { %v2797_v57 = vadd.f32 %v3333_v11, %v2796_v31 }
 0x4ee   : > { %v2806_v10 = vadd.f32 %v2797_v57, %v2300_v25 }
 0x4f0   : > { %v2858_v40 = vadd.f32 %v2848_v58, %v2806_v10 }
 0x4f2   : > { %2866 = vst.msk [vmem:[%s5136_s4 + $0x38] sm:$0xff] %vm2309_vm5, %v2858_v40 }
 0x4f3 PF: > { %s35_s1 = sadd.s32 1, %s3647_s1  }
 0x4f4   : > { %p32_p7 = scmp.ge.s32.totalorder %s35_s1, 4  }
 0x4f6   :  { %34 = sbr.rel (!%p32_p7) target bundleno = 15 (0xf), region = 175 }
 0x4fb   :  { %2889 = vsyncpa [#allocation6], 1 }
 0x4fc   :  { %2891 = vsyncpa [#allocation6 + $0x1], 1 }
 0x4fd   :  { %2892 = vsyncpa [#allocation8], 1 }
 0x4fe   :  { %2893 = vsyncpa [#allocation11], 1 }
 0x4ff   :  { %2894 = vsyncpa [#allocation14], 1 }
 0x500   :  { %2895 = vsyncpa [#allocation17], 1 }

</bundles_post_ra>
